<compile_context>
chip_gen: v7x
topology: tpu7x:2x2x1
jax: 0.10.0
libtpu: 0.0.40
codegen_flags: <defaults>
</compile_context>

<pallas_src>
import jax
import jax.numpy as jnp
from jax import lax
from jax.experimental import pallas as pl
from jax.experimental.pallas import tpu as pltpu

_CNN_FEATS = 32 * 7 * 7  # 1568


# -----------------------------------------------------------------------------
# Fused kernel: conv1+relu+pool -> conv2+relu+pool -> fc, one batch tile / step
# -----------------------------------------------------------------------------
def _fused_forward_kernel(xr_ref, w1_ref, b1_ref, w2_ref, b2_ref,
                          wfc_ref, wemb_ref, bfc_ref, emb_ref,
                          out_ref, s2_ref, s3_ref):
    f32 = jnp.float32
    bt = xr_ref.shape[0]

    # ---------------- conv1 + bias + ReLU + 2x2 max-pool : ONE matmul --------
    # xr holds the (34,30) zero-extended padded image split by row parity:
    #   xr[b, p, a, xi] = xpad2[b, 2a+p, xi]
    # LHS rows = (qy, b, y_pad in [0,16)); K = (dy, xi) = 90;
    # N = (qx, x_pad in [0,16), c) = 512. W1 is the row-Toeplitz conv1 weight
    # with zeros at the x padding columns, so those lanes come out exactly 0.
    qy_parts = []
    for qy in range(2):
        cols = []
        for dy in range(3):
            ry = qy + dy
            cols.append(xr_ref[:, ry & 1, (ry >> 1):(ry >> 1) + 16, :])  # (bt,16,30)
        qy_parts.append(jnp.concatenate(cols, axis=-1))                  # (bt,16,90)
    lhs1 = jnp.concatenate(qy_parts, axis=0).reshape(2 * bt * 16, 90)

    h1 = jnp.dot(lhs1, w1_ref[...], preferred_element_type=f32)          # (2*bt*16,512)
    half = bt * 16
    h1 = jnp.maximum(h1[:half, :], h1[half:, :])                         # pool over qy
    h1 = jnp.maximum(h1[:, :256], h1[:, 256:])                           # pool over qx
    h1 = jnp.maximum(h1 + b1_ref[...], 0.0)                              # bias + ReLU

    # Stage the zero-padded pooled map (rows = y_pad, lanes = (x_pad, c)).
    # Only the halo rows are (re)zeroed -- no full-slab zero fill.
    s2_ref[:, 0:16, :] = h1.reshape(bt, 16, 256)
    s2_ref[:, 0:1, :] = jnp.zeros((bt, 1, 256), f32)
    s2_ref[:, 15:18, :] = jnp.zeros((bt, 3, 256), f32)

    # ---------------- conv2 + bias + ReLU + x-half of max-pool : ONE matmul --
    # LHS rows = (b, y2 in [0,16)); K = 3 s2-rows x 256 lanes = 768;
    # N = (qx2, j2 in [0,8), cout) = 512 (row-Toeplitz conv2 weight).
    lhs2 = jnp.concatenate([s2_ref[:, 0:16, :],
                            s2_ref[:, 1:17, :],
                            s2_ref[:, 2:18, :]], axis=-1)                # (bt,16,768)
    lhs2 = lhs2.reshape(bt * 16, 768)
    h2 = jnp.dot(lhs2, w2_ref[...], preferred_element_type=f32)          # (bt*16,512)
    h2 = jnp.maximum(h2[:, :256], h2[:, 256:])                           # pool over qx2
    h2 = jnp.maximum(h2 + b2_ref[...], 0.0)                              # bias + ReLU

    # ---------------- y-half of max-pool via a one-row shifted read ----------
    n = bt * 16
    s3_ref[0:n, :] = h2
    s3_ref[n:n + 8, :] = jnp.zeros((8, 256), f32)                        # keep tail finite
    feats = jnp.maximum(s3_ref[0:n, :], s3_ref[1:n + 1, :])              # even rows valid
    feats = feats.reshape(bt, 16, 256).reshape(bt, 16 * 256)             # (bt, 4096)

    # ---------------- FC: one big matmul (zero weights at garbage slots) -----
    logits = jnp.dot(feats, wfc_ref[...], preferred_element_type=f32)
    logits = logits + jnp.dot(emb_ref[...], wemb_ref[...],
                              preferred_element_type=f32)
    out_ref[...] = logits + bfc_ref[...]                                 # (bt,128) dense


# -----------------------------------------------------------------------------
# Weight re-layout (pure, tiny XLA work done once per trace)
# -----------------------------------------------------------------------------
def _prep_weights(params, use_emb):
    f32 = jnp.float32
    w1 = params["w1"].astype(f32)           # (16, 1, 3, 3)
    b1 = params["b1"].astype(f32)           # (16,)
    w2 = params["w2"].astype(f32)           # (32, 16, 3, 3)
    b2 = params["b2"].astype(f32)           # (32,)
    w_fc = params["w_fc"].astype(f32)       # (10, 1568 + E)
    b_fc = params["b_fc"].astype(f32)       # (10,)

    # conv1 row-Toeplitz weight: [dy, xi, qx, x_pad, c] -> (90, 512)
    W1 = jnp.zeros((3, 30, 2, 16, 16), f32)
    xp = jnp.arange(1, 15)
    for dy in range(3):
        for dx in range(3):
            for qx in range(2):
                xi = 2 * xp - 2 + qx + dx                     # always in [0, 30)
                W1 = W1.at[dy, xi, qx, xp, :].set(
                    jnp.broadcast_to(w1[:, 0, dy, dx], (14, 16)))
    W1 = W1.reshape(90, 512)
    B1 = jnp.zeros((16, 16), f32).at[1:15, :].set(
        jnp.broadcast_to(b1, (14, 16))).reshape(1, 256)       # zero at pad lanes

    # conv2 row-Toeplitz weight: [dy2, x_pad, cin, qx2, j2, cout] -> (768, 512)
    W2 = jnp.zeros((3, 16, 16, 2, 8, 32), f32)
    for dy2 in range(3):
        for dx2 in range(3):
            for qx2 in range(2):
                j2s = [j for j in range(8) if 2 * j + qx2 + dx2 < 16]
                us = [2 * j + qx2 + dx2 for j in j2s]
                W2 = W2.at[dy2, jnp.array(us), :, qx2, jnp.array(j2s), :].set(
                    jnp.broadcast_to(w2[:, :, dy2, dx2].T, (len(j2s), 16, 32)))
    W2 = W2.reshape(768, 512)
    B2 = jnp.broadcast_to(b2, (8, 32)).reshape(1, 256)

    # FC weight on the full 16x8 (y2, j2) grid; zero rows at the pool-garbage
    # slots (odd y2, i2 == 7, j2 == 7) so those finite-but-unused features
    # contribute exactly 0 and no odd slicing is needed in-kernel.
    wfc_cnn = w_fc[:, :_CNN_FEATS].reshape(10, 32, 7, 7)      # [o, c, i, j]
    WFC = jnp.zeros((16, 8, 32, 10), f32)
    WFC = WFC.at[0:14:2, 0:7, :, :].set(jnp.transpose(wfc_cnn, (2, 3, 1, 0)))
    WFC = jnp.pad(WFC.reshape(4096, 10), ((0, 0), (0, 118)))  # (4096, 128)

    if use_emb:
        WEMB = jnp.pad(w_fc[:, _CNN_FEATS:].T, ((0, 0), (0, 118)))   # (E, 128)
    else:
        WEMB = jnp.zeros((1, 128), f32)
    BFC = jnp.pad(b_fc, (0, 118)).reshape(1, 128)
    return W1, B1, W2, B2, WFC, WEMB, BFC


# -----------------------------------------------------------------------------
# Wrapper (mirrors HybridMnistModel.forward)
# -----------------------------------------------------------------------------
def hybrid_mnist_forward(params, image_nchw, emb=None):
    B = image_nchw.shape[0]
    x = image_nchw.reshape(B, 28, 28).astype(jnp.float32)        # Cin == 1
    # 3 extra zero rows top/bottom (2x2-pool halo rows), 1 zero col each side,
    # then split by row parity so every kernel slice is contiguous.
    xpad2 = jnp.pad(x, ((0, 0), (3, 3), (1, 1)))                  # (B, 34, 30)
    xr = jnp.stack([xpad2[:, 0::2, :], xpad2[:, 1::2, :]], axis=1)  # (B,2,17,30)

    if emb is None:
        emb_arr = jnp.zeros((B, 1), jnp.float32)
    else:
        emb_arr = emb.astype(jnp.float32)

    W1, B1, W2, B2, WFC, WEMB, BFC = _prep_weights(params, emb is not None)

    # Pad the embedding contraction dim to a multiple of 8 (>= 8).
    E0 = emb_arr.shape[1]
    Ek = max(8, ((E0 + 7) // 8) * 8)
    if Ek != E0:
        emb_arr = jnp.pad(emb_arr, ((0, 0), (0, Ek - E0)))
        WEMB = jnp.pad(WEMB, ((0, Ek - E0), (0, 0)))

    # Batch tile: 32 keeps total VMEM ~17 MiB (safe on v7x's 64 MiB, well under
    # v5e/v6e 128 MiB) and gives >=2 "parallel" grid steps once B >= 64.
    bt = 32 if B > 16 else 8
    Bp = ((B + bt - 1) // bt) * bt
    if Bp != B:
        xr = jnp.pad(xr, ((0, Bp - B), (0, 0), (0, 0), (0, 0)))
        emb_arr = jnp.pad(emb_arr, ((0, Bp - B), (0, 0)))
    steps = Bp // bt

    flops = 2 * steps * (2 * bt * 16 * 90 * 512 + bt * 16 * 768 * 512
                         + bt * 4096 * 128 + bt * Ek * 128)
    bytes_accessed = 4 * (xr.size + W1.size + B1.size + W2.size + B2.size
                          + WFC.size + WEMB.size + BFC.size + emb_arr.size
                          + Bp * 128)

    out = pl.pallas_call(
        _fused_forward_kernel,
        out_shape=jax.ShapeDtypeStruct((Bp, 128), jnp.float32),
        grid=(steps,),
        in_specs=[
            pl.BlockSpec((bt, 2, 17, 30), lambda i: (i, 0, 0, 0)),
            pl.BlockSpec((90, 512), lambda i: (0, 0)),
            pl.BlockSpec((1, 256), lambda i: (0, 0)),
            pl.BlockSpec((768, 512), lambda i: (0, 0)),
            pl.BlockSpec((1, 256), lambda i: (0, 0)),
            pl.BlockSpec((4096, 128), lambda i: (0, 0)),
            pl.BlockSpec((WEMB.shape[0], 128), lambda i: (0, 0)),
            pl.BlockSpec((1, 128), lambda i: (0, 0)),
            pl.BlockSpec((bt, Ek), lambda i: (i, 0)),
        ],
        out_specs=pl.BlockSpec((bt, 128), lambda i: (i, 0)),
        scratch_shapes=[pltpu.VMEM((bt, 18, 256), jnp.float32),       # padded pool1
                        pltpu.VMEM((bt * 16 + 8, 256), jnp.float32)], # conv2 out
        compiler_params=pltpu.CompilerParams(
            dimension_semantics=("parallel",),
            vmem_limit_bytes=48 * 1024 * 1024),
        cost_estimate=pl.CostEstimate(flops=flops, transcendentals=0,
                                      bytes_accessed=bytes_accessed),
    )(xr, W1, B1, W2, B2, WFC, WEMB, BFC, emb_arr)

    return out[:B, :10]


# -----------------------------------------------------------------------------
# Deterministic parameter init (shapes from the module's __init__)
# -----------------------------------------------------------------------------
def init_params(key, embedding_size=0):
    ks = jax.random.split(key, 6)

    def u(k, shape, fan_in):
        bound = 1.0 / jnp.sqrt(jnp.float32(fan_in))
        return jax.random.uniform(k, shape, jnp.float32, -bound, bound)

    total_in = _CNN_FEATS + embedding_size
    return {
        "w1": u(ks[0], (16, 1, 3, 3), 9),
        "b1": u(ks[1], (16,), 9),
        "w2": u(ks[2], (32, 16, 3, 3), 16 * 9),
        "b2": u(ks[3], (32,), 16 * 9),
        "w_fc": u(ks[4], (10, total_in), total_in),
        "b_fc": u(ks[5], (10,), total_in),
    }


# -----------------------------------------------------------------------------
# Pure-JAX reference (correctness check for the Pallas path)
# -----------------------------------------------------------------------------
def reference_forward(params, image_nchw, emb=None):
    dn = ("NCHW", "OIHW", "NCHW")
    hp = lax.Precision.HIGHEST
    y = lax.conv_general_dilated(image_nchw, params["w1"], (1, 1), "SAME",
                                 dimension_numbers=dn, precision=hp)
    y = jax.nn.relu(y + params["b1"][None, :, None, None])
    y = lax.reduce_window(y, -jnp.inf, lax.max, (1, 1, 2, 2), (1, 1, 2, 2), "VALID")
    y = lax.conv_general_dilated(y, params["w2"], (1, 1), "SAME",
                                 dimension_numbers=dn, precision=hp)
    y = jax.nn.relu(y + params["b2"][None, :, None, None])
    y = lax.reduce_window(y, -jnp.inf, lax.max, (1, 1, 2, 2), (1, 1, 2, 2), "VALID")
    feats = y.reshape(y.shape[0], -1)
    if emb is not None:
        feats = jnp.concatenate([feats, emb], axis=1)
    return jnp.dot(feats, params["w_fc"].T, precision=hp) + params["b_fc"]


if __name__ == "__main__":
    key = jax.random.PRNGKey(0)
    k_img, k_emb, k_par = jax.random.split(key, 3)

    B, E = 2, 8                                      # batch=2, embedding_size=8
    image = jax.random.normal(k_img, (B, 1, 28, 28), jnp.float32)  # MNIST-sized
    emb = jax.random.normal(k_emb, (B, E), jnp.float32)
    params = init_params(k_par, embedding_size=E)

    fwd = jax.jit(hybrid_mnist_forward)
    out = jax.block_until_ready(fwd(params, image, emb))
    assert out.shape == (B, 10)

    ref = reference_forward(params, image, emb)
    max_diff = float(jnp.max(jnp.abs(out - ref)))
    assert max_diff < 1e-2, f"Pallas vs reference mismatch: {max_diff}"

    # TODO(synk): training_step/validation_step (cross_entropy, argmax accuracy)
    # are training utilities, not part of forward(), and are intentionally omitted.
    print("KERNEL_OK")
</pallas_src>

<mosaic_0001>
module attributes {stable_mosaic.version = 11 : i64} {
  func.func @_fused_forward_kernel(%arg0: i32, %arg1: memref<8x2x17x30xf32, #tpu.memory_space<vmem>>, %arg2: memref<90x512xf32, #tpu.memory_space<vmem>>, %arg3: memref<1x256xf32, #tpu.memory_space<vmem>>, %arg4: memref<768x512xf32, #tpu.memory_space<vmem>>, %arg5: memref<1x256xf32, #tpu.memory_space<vmem>>, %arg6: memref<4096x128xf32, #tpu.memory_space<vmem>>, %arg7: memref<8x128xf32, #tpu.memory_space<vmem>>, %arg8: memref<1x128xf32, #tpu.memory_space<vmem>>, %arg9: memref<8x8xf32, #tpu.memory_space<vmem>>, %arg10: memref<8x128xf32, #tpu.memory_space<vmem>>, %arg11: memref<8x18x256xf32, #tpu.memory_space<vmem>>, %arg12: memref<136x256xf32, #tpu.memory_space<vmem>>) attributes {dimension_semantics = [#tpu.dimension_semantics<parallel>], iteration_bounds = array<i64: 1>, scalar_prefetch = 0 : i64, scratch_operands = 2 : i64, tpu.core_type = #tpu.core_type<tc>, window_params = [{transform_indices = @transform_0, window_bounds = array<i64: 8, 2, 17, 30>}, {pipeline_mode = #tpu.pipeline_mode<synchronous>, transform_indices = @transform_1, window_bounds = array<i64: 90, 512>}, {pipeline_mode = #tpu.pipeline_mode<synchronous>, transform_indices = @transform_2, window_bounds = array<i64: 1, 256>}, {pipeline_mode = #tpu.pipeline_mode<synchronous>, transform_indices = @transform_3, window_bounds = array<i64: 768, 512>}, {pipeline_mode = #tpu.pipeline_mode<synchronous>, transform_indices = @transform_4, window_bounds = array<i64: 1, 256>}, {pipeline_mode = #tpu.pipeline_mode<synchronous>, transform_indices = @transform_5, window_bounds = array<i64: 4096, 128>}, {pipeline_mode = #tpu.pipeline_mode<synchronous>, transform_indices = @transform_6, window_bounds = array<i64: 8, 128>}, {pipeline_mode = #tpu.pipeline_mode<synchronous>, transform_indices = @transform_7, window_bounds = array<i64: 1, 128>}, {transform_indices = @transform_8, window_bounds = array<i64: 8, 8>}, {transform_indices = @transform_9, window_bounds = array<i64: 8, 128>}]} {
    %c0 = arith.constant 0 : index
    %c0_0 = arith.constant 0 : index
    %c0_1 = arith.constant 0 : index
    %c0_2 = arith.constant 0 : index
    %0 = vector.load %arg1[%c0, %c0_0, %c0_1, %c0_2] : memref<8x2x17x30xf32, #tpu.memory_space<vmem>>, vector<8x1x16x30xf32>
    %1 = vector.shape_cast %0 : vector<8x1x16x30xf32> to vector<8x16x30xf32>
    %c0_3 = arith.constant 0 : index
    %c1 = arith.constant 1 : index
    %c0_4 = arith.constant 0 : index
    %c0_5 = arith.constant 0 : index
    %2 = vector.load %arg1[%c0_3, %c1, %c0_4, %c0_5] : memref<8x2x17x30xf32, #tpu.memory_space<vmem>>, vector<8x1x16x30xf32>
    %3 = vector.shape_cast %2 : vector<8x1x16x30xf32> to vector<8x16x30xf32>
    %c0_6 = arith.constant 0 : index
    %c0_7 = arith.constant 0 : index
    %c1_8 = arith.constant 1 : index
    %c0_9 = arith.constant 0 : index
    %4 = vector.load %arg1[%c0_6, %c0_7, %c1_8, %c0_9] : memref<8x2x17x30xf32, #tpu.memory_space<vmem>>, vector<8x1x16x30xf32>
    %5 = vector.shape_cast %4 : vector<8x1x16x30xf32> to vector<8x16x30xf32>
    %6 = tpu.concatenate %1, %3, %5 in 2 : vector<8x16x30xf32>, vector<8x16x30xf32>, vector<8x16x30xf32> -> vector<8x16x90xf32>
    %c0_10 = arith.constant 0 : index
    %c1_11 = arith.constant 1 : index
    %c0_12 = arith.constant 0 : index
    %c0_13 = arith.constant 0 : index
    %7 = vector.load %arg1[%c0_10, %c1_11, %c0_12, %c0_13] : memref<8x2x17x30xf32, #tpu.memory_space<vmem>>, vector<8x1x16x30xf32>
    %8 = vector.shape_cast %7 : vector<8x1x16x30xf32> to vector<8x16x30xf32>
    %c0_14 = arith.constant 0 : index
    %c0_15 = arith.constant 0 : index
    %c1_16 = arith.constant 1 : index
    %c0_17 = arith.constant 0 : index
    %9 = vector.load %arg1[%c0_14, %c0_15, %c1_16, %c0_17] : memref<8x2x17x30xf32, #tpu.memory_space<vmem>>, vector<8x1x16x30xf32>
    %10 = vector.shape_cast %9 : vector<8x1x16x30xf32> to vector<8x16x30xf32>
    %c0_18 = arith.constant 0 : index
    %c1_19 = arith.constant 1 : index
    %c1_20 = arith.constant 1 : index
    %c0_21 = arith.constant 0 : index
    %11 = vector.load %arg1[%c0_18, %c1_19, %c1_20, %c0_21] : memref<8x2x17x30xf32, #tpu.memory_space<vmem>>, vector<8x1x16x30xf32>
    %12 = vector.shape_cast %11 : vector<8x1x16x30xf32> to vector<8x16x30xf32>
    %13 = tpu.concatenate %8, %10, %12 in 2 : vector<8x16x30xf32>, vector<8x16x30xf32>, vector<8x16x30xf32> -> vector<8x16x90xf32>
    %14 = tpu.concatenate %6, %13 in 0 : vector<8x16x90xf32>, vector<8x16x90xf32> -> vector<16x16x90xf32>
    %15 = vector.shape_cast %14 : vector<16x16x90xf32> to vector<256x90xf32>
    %c0_22 = arith.constant 0 : index
    %c0_23 = arith.constant 0 : index
    %16 = vector.load %arg2[%c0_22, %c0_23] : memref<90x512xf32, #tpu.memory_space<vmem>>, vector<90x512xf32>
    %cst = arith.constant dense<0.000000e+00> : vector<256x512xf32>
    %17 = tpu.matmul %15, %16, %cst {dimension_numbers = #tpu.dot_dimension_numbers<[1], [0], [0], [1], [0, 0, 1, 1], [], []>} : vector<256x90xf32>, vector<90x512xf32>, vector<256x512xf32> -> vector<256x512xf32>
    %18 = vector.extract_strided_slice %17 {offsets = [0, 0], sizes = [128, 512], strides = [1, 1]} : vector<256x512xf32> to vector<128x512xf32>
    %19 = vector.extract_strided_slice %17 {offsets = [128, 0], sizes = [128, 512], strides = [1, 1]} : vector<256x512xf32> to vector<128x512xf32>
    %20 = arith.maximumf %18, %19 : vector<128x512xf32>
    %21 = vector.extract_strided_slice %20 {offsets = [0, 0], sizes = [128, 256], strides = [1, 1]} : vector<128x512xf32> to vector<128x256xf32>
    %22 = vector.extract_strided_slice %20 {offsets = [0, 256], sizes = [128, 256], strides = [1, 1]} : vector<128x512xf32> to vector<128x256xf32>
    %23 = arith.maximumf %21, %22 : vector<128x256xf32>
    %c0_24 = arith.constant 0 : index
    %c0_25 = arith.constant 0 : index
    %24 = vector.load %arg3[%c0_24, %c0_25] : memref<1x256xf32, #tpu.memory_space<vmem>>, vector<1x256xf32>
    %25 = vector.broadcast %24 : vector<1x256xf32> to vector<128x256xf32>
    %26 = arith.addf %23, %25 : vector<128x256xf32>
    %cst_26 = arith.constant 0.000000e+00 : f32
    %27 = vector.broadcast %cst_26 : f32 to vector<128x256xf32>
    %28 = arith.maximumf %26, %27 : vector<128x256xf32>
    %29 = vector.shape_cast %28 : vector<128x256xf32> to vector<8x16x256xf32>
    %c0_27 = arith.constant 0 : index
    %c0_28 = arith.constant 0 : index
    %c0_29 = arith.constant 0 : index
    %30 = vector.load %arg11[%c0_27, %c0_28, %c0_29] : memref<8x18x256xf32, #tpu.memory_space<vmem>>, vector<8x16x256xf32>
    tpu.vector_store %arg11[%c0_27, %c0_28, %c0_29], %29 {strides = array<i32>} : memref<8x18x256xf32, #tpu.memory_space<vmem>>, vector<8x16x256xf32>,
    %cst_30 = arith.constant 0.000000e+00 : f32
    %31 = vector.broadcast %cst_30 : f32 to vector<8x1x256xf32>
    %c0_31 = arith.constant 0 : index
    %c0_32 = arith.constant 0 : index
    %c0_33 = arith.constant 0 : index
    %32 = vector.load %arg11[%c0_31, %c0_32, %c0_33] : memref<8x18x256xf32, #tpu.memory_space<vmem>>, vector<8x1x256xf32>
    tpu.vector_store %arg11[%c0_31, %c0_32, %c0_33], %31 {strides = array<i32>} : memref<8x18x256xf32, #tpu.memory_space<vmem>>, vector<8x1x256xf32>,
    %cst_34 = arith.constant 0.000000e+00 : f32
    %33 = vector.broadcast %cst_34 : f32 to vector<8x3x256xf32>
    %c0_35 = arith.constant 0 : index
    %c15 = arith.constant 15 : index
    %c0_36 = arith.constant 0 : index
    %34 = vector.load %arg11[%c0_35, %c15, %c0_36] : memref<8x18x256xf32, #tpu.memory_space<vmem>>, vector<8x3x256xf32>
    tpu.vector_store %arg11[%c0_35, %c15, %c0_36], %33 {strides = array<i32>} : memref<8x18x256xf32, #tpu.memory_space<vmem>>, vector<8x3x256xf32>,
    %c0_37 = arith.constant 0 : index
    %c0_38 = arith.constant 0 : index
    %c0_39 = arith.constant 0 : index
    %35 = vector.load %arg11[%c0_37, %c0_38, %c0_39] : memref<8x18x256xf32, #tpu.memory_space<vmem>>, vector<8x16x256xf32>
    %c0_40 = arith.constant 0 : index
    %c1_41 = arith.constant 1 : index
    %c0_42 = arith.constant 0 : index
    %36 = vector.load %arg11[%c0_40, %c1_41, %c0_42] : memref<8x18x256xf32, #tpu.memory_space<vmem>>, vector<8x16x256xf32>
    %c0_43 = arith.constant 0 : index
    %c2 = arith.constant 2 : index
    %c0_44 = arith.constant 0 : index
    %37 = vector.load %arg11[%c0_43, %c2, %c0_44] : memref<8x18x256xf32, #tpu.memory_space<vmem>>, vector<8x16x256xf32>
    %38 = tpu.concatenate %35, %36, %37 in 2 : vector<8x16x256xf32>, vector<8x16x256xf32>, vector<8x16x256xf32> -> vector<8x16x768xf32>
    %39 = vector.shape_cast %38 : vector<8x16x768xf32> to vector<128x768xf32>
    %c0_45 = arith.constant 0 : index
    %c0_46 = arith.constant 0 : index
    %40 = vector.load %arg4[%c0_45, %c0_46] : memref<768x512xf32, #tpu.memory_space<vmem>>, vector<768x512xf32>
    %cst_47 = arith.constant dense<0.000000e+00> : vector<128x512xf32>
    %41 = tpu.matmul %39, %40, %cst_47 {dimension_numbers = #tpu.dot_dimension_numbers<[1], [0], [0], [1], [0, 0, 1, 1], [], []>} : vector<128x768xf32>, vector<768x512xf32>, vector<128x512xf32> -> vector<128x512xf32>
    %42 = vector.extract_strided_slice %41 {offsets = [0, 0], sizes = [128, 256], strides = [1, 1]} : vector<128x512xf32> to vector<128x256xf32>
    %43 = vector.extract_strided_slice %41 {offsets = [0, 256], sizes = [128, 256], strides = [1, 1]} : vector<128x512xf32> to vector<128x256xf32>
    %44 = arith.maximumf %42, %43 : vector<128x256xf32>
    %c0_48 = arith.constant 0 : index
    %c0_49 = arith.constant 0 : index
    %45 = vector.load %arg5[%c0_48, %c0_49] : memref<1x256xf32, #tpu.memory_space<vmem>>, vector<1x256xf32>
    %46 = vector.broadcast %45 : vector<1x256xf32> to vector<128x256xf32>
    %47 = arith.addf %44, %46 : vector<128x256xf32>
    %cst_50 = arith.constant 0.000000e+00 : f32
    %48 = vector.broadcast %cst_50 : f32 to vector<128x256xf32>
    %49 = arith.maximumf %47, %48 : vector<128x256xf32>
    %c0_51 = arith.constant 0 : index
    %c0_52 = arith.constant 0 : index
    %50 = vector.load %arg12[%c0_51, %c0_52] : memref<136x256xf32, #tpu.memory_space<vmem>>, vector<128x256xf32>
    tpu.vector_store %arg12[%c0_51, %c0_52], %49 {strides = array<i32>} : memref<136x256xf32, #tpu.memory_space<vmem>>, vector<128x256xf32>,
    %cst_53 = arith.constant 0.000000e+00 : f32
    %51 = vector.broadcast %cst_53 : f32 to vector<8x256xf32>
    %c128 = arith.constant 128 : index
    %c0_54 = arith.constant 0 : index
    %52 = vector.load %arg12[%c128, %c0_54] : memref<136x256xf32, #tpu.memory_space<vmem>>, vector<8x256xf32>
    tpu.vector_store %arg12[%c128, %c0_54], %51 {strides = array<i32>} : memref<136x256xf32, #tpu.memory_space<vmem>>, vector<8x256xf32>,
    %c0_55 = arith.constant 0 : index
    %c0_56 = arith.constant 0 : index
    %53 = vector.load %arg12[%c0_55, %c0_56] : memref<136x256xf32, #tpu.memory_space<vmem>>, vector<128x256xf32>
    %c1_57 = arith.constant 1 : index
    %c0_58 = arith.constant 0 : index
    %54 = vector.load %arg12[%c1_57, %c0_58] : memref<136x256xf32, #tpu.memory_space<vmem>>, vector<128x256xf32>
    %55 = arith.maximumf %53, %54 : vector<128x256xf32>
    %56 = vector.shape_cast %55 : vector<128x256xf32> to vector<8x16x256xf32>
    %57 = vector.shape_cast %56 : vector<8x16x256xf32> to vector<8x4096xf32>
    %c0_59 = arith.constant 0 : index
    %c0_60 = arith.constant 0 : index
    %58 = vector.load %arg6[%c0_59, %c0_60] : memref<4096x128xf32, #tpu.memory_space<vmem>>, vector<4096x128xf32>
    %cst_61 = arith.constant dense<0.000000e+00> : vector<8x128xf32>
    %59 = tpu.matmul %57, %58, %cst_61 {dimension_numbers = #tpu.dot_dimension_numbers<[1], [0], [0], [1], [0, 0, 1, 1], [], []>} : vector<8x4096xf32>, vector<4096x128xf32>, vector<8x128xf32> -> vector<8x128xf32>
    %c0_62 = arith.constant 0 : index
    %c0_63 = arith.constant 0 : index
    %60 = vector.load %arg9[%c0_62, %c0_63] : memref<8x8xf32, #tpu.memory_space<vmem>>, vector<8x8xf32>
    %c0_64 = arith.constant 0 : index
    %c0_65 = arith.constant 0 : index
    %61 = vector.load %arg7[%c0_64, %c0_65] : memref<8x128xf32, #tpu.memory_space<vmem>>, vector<8x128xf32>
    %cst_66 = arith.constant dense<0.000000e+00> : vector<8x128xf32>
    %62 = tpu.matmul %60, %61, %cst_66 {dimension_numbers = #tpu.dot_dimension_numbers<[1], [0], [0], [1], [0, 0, 1, 1], [], []>} : vector<8x8xf32>, vector<8x128xf32>, vector<8x128xf32> -> vector<8x128xf32>
    %63 = arith.addf %59, %62 : vector<8x128xf32>
    %c0_67 = arith.constant 0 : index
    %c0_68 = arith.constant 0 : index
    %64 = vector.load %arg8[%c0_67, %c0_68] : memref<1x128xf32, #tpu.memory_space<vmem>>, vector<1x128xf32>
    %65 = vector.broadcast %64 : vector<1x128xf32> to vector<8x128xf32>
    %66 = arith.addf %63, %65 : vector<8x128xf32>
    %c0_69 = arith.constant 0 : index
    %c0_70 = arith.constant 0 : index
    %67 = vector.load %arg10[%c0_69, %c0_70] : memref<8x128xf32, #tpu.memory_space<vmem>>, vector<8x128xf32>
    tpu.vector_store %arg10[%c0_69, %c0_70], %66 {strides = array<i32>} : memref<8x128xf32, #tpu.memory_space<vmem>>, vector<8x128xf32>,
    return
  }
  func.func @transform_0(%arg0: i32) -> (i32, i32, i32, i32) {
    %c0_i32 = arith.constant 0 : i32
    %c0_i32_0 = arith.constant 0 : i32
    %c0_i32_1 = arith.constant 0 : i32
    %c0_i32_2 = arith.constant 0 : i32
    return %arg0, %c0_i32, %c0_i32_0, %c0_i32_1 : i32, i32, i32, i32
  }
  func.func @transform_1(%arg0: i32) -> (i32, i32) {
    %c0_i32 = arith.constant 0 : i32
    %c0_i32_0 = arith.constant 0 : i32
    %c0_i32_1 = arith.constant 0 : i32
    return %c0_i32, %c0_i32_0 : i32, i32
  }
  func.func @transform_2(%arg0: i32) -> (i32, i32) {
    %c0_i32 = arith.constant 0 : i32
    %c0_i32_0 = arith.constant 0 : i32
    %c0_i32_1 = arith.constant 0 : i32
    return %c0_i32, %c0_i32_0 : i32, i32
  }
  func.func @transform_3(%arg0: i32) -> (i32, i32) {
    %c0_i32 = arith.constant 0 : i32
    %c0_i32_0 = arith.constant 0 : i32
    %c0_i32_1 = arith.constant 0 : i32
    return %c0_i32, %c0_i32_0 : i32, i32
  }
  func.func @transform_4(%arg0: i32) -> (i32, i32) {
    %c0_i32 = arith.constant 0 : i32
    %c0_i32_0 = arith.constant 0 : i32
    %c0_i32_1 = arith.constant 0 : i32
    return %c0_i32, %c0_i32_0 : i32, i32
  }
  func.func @transform_5(%arg0: i32) -> (i32, i32) {
    %c0_i32 = arith.constant 0 : i32
    %c0_i32_0 = arith.constant 0 : i32
    %c0_i32_1 = arith.constant 0 : i32
    return %c0_i32, %c0_i32_0 : i32, i32
  }
  func.func @transform_6(%arg0: i32) -> (i32, i32) {
    %c0_i32 = arith.constant 0 : i32
    %c0_i32_0 = arith.constant 0 : i32
    %c0_i32_1 = arith.constant 0 : i32
    return %c0_i32, %c0_i32_0 : i32, i32
  }
  func.func @transform_7(%arg0: i32) -> (i32, i32) {
    %c0_i32 = arith.constant 0 : i32
    %c0_i32_0 = arith.constant 0 : i32
    %c0_i32_1 = arith.constant 0 : i32
    return %c0_i32, %c0_i32_0 : i32, i32
  }
  func.func @transform_8(%arg0: i32) -> (i32, i32) {
    %c0_i32 = arith.constant 0 : i32
    %c0_i32_0 = arith.constant 0 : i32
    return %arg0, %c0_i32 : i32, i32
  }
  func.func @transform_9(%arg0: i32) -> (i32, i32) {
    %c0_i32 = arith.constant 0 : i32
    %c0_i32_0 = arith.constant 0 : i32
    return %arg0, %c0_i32 : i32, i32
  }
}

</mosaic_0001>

<bundles_post_ra>
// kernel: hybrid_mnist_forward.1
= control target key start
LH: loop header
LB: loop body
LE: loop exit
PB: predicated region body
PF: predicated region fallthrough
CT: control target
= control target key end

     0   :  { %s7882_s13 = smov 30   ;;  %v7883_v2 = vmov 0.0   ;;  %s7884_s18 = smov 60   ;;  %vm548_vm0 = vcmask 1041408   ;;  %vm7885_vm1 = vmmov 1   ;;  %vm209_vm3 = vcmask 244736   ;;  %s13061_s0 = inlined_call_operand.vmem [shape: f32[8,2,17,30], index: 0, kind: input, shape index: {}]   ;;  %s13062_s1 = inlined_call_operand.vmem [shape: f32[90,512], index: 1, kind: input, shape index: {}]   ;;  %s13063_s3 = inlined_call_operand.vmem [shape: f32[768,512], index: 3, kind: input, shape index: {}]   ;;  %s13064_s2 = inlined_call_operand.vmem [shape: f32[1,256], index: 2, kind: input, shape index: {}]   ;;  %s13065_s6 = inlined_call_operand.vmem [shape: f32[8,128], index: 6, kind: input, shape index: {}]   ;;  %s13066_s5 = inlined_call_operand.vmem [shape: f32[4096,128], index: 5, kind: input, shape index: {}]   ;;  %s13067_s8 = inlined_call_operand.vmem [shape: f32[8,8], index: 8, kind: input, shape index: {}]   ;;  %s13068_s4 = inlined_call_operand.vmem [shape: f32[1,256], index: 4, kind: input, shape index: {}]   ;;  %s13069_s7 = inlined_call_operand.vmem [shape: f32[1,128], index: 7, kind: input, shape index: {}]   ;;  %s13070_s9 = inlined_call_operand.vmem [shape: f32[8,128], index: 9, kind: output, shape index: {}]  }
   0x1   :  { %v7942_v0 = vld [vmem:[%s13061_s0 + $0x18] sm:$0xff]  ;;  %v7947_v1 = vld [vmem:[%s13061_s0 + $0x20] sm:$0xff]  ;;  %1308 = vst [vmem:[#allocation2 + $0x20] sm:$0x3] %v7883_v2  ;;  %1309 = vst [vmem:[#allocation2 + $0x28] sm:$0x3] %v7883_v2  ;;  %625 = vmatprep.mubr.f32.mxu0 %v7883_v2  ;;  %882 = vmatprep.mubr.f32.mxu1 %v7883_v2 }
   0x2   :  { %97 = vrot.lane.b32.xlu0 %v7942_v0, %s7882_s13  ;;  %99 = vrot.lane.b32.xlu1 %v7947_v1, %s7882_s13  ;;  %1312 = vst [vmem:[#allocation2 + $0x50] sm:$0x3] %v7883_v2  ;;  %1313 = vst [vmem:[#allocation2 + $0x58] sm:$0x3] %v7883_v2  ;;  %v7974_v3 = vld [vmem:[%s13061_s0 + $0x1] sm:$0xff]  ;;  %v7979_v4 = vld [vmem:[%s13061_s0 + $0x9] sm:$0xff] }
   0x3   :  { %1316 = vst [vmem:[#allocation2 + $0x80] sm:$0x3] %v7883_v2  ;;  %1317 = vst [vmem:[#allocation2 + $0x88] sm:$0x3] %v7883_v2  ;;  %v7990_v5 = vld [vmem:[%s13061_s0 + $0x48] sm:$0xff]  ;;  %v7995_v6 = vld [vmem:[%s13061_s0 + $0x31] sm:$0xff] }
   0x4   :  { %1320 = vst [vmem:[#allocation2 + $0xb0] sm:$0x3] %v7883_v2  ;;  %1321 = vst [vmem:[#allocation2 + $0xb8] sm:$0x3] %v7883_v2  ;;  %v8004_v7 = vld [vmem:[%s13061_s0 + $0x50] sm:$0xff]  ;;  %v8009_v8 = vld [vmem:[%s13061_s0 + $0x39] sm:$0xff] }
   0x5   :  { %1324 = vst [vmem:[#allocation2 + $0xe0] sm:$0x3] %v7883_v2  ;;  %1325 = vst [vmem:[#allocation2 + $0xe8] sm:$0x3] %v7883_v2  ;;  %v8018_v9 = vld [vmem:[%s13061_s0 + $0x78] sm:$0xff]  ;;  %v8023_v10 = vld [vmem:[%s13061_s0 + $0x61] sm:$0xff] }
   0x6   :  { %1328 = vst [vmem:[#allocation2 + $0x110] sm:$0x3] %v7883_v2  ;;  %1329 = vst [vmem:[#allocation2 + $0x118] sm:$0x3] %v7883_v2  ;;  %161 = vrot.lane.b32.xlu0 %v7974_v3, %s7884_s18  ;;  %163 = vrot.lane.b32.xlu1 %v7979_v4, %s7884_s18  ;;  %v404_v11 = vld [vmem:[%s13062_s1 + $0x8] sm:$0xff]  ;;  %v406_v14 = vld [vmem:[%s13062_s1 + $0x18] sm:$0xff] }
   0x7   :  { %1332 = vst [vmem:[#allocation2 + $0x140] sm:$0x3] %v7883_v2  ;;  %1333 = vst [vmem:[#allocation2 + $0x148] sm:$0x3] %v7883_v2  ;;  %v408_v12 = vld [vmem:[%s13062_s1 + $0x28] sm:$0xff]  ;;  %v410_v15 = vld [vmem:[%s13062_s1 + $0x38] sm:$0xff] }
   0x8   :  { %1336 = vst [vmem:[#allocation2 + $0x170] sm:$0x3] %v7883_v2  ;;  %1337 = vst [vmem:[#allocation2 + $0x178] sm:$0x3] %v7883_v2  ;;  %v6780_v13 = vpack.c.bf16 %v408_v12, %v404_v11  ;;  %v8040_v16 = vld [vmem:[%s13061_s0 + $0x80] sm:$0xff]  ;;  %v8045_v17 = vld [vmem:[%s13061_s0 + $0x69] sm:$0xff]  ;;  %v6806_v18 = vpack.c.bf16 %v410_v15, %v406_v14 }
   0x9   :  { %3230 = vst [vmem:[#allocation3 + $0x100] sm:$0xff] %v7883_v2  ;;  %3231 = vst [vmem:[#allocation3 + $0x108] sm:$0xff] %v7883_v2  ;;  %v403_v19 = vld [vmem:[%s13062_s1] sm:$0xff]  ;;  %v405_v21 = vld [vmem:[%s13062_s1 + $0x10] sm:$0xff]  ;;  %vm226_vm4 = vcmask 490496   ;;  %vm451_vm5 = vcmask 736256  }
   0xa   :  { %101 = vrot.lane.b32.xlu0 %v7990_v5, %s7882_s13  ;;  %165 = vrot.lane.b32.xlu1 %v7995_v6, %s7884_s18  ;;  %v407_v20 = vld [vmem:[%s13062_s1 + $0x20] sm:$0xff]  ;;  %v409_v23 = vld [vmem:[%s13062_s1 + $0x30] sm:$0xff]  ;;  %vm8223_vm2 = vmpackc.low %vm548_vm0, %vm7885_vm1  ;;  %vm1482_vm7 = vcmask 1046528   ;;  %vm1627_vm8 = vcmask 1045504   ;;  %vm4296_vm9 = vcmask 64512   ;;  %vm7886_vm10 = vmmov 0  }
   0xb   :  { %v6782_v22 = vpack.c.bf16 %v407_v20, %v403_v19  ;;  %v412_v24 = vld [vmem:[%s13062_s1 + $0x48] sm:$0xff]  ;;  %6781 = vmatprep.subr.bf16.mxu0 %v6780_v13  ;;  %6807 = vmatprep.subr.bf16.mxu1 %v6806_v18  ;;  %v6808_v25 = vpack.c.bf16 %v409_v23, %v405_v21  ;;  %v414_v27 = vld [vmem:[%s13062_s1 + $0x58] sm:$0xff]  ;;  %v411_v31 = vld [vmem:[%s13062_s1 + $0x40] sm:$0xff] }
   0xc   :  { %v416_v26 = vld [vmem:[%s13062_s1 + $0x68] sm:$0xff]  ;;  %v418_v28 = vld [vmem:[%s13062_s1 + $0x78] sm:$0xff]  ;;  %v415_v32 = vld [vmem:[%s13062_s1 + $0x60] sm:$0xff] }
   0xd   :  { %6783 = vmatpush1.bf16.msra.mxu0 %v6782_v22  ;;  %v6784_v29 = vpack.c.bf16 %v416_v26, %v412_v24  ;;  %v6810_v30 = vpack.c.bf16 %v418_v28, %v414_v27  ;;  %v8084_v33 = vld [vmem:[%s13061_s0 + $0xa8] sm:$0xff]  ;;  %6809 = vmatpush1.bf16.msra.mxu1 %v6808_v25  ;;  %v6786_v34 = vpack.c.bf16 %v415_v32, %v411_v31  ;;  %v413_v35 = vld [vmem:[%s13062_s1 + $0x50] sm:$0xff]  ;;  %v422_v40 = vld [vmem:[%s13062_s1 + $0x98] sm:$0xff] }
   0xe   :  { %103 = vrot.lane.b32.xlu0 %v8004_v7, %s7882_s13  ;;  %167 = vrot.lane.b32.xlu1 %v8009_v8, %s7884_s18  ;;  %v417_v36 = vld [vmem:[%s13062_s1 + $0x70] sm:$0xff]  ;;  %v420_v37 = vld [vmem:[%s13062_s1 + $0x88] sm:$0xff] }
   0xf   :  { %v6812_v38 = vpack.c.bf16 %v417_v36, %v413_v35  ;;  %v424_v39 = vld [vmem:[%s13062_s1 + $0xa8] sm:$0xff]  ;;  %v8108_v41 = vld [vmem:[%s13061_s0 + $0x91] sm:$0xff]  ;;  %6785 = vmatprep.subr.bf16.mxu0 %v6784_v29  ;;  %6811 = vmatprep.subr.bf16.mxu1 %v6810_v30  ;;  %v419_v44 = vld [vmem:[%s13062_s1 + $0x80] sm:$0xff] }
  0x10   :  { %v6788_v42 = vpack.c.bf16 %v424_v39, %v420_v37  ;;  %v426_v43 = vld [vmem:[%s13062_s1 + $0xb8] sm:$0xff]  ;;  %v423_v46 = vld [vmem:[%s13062_s1 + $0xa0] sm:$0xff]  ;;  %v421_v47 = vld [vmem:[%s13062_s1 + $0x90] sm:$0xff] }
  0x11   :  { %6787 = vmatpush1.bf16.msra.mxu0 %v6786_v34  ;;  %v6814_v45 = vpack.c.bf16 %v426_v43, %v422_v40  ;;  %v425_v48 = vld [vmem:[%s13062_s1 + $0xb0] sm:$0xff]  ;;  %6813 = vmatpush1.bf16.msra.mxu1 %v6812_v38  ;;  %v6790_v50 = vpack.c.bf16 %v423_v46, %v419_v44  ;;  %v428_v52 = vld [vmem:[%s13062_s1 + $0xc8] sm:$0xff]  ;;  %v430_v54 = vld [vmem:[%s13062_s1 + $0xd8] sm:$0xff] }
  0x12   :  { %105 = vrot.lane.b32.xlu0 %v8018_v9, %s7882_s13  ;;  %169 = vrot.lane.b32.xlu1 %v8023_v10, %s7884_s18  ;;  %v8128_v49 = vld [vmem:[%s13061_s0 + $0xb0] sm:$0xff]  ;;  %v6816_v51 = vpack.c.bf16 %v425_v48, %v421_v47  ;;  %v432_v53 = vld [vmem:[%s13062_s1 + $0xe8] sm:$0xff] }
  0x13   :  { %6789 = vmatprep.subr.bf16.mxu0 %v6788_v42  ;;  %v8146_v55 = vld [vmem:[%s13061_s0 + $0x99] sm:$0xff]  ;;  %v6792_v56 = vpack.c.bf16 %v432_v53, %v428_v52  ;;  %6815 = vmatprep.subr.bf16.mxu1 %v6814_v45  ;;  %v429_v61 = vld [vmem:[%s13062_s1 + $0xd0] sm:$0xff]  ;;  %v436_v11 = vld [vmem:[%s13062_s1 + $0x108] sm:$0xff] }
  0x14   :  { %v434_v57 = vld [vmem:[%s13062_s1 + $0xf8] sm:$0xff]  ;;  %v427_v59 = vld [vmem:[%s13062_s1 + $0xc0] sm:$0xff]  ;;  %v433_v63 = vld [vmem:[%s13062_s1 + $0xf0] sm:$0xff] }
  0x15   :  { %v6818_v58 = vpack.c.bf16 %v434_v57, %v430_v54  ;;  %v431_v60 = vld [vmem:[%s13062_s1 + $0xe0] sm:$0xff]  ;;  %6791 = vmatpush1.bf16.msra.mxu0 %v6790_v50  ;;  %v440_v12 = vld [vmem:[%s13062_s1 + $0x128] sm:$0xff]  ;;  %v8172_v13 = vld [vmem:[%s13061_s0 + $0xd8] sm:$0xff]  ;;  %6817 = vmatpush1.bf16.msra.mxu1 %v6816_v51  ;;  %v6820_v14 = vpack.c.bf16 %v433_v63, %v429_v61 }
  0x16   :  { %107 = vrot.lane.b32.xlu0 %v8040_v16, %s7882_s13  ;;  %171 = vrot.lane.b32.xlu1 %v8045_v17, %s7884_s18  ;;  %v6794_v62 = vpack.c.bf16 %v431_v60, %v427_v59  ;;  %v6796_v15 = vpack.c.bf16 %v440_v12, %v436_v11  ;;  %v438_v18 = vld [vmem:[%s13062_s1 + $0x118] sm:$0xff]  ;;  %v435_v20 = vld [vmem:[%s13062_s1 + $0x100] sm:$0xff] }
  0x17   :  { %6793 = vmatprep.subr.bf16.mxu0 %v6792_v56  ;;  %v442_v19 = vld [vmem:[%s13062_s1 + $0x138] sm:$0xff]  ;;  %v439_v21 = vld [vmem:[%s13062_s1 + $0x120] sm:$0xff]  ;;  %6819 = vmatprep.subr.bf16.mxu1 %v6818_v58  ;;  %v437_v24 = vld [vmem:[%s13062_s1 + $0x110] sm:$0xff] }
  0x18   :  { %v8193_v22 = vld [vmem:[%s13061_s0 + $0xc1] sm:$0xff]  ;;  %v6822_v23 = vpack.c.bf16 %v442_v19, %v438_v18  ;;  %v441_v25 = vld [vmem:[%s13062_s1 + $0x130] sm:$0xff]  ;;  %v6798_v26 = vpack.c.bf16 %v439_v21, %v435_v20  ;;  %v446_v32 = vld [vmem:[%s13062_s1 + $0x158] sm:$0xff] }
  0x19   :  { %6795 = vmatpush1.bf16.msra.mxu0 %v6794_v62  ;;  %v444_v27 = vld [vmem:[%s13062_s1 + $0x148] sm:$0xff]  ;;  %v8210_v29 = vld [vmem:[%s13061_s0 + $0xe0] sm:$0xff]  ;;  %6821 = vmatpush1.bf16.msra.mxu1 %v6820_v14  ;;  %v6824_v30 = vpack.c.bf16 %v441_v25, %v437_v24  ;;  %v450_v34 = vld [vmem:[%s13062_s1 + $0x178] sm:$0x3] }
  0x1a   :  { %109 = vrot.lane.b32.xlu0 %v8084_v33, %s7882_s13  ;;  %173 = vrot.lane.b32.xlu1 %v8108_v41, %s7884_s18  ;;  %v448_v28 = vld [vmem:[%s13062_s1 + $0x168] sm:$0x3]  ;;  %v443_v36 = vld [vmem:[%s13062_s1 + $0x140] sm:$0xff]  ;;  %v6826_v39 = vpack.c.bf16 %v450_v34, %v446_v32 }
  0x1b   :  { %6797 = vmatprep.subr.bf16.mxu0 %v6796_v15  ;;  %v6800_v31 = vpack.c.bf16 %v448_v28, %v444_v27  ;;  %v447_v37 = vld [vmem:[%s13062_s1 + $0x160] sm:$0x3]  ;;  %v8236_v38 = vld [vmem:[%s13061_s0 + $0xc9] sm:$0xff]  ;;  %6823 = vmatprep.subr.bf16.mxu1 %v6822_v23  ;;  %v75_v46 = vld [vmem:[%s13061_s0 + $0xf1] sm:$0xff] }
  0x1c   :  { %v445_v40 = vld [vmem:[%s13062_s1 + $0x150] sm:$0xff]  ;;  %v6803_v43 = vpack.c.bf16 %v447_v37, %v443_v36  ;;  %v8253_v45 = vld [vmem:[%s13061_s0 + $0x108] sm:$0xff]  ;;  %v76_v48 = vld [vmem:[%s13061_s0 + $0xf9] sm:$0xff] }
  0x1d   :  { %v449_v42 = vld [vmem:[%s13062_s1 + $0x170] sm:$0x3]  ;;  %6799 = vmatpush1.bf16.msra.mxu0 %v6798_v26  ;;  %6825 = vmatpush1.bf16.msra.mxu1 %v6824_v30  ;;  %v8281_v50 = vld [vmem:[%s13061_s0 + $0x138] sm:$0xff]  ;;  %v77_v51 = vld [vmem:[%s13061_s0 + $0x121] sm:$0xff] }
  0x1e   :  { %111 = vrot.lane.b32.xlu0 %v8128_v49, %s7882_s13  ;;  %175 = vrot.lane.b32.xlu1 %v8146_v55, %s7884_s18  ;;  %v6829_v44 = vpack.c.bf16 %v449_v42, %v445_v40  ;;  %v8270_v47 = vld [vmem:[%s13061_s0 + $0x110] sm:$0xff]  ;;  %v8292_v52 = vld [vmem:[%s13061_s0 + $0x140] sm:$0xff] }
  0x1f   :  { %6802 = vmatprep.subr.msk.bf16.mxu0 %vm8223_vm2, %v6800_v31  ;;  %6828 = vmatprep.subr.msk.bf16.mxu1 %vm8223_vm2, %v6826_v39  ;;  %v78_v53 = vld [vmem:[%s13061_s0 + $0x129] sm:$0xff]  ;;  %v8308_v56 = vld [vmem:[%s13061_s0 + $0x151] sm:$0xff]  ;;  %v8322_v58 = vld [vmem:[%s13061_s0 + $0x159] sm:$0xff] }
  0x20   :  { %v8303_v54 = vld [vmem:[%s13061_s0 + $0x168] sm:$0xff]  ;;  %v8317_v57 = vld [vmem:[%s13061_s0 + $0x170] sm:$0xff]  ;;  %v6127_v59 = vld [vmem:[%s13061_s0 + $0x19] sm:$0xff] }
  0x21   :  { %6805 = vmatpush1.bf16.msk.msra.mxu0 %vm8223_vm2, %v6803_v43  ;;  %6831 = vmatpush1.bf16.msk.msra.mxu1 %vm8223_vm2, %v6829_v44  ;;  %v6128_v60 = vld [vmem:[%s13061_s0 + $0x21] sm:$0xff]  ;;  %v6129_v61 = vld [vmem:[%s13061_s0 + $0x49] sm:$0xff]  ;;  %v6138_v62 = vld [vmem:[%s13061_s0 + $0x111] sm:$0xff] }
  0x22   :  { %113 = vrot.lane.b32.xlu0 %v8172_v13, %s7882_s13  ;;  %177 = vrot.lane.b32.xlu1 %v8193_v22, %s7884_s18  ;;  %v6139_v63 = vld [vmem:[%s13061_s0 + $0x139] sm:$0xff]  ;;  %v6140_v11 = vld [vmem:[%s13061_s0 + $0x141] sm:$0xff] }
  0x23   :  { %v32_v15 = vld [vmem:[%s13061_s0] sm:$0xff]  ;;  %v33_v18 = vld [vmem:[%s13061_s0 + $0x8] sm:$0xff]  ;;  %v1743_v21 = vld [vmem:[%s13063_s3 + $0x18] sm:$0xff] }
  0x24   :  { %v1741_v19 = vld [vmem:[%s13063_s3 + $0x8] sm:$0xff]  ;;  %v1747_v25 = vld [vmem:[%s13063_s3 + $0x38] sm:$0xff]  ;;  %v34_v30 = vld [vmem:[%s13061_s0 + $0x30] sm:$0xff] }
  0x25   :  { %v1745_v20 = vld [vmem:[%s13063_s3 + $0x28] sm:$0xff]  ;;  %v7024_v32 = vpack.c.bf16 %v1747_v25, %v1743_v21  ;;  %v1740_v34 = vld [vmem:[%s13063_s3] sm:$0xff]  ;;  %v1742_v36 = vld [vmem:[%s13063_s3 + $0x10] sm:$0xff] }
  0x26   :  { %115 = vrot.lane.b32.xlu0 %v8210_v29, %s7882_s13  ;;  %179 = vrot.lane.b32.xlu1 %v8236_v38, %s7884_s18  ;;  %v6141_v28 = vld [vmem:[%s13061_s0 + $0x169] sm:$0xff]  ;;  %v6832_v31 = vpack.c.bf16 %v1745_v20, %v1741_v19  ;;  %v1744_v35 = vld [vmem:[%s13063_s3 + $0x20] sm:$0xff] }
  0x27   :  { %v1746_v37 = vld [vmem:[%s13063_s3 + $0x30] sm:$0xff]  ;;  %v35_v43 = vld [vmem:[%s13061_s0 + $0x38] sm:$0xff]  ;;  %v1749_v44 = vld [vmem:[%s13063_s3 + $0x48] sm:$0xff]  ;;  %7025 = vmatprep.subr.bf16.mxu1 %v7024_v32 }
  0x28   :  { %6833 = vmatprep.subr.bf16.mxu0 %v6832_v31  ;;  %v1760_v19 = vld [vmem:[%s13063_s3 + $0xa0] sm:$0xff]  ;;  %v1758_v20 = vld [vmem:[%s13063_s3 + $0x90] sm:$0xff]  ;;  %v37_v25 = vld [vmem:[%s13061_s0 + $0x68] sm:$0xff] }
  0x29   :  { %v1762_v21 = vld [vmem:[%s13063_s3 + $0xb0] sm:$0xff] }
  0x2a   :  { %117 = vrot.lane.b32.xlu0 %v8253_v45, %s7882_s13  ;;  %181 = vrot.lane.b32.xlu1 %v75_v46, %s7884_s18 }
  0x2e   :  { %119 = vrot.lane.b32.xlu0 %v8270_v47, %s7882_s13  ;;  %183 = vrot.lane.b32.xlu1 %v76_v48, %s7884_s18 }
  0x32   :  { %121 = vrot.lane.b32.xlu0 %v8281_v50, %s7882_s13  ;;  %185 = vrot.lane.b32.xlu1 %v77_v51, %s7884_s18 }
  0x36   :  { %123 = vrot.lane.b32.xlu0 %v8292_v52, %s7882_s13  ;;  %187 = vrot.lane.b32.xlu1 %v78_v53, %s7884_s18 }
  0x3a   :  { %125 = vrot.lane.b32.xlu0 %v8303_v54, %s7882_s13  ;;  %189 = vrot.lane.b32.xlu1 %v8308_v56, %s7884_s18 }
  0x3e   :  { %127 = vrot.lane.b32.xlu0 %v8317_v57, %s7882_s13  ;;  %191 = vrot.lane.b32.xlu1 %v8322_v58, %s7884_s18 }
  0x42   :  { %259 = vrot.lane.b32.xlu0 %v7974_v3, %s7882_s13  ;;  %323 = vrot.lane.b32.xlu1 %v6127_v59, %s7884_s18  ;;  %v6130_v3 = vld [vmem:[%s13061_s0 + $0x51] sm:$0xff] }
  0x43   :  { %v1755_v59 = vld [vmem:[%s13063_s3 + $0x78] sm:$0xff] }
  0x46   :  { %261 = vrot.lane.b32.xlu0 %v7979_v4, %s7882_s13  ;;  %325 = vrot.lane.b32.xlu1 %v6128_v60, %s7884_s18  ;;  %v6131_v4 = vld [vmem:[%s13061_s0 + $0x79] sm:$0xff] }
  0x47   :  { %v1748_v60 = vld [vmem:[%s13063_s3 + $0x40] sm:$0xff] }
  0x4a   :  { %263 = vrot.lane.b32.xlu0 %v7995_v6, %s7882_s13  ;;  %327 = vrot.lane.b32.xlu1 %v6129_v61, %s7884_s18  ;;  %v6132_v6 = vld [vmem:[%s13061_s0 + $0x81] sm:$0xff] }
  0x4b   :  { %v1752_v61 = vld [vmem:[%s13063_s3 + $0x60] sm:$0xff] }
  0x4e   :  { %265 = vrot.lane.b32.xlu0 %v8009_v8, %s7882_s13  ;;  %329 = vrot.lane.b32.xlu1 %v6130_v3, %s7884_s18  ;;  %v6133_v8 = vld [vmem:[%s13061_s0 + $0xa9] sm:$0xff] }
  0x4f   :  { %v1750_v3 = vld [vmem:[%s13063_s3 + $0x50] sm:$0xff] }
  0x52   :  { %267 = vrot.lane.b32.xlu0 %v8023_v10, %s7882_s13  ;;  %331 = vrot.lane.b32.xlu1 %v6131_v4, %s7884_s18  ;;  %v6134_v10 = vld [vmem:[%s13061_s0 + $0xb1] sm:$0xff] }
  0x53   :  { %v1754_v4 = vld [vmem:[%s13063_s3 + $0x70] sm:$0xff] }
  0x56   :  { %269 = vrot.lane.b32.xlu0 %v8045_v17, %s7882_s13  ;;  %333 = vrot.lane.b32.xlu1 %v6132_v6, %s7884_s18  ;;  %v6135_v17 = vld [vmem:[%s13061_s0 + $0xd9] sm:$0xff] }
  0x5a   :  { %271 = vrot.lane.b32.xlu0 %v8108_v41, %s7882_s13  ;;  %335 = vrot.lane.b32.xlu1 %v6133_v8, %s7884_s18  ;;  %v6136_v41 = vld [vmem:[%s13061_s0 + $0xe1] sm:$0xff] }
  0x5e   :  { %273 = vrot.lane.b32.xlu0 %v8146_v55, %s7882_s13  ;;  %337 = vrot.lane.b32.xlu1 %v6134_v10, %s7884_s18  ;;  %v6137_v55 = vld [vmem:[%s13061_s0 + $0x109] sm:$0xff] }
  0x62   :  { %275 = vrot.lane.b32.xlu0 %v8193_v22, %s7882_s13  ;;  %339 = vrot.lane.b32.xlu1 %v6135_v17, %s7884_s18  ;;  %v36_v17 = vld [vmem:[%s13061_s0 + $0x60] sm:$0xff] }
  0x66   :  { %277 = vrot.lane.b32.xlu0 %v8236_v38, %s7882_s13  ;;  %341 = vrot.lane.b32.xlu1 %v6136_v41, %s7884_s18  ;;  %v6142_v38 = vld [vmem:[%s13061_s0 + $0x171] sm:$0xff] }
  0x6a   :  { %279 = vrot.lane.b32.xlu0 %v75_v46, %s7882_s13  ;;  %343 = vrot.lane.b32.xlu1 %v6137_v55, %s7884_s18  ;;  %v1753_v46 = vld [vmem:[%s13063_s3 + $0x68] sm:$0xff] }
  0x6b   :  { %v6836_v41 = vpack.c.bf16 %v1753_v46, %v1749_v44  ;;  %v38_v46 = vld [vmem:[%s13061_s0 + $0x90] sm:$0xff] }
  0x6e   :  { %281 = vrot.lane.b32.xlu0 %v76_v48, %s7882_s13  ;;  %345 = vrot.lane.b32.xlu1 %v6138_v62, %s7884_s18  ;;  %v1757_v62 = vld [vmem:[%s13063_s3 + $0x88] sm:$0xff] }
  0x72   :  { %283 = vrot.lane.b32.xlu0 %v77_v51, %s7882_s13  ;;  %347 = vrot.lane.b32.xlu1 %v6139_v63, %s7884_s18  ;;  %v6834_v51 = vpack.c.bf16 %v1744_v35, %v1740_v34  ;;  %v7034_v34 = vpack.c.bf16 %v1762_v21, %v1758_v20  ;;  %v1767_v35 = vld [vmem:[%s13063_s3 + $0xd8] sm:$0xff] }
  0x73   :  { %v1783_v20 = vld [vmem:[%s13063_s3 + $0x158] sm:$0xff] }
  0x74   :  { %v98_v12 = vpop.permute.xlu0 %97  ;;  %v100_v14 = vpop.permute.xlu1 %99  ;;  %v1787_v21 = vld [vmem:[%s13063_s3 + $0x178] sm:$0xff] }
  0x75   :  { %v210_v22 = vsel %vm209_vm3, %v32_v15, %v98_v12  ;;  %v211_v26 = vsel %vm209_vm3, %v33_v18, %v100_v14  ;;  %v7030_v12 = vpack.c.bf16 %v1754_v4, %v1750_v3  ;;  %v1759_v14 = vld [vmem:[%s13063_s3 + $0x98] sm:$0xff]  ;;  %v1756_v18 = vld [vmem:[%s13063_s3 + $0x80] sm:$0xff] }
  0x76   :  { %285 = vrot.lane.b32.xlu0 %v78_v53, %s7882_s13  ;;  %349 = vrot.lane.b32.xlu1 %v6140_v11, %s7884_s18  ;;  %v7026_v53 = vpack.c.bf16 %v1746_v37, %v1742_v36  ;;  %v6838_v11 = vpack.c.bf16 %v1752_v61, %v1748_v60  ;;  %v1763_v15 = vld [vmem:[%s13063_s3 + $0xb8] sm:$0xff]  ;;  %v6842_v32 = vpack.c.bf16 %v1760_v19, %v1756_v18  ;;  %v1764_v37 = vld [vmem:[%s13063_s3 + $0xc0] sm:$0xff] }
  0x77   :  { %v1771_v36 = vld [vmem:[%s13063_s3 + $0xf8] sm:$0xff] }
  0x78   :  { %v162_v23 = vpop.permute.xlu0 %161  ;;  %v164_v24 = vpop.permute.xlu1 %163  ;;  %v1775_v3 = vld [vmem:[%s13063_s3 + $0x118] sm:$0xff] }
  0x79   :  { %v227_v27 = vsel %vm226_vm4, %v210_v22, %v162_v23  ;;  %v228_v39 = vsel %vm226_vm4, %v211_v26, %v164_v24  ;;  %v1779_v4 = vld [vmem:[%s13063_s3 + $0x138] sm:$0xff] }
  0x7a   :  { %6145 = vmatmul.mubr.msk.f32.vlgmr.msra.gmra.mrb[0].mxu0 %vm451_vm5, %v227_v27  ;;  %6179 = vmatmul.mubr.msk.f32.vlgmr.msra.gmra.mrb[0].mxu1 %vm451_vm5, %v227_v27  ;;  %v7032_v27 = vpack.c.bf16 %v1763_v15, %v1759_v14  ;;  %v1785_v14 = vld [vmem:[%s13063_s3 + $0x168] sm:$0xff] }
  0x7b   :  { %287 = vrot.lane.b32.xlu0 %v8308_v56, %s7882_s13  ;;  %631 = vmatprep.mubr.f32.mxu0 %v7883_v2  ;;  %v1751_v56 = vld [vmem:[%s13063_s3 + $0x58] sm:$0xff] }
  0x7c   :  { %888 = vmatprep.mubr.f32.mxu1 %v7883_v2  ;;  %351 = vrot.lane.b32.xlu1 %v6141_v28, %s7884_s18  ;;  %v102_v40 = vpop.permute.xlu0 %101  ;;  %v166_v42 = vpop.permute.xlu1 %165  ;;  %v7028_v55 = vpack.c.bf16 %v1755_v59, %v1751_v56  ;;  %v1765_v28 = vld [vmem:[%s13063_s3 + $0xc8] sm:$0xff] }
  0x7d   :  { %v212_v48 = vsel %vm209_vm3, %v34_v30, %v102_v40  ;;  %6835 = vmatpush1.bf16.msra.mxu0 %v6834_v51  ;;  %7027 = vmatpush1.bf16.msra.mxu1 %v7026_v53  ;;  %v1769_v30 = vld [vmem:[%s13063_s3 + $0xe8] sm:$0xff]  ;;  %v1770_v40 = vld [vmem:[%s13063_s3 + $0xf0] sm:$0xff]  ;;  %v7036_v51 = vpack.c.bf16 %v1771_v36, %v1767_v35  ;;  %v40_v36 = vld [vmem:[%s13061_s0 + $0xc0] sm:$0xff] }
  0x7e   :  { %6146 = vmatmul.mubr.msk.f32.gmra.mrb[2].mxu0 %vm451_vm5, %v228_v39  ;;  %6180 = vmatmul.mubr.msk.f32.gmra.mrb[2].mxu1 %vm451_vm5, %v228_v39  ;;  %v229_v6 = vsel %vm226_vm4, %v212_v48, %v166_v42  ;;  %v1766_v39 = vld [vmem:[%s13063_s3 + $0xd0] sm:$0xff]  ;;  %v6844_v48 = vpack.c.bf16 %v1769_v30, %v1765_v28  ;;  %v1773_v53 = vld [vmem:[%s13063_s3 + $0x108] sm:$0xff] }
  0x7f   :  { %289 = vrot.lane.b32.xlu0 %v8322_v58, %s7882_s13  ;;  %637 = vmatprep.mubr.f32.mxu0 %v7883_v2  ;;  %v1761_v58 = vld [vmem:[%s13063_s3 + $0xa8] sm:$0xff]  ;;  %v7038_v61 = vpack.c.bf16 %v1770_v40, %v1766_v39 }
  0x80   :  { %894 = vmatprep.mubr.f32.mxu1 %v7883_v2  ;;  %353 = vrot.lane.b32.xlu1 %v6142_v38, %s7884_s18  ;;  %v104_v8 = vpop.permute.xlu0 %103  ;;  %v168_v10 = vpop.permute.xlu1 %167  ;;  %v6840_v26 = vpack.c.bf16 %v1761_v58, %v1757_v62  ;;  %v1768_v38 = vld [vmem:[%s13063_s3 + $0xe0] sm:$0xff]  ;;  %v1777_v56 = vld [vmem:[%s13063_s3 + $0x128] sm:$0xff]  ;;  %v39_v58 = vld [vmem:[%s13061_s0 + $0x98] sm:$0xff] }
  0x81   :  { %v213_v63 = vsel %vm209_vm3, %v35_v43, %v104_v8  ;;  %6837 = vmatprep.subr.bf16.mxu0 %v6836_v41  ;;  %7029 = vmatprep.subr.bf16.mxu1 %v7028_v55  ;;  %v6846_v60 = vpack.c.bf16 %v1768_v38, %v1764_v37  ;;  %v1776_v8 = vld [vmem:[%s13063_s3 + $0x120] sm:$0xff] }
  0x82   :  { %6147 = vmatmul.mubr.msk.f32.gmra.mrb[4].mxu0 %vm451_vm5, %v229_v6  ;;  %6181 = vmatmul.mubr.msk.f32.gmra.mrb[4].mxu1 %vm451_vm5, %v229_v6  ;;  %v230_v22 = vsel %vm226_vm4, %v213_v63, %v168_v10  ;;  %v1772_v6 = vld [vmem:[%s13063_s3 + $0x100] sm:$0xff]  ;;  %v1774_v10 = vld [vmem:[%s13063_s3 + $0x110] sm:$0xff]  ;;  %v6848_v63 = vpack.c.bf16 %v1777_v56, %v1773_v53 }
  0x83   :  { %643 = vmatprep.mubr.f32.mxu0 %v7883_v2  ;;  %900 = vmatprep.mubr.f32.mxu1 %v7883_v2  ;;  %v6850_v18 = vpack.c.bf16 %v1776_v8, %v1772_v6 }
  0x84   :  { %v106_v23 = vpop.permute.xlu0 %105  ;;  %v170_v24 = vpop.permute.xlu1 %169  ;;  %6839 = vmatpush1.bf16.msra.mxu0 %v6838_v11  ;;  %7031 = vmatpush1.bf16.msra.mxu1 %v7030_v12  ;;  %v7040_v11 = vpack.c.bf16 %v1779_v4, %v1775_v3  ;;  %v1781_v12 = vld [vmem:[%s13063_s3 + $0x148] sm:$0xff] }
  0x85   :  { %v214_v31 = vsel %vm209_vm3, %v36_v17, %v106_v23  ;;  %6841 = vmatprep.subr.bf16.mxu0 %v6840_v26  ;;  %7033 = vmatprep.subr.bf16.mxu1 %v7032_v27  ;;  %v1778_v17 = vld [vmem:[%s13063_s3 + $0x130] sm:$0xff]  ;;  %v1784_v23 = vld [vmem:[%s13063_s3 + $0x160] sm:$0xff]  ;;  %v6852_v30 = vpack.c.bf16 %v1785_v14, %v1781_v12 }
  0x86   :  { %6148 = vmatmul.mubr.msk.f32.gmra.mrb[6].mxu0 %vm451_vm5, %v230_v22  ;;  %6182 = vmatmul.mubr.msk.f32.gmra.mrb[6].mxu1 %vm451_vm5, %v230_v22  ;;  %v231_v42 = vsel %vm226_vm4, %v214_v31, %v170_v24  ;;  %v7042_v19 = vpack.c.bf16 %v1778_v17, %v1774_v10  ;;  %v1780_v22 = vld [vmem:[%s13063_s3 + $0x140] sm:$0xff]  ;;  %v1782_v24 = vld [vmem:[%s13063_s3 + $0x150] sm:$0xff]  ;;  %v7044_v31 = vpack.c.bf16 %v1787_v21, %v1783_v20 }
  0x87   :  { %649 = vmatprep.mubr.f32.mxu0 %v7883_v2  ;;  %906 = vmatprep.mubr.f32.mxu1 %v7883_v2  ;;  %v44_v10 = vld [vmem:[%s13061_s0 + $0x120] sm:$0xff] }
  0x88   :  { %v108_v43 = vpop.permute.xlu0 %107  ;;  %v172_v44 = vpop.permute.xlu1 %171  ;;  %6843 = vmatpush1.bf16.msra.mxu0 %v6842_v32  ;;  %7035 = vmatpush1.bf16.msra.mxu1 %v7034_v34  ;;  %v6854_v34 = vpack.c.bf16 %v1784_v23, %v1780_v22  ;;  %v47_v22 = vld [vmem:[%s13061_s0 + $0x158] sm:$0xff] }
  0x89   :  { %v215_v59 = vsel %vm209_vm3, %v37_v25, %v108_v43  ;;  %6845 = vmatprep.subr.bf16.mxu0 %v6844_v48  ;;  %7037 = vmatprep.subr.bf16.mxu1 %v7036_v51  ;;  %v1786_v25 = vld [vmem:[%s13063_s3 + $0x170] sm:$0xff] }
  0x8a   :  { %6149 = vmatmul.mubr.msk.f32.gmra.mrb[8].mxu0 %vm451_vm5, %v231_v42  ;;  %6183 = vmatmul.mubr.msk.f32.gmra.mrb[8].mxu1 %vm451_vm5, %v231_v42  ;;  %v232_v41 = vsel %vm226_vm4, %v215_v59, %v172_v44  ;;  %v7046_v35 = vpack.c.bf16 %v1786_v25, %v1782_v24  ;;  %v41_v42 = vld [vmem:[%s13061_s0 + $0xc8] sm:$0xff]  ;;  %v42_v51 = vld [vmem:[%s13061_s0 + $0xf0] sm:$0xff] }
  0x8b   :  { %655 = vmatprep.mubr.f32.mxu0 %v7883_v2  ;;  %912 = vmatprep.mubr.f32.mxu1 %v7883_v2 }
  0x8c   :  { %v110_v55 = vpop.permute.xlu0 %109  ;;  %v174_v62 = vpop.permute.xlu1 %173  ;;  %6847 = vmatpush1.bf16.msra.mxu0 %v6846_v60  ;;  %7039 = vmatpush1.bf16.msra.mxu1 %v7038_v61  ;;  %v43_v61 = vld [vmem:[%s13061_s0 + $0xf8] sm:$0xff] }
  0x8d   :  { %v216_v15 = vsel %vm209_vm3, %v38_v46, %v110_v55  ;;  %6849 = vmatprep.subr.bf16.mxu0 %v6848_v63  ;;  %7041 = vmatprep.subr.bf16.mxu1 %v7040_v11 }
  0x8e   :  { %6150 = vmatmul.mubr.msk.f32.gmra.mrb[10].mxu0 %vm451_vm5, %v232_v41  ;;  %6184 = vmatmul.mubr.msk.f32.gmra.mrb[10].mxu1 %vm451_vm5, %v232_v41  ;;  %v233_v26 = vsel %vm226_vm4, %v216_v15, %v174_v62  ;;  %v46_v15 = vld [vmem:[%s13061_s0 + $0x150] sm:$0xff] }
  0x8f   :  { %661 = vmatprep.mubr.f32.mxu0 %v7883_v2  ;;  %918 = vmatprep.mubr.f32.mxu1 %v7883_v2 }
  0x90   :  { %v112_v27 = vpop.permute.xlu0 %111  ;;  %v176_v28 = vpop.permute.xlu1 %175  ;;  %6851 = vmatpush1.bf16.msra.mxu0 %v6850_v18  ;;  %7043 = vmatpush1.bf16.msra.mxu1 %v7042_v19 }
  0x91   :  { %v217_v32 = vsel %vm209_vm3, %v39_v58, %v112_v27  ;;  %6853 = vmatprep.subr.bf16.mxu0 %v6852_v30  ;;  %7045 = vmatprep.subr.bf16.mxu1 %v7044_v31  ;;  %v45_v58 = vld [vmem:[%s13061_s0 + $0x128] sm:$0xff] }
  0x92   :  { %6151 = vmatmul.mubr.msk.f32.gmra.mrb[12].mxu0 %vm451_vm5, %v233_v26  ;;  %6185 = vmatmul.mubr.msk.f32.gmra.mrb[12].mxu1 %vm451_vm5, %v233_v26  ;;  %v234_v37 = vsel %vm226_vm4, %v217_v32, %v176_v28 }
  0x93   :  { %667 = vmatprep.mubr.f32.mxu0 %v7883_v2  ;;  %924 = vmatprep.mubr.f32.mxu1 %v7883_v2 }
  0x94   :  { %v114_v38 = vpop.permute.xlu0 %113  ;;  %v178_v39 = vpop.permute.xlu1 %177  ;;  %6855 = vmatpush1.bf16.msra.mxu0 %v6854_v34  ;;  %7047 = vmatpush1.bf16.msra.mxu1 %v7046_v35 }
  0x95   :  { %v218_v40 = vsel %vm209_vm3, %v40_v36, %v114_v38 }
  0x96   :  { %6152 = vmatmul.mubr.msk.f32.gmra.mrb[14].mxu0 %vm451_vm5, %v234_v37  ;;  %6186 = vmatmul.mubr.msk.f32.gmra.mrb[14].mxu1 %vm451_vm5, %v234_v37  ;;  %v235_v43 = vsel %vm226_vm4, %v218_v40, %v178_v39 }
  0x97   :  { %673 = vmatprep.mubr.f32.mxu0 %v7883_v2  ;;  %930 = vmatprep.mubr.f32.mxu1 %v7883_v2 }
  0x98   :  { %v116_v44 = vpop.permute.xlu0 %115  ;;  %v180_v46 = vpop.permute.xlu1 %179 }
  0x99   :  { %v219_v48 = vsel %vm209_vm3, %v41_v42, %v116_v44 }
  0x9a   :  { %6153 = vmatmul.mubr.msk.f32.gmra.mrb[16].mxu0 %vm451_vm5, %v235_v43  ;;  %6187 = vmatmul.mubr.msk.f32.gmra.mrb[16].mxu1 %vm451_vm5, %v235_v43  ;;  %v236_v53 = vsel %vm226_vm4, %v219_v48, %v180_v46 }
  0x9b   :  { %679 = vmatprep.mubr.f32.mxu0 %v7883_v2  ;;  %936 = vmatprep.mubr.f32.mxu1 %v7883_v2 }
  0x9c   :  { %v118_v56 = vpop.permute.xlu0 %117  ;;  %v182_v59 = vpop.permute.xlu1 %181 }
  0x9d   :  { %v220_v60 = vsel %vm209_vm3, %v42_v51, %v118_v56 }
  0x9e   :  { %6154 = vmatmul.mubr.msk.f32.gmra.mrb[18].mxu0 %vm451_vm5, %v236_v53  ;;  %6188 = vmatmul.mubr.msk.f32.gmra.mrb[18].mxu1 %vm451_vm5, %v236_v53  ;;  %v237_v3 = vsel %vm226_vm4, %v220_v60, %v182_v59 }
  0x9f   :  { %685 = vmatprep.mubr.f32.mxu0 %v7883_v2  ;;  %942 = vmatprep.mubr.f32.mxu1 %v7883_v2 }
  0xa0   :  { %v120_v4 = vpop.permute.xlu0 %119  ;;  %v184_v6 = vpop.permute.xlu1 %183 }
  0xa1   :  { %v221_v8 = vsel %vm209_vm3, %v43_v61, %v120_v4  ;;  %v1791_v4 = vld [vmem:[%s13063_s3 + $0x198] sm:$0xff] }
  0xa2   :  { %6155 = vmatmul.mubr.msk.f32.gmra.mrb[20].mxu0 %vm451_vm5, %v237_v3  ;;  %6189 = vmatmul.mubr.msk.f32.gmra.mrb[20].mxu1 %vm451_vm5, %v237_v3  ;;  %v238_v17 = vsel %vm226_vm4, %v221_v8, %v184_v6  ;;  %v1793_v3 = vld [vmem:[%s13063_s3 + $0x1a8] sm:$0xff]  ;;  %v1795_v8 = vld [vmem:[%s13063_s3 + $0x1b8] sm:$0xff] }
  0xa3   :  { %691 = vmatprep.mubr.f32.mxu0 %v7883_v2  ;;  %948 = vmatprep.mubr.f32.mxu1 %v7883_v2 }
  0xa4   :  { %v122_v41 = vpop.permute.xlu0 %121  ;;  %v186_v55 = vpop.permute.xlu1 %185 }
  0xa5   :  { %v222_v62 = vsel %vm209_vm3, %v44_v10, %v122_v41  ;;  %v7048_v41 = vpack.c.bf16 %v1795_v8, %v1791_v4  ;;  %v1817_v4 = vld [vmem:[%s13063_s3 + $0x268] sm:$0xff]  ;;  %v1819_v8 = vld [vmem:[%s13063_s3 + $0x278] sm:$0xff] }
  0xa6   :  { %6156 = vmatmul.mubr.msk.f32.gmra.mrb[22].mxu0 %vm451_vm5, %v238_v17  ;;  %6190 = vmatmul.mubr.msk.f32.gmra.mrb[22].mxu1 %vm451_vm5, %v238_v17  ;;  %v239_v63 = vsel %vm226_vm4, %v222_v62, %v186_v55  ;;  %v1788_v62 = vld [vmem:[%s13063_s3 + $0x180] sm:$0xff] }
  0xa7   :  { %697 = vmatprep.mubr.f32.mxu0 %v7883_v2  ;;  %954 = vmatprep.mubr.f32.mxu1 %v7883_v2 }
  0xa8   :  { %v124_v11 = vpop.permute.xlu0 %123  ;;  %v188_v12 = vpop.permute.xlu1 %187  ;;  %7049 = vmatprep.subr.bf16.mxu1 %v7048_v41 }
  0xa9   :  { %v223_v14 = vsel %vm209_vm3, %v45_v58, %v124_v11  ;;  %v1790_v58 = vld [vmem:[%s13063_s3 + $0x190] sm:$0xff] }
  0xaa   :  { %6157 = vmatmul.mubr.msk.f32.gmra.mrb[24].mxu0 %vm451_vm5, %v239_v63  ;;  %6191 = vmatmul.mubr.msk.f32.gmra.mrb[24].mxu1 %vm451_vm5, %v239_v63  ;;  %v240_v18 = vsel %vm226_vm4, %v223_v14, %v188_v12  ;;  %v8782_v12 = vld [vmem:[#allocation3 + $0x100] sm:$0xff] }
  0xab   :  { %703 = vmatprep.mubr.f32.mxu0 %v7883_v2  ;;  %960 = vmatprep.mubr.f32.mxu1 %v7883_v2 }
  0xac   :  { %v126_v19 = vpop.permute.xlu0 %125  ;;  %v190_v20 = vpop.permute.xlu1 %189 }
  0xad   :  { %v224_v21 = vsel %vm209_vm3, %v46_v15, %v126_v19 }
  0xae   :  { %6158 = vmatmul.mubr.msk.f32.gmra.mrb[26].mxu0 %vm451_vm5, %v240_v18  ;;  %6192 = vmatmul.mubr.msk.f32.gmra.mrb[26].mxu1 %vm451_vm5, %v240_v18  ;;  %v241_v23 = vsel %vm226_vm4, %v224_v21, %v190_v20  ;;  %v1797_v20 = vld [vmem:[%s13063_s3 + $0x1c8] sm:$0xff] }
  0xaf   :  { %709 = vmatprep.mubr.f32.mxu0 %v7883_v2  ;;  %966 = vmatprep.mubr.f32.mxu1 %v7883_v2  ;;  %v1801_v21 = vld [vmem:[%s13063_s3 + $0x1e8] sm:$0xff] }
  0xb0   :  { %v128_v24 = vpop.permute.xlu0 %127  ;;  %v192_v25 = vpop.permute.xlu1 %191 }
  0xb1   :  { %v225_v26 = vsel %vm209_vm3, %v47_v22, %v128_v24  ;;  %v1799_v22 = vld [vmem:[%s13063_s3 + $0x1d8] sm:$0xff] }
  0xb2   :  { %6159 = vmatmul.mubr.msk.f32.gmra.mrb[28].mxu0 %vm451_vm5, %v241_v23  ;;  %6193 = vmatmul.mubr.msk.f32.gmra.mrb[28].mxu1 %vm451_vm5, %v241_v23  ;;  %v242_v27 = vsel %vm226_vm4, %v225_v26, %v192_v25  ;;  %v1803_v24 = vld [vmem:[%s13063_s3 + $0x1f8] sm:$0xff] }
  0xb3   :  { %715 = vmatprep.mubr.f32.mxu0 %v7883_v2  ;;  %972 = vmatprep.mubr.f32.mxu1 %v7883_v2 }
  0xb4   :  { %v260_v28 = vpop.permute.xlu0 %259  ;;  %v324_v30 = vpop.permute.xlu1 %323 }
  0xb5   :  { %v371_v31 = vsel %vm209_vm3, %v7942_v0, %v260_v28 }
  0xb6   :  { %6160 = vmatmul.mubr.msk.f32.gmra.mrb[30].mxu0 %vm451_vm5, %v242_v27  ;;  %6194 = vmatmul.mubr.msk.f32.gmra.mrb[30].mxu1 %vm451_vm5, %v242_v27  ;;  %v387_v32 = vsel %vm226_vm4, %v371_v31, %v324_v30  ;;  %v7052_v27 = vpack.c.bf16 %v1803_v24, %v1799_v22  ;;  %v1796_v30 = vld [vmem:[%s13063_s3 + $0x1c0] sm:$0xff] }
  0xb7   :  { %721 = vmatprep.mubr.f32.mxu0 %v7883_v2  ;;  %978 = vmatprep.mubr.f32.mxu1 %v7883_v2  ;;  %v1800_v31 = vld [vmem:[%s13063_s3 + $0x1e0] sm:$0xff] }
  0xb8   :  { %v262_v34 = vpop.permute.xlu0 %261  ;;  %v326_v35 = vpop.permute.xlu1 %325 }
  0xb9   :  { %v372_v36 = vsel %vm209_vm3, %v7947_v1, %v262_v34  ;;  %v6862_v34 = vpack.c.bf16 %v1800_v31, %v1796_v30 }
  0xba   :  { %6161 = vmatmul.mubr.msk.f32.gmra.mrb[32].mxu0 %vm451_vm5, %v387_v32  ;;  %6195 = vmatmul.mubr.msk.f32.gmra.mrb[32].mxu1 %vm451_vm5, %v387_v32  ;;  %v388_v0 = vsel %vm226_vm4, %v372_v36, %v326_v35  ;;  %v1798_v32 = vld [vmem:[%s13063_s3 + $0x1d0] sm:$0xff] }
  0xbb   :  { %727 = vmatprep.mubr.f32.mxu0 %v7883_v2  ;;  %984 = vmatprep.mubr.f32.mxu1 %v7883_v2 }
  0xbc   :  { %v264_v37 = vpop.permute.xlu0 %263  ;;  %v328_v38 = vpop.permute.xlu1 %327 }
  0xbd   :  { %v373_v39 = vsel %vm209_vm3, %v7990_v5, %v264_v37 }
  0xbe   :  { %6162 = vmatmul.mubr.msk.f32.gmra.mrb[34].mxu0 %vm451_vm5, %v388_v0  ;;  %6196 = vmatmul.mubr.msk.f32.gmra.mrb[34].mxu1 %vm451_vm5, %v388_v0  ;;  %v389_v1 = vsel %vm226_vm4, %v373_v39, %v328_v38  ;;  %v1805_v39 = vld [vmem:[%s13063_s3 + $0x208] sm:$0xff] }
  0xbf   :  { %733 = vmatprep.mubr.f32.mxu0 %v7883_v2  ;;  %990 = vmatprep.mubr.f32.mxu1 %v7883_v2 }
  0xc0   :  { %v266_v40 = vpop.permute.xlu0 %265  ;;  %v330_v42 = vpop.permute.xlu1 %329 }
  0xc1   :  { %v374_v43 = vsel %vm209_vm3, %v8004_v7, %v266_v40  ;;  %v1807_v40 = vld [vmem:[%s13063_s3 + $0x218] sm:$0xff] }
  0xc2   :  { %6163 = vmatmul.mubr.msk.f32.gmra.mrb[36].mxu0 %vm451_vm5, %v389_v1  ;;  %6197 = vmatmul.mubr.msk.f32.gmra.mrb[36].mxu1 %vm451_vm5, %v389_v1  ;;  %v390_v5 = vsel %vm226_vm4, %v374_v43, %v330_v42  ;;  %v1809_v1 = vld [vmem:[%s13063_s3 + $0x228] sm:$0xff]  ;;  %v1811_v43 = vld [vmem:[%s13063_s3 + $0x238] sm:$0xff] }
  0xc3   :  { %739 = vmatprep.mubr.f32.mxu0 %v7883_v2  ;;  %996 = vmatprep.mubr.f32.mxu1 %v7883_v2 }
  0xc4   :  { %v268_v44 = vpop.permute.xlu0 %267  ;;  %v332_v46 = vpop.permute.xlu1 %331 }
  0xc5   :  { %v375_v48 = vsel %vm209_vm3, %v8018_v9, %v268_v44 }
  0xc6   :  { %6164 = vmatmul.mubr.msk.f32.gmra.mrb[38].mxu0 %vm451_vm5, %v390_v5  ;;  %6198 = vmatmul.mubr.msk.f32.gmra.mrb[38].mxu1 %vm451_vm5, %v390_v5  ;;  %v391_v7 = vsel %vm226_vm4, %v375_v48, %v332_v46  ;;  %v7056_v46 = vpack.c.bf16 %v1811_v43, %v1807_v40  ;;  %v1830_v40 = vld [vmem:[%s13063_s3 + $0x2d0] sm:$0xff] }
  0xc7   :  { %745 = vmatprep.mubr.f32.mxu0 %v7883_v2  ;;  %1002 = vmatprep.mubr.f32.mxu1 %v7883_v2 }
  0xc8   :  { %v270_v51 = vpop.permute.xlu0 %269  ;;  %v334_v53 = vpop.permute.xlu1 %333 }
  0xc9   :  { %v376_v56 = vsel %vm209_vm3, %v8040_v16, %v270_v51  ;;  %v1789_v16 = vld [vmem:[%s13063_s3 + $0x188] sm:$0xff]  ;;  %v1808_v51 = vld [vmem:[%s13063_s3 + $0x220] sm:$0xff] }
  0xca   :  { %6165 = vmatmul.mubr.msk.f32.gmra.mrb[40].mxu0 %vm451_vm5, %v391_v7  ;;  %6199 = vmatmul.mubr.msk.f32.gmra.mrb[40].mxu1 %vm451_vm5, %v391_v7  ;;  %v392_v9 = vsel %vm226_vm4, %v376_v56, %v334_v53  ;;  %v1804_v7 = vld [vmem:[%s13063_s3 + $0x200] sm:$0xff]  ;;  %v1806_v53 = vld [vmem:[%s13063_s3 + $0x210] sm:$0xff] }
  0xcb   :  { %751 = vmatprep.mubr.f32.mxu0 %v7883_v2  ;;  %1008 = vmatprep.mubr.f32.mxu1 %v7883_v2  ;;  %v6866_v56 = vpack.c.bf16 %v1808_v51, %v1804_v7  ;;  %v1843_v7 = vld [vmem:[%s13063_s3 + $0x338] sm:$0xff] }
  0xcc   :  { %v272_v59 = vpop.permute.xlu0 %271  ;;  %v336_v60 = vpop.permute.xlu1 %335 }
  0xcd   :  { %v377_v61 = vsel %vm209_vm3, %v8084_v33, %v272_v59  ;;  %v6856_v33 = vpack.c.bf16 %v1793_v3, %v1789_v16  ;;  %v1813_v3 = vld [vmem:[%s13063_s3 + $0x248] sm:$0xff] }
  0xce   :  { %6166 = vmatmul.mubr.msk.f32.gmra.mrb[42].mxu0 %vm451_vm5, %v392_v9  ;;  %6200 = vmatmul.mubr.msk.f32.gmra.mrb[42].mxu1 %vm451_vm5, %v392_v9  ;;  %v393_v6 = vsel %vm226_vm4, %v377_v61, %v336_v60 }
  0xcf   :  { %757 = vmatprep.mubr.f32.mxu0 %v7883_v2  ;;  %1014 = vmatprep.mubr.f32.mxu1 %v7883_v2  ;;  %v1792_v2 = vld [vmem:[%s13063_s3 + $0x1a0] sm:$0xff] }
  0xd0   :  { %v274_v10 = vpop.permute.xlu0 %273  ;;  %v338_v17 = vpop.permute.xlu1 %337  ;;  %6857 = vmatprep.subr.bf16.mxu0 %v6856_v33  ;;  %v6858_v63 = vpack.c.bf16 %v1792_v2, %v1788_v62  ;;  %v1812_v62 = vld [vmem:[%s13063_s3 + $0x240] sm:$0xff] }
  0xd1   :  { %v378_v55 = vsel %vm209_vm3, %v8128_v49, %v274_v10  ;;  %v1794_v49 = vld [vmem:[%s13063_s3 + $0x1b0] sm:$0xff]  ;;  %v1816_v2 = vld [vmem:[%s13063_s3 + $0x260] sm:$0xff] }
  0xd2   :  { %6167 = vmatmul.mubr.msk.f32.gmra.mrb[44].mxu0 %vm451_vm5, %v393_v6  ;;  %6201 = vmatmul.mubr.msk.f32.gmra.mrb[44].mxu1 %vm451_vm5, %v393_v6  ;;  %v394_v11 = vsel %vm226_vm4, %v378_v55, %v338_v17  ;;  %v7050_v14 = vpack.c.bf16 %v1794_v49, %v1790_v58  ;;  %v1815_v6 = vld [vmem:[%s13063_s3 + $0x258] sm:$0xff]  ;;  %v1814_v58 = vld [vmem:[%s13063_s3 + $0x250] sm:$0xff] }
  0xd3   :  { %763 = vmatprep.mubr.f32.mxu0 %v8782_v12  ;;  %1020 = vmatprep.mubr.f32.mxu1 %v8782_v12  ;;  %v7060_v41 = vpack.c.bf16 %v1819_v8, %v1815_v6  ;;  %v1851_v6 = vld [vmem:[%s13063_s3 + $0x378] sm:$0xff]  ;;  %v1848_v8 = vld [vmem:[%s13063_s3 + $0x360] sm:$0xff] }
  0xd4   :  { %v276_v15 = vpop.permute.xlu0 %275  ;;  %v340_v18 = vpop.permute.xlu1 %339  ;;  %6859 = vmatpush1.bf16.msra.mxu0 %v6858_v63  ;;  %7051 = vmatpush1.bf16.msra.mxu1 %v7050_v14  ;;  %v6870_v63 = vpack.c.bf16 %v1816_v2, %v1812_v62  ;;  %v1853_v62 = vld [vmem:[%s13063_s3 + $0x388] sm:$0xff] }
  0xd5   :  { %v379_v19 = vsel %vm209_vm3, %v8172_v13, %v276_v15  ;;  %v6860_v13 = vpack.c.bf16 %v1801_v21, %v1797_v20  ;;  %7053 = vmatprep.subr.bf16.mxu1 %v7052_v27  ;;  %v1825_v20 = vld [vmem:[%s13063_s3 + $0x2a8] sm:$0xff]  ;;  %v1823_v21 = vld [vmem:[%s13063_s3 + $0x298] sm:$0xff]  ;;  %v1822_v27 = vld [vmem:[%s13063_s3 + $0x290] sm:$0xff] }
  0xd6   :  { %6168 = vmatmul.mubr.msk.f32.gmra.mrb[46].mxu0 %vm451_vm5, %v394_v11  ;;  %6202 = vmatmul.mubr.msk.f32.gmra.mrb[46].mxu1 %vm451_vm5, %v394_v11  ;;  %v395_v23 = vsel %vm226_vm4, %v379_v19, %v340_v18  ;;  %v1821_v19 = vld [vmem:[%s13063_s3 + $0x288] sm:$0xff] }
  0xd7   :  { %769 = vmatprep.mubr.f32.mxu0 %v8782_v12  ;;  %1026 = vmatprep.mubr.f32.mxu1 %v8782_v12  ;;  %v1857_v2 = vld [vmem:[%s13063_s3 + $0x3a8] sm:$0xff] }
  0xd8   :  { %v278_v25 = vpop.permute.xlu0 %277  ;;  %v342_v26 = vpop.permute.xlu1 %341  ;;  %6861 = vmatprep.subr.bf16.mxu0 %v6860_v13 }
  0xd9   :  { %v380_v28 = vsel %vm209_vm3, %v8210_v29, %v278_v25  ;;  %v1802_v29 = vld [vmem:[%s13063_s3 + $0x1f0] sm:$0xff]  ;;  %6863 = vmatpush1.bf16.msra.mxu0 %v6862_v34  ;;  %v1820_v25 = vld [vmem:[%s13063_s3 + $0x280] sm:$0xff] }
  0xda   :  { %6169 = vmatmul.mubr.msk.f32.gmra.mrb[48].mxu0 %vm451_vm5, %v395_v23  ;;  %6203 = vmatmul.mubr.msk.f32.gmra.mrb[48].mxu1 %vm451_vm5, %v395_v23  ;;  %v396_v35 = vsel %vm226_vm4, %v380_v28, %v342_v26  ;;  %v7054_v36 = vpack.c.bf16 %v1802_v29, %v1798_v32  ;;  %v1827_v23 = vld [vmem:[%s13063_s3 + $0x2b8] sm:$0xff]  ;;  %v1824_v26 = vld [vmem:[%s13063_s3 + $0x2a0] sm:$0xff]  ;;  %v1826_v32 = vld [vmem:[%s13063_s3 + $0x2b0] sm:$0xff] }
  0xdb   :  { %775 = vmatprep.mubr.f32.mxu0 %v8782_v12  ;;  %1032 = vmatprep.mubr.f32.mxu1 %v8782_v12  ;;  %v7064_v13 = vpack.c.bf16 %v1827_v23, %v1823_v21  ;;  %v6874_v31 = vpack.c.bf16 %v1824_v26, %v1820_v25  ;;  %v7066_v29 = vpack.c.bf16 %v1826_v32, %v1822_v27  ;;  %v1861_v21 = vld [vmem:[%s13063_s3 + $0x3c8] sm:$0xff]  ;;  %v1864_v25 = vld [vmem:[%s13063_s3 + $0x3e0] sm:$0xff] }
  0xdc   :  { %v280_v0 = vpop.permute.xlu0 %279  ;;  %v344_v37 = vpop.permute.xlu1 %343  ;;  %7055 = vmatpush1.bf16.msra.mxu1 %v7054_v36  ;;  %v1831_v36 = vld [vmem:[%s13063_s3 + $0x2d8] sm:$0xff]  ;;  %v1869_v32 = vld [vmem:[%s13063_s3 + $0x408] sm:$0xff] }
  0xdd   :  { %v381_v38 = vsel %vm209_vm3, %v8253_v45, %v280_v0  ;;  %v6864_v45 = vpack.c.bf16 %v1809_v1, %v1805_v39  ;;  %7057 = vmatprep.subr.bf16.mxu1 %v7056_v46  ;;  %v1828_v39 = vld [vmem:[%s13063_s3 + $0x2c0] sm:$0xff]  ;;  %v1839_v46 = vld [vmem:[%s13063_s3 + $0x318] sm:$0xff] }
  0xde   :  { %6170 = vmatmul.mubr.msk.f32.gmra.mrb[50].mxu0 %vm451_vm5, %v396_v35  ;;  %6204 = vmatmul.mubr.msk.f32.gmra.mrb[50].mxu1 %vm451_vm5, %v396_v35  ;;  %v397_v42 = vsel %vm226_vm4, %v381_v38, %v344_v37  ;;  %v1833_v35 = vld [vmem:[%s13063_s3 + $0x2e8] sm:$0xff]  ;;  %v1835_v37 = vld [vmem:[%s13063_s3 + $0x2f8] sm:$0xff]  ;;  %v1832_v1 = vld [vmem:[%s13063_s3 + $0x2e0] sm:$0xff]  ;;  %v7072_v51 = vpack.c.bf16 %v1843_v7, %v1839_v46 }
  0xdf   :  { %781 = vmatprep.mubr.f32.mxu0 %v8782_v12  ;;  %1038 = vmatprep.mubr.f32.mxu1 %v8782_v12  ;;  %v7068_v38 = vpack.c.bf16 %v1835_v37, %v1831_v36 }
  0xe0   :  { %v282_v5 = vpop.permute.xlu0 %281  ;;  %v346_v44 = vpop.permute.xlu1 %345  ;;  %6865 = vmatprep.subr.bf16.mxu0 %v6864_v45  ;;  %v1834_v45 = vld [vmem:[%s13063_s3 + $0x2f0] sm:$0xff] }
  0xe1   :  { %v382_v48 = vsel %vm209_vm3, %v8270_v47, %v282_v5  ;;  %v1810_v47 = vld [vmem:[%s13063_s3 + $0x230] sm:$0xff]  ;;  %6867 = vmatpush1.bf16.msra.mxu0 %v6866_v56  ;;  %v7070_v43 = vpack.c.bf16 %v1834_v45, %v1830_v40  ;;  %v1837_v5 = vld [vmem:[%s13063_s3 + $0x308] sm:$0xff]  ;;  %v1840_v56 = vld [vmem:[%s13063_s3 + $0x320] sm:$0xff] }
  0xe2   :  { %6171 = vmatmul.mubr.msk.f32.gmra.mrb[52].mxu0 %vm451_vm5, %v397_v42  ;;  %6205 = vmatmul.mubr.msk.f32.gmra.mrb[52].mxu1 %vm451_vm5, %v397_v42  ;;  %v398_v9 = vsel %vm226_vm4, %v382_v48, %v346_v44  ;;  %v7058_v59 = vpack.c.bf16 %v1810_v47, %v1806_v53  ;;  %v6878_v42 = vpack.c.bf16 %v1832_v1, %v1828_v39  ;;  %v1841_v44 = vld [vmem:[%s13063_s3 + $0x328] sm:$0xff]  ;;  %v1836_v53 = vld [vmem:[%s13063_s3 + $0x300] sm:$0xff]  ;;  %v1838_v47 = vld [vmem:[%s13063_s3 + $0x310] sm:$0xff] }
  0xe3   :  { %787 = vmatprep.mubr.f32.mxu0 %v8782_v12  ;;  %1044 = vmatprep.mubr.f32.mxu1 %v8782_v12  ;;  %v6880_v48 = vpack.c.bf16 %v1841_v44, %v1837_v5 }
  0xe4   :  { %v284_v60 = vpop.permute.xlu0 %283  ;;  %v348_v61 = vpop.permute.xlu1 %347  ;;  %7059 = vmatpush1.bf16.msra.mxu1 %v7058_v59  ;;  %v1842_v59 = vld [vmem:[%s13063_s3 + $0x330] sm:$0xff] }
  0xe5   :  { %v383_v16 = vsel %vm209_vm3, %v8281_v50, %v284_v60  ;;  %v6868_v50 = vpack.c.bf16 %v1817_v4, %v1813_v3  ;;  %7061 = vmatprep.subr.bf16.mxu1 %v7060_v41  ;;  %v7074_v60 = vpack.c.bf16 %v1842_v59, %v1838_v47  ;;  %v1847_v3 = vld [vmem:[%s13063_s3 + $0x358] sm:$0xff]  ;;  %v1850_v41 = vld [vmem:[%s13063_s3 + $0x370] sm:$0xff] }
  0xe6   :  { %6172 = vmatmul.mubr.msk.f32.gmra.mrb[54].mxu0 %vm451_vm5, %v398_v9  ;;  %6206 = vmatmul.mubr.msk.f32.gmra.mrb[54].mxu1 %vm451_vm5, %v398_v9  ;;  %v399_v33 = vsel %vm226_vm4, %v383_v16, %v348_v61  ;;  %v6882_v9 = vpack.c.bf16 %v1840_v56, %v1836_v53  ;;  %v1845_v61 = vld [vmem:[%s13063_s3 + $0x348] sm:$0xff] }
  0xe7   :  { %793 = vmatprep.mubr.f32.mxu0 %v8782_v12  ;;  %1050 = vmatprep.mubr.f32.mxu1 %v8782_v12  ;;  %v1849_v16 = vld [vmem:[%s13063_s3 + $0x368] sm:$0xff] }
  0xe8   :  { %v286_v10 = vpop.permute.xlu0 %285  ;;  %v350_v17 = vpop.permute.xlu1 %349  ;;  %6869 = vmatprep.subr.bf16.mxu0 %v6868_v50  ;;  %v6884_v4 = vpack.c.bf16 %v1849_v16, %v1845_v61  ;;  %v1844_v50 = vld [vmem:[%s13063_s3 + $0x340] sm:$0xff] }
  0xe9   :  { %v384_v55 = vsel %vm209_vm3, %v8292_v52, %v286_v10  ;;  %v1818_v52 = vld [vmem:[%s13063_s3 + $0x270] sm:$0xff]  ;;  %6871 = vmatpush1.bf16.msra.mxu0 %v6870_v63  ;;  %v1855_v63 = vld [vmem:[%s13063_s3 + $0x398] sm:$0xff] }
  0xea   :  { %6173 = vmatmul.mubr.msk.f32.gmra.mrb[56].mxu0 %vm451_vm5, %v399_v33  ;;  %6207 = vmatmul.mubr.msk.f32.gmra.mrb[56].mxu1 %vm451_vm5, %v399_v33  ;;  %v400_v49 = vsel %vm226_vm4, %v384_v55, %v350_v17  ;;  %v7062_v11 = vpack.c.bf16 %v1818_v52, %v1814_v58  ;;  %v7076_v33 = vpack.c.bf16 %v1851_v6, %v1847_v3  ;;  %v1846_v10 = vld [vmem:[%s13063_s3 + $0x350] sm:$0xff]  ;;  %v1859_v52 = vld [vmem:[%s13063_s3 + $0x3b8] sm:$0xff] }
  0xeb   :  { %799 = vmatprep.mubr.f32.mxu0 %v8782_v12  ;;  %1056 = vmatprep.mubr.f32.mxu1 %v8782_v12  ;;  %v6886_v17 = vpack.c.bf16 %v1848_v8, %v1844_v50  ;;  %v7078_v55 = vpack.c.bf16 %v1850_v41, %v1846_v10  ;;  %v6888_v58 = vpack.c.bf16 %v1857_v2, %v1853_v62 }
  0xec   :  { %7063 = vmatpush1.bf16.msra.mxu1 %v7062_v11  ;;  %v7080_v11 = vpack.c.bf16 %v1859_v52, %v1855_v63 }
  0xed   :  { %v288_v14 = vpop.permute.xlu0 %287  ;;  %7065 = vmatprep.subr.bf16.mxu1 %v7064_v13  ;;  %v1867_v13 = vld [vmem:[%s13063_s3 + $0x3f8] sm:$0xff] }
  0xee   :  { %6174 = vmatmul.mubr.msk.f32.gmra.mrb[58].mxu0 %vm451_vm5, %v400_v49  ;;  %6208 = vmatmul.mubr.msk.f32.gmra.mrb[58].mxu1 %vm451_vm5, %v400_v49  ;;  %v385_v15 = vsel %vm209_vm3, %v8303_v54, %v288_v14  ;;  %v352_v18 = vpop.permute.xlu1 %351  ;;  %v6872_v54 = vpack.c.bf16 %v1825_v20, %v1821_v19  ;;  %v1852_v49 = vld [vmem:[%s13063_s3 + $0x380] sm:$0xff] }
  0xef   :  { %v401_v22 = vsel %vm226_vm4, %v385_v15, %v352_v18  ;;  %805 = vmatprep.mubr.f32.mxu0 %v8782_v12  ;;  %1062 = vmatprep.mubr.f32.mxu1 %v8782_v12  ;;  %v1856_v14 = vld [vmem:[%s13063_s3 + $0x3a0] sm:$0xff]  ;;  %v1854_v15 = vld [vmem:[%s13063_s3 + $0x390] sm:$0xff] }
  0xf0   :  { %6873 = vmatprep.subr.bf16.mxu0 %v6872_v54  ;;  %7067 = vmatpush1.bf16.msra.mxu1 %v7066_v29  ;;  %v1858_v18 = vld [vmem:[%s13063_s3 + $0x3b0] sm:$0xff]  ;;  %v6890_v19 = vpack.c.bf16 %v1856_v14, %v1852_v49  ;;  %v1863_v54 = vld [vmem:[%s13063_s3 + $0x3d8] sm:$0xff] }
  0xf1   :  { %v290_v24 = vpop.permute.xlu0 %289  ;;  %6875 = vmatpush1.bf16.msra.mxu0 %v6874_v31  ;;  %7069 = vmatprep.subr.bf16.mxu1 %v7068_v38  ;;  %v7082_v20 = vpack.c.bf16 %v1858_v18, %v1854_v15  ;;  %v7084_v26 = vpack.c.bf16 %v1867_v13, %v1863_v54  ;;  %v1871_v29 = vld [vmem:[%s13063_s3 + $0x418] sm:$0xff] }
  0xf2   :  { %6175 = vmatmul.mubr.msk.f32.gmra.mrb[60].mxu0 %vm451_vm5, %v401_v22  ;;  %6209 = vmatmul.mubr.msk.f32.gmra.mrb[60].mxu1 %vm451_vm5, %v401_v22  ;;  %v386_v28 = vsel %vm209_vm3, %v8317_v57, %v290_v24  ;;  %v354_v30 = vpop.permute.xlu1 %353  ;;  %v1829_v57 = vld [vmem:[%s13063_s3 + $0x2c8] sm:$0xff]  ;;  %v1860_v24 = vld [vmem:[%s13063_s3 + $0x3c0] sm:$0xff] }
  0xf3   :  { %v402_v34 = vsel %vm226_vm4, %v386_v28, %v354_v30  ;;  %811 = vmatprep.mubr.f32.mxu0 %v8782_v12  ;;  %1068 = vmatprep.mubr.f32.mxu1 %v8782_v12  ;;  %v6876_v0 = vpack.c.bf16 %v1833_v35, %v1829_v57  ;;  %v1865_v22 = vld [vmem:[%s13063_s3 + $0x3e8] sm:$0xff]  ;;  %v6894_v27 = vpack.c.bf16 %v1864_v25, %v1860_v24  ;;  %v1862_v28 = vld [vmem:[%s13063_s3 + $0x3d0] sm:$0xff]  ;;  %v1875_v35 = vld [vmem:[%s13063_s3 + $0x438] sm:$0xff] }
  0xf4   :  { %7071 = vmatpush1.bf16.msra.mxu1 %v7070_v43  ;;  %v6892_v23 = vpack.c.bf16 %v1865_v22, %v1861_v21  ;;  %v1866_v30 = vld [vmem:[%s13063_s3 + $0x3f0] sm:$0xff]  ;;  %v7088_v36 = vpack.c.bf16 %v1875_v35, %v1871_v29 }
  0xf5   :  { %6877 = vmatprep.subr.bf16.mxu0 %v6876_v0  ;;  %7073 = vmatprep.subr.bf16.mxu1 %v7072_v51  ;;  %v7086_v31 = vpack.c.bf16 %v1866_v30, %v1862_v28 }
  0xf6   :  { %6176 = vmatmul.mubr.msk.f32.gmra.mrb[62].mxu0 %vm451_vm5, %v402_v34  ;;  %6210 = vmatmul.mubr.msk.f32.gmra.mrb[62].mxu1 %vm451_vm5, %v402_v34  ;;  %v1873_v34 = vld [vmem:[%s13063_s3 + $0x428] sm:$0xff] }
  0xf7   :  { %6879 = vmatpush1.bf16.msra.mxu0 %v6878_v42  ;;  %v6896_v57 = vpack.c.bf16 %v1873_v34, %v1869_v32 }
  0xf8   :  { %6881 = vmatprep.subr.bf16.mxu0 %v6880_v48  ;;  %7075 = vmatpush1.bf16.msra.mxu1 %v7074_v60 }
  0xf9   :  { %7077 = vmatprep.subr.bf16.mxu1 %v7076_v33 }
  0xfb   :  { %6883 = vmatpush1.bf16.msra.mxu0 %v6882_v9 }
  0xfc   :  { %6885 = vmatprep.subr.bf16.mxu0 %v6884_v4  ;;  %7079 = vmatpush1.bf16.msra.mxu1 %v7078_v55 }
  0xfd   :  { %7081 = vmatprep.subr.bf16.mxu1 %v7080_v11 }
  0xff   :  { %6887 = vmatpush1.bf16.msra.mxu0 %v6886_v17 }
 0x100   :  { %6889 = vmatprep.subr.bf16.mxu0 %v6888_v58  ;;  %7083 = vmatpush1.bf16.msra.mxu1 %v7082_v20 }
 0x101   :  { %7085 = vmatprep.subr.bf16.mxu1 %v7084_v26 }
 0x103   :  { %6891 = vmatpush1.bf16.msra.mxu0 %v6890_v19 }
 0x104   :  { %6893 = vmatprep.subr.bf16.mxu0 %v6892_v23  ;;  %7087 = vmatpush1.bf16.msra.mxu1 %v7086_v31  ;;  %v1173_v31 = vlaneseq }
 0x105   :  { %7089 = vmatprep.subr.bf16.mxu1 %v7088_v36 }
 0x106   :  { %v9192_v35 = vshrl.u32 %v1173_v31, 7  ;;  %vm9225_vm6 = vcmp.lt.s32.totalorder %v1173_v31, 256 }
 0x107   :  { %6895 = vmatpush1.bf16.msra.mxu0 %v6894_v27 }
 0x108   :  { %6897 = vmatprep.subr.bf16.mxu0 %v6896_v57 }
 0x14d   :  { %v9072_v0 = vpop.f32.mrb[0].mxu0  ;;  %v9074_v37 = vpop.f32.mrb[0].mxu1 }
 0x14e   :  { %v9076_v38 = vpop.f32.mrb[1].mxu0  ;;  %v9078_v39 = vpop.f32.mrb[1].mxu1 }
 0x151   :  { %v9080_v1 = vpop.f32.mrb[2].mxu0  ;;  %v9082_v40 = vpop.f32.mrb[2].mxu1 }
 0x152   :  { %v9084_v42 = vpop.f32.mrb[3].mxu0  ;;  %v9086_v45 = vpop.f32.mrb[3].mxu1 }
 0x155   :  { %v9088_v43 = vpop.f32.mrb[4].mxu0  ;;  %v9090_v5 = vpop.f32.mrb[4].mxu1 }
 0x156   :  { %v9092_v44 = vpop.f32.mrb[5].mxu0  ;;  %v9094_v46 = vpop.f32.mrb[5].mxu1 }
 0x159   :  { %v9096_v48 = vpop.f32.mrb[6].mxu0  ;;  %v9098_v7 = vpop.f32.mrb[6].mxu1 }
 0x15a   :  { %v9100_v51 = vpop.f32.mrb[7].mxu0  ;;  %v9102_v53 = vpop.f32.mrb[7].mxu1 }
 0x15d   :  { %v9104_v56 = vpop.f32.mrb[8].mxu0  ;;  %v9106_v47 = vpop.f32.mrb[8].mxu1 }
 0x15e   :  { %v9108_v9 = vpop.f32.mrb[9].mxu0  ;;  %v9110_v59 = vpop.f32.mrb[9].mxu1 }
 0x161   :  { %v9112_v60 = vpop.f32.mrb[10].mxu0  ;;  %v9114_v61 = vpop.f32.mrb[10].mxu1 }
 0x162   :  { %v9116_v16 = vpop.f32.mrb[11].mxu0  ;;  %v9118_v3 = vpop.f32.mrb[11].mxu1 }
 0x165   :  { %v9120_v4 = vpop.f32.mrb[12].mxu0  ;;  %v9122_v6 = vpop.f32.mrb[12].mxu1 }
 0x166   :  { %v9124_v33 = vpop.f32.mrb[13].mxu0  ;;  %v9126_v50 = vpop.f32.mrb[13].mxu1 }
 0x169   :  { %v9128_v8 = vpop.f32.mrb[14].mxu0  ;;  %v9130_v10 = vpop.f32.mrb[14].mxu1 }
 0x16a   :  { %v9132_v17 = vpop.f32.mrb[15].mxu0  ;;  %v9134_v41 = vpop.f32.mrb[15].mxu1 }
 0x16d   :  { %v9136_v55 = vpop.f32.mrb[16].mxu0  ;;  %v9138_v62 = vpop.f32.mrb[16].mxu1 }
 0x16e   :  { %v9140_v2 = vpop.f32.mrb[17].mxu0  ;;  %v9142_v58 = vpop.f32.mrb[17].mxu1 }
 0x171   :  { %v9144_v63 = vpop.f32.mrb[18].mxu0  ;;  %v9146_v52 = vpop.f32.mrb[18].mxu1 }
 0x172   :  { %v9148_v49 = vpop.f32.mrb[19].mxu0  ;;  %v9150_v11 = vpop.f32.mrb[19].mxu1 }
 0x175   :  { %v9152_v14 = vpop.f32.mrb[20].mxu0  ;;  %v9154_v15 = vpop.f32.mrb[20].mxu1 }
 0x176   :  { %v9156_v18 = vpop.f32.mrb[21].mxu0  ;;  %v9158_v19 = vpop.f32.mrb[21].mxu1 }
 0x179   :  { %v9160_v20 = vpop.f32.mrb[22].mxu0  ;;  %v9162_v21 = vpop.f32.mrb[22].mxu1 }
 0x17a   :  { %13124 = vst [vmem:[#allocation4_spill] sm:$0xff] %v9160_v20  ;;  %13125 = vst [vmem:[#allocation5_spill] sm:$0xff] %v9162_v21  ;;  %v9164_v22 = vpop.f32.mrb[23].mxu0  ;;  %v9166_v54 = vpop.f32.mrb[23].mxu1 }
 0x17b   :  { %13126 = vst [vmem:[#allocation6_spill] sm:$0xff] %v9164_v22  ;;  %13127 = vst [vmem:[#allocation7_spill] sm:$0xff] %v9166_v54 }
 0x17d   :  { %v9168_v23 = vpop.f32.mrb[24].mxu0  ;;  %v9170_v13 = vpop.f32.mrb[24].mxu1 }
 0x17e   :  { %13128 = vst [vmem:[#allocation8_spill] sm:$0xff] %v9168_v23  ;;  %13129 = vst [vmem:[#allocation9_spill] sm:$0xff] %v9170_v13  ;;  %v9172_v24 = vpop.f32.mrb[25].mxu0  ;;  %v9174_v25 = vpop.f32.mrb[25].mxu1 }
 0x17f   :  { %13130 = vst [vmem:[#allocation10_spill] sm:$0xff] %v9172_v24  ;;  %13131 = vst [vmem:[#allocation11_spill] sm:$0xff] %v9174_v25 }
 0x181   :  { %v9176_v26 = vpop.f32.mrb[26].mxu0  ;;  %v9178_v27 = vpop.f32.mrb[26].mxu1 }
 0x182   :  { %13132 = vst [vmem:[#allocation12_spill] sm:$0xff] %v9176_v26  ;;  %13133 = vst [vmem:[#allocation13_spill] sm:$0xff] %v9178_v27  ;;  %v9180_v28 = vpop.f32.mrb[27].mxu0  ;;  %v9182_v30 = vpop.f32.mrb[27].mxu1 }
 0x183   :  { %13134 = vst [vmem:[#allocation14_spill] sm:$0xff] %v9180_v28  ;;  %13135 = vst [vmem:[#allocation15_spill] sm:$0xff] %v9182_v30  ;;  %v13071_v30 = vsub.s32 0, %v9192_v35 }
 0x185   :  { %v9184_v32 = vpop.f32.mrb[28].mxu0  ;;  %v9186_v34 = vpop.f32.mrb[28].mxu1 }
 0x186   :  { %13136 = vst [vmem:[#allocation16_spill] sm:$0xff] %v9184_v32  ;;  %13137 = vst [vmem:[#allocation17_spill] sm:$0xff] %v9186_v34  ;;  %v9188_v29 = vpop.f32.mrb[29].mxu0  ;;  %v9190_v57 = vpop.f32.mrb[29].mxu1  ;;  %v1171_v34 = vld [vmem:[%s13064_s2] sm:$0x3] }
 0x187   :  { %13138 = vst [vmem:[#allocation18_spill] sm:$0xff] %v9188_v29  ;;  %13139 = vst [vmem:[#allocation19_spill] sm:$0xff] %v9190_v57  ;;  %v1179_v29 = vsub.s32 1, %v9192_v35 }
 0x189   :  { %v9194_v36 = vpop.f32.mrb[30].mxu0  ;;  %v9196_v26 = vpop.f32.mrb[30].mxu1  ;;  %v9217_v23 = vrot.slane %v1171_v34, %v1179_v29 }
 0x18a   :  { %13140 = vst [vmem:[#allocation20_spill] sm:$0xff] %v9194_v36  ;;  %13141 = vst [vmem:[#allocation21_spill] sm:$0xff] %v9196_v26  ;;  %v9198_v27 = vpop.f32.mrb[31].mxu0  ;;  %v9200_v28 = vpop.f32.mrb[31].mxu1  ;;  %v9211_v26 = vrot.slane %v1171_v34, %v13071_v30 }
 0x18b   :  { %13142 = vst [vmem:[#allocation22_spill] sm:$0xff] %v9198_v27  ;;  %13143 = vst [vmem:[#allocation23_spill] sm:$0xff] %v9200_v28 }
 0x18d   :  { %v723_v32 = vpop.f32.mrb[32].mxu0  ;;  %v980_v57 = vpop.f32.mrb[32].mxu1 }
 0x18e   :  { %v1075_v25 = vmax.f32 %v9072_v0, %v723_v32  ;;  %v1077_v36 = vmax.f32 %v9074_v37, %v980_v57  ;;  %v725_v27 = vpop.f32.mrb[33].mxu0  ;;  %v982_v28 = vpop.f32.mrb[33].mxu1 }
 0x18f   :  { %v1076_v24 = vmax.f32 %v9076_v38, %v725_v27  ;;  %v1078_v13 = vmax.f32 %v9078_v39, %v982_v28 }
 0x190   :  { %v1139_v54 = vmax.f32 %v1075_v25, %v1077_v36 }
 0x191   :  { %v1140_v22 = vmax.f32 %v1076_v24, %v1078_v13  ;;  %v729_v21 = vpop.f32.mrb[34].mxu0  ;;  %v986_v0 = vpop.f32.mrb[34].mxu1  ;;  %v1980_v13 = vld [vmem:[%s13063_s3 + $0x780] sm:$0xff] }
 0x192   :  { %v1183_v37 = vadd.f32 %v9211_v26, %v1139_v54  ;;  %v1079_v32 = vmax.f32 %v9080_v1, %v729_v21  ;;  %v1081_v57 = vmax.f32 %v9082_v40, %v986_v0  ;;  %v731_v30 = vpop.f32.mrb[35].mxu0  ;;  %v988_v20 = vpop.f32.mrb[35].mxu1 }
 0x193   :  { %v1184_v38 = vadd.f32 %v9217_v23, %v1140_v22  ;;  %v1080_v39 = vmax.f32 %v9084_v42, %v731_v30  ;;  %v1082_v27 = vmax.f32 %v9086_v45, %v988_v20 }
 0x194   :  { %v1215_v28 = vmax.f32 %v1183_v37, 0.0  ;;  %v1141_v34 = vmax.f32 %v1079_v32, %v1081_v57 }
 0x195   :  { %v1216_v25 = vmax.f32 %v1184_v38, 0.0  ;;  %v1142_v54 = vmax.f32 %v1080_v39, %v1082_v27  ;;  %v735_v24 = vpop.f32.mrb[36].mxu0  ;;  %v992_v1 = vpop.f32.mrb[36].mxu1 }
 0x196   :  { %1247 = vst [vmem:[#allocation2] sm:$0xff] %v1215_v28  ;;  %v1185_v40 = vadd.f32 %v9211_v26, %v1141_v34  ;;  %v1083_v21 = vmax.f32 %v9088_v43, %v735_v24  ;;  %v1085_v22 = vmax.f32 %v9090_v5, %v992_v1  ;;  %v737_v42 = vpop.f32.mrb[37].mxu0  ;;  %v994_v30 = vpop.f32.mrb[37].mxu1  ;;  %v9241_v5 = vld [vmem:[%s13063_s3 + $0x400] sm:$0xff]  ;;  %v9254_v34 = vld [vmem:[%s13063_s3 + $0x410] sm:$0xff]  ;;  %v9268_v24 = vld [vmem:[%s13063_s3 + $0x448] sm:$0xff] }
 0x197   :  { %1248 = vst [vmem:[#allocation2 + $0x8] sm:$0xff] %v1216_v25  ;;  %v1186_v45 = vadd.f32 %v9217_v23, %v1142_v54  ;;  %v1084_v20 = vmax.f32 %v9092_v44, %v737_v42  ;;  %v1086_v31 = vmax.f32 %v9094_v46, %v994_v30  ;;  %v9249_v28 = vld [vmem:[%s13063_s3 + $0x420] sm:$0xff]  ;;  %v9259_v25 = vld [vmem:[%s13063_s3 + $0x430] sm:$0xff]  ;;  %v9273_v1 = vld [vmem:[%s13063_s3 + $0x468] sm:$0xff] }
 0x198   :  { %1283 = vst.msk [vmem:[#allocation2] ss:$8 sm:$0x3] %vm9225_vm6, %v8782_v12  ;;  %v1217_v36 = vmax.f32 %v1185_v40, 0.0  ;;  %v1143_v0 = vmax.f32 %v1083_v21, %v1085_v22  ;;  %v9278_v40 = vld [vmem:[%s13063_s3 + $0x458] sm:$0xff]  ;;  %v9289_v22 = vld [vmem:[%s13063_s3 + $0x440] sm:$0xff] }
 0x199   :  { %v1218_v37 = vmax.f32 %v1186_v45, 0.0  ;;  %v1144_v32 = vmax.f32 %v1084_v20, %v1086_v31  ;;  %v741_v43 = vpop.f32.mrb[38].mxu0  ;;  %v998_v57 = vpop.f32.mrb[38].mxu1  ;;  %v9294_v42 = vld [vmem:[%s13063_s3 + $0x460] sm:$0xff] }
 0x19a   :  { %1249 = vst [vmem:[#allocation2 + $0x10] sm:$0xff] %v1217_v36  ;;  %v1187_v44 = vadd.f32 %v9211_v26, %v1143_v0  ;;  %v1087_v46 = vmax.f32 %v9096_v48, %v741_v43  ;;  %v1089_v38 = vmax.f32 %v9098_v7, %v998_v57  ;;  %v743_v39 = vpop.f32.mrb[39].mxu0  ;;  %v1000_v27 = vpop.f32.mrb[39].mxu1  ;;  %v6898_v36 = vpack.c.bf16 %v9249_v28, %v9241_v5  ;;  %v9313_v43 = vld [vmem:[%s13063_s3 + $0x488] sm:$0xff]  ;;  %v9328_v28 = vld [vmem:[%s13063_s3 + $0x498] sm:$0xff] }
 0x19b   :  { %1306 = vst [vmem:[#allocation2 + $0x10] sm:$0x80] %v8782_v12  ;;  %1250 = vst [vmem:[#allocation2 + $0x18] sm:$0xff] %v1218_v37  ;;  %v1188_v48 = vadd.f32 %v9217_v23, %v1144_v32  ;;  %v1088_v7 = vmax.f32 %v9100_v51, %v743_v39  ;;  %v1090_v54 = vmax.f32 %v9102_v53, %v1000_v27  ;;  %v9284_v53 = vld [vmem:[%s13063_s3 + $0x478] sm:$0xff]  ;;  %v9303_v37 = vld [vmem:[%s13063_s3 + $0x450] sm:$0xff] }
 0x19c   :  { %1307 = vst [vmem:[#allocation2 + $0x18] sm:$0x80] %v8782_v12  ;;  %v1219_v51 = vmax.f32 %v1187_v44, 0.0  ;;  %v1145_v21 = vmax.f32 %v1087_v46, %v1089_v38  ;;  %v7090_v0 = vpack.c.bf16 %v9259_v25, %v9254_v34  ;;  %v9308_v32 = vld [vmem:[%s13063_s3 + $0x470] sm:$0xff]  ;;  %v6900_v39 = vpack.c.bf16 %v9273_v1, %v9268_v24  ;;  %v9323_v27 = vld [vmem:[%s13063_s3 + $0x4a8] sm:$0xff] }
 0x19d   :  { %v1220_v30 = vmax.f32 %v1188_v48, 0.0  ;;  %v1146_v45 = vmax.f32 %v1088_v7, %v1090_v54  ;;  %v747_v20 = vpop.f32.mrb[40].mxu0  ;;  %v1004_v31 = vpop.f32.mrb[40].mxu1  ;;  %v7092_v54 = vpack.c.bf16 %v9284_v53, %v9278_v40  ;;  %v9355_v40 = vld [vmem:[%s13063_s3 + $0x4a0] sm:$0xff] }
 0x19e   :  { %1251 = vst [vmem:[#allocation2 + $0x30] sm:$0xff] %v1219_v51  ;;  %v1189_v57 = vadd.f32 %v9211_v26, %v1145_v21  ;;  %v1091_v5 = vmax.f32 %v9104_v56, %v747_v20  ;;  %v1093_v44 = vmax.f32 %v9106_v47, %v1004_v31  ;;  %v749_v46 = vpop.f32.mrb[41].mxu0  ;;  %v1006_v38 = vpop.f32.mrb[41].mxu1  ;;  %v9333_v56 = vld [vmem:[%s13063_s3 + $0x4b8] sm:$0xff]  ;;  %v6902_v51 = vpack.c.bf16 %v9294_v42, %v9289_v22  ;;  %v9364_v20 = vld [vmem:[%s13063_s3 + $0x490] sm:$0xff] }
 0x19f   :  { %1252 = vst [vmem:[#allocation2 + $0x38] sm:$0xff] %v1220_v30  ;;  %v1190_v47 = vadd.f32 %v9217_v23, %v1146_v45  ;;  %v1092_v34 = vmax.f32 %v9108_v9, %v749_v46  ;;  %v1094_v25 = vmax.f32 %v9110_v59, %v1006_v38  ;;  %v1339_v48 = vld [vmem:[#allocation2 + $0x8] sm:$0xff]  ;;  %v1338_v7 = vld [vmem:[#allocation2] sm:$0xff]  ;;  %v7094_v9 = vpack.c.bf16 %v9308_v32, %v9303_v37  ;;  %v9369_v31 = vld [vmem:[%s13063_s3 + $0x4b0] sm:$0xff] }
 0x1a0   :  { %1286 = vst.msk [vmem:[#allocation2 + $0x30] ss:$8 sm:$0x3] %vm9225_vm6, %v8782_v12  ;;  %v1221_v24 = vmax.f32 %v1189_v57, 0.0  ;;  %v1147_v1 = vmax.f32 %v1091_v5, %v1093_v44  ;;  %2188 = vmatprep.mubr.f32.mxu0 %v1339_v48  ;;  %2671 = vmatprep.mubr.f32.mxu1 %v1339_v48  ;;  %v9350_v59 = vld [vmem:[%s13063_s3 + $0x480] sm:$0xff]  ;;  %v6904_v22 = vpack.c.bf16 %v9323_v27, %v9313_v43  ;;  %v9374_v37 = vld [vmem:[%s13063_s3 + $0x4c8] sm:$0xff] }
 0x1a1   :  { %v1222_v21 = vmax.f32 %v1190_v47, 0.0  ;;  %v1148_v53 = vmax.f32 %v1092_v34, %v1094_v25  ;;  %v753_v30 = vpop.f32.mrb[42].mxu0  ;;  %v1010_v45 = vpop.f32.mrb[42].mxu1  ;;  %2189 = vmatmul.mubr.f32.vlgmr.msra.gmra.mrb[64].mxu0 %v1338_v7  ;;  %2672 = vmatmul.mubr.f32.vlgmr.msra.gmra.mrb[64].mxu1 %v1338_v7  ;;  %v7096_v42 = vpack.c.bf16 %v9333_v56, %v9328_v28  ;;  %v9382_v46 = vld [vmem:[%s13063_s3 + $0x4e8] sm:$0xff]  ;;  %v9387_v38 = vld [vmem:[%s13063_s3 + $0x4d8] sm:$0xff]  ;;  %v6906_v34 = vpack.c.bf16 %v9355_v40, %v9350_v59  ;;  %v9428_v59 = vld [vmem:[%s13063_s3 + $0x4d0] sm:$0xff] }
 0x1a2   :  { %1253 = vst [vmem:[#allocation2 + $0x40] sm:$0xff] %v1221_v24  ;;  %v1191_v32 = vadd.f32 %v9211_v26, %v1147_v1  ;;  %v1095_v43 = vmax.f32 %v9112_v60, %v753_v30  ;;  %v1097_v57 = vmax.f32 %v9114_v61, %v1010_v45  ;;  %6899 = vmatpush1.bf16.msra.mxu0 %v6898_v36  ;;  %v755_v5 = vpop.f32.mrb[43].mxu0  ;;  %v1012_v44 = vpop.f32.mrb[43].mxu1  ;;  %v9392_v60 = vld [vmem:[%s13063_s3 + $0x4f8] sm:$0xff]  ;;  %v9403_v47 = vld [vmem:[#allocation2 + $0x10] sm:$0xff] }
 0x1a3   :  { %7091 = vmatpush1.bf16.msra.mxu1 %v7090_v0  ;;  %1310 = vst [vmem:[#allocation2 + $0x40] sm:$0x80] %v8782_v12  ;;  %1254 = vst [vmem:[#allocation2 + $0x48] sm:$0xff] %v1222_v21  ;;  %v1192_v61 = vadd.f32 %v9217_v23, %v1148_v53  ;;  %v1096_v36 = vmax.f32 %v9116_v16, %v755_v5  ;;  %v1098_v0 = vmax.f32 %v9118_v3, %v1012_v44  ;;  %v9398_v27 = vld [vmem:[#allocation2 + $0x18] sm:$0xff]  ;;  %v9412_v3 = vld [vmem:[%s13063_s3 + $0x4c0] sm:$0xff] }
 0x1a4   :  { %6901 = vmatprep.subr.bf16.mxu0 %v6900_v39  ;;  %7093 = vmatprep.subr.bf16.mxu1 %v7092_v54  ;;  %1311 = vst [vmem:[#allocation2 + $0x48] sm:$0x80] %v8782_v12  ;;  %v1223_v28 = vmax.f32 %v1191_v32, 0.0  ;;  %v1149_v56 = vmax.f32 %v1095_v43, %v1097_v57  ;;  %v7098_v16 = vpack.c.bf16 %v9369_v31, %v9364_v20  ;;  %v9417_v39 = vld [vmem:[%s13063_s3 + $0x4e0] sm:$0xff]  ;;  %v9433_v40 = vld [vmem:[%s13063_s3 + $0x4f0] sm:$0xff]  ;;  %v9438_v21 = vld [vmem:[%s13063_s3 + $0x508] sm:$0xff] }
 0x1a5   :  { %2194 = vmatprep.mubr.f32.mxu0 %v9398_v27  ;;  %2677 = vmatprep.mubr.f32.mxu1 %v9398_v27  ;;  %v1224_v25 = vmax.f32 %v1192_v61, 0.0  ;;  %v1150_v48 = vmax.f32 %v1096_v36, %v1098_v0  ;;  %v759_v7 = vpop.f32.mrb[44].mxu0  ;;  %v1016_v54 = vpop.f32.mrb[44].mxu1  ;;  %v6908_v24 = vpack.c.bf16 %v9382_v46, %v9374_v37  ;;  %v7100_v1 = vpack.c.bf16 %v9392_v60, %v9387_v38  ;;  %v9446_v37 = vld [vmem:[%s13063_s3 + $0x528] sm:$0xff]  ;;  %v9451_v32 = vld [vmem:[%s13063_s3 + $0x518] sm:$0xff] }
 0x1a6   :  { %2195 = vmatmul.mubr.f32.gmra.mrb[66].mxu0 %v9403_v47  ;;  %2678 = vmatmul.mubr.f32.gmra.mrb[66].mxu1 %v9403_v47  ;;  %1255 = vst [vmem:[#allocation2 + $0x60] sm:$0xff] %v1223_v28  ;;  %v1193_v53 = vadd.f32 %v9211_v26, %v1149_v56  ;;  %v1099_v30 = vmax.f32 %v9120_v4, %v759_v7  ;;  %v761_v20 = vpop.f32.mrb[45].mxu0  ;;  %v1018_v31 = vpop.f32.mrb[45].mxu1  ;;  %v9456_v4 = vld [vmem:[%s13063_s3 + $0x538] sm:$0xff]  ;;  %v9485_v28 = vld [vmem:[%s13063_s3 + $0x510] sm:$0xff] }
 0x1a7   :  { %v1101_v45 = vmax.f32 %v9122_v6, %v1016_v54  ;;  %6903 = vmatpush1.bf16.msra.mxu0 %v6902_v51  ;;  %7095 = vmatpush1.bf16.msra.mxu1 %v7094_v9  ;;  %1256 = vst [vmem:[#allocation2 + $0x68] sm:$0xff] %v1224_v25  ;;  %v1194_v6 = vadd.f32 %v9217_v23, %v1150_v48  ;;  %v1343_v43 = vld [vmem:[#allocation2 + $0x38] sm:$0xff]  ;;  %v1342_v57 = vld [vmem:[#allocation2 + $0x30] sm:$0xff] }
 0x1a8   :  { %v1100_v51 = vmax.f32 %v9124_v33, %v761_v20  ;;  %v1102_v9 = vmax.f32 %v9126_v50, %v1018_v31  ;;  %6905 = vmatprep.subr.bf16.mxu0 %v6904_v22  ;;  %7097 = vmatprep.subr.bf16.mxu1 %v7096_v42  ;;  %1289 = vst.msk [vmem:[#allocation2 + $0x60] ss:$8 sm:$0x3] %vm9225_vm6, %v8782_v12  ;;  %v1225_v5 = vmax.f32 %v1193_v53, 0.0  ;;  %v9471_v50 = vld [vmem:[%s13063_s3 + $0x500] sm:$0xff]  ;;  %v9490_v56 = vld [vmem:[%s13063_s3 + $0x530] sm:$0xff] }
 0x1a9   :  { %v1151_v44 = vmax.f32 %v1099_v30, %v1101_v45  ;;  %2200 = vmatprep.mubr.f32.mxu0 %v1343_v43  ;;  %2683 = vmatprep.mubr.f32.mxu1 %v1343_v43  ;;  %v6910_v46 = vpack.c.bf16 %v9417_v39, %v9412_v3  ;;  %v7102_v33 = vpack.c.bf16 %v9433_v40, %v9428_v59  ;;  %v9476_v22 = vld [vmem:[%s13063_s3 + $0x520] sm:$0xff]  ;;  %v1226_v42 = vmax.f32 %v1194_v6, 0.0  ;;  %v765_v60 = vpop.f32.mrb[46].mxu0  ;;  %v1022_v61 = vpop.f32.mrb[46].mxu1  ;;  %v9495_v3 = vld [vmem:[%s13063_s3 + $0x548] sm:$0xff]  ;;  %v9508_v40 = vld [vmem:[%s13063_s3 + $0x558] sm:$0xff] }
 0x1aa   :  { %v1152_v38 = vmax.f32 %v1100_v51, %v1102_v9  ;;  %2201 = vmatmul.mubr.f32.gmra.mrb[68].mxu0 %v1342_v57  ;;  %2684 = vmatmul.mubr.f32.gmra.mrb[68].mxu1 %v1342_v57  ;;  %v6912_v36 = vpack.c.bf16 %v9446_v37, %v9438_v21  ;;  %v7104_v0 = vpack.c.bf16 %v9456_v4, %v9451_v32  ;;  %v767_v7 = vpop.f32.mrb[47].mxu0  ;;  %v1024_v54 = vpop.f32.mrb[47].mxu1  ;;  %v9503_v59 = vld [vmem:[%s13063_s3 + $0x568] sm:$0xff]  ;;  %v9524_v45 = vld [vmem:[#allocation2 + $0x40] sm:$0xff]  ;;  %v9549_v6 = vld [vmem:[%s13063_s3 + $0x550] sm:$0xff] }
 0x1ab   :  { %1257 = vst [vmem:[#allocation2 + $0x70] sm:$0xff] %v1225_v5  ;;  %v1195_v39 = vadd.f32 %v9211_v26, %v1151_v44  ;;  %v1103_v25 = vmax.f32 %v9128_v8, %v765_v60  ;;  %v1105_v48 = vmax.f32 %v9130_v10, %v1022_v61  ;;  %6907 = vmatpush1.bf16.msra.mxu0 %v6906_v34  ;;  %v9513_v8 = vld [vmem:[%s13063_s3 + $0x578] sm:$0xff]  ;;  %1258 = vst [vmem:[#allocation2 + $0x78] sm:$0xff] %v1226_v42  ;;  %v9519_v21 = vld [vmem:[#allocation2 + $0x48] sm:$0xff] }
 0x1ac   :  { %7099 = vmatpush1.bf16.msra.mxu1 %v7098_v16  ;;  %1314 = vst [vmem:[#allocation2 + $0x70] sm:$0x80] %v8782_v12  ;;  %v1196_v10 = vadd.f32 %v9217_v23, %v1152_v38  ;;  %v1104_v34 = vmax.f32 %v9132_v17, %v767_v7  ;;  %v1106_v16 = vmax.f32 %v9134_v41, %v1024_v54  ;;  %1315 = vst [vmem:[#allocation2 + $0x78] sm:$0x80] %v8782_v12  ;;  %v9533_v41 = vld [vmem:[%s13063_s3 + $0x540] sm:$0xff]  ;;  %v9554_v51 = vld [vmem:[%s13063_s3 + $0x570] sm:$0xff] }
 0x1ad   :  { %6909 = vmatprep.subr.bf16.mxu0 %v6908_v24  ;;  %7101 = vmatprep.subr.bf16.mxu1 %v7100_v1  ;;  %v1227_v53 = vmax.f32 %v1195_v39, 0.0  ;;  %v1153_v30 = vmax.f32 %v1103_v25, %v1105_v48  ;;  %v6914_v20 = vpack.c.bf16 %v9476_v22, %v9471_v50  ;;  %v7106_v17 = vpack.c.bf16 %v9490_v56, %v9485_v28  ;;  %v9538_v12 = vld [vmem:[%s13063_s3 + $0x560] sm:$0xff]  ;;  %v771_v31 = vpop.f32.mrb[48].mxu0  ;;  %v1028_v37 = vpop.f32.mrb[48].mxu1  ;;  %v9559_v9 = vld [vmem:[%s13063_s3 + $0x588] sm:$0xff]  ;;  %v9572_v42 = vld [vmem:[%s13063_s3 + $0x598] sm:$0xff] }
 0x1ae   :  { %2206 = vmatprep.mubr.f32.mxu0 %v9519_v21  ;;  %2689 = vmatprep.mubr.f32.mxu1 %v9519_v21  ;;  %v1228_v24 = vmax.f32 %v1196_v10, 0.0  ;;  %v1154_v1 = vmax.f32 %v1104_v34, %v1106_v16  ;;  %v6916_v32 = vpack.c.bf16 %v9503_v59, %v9495_v3  ;;  %v7108_v4 = vpack.c.bf16 %v9513_v8, %v9508_v40  ;;  %v773_v44 = vpop.f32.mrb[49].mxu0  ;;  %v1030_v50 = vpop.f32.mrb[49].mxu1  ;;  %v9567_v22 = vld [vmem:[%s13063_s3 + $0x5a8] sm:$0xff]  ;;  %v9582_v61 = vld [vmem:[#allocation3 + $0x100] sm:$0xff]  ;;  %v9608_v59 = vld [vmem:[%s13063_s3 + $0x590] sm:$0xff] }
 0x1af   :  { %2207 = vmatmul.mubr.f32.gmra.mrb[70].mxu0 %v9524_v45  ;;  %2690 = vmatmul.mubr.f32.gmra.mrb[70].mxu1 %v9524_v45  ;;  %1259 = vst [vmem:[#allocation2 + $0x90] sm:$0xff] %v1227_v53  ;;  %v1197_v43 = vadd.f32 %v9211_v26, %v1153_v30  ;;  %v1107_v57 = vmax.f32 %v9136_v55, %v771_v31  ;;  %v9577_v55 = vld [vmem:[%s13063_s3 + $0x5b8] sm:$0xff]  ;;  %v1347_v38 = vld [vmem:[#allocation2 + $0x68] sm:$0xff]  ;;  %v1346_v60 = vld [vmem:[#allocation2 + $0x60] sm:$0xff] }
 0x1b0   :  { %v1109_v5 = vmax.f32 %v9138_v62, %v1028_v37  ;;  %6911 = vmatpush1.bf16.msra.mxu0 %v6910_v46  ;;  %7103 = vmatpush1.bf16.msra.mxu1 %v7102_v33  ;;  %1260 = vst [vmem:[#allocation2 + $0x98] sm:$0xff] %v1228_v24  ;;  %v1198_v62 = vadd.f32 %v9217_v23, %v1154_v1  ;;  %v9613_v40 = vld [vmem:[%s13063_s3 + $0x5b0] sm:$0xff]  ;;  %v9618_v8 = vld [vmem:[%s13063_s3 + $0x5c8] sm:$0xff] }
 0x1b1   :  { %v1108_v46 = vmax.f32 %v9140_v2, %v773_v44  ;;  %v1110_v33 = vmax.f32 %v9142_v58, %v1030_v50  ;;  %6913 = vmatprep.subr.bf16.mxu0 %v6912_v36  ;;  %7105 = vmatprep.subr.bf16.mxu1 %v7104_v0  ;;  %1292 = vst.msk [vmem:[#allocation2 + $0x90] ss:$8 sm:$0x3] %vm9225_vm6, %v9582_v61  ;;  %v1229_v28 = vmax.f32 %v1197_v43, 0.0  ;;  %v9594_v58 = vld [vmem:[%s13063_s3 + $0x580] sm:$0xff]  ;;  %v777_v25 = vpop.f32.mrb[50].mxu0 }
 0x1b2   :  { %v1155_v56 = vmax.f32 %v1107_v57, %v1109_v5  ;;  %2212 = vmatprep.mubr.f32.mxu0 %v1347_v38  ;;  %2695 = vmatprep.mubr.f32.mxu1 %v1347_v38  ;;  %v6918_v3 = vpack.c.bf16 %v9538_v12, %v9533_v41  ;;  %v7110_v2 = vpack.c.bf16 %v9554_v51, %v9549_v6  ;;  %v9599_v36 = vld [vmem:[%s13063_s3 + $0x5a0] sm:$0xff]  ;;  %v1230_v0 = vmax.f32 %v1198_v62, 0.0  ;;  %v1034_v48 = vpop.f32.mrb[50].mxu1  ;;  %v779_v53 = vpop.f32.mrb[51].mxu0  ;;  %v9626_v41 = vld [vmem:[%s13063_s3 + $0x5e8] sm:$0xff]  ;;  %v9631_v12 = vld [vmem:[%s13063_s3 + $0x5d8] sm:$0xff] }
 0x1b3   :  { %v1156_v39 = vmax.f32 %v1108_v46, %v1110_v33  ;;  %2213 = vmatmul.mubr.f32.gmra.mrb[72].mxu0 %v1346_v60  ;;  %2696 = vmatmul.mubr.f32.gmra.mrb[72].mxu1 %v1346_v60  ;;  %v6920_v7 = vpack.c.bf16 %v9567_v22, %v9559_v9  ;;  %v7112_v54 = vpack.c.bf16 %v9577_v55, %v9572_v42  ;;  %v1036_v30 = vpop.f32.mrb[51].mxu1  ;;  %v9642_v24 = vld [vmem:[#allocation2 + $0x78] sm:$0xff]  ;;  %v9647_v37 = vld [vmem:[#allocation2 + $0x70] sm:$0xff]  ;;  %v9682_v22 = vld [vmem:[%s13063_s3 + $0x608] sm:$0xff] }
 0x1b4   :  { %1261 = vst [vmem:[#allocation2 + $0xa0] sm:$0xff] %v1229_v28  ;;  %v1199_v10 = vadd.f32 %v9211_v26, %v1155_v56  ;;  %v1111_v34 = vmax.f32 %v9144_v63, %v777_v25  ;;  %v1113_v16 = vmax.f32 %v9146_v52, %v1034_v48  ;;  %6915 = vmatpush1.bf16.msra.mxu0 %v6914_v20  ;;  %v9636_v63 = vld [vmem:[%s13063_s3 + $0x5f8] sm:$0xff]  ;;  %1262 = vst [vmem:[#allocation2 + $0xa8] sm:$0xff] %v1230_v0  ;;  %v9672_v44 = vld [vmem:[%s13063_s3 + $0x5d0] sm:$0xff] }
 0x1b5   :  { %7107 = vmatpush1.bf16.msra.mxu1 %v7106_v17  ;;  %1318 = vst [vmem:[#allocation2 + $0xa0] sm:$0x80] %v9582_v61  ;;  %v1200_v52 = vadd.f32 %v9217_v23, %v1156_v39  ;;  %v1112_v20 = vmax.f32 %v9148_v49, %v779_v53  ;;  %v1114_v17 = vmax.f32 %v9150_v11, %v1036_v30  ;;  %1319 = vst [vmem:[#allocation2 + $0xa8] sm:$0x80] %v9582_v61  ;;  %v9656_v11 = vld [vmem:[%s13063_s3 + $0x5c0] sm:$0xff]  ;;  %v783_v9 = vpop.f32.mrb[52].mxu0 }
 0x1b6   :  { %6917 = vmatprep.subr.bf16.mxu0 %v6916_v32  ;;  %7109 = vmatprep.subr.bf16.mxu1 %v7108_v4  ;;  %v1231_v1 = vmax.f32 %v1199_v10, 0.0  ;;  %v1157_v31 = vmax.f32 %v1111_v34, %v1113_v16  ;;  %v6922_v6 = vpack.c.bf16 %v9599_v36, %v9594_v58  ;;  %v7114_v49 = vpack.c.bf16 %v9613_v40, %v9608_v59  ;;  %v9661_v32 = vld [vmem:[%s13063_s3 + $0x5e0] sm:$0xff]  ;;  %v1040_v43 = vpop.f32.mrb[52].mxu1  ;;  %v9677_v50 = vld [vmem:[%s13063_s3 + $0x5f0] sm:$0xff]  ;;  %v785_v46 = vpop.f32.mrb[53].mxu0  ;;  %v9690_v38 = vld [vmem:[%s13063_s3 + $0x628] sm:$0xff] }
 0x1b7   :  { %2218 = vmatprep.mubr.f32.mxu0 %v9642_v24  ;;  %2701 = vmatprep.mubr.f32.mxu1 %v9642_v24  ;;  %v1232_v4 = vmax.f32 %v1200_v52, 0.0  ;;  %v1158_v51 = vmax.f32 %v1112_v20, %v1114_v17  ;;  %v6924_v57 = vpack.c.bf16 %v9626_v41, %v9618_v8  ;;  %v7116_v5 = vpack.c.bf16 %v9636_v63, %v9631_v12  ;;  %v1042_v33 = vpop.f32.mrb[53].mxu1  ;;  %v9695_v60 = vld [vmem:[%s13063_s3 + $0x618] sm:$0xff]  ;;  %v9720_v39 = vld [vmem:[%s13063_s3 + $0x620] sm:$0xff]  ;;  %v9729_v8 = vld [vmem:[%s13063_s3 + $0x610] sm:$0xff] }
 0x1b8   :  { %2219 = vmatmul.mubr.f32.gmra.mrb[74].mxu0 %v9647_v37  ;;  %2702 = vmatmul.mubr.f32.gmra.mrb[74].mxu1 %v9647_v37  ;;  %1263 = vst [vmem:[#allocation2 + $0xc0] sm:$0xff] %v1231_v1  ;;  %v1201_v42 = vadd.f32 %v9211_v26, %v1157_v31  ;;  %v1115_v55 = vmax.f32 %v9152_v14, %v783_v9  ;;  %v9700_v14 = vld [vmem:[%s13063_s3 + $0x638] sm:$0xff]  ;;  %v9734_v10 = vld [vmem:[%s13063_s3 + $0x630] sm:$0xff]  ;;  %v9739_v34 = vld [vmem:[%s13063_s3 + $0x648] sm:$0xff] }
 0x1b9   :  { %v1117_v62 = vmax.f32 %v9154_v15, %v1040_v43  ;;  %6919 = vmatpush1.bf16.msra.mxu0 %v6918_v3  ;;  %7111 = vmatpush1.bf16.msra.mxu1 %v7110_v2  ;;  %1264 = vst [vmem:[#allocation2 + $0xc8] sm:$0xff] %v1232_v4  ;;  %v1202_v15 = vadd.f32 %v9217_v23, %v1158_v51  ;;  %v1351_v3 = vld [vmem:[#allocation2 + $0x98] sm:$0xff]  ;;  %v1350_v2 = vld [vmem:[#allocation2 + $0x90] sm:$0xff]  ;;  %v9747_v20 = vld [vmem:[%s13063_s3 + $0x668] sm:$0xff] }
 0x1ba   :  { %v1116_v28 = vmax.f32 %v9156_v18, %v785_v46  ;;  %v1118_v56 = vmax.f32 %v9158_v19, %v1042_v33  ;;  %6921 = vmatprep.subr.bf16.mxu0 %v6920_v7  ;;  %7113 = vmatprep.subr.bf16.mxu1 %v7112_v54  ;;  %1295 = vst.msk [vmem:[#allocation2 + $0xc0] ss:$8 sm:$0x3] %vm9225_vm6, %v9582_v61  ;;  %v1233_v58 = vmax.f32 %v1201_v42, 0.0  ;;  %v9715_v19 = vld [vmem:[%s13063_s3 + $0x600] sm:$0xff]  ;;  %v789_v7 = vpop.f32.mrb[54].mxu0 }
 0x1bb   :  { %v1159_v36 = vmax.f32 %v1115_v55, %v1117_v62  ;;  %2224 = vmatprep.mubr.f32.mxu0 %v1351_v3  ;;  %2707 = vmatprep.mubr.f32.mxu1 %v1351_v3  ;;  %v6926_v0 = vpack.c.bf16 %v9661_v32, %v9656_v11  ;;  %v7118_v18 = vpack.c.bf16 %v9677_v50, %v9672_v44  ;;  %v1234_v25 = vmax.f32 %v1202_v15, 0.0  ;;  %v1046_v54 = vpop.f32.mrb[54].mxu1  ;;  %v13146_v53 = vld [vmem:[#allocation4_spill] sm:$0xff]  ;;  %v13147_v41 = vld [vmem:[#allocation5_spill] sm:$0xff]  ;;  %v791_v63 = vpop.f32.mrb[55].mxu0  ;;  %v13149_v11 = vld [vmem:[#allocation7_spill] sm:$0xff] }
 0x1bc   :  { %v1160_v48 = vmax.f32 %v1116_v28, %v1118_v56  ;;  %2225 = vmatmul.mubr.f32.gmra.mrb[76].mxu0 %v1350_v2  ;;  %2708 = vmatmul.mubr.f32.gmra.mrb[76].mxu1 %v1350_v2  ;;  %v6928_v59 = vpack.c.bf16 %v9690_v38, %v9682_v22  ;;  %v7120_v40 = vpack.c.bf16 %v9700_v14, %v9695_v60  ;;  %v1048_v52 = vpop.f32.mrb[55].mxu1  ;;  %v9752_v17 = vld [vmem:[%s13063_s3 + $0x658] sm:$0xff]  ;;  %v9763_v4 = vld [vmem:[#allocation2 + $0xa8] sm:$0xff]  ;;  %v9768_v43 = vld [vmem:[#allocation2 + $0xa0] sm:$0xff] }
 0x1bd   :  { %1265 = vst [vmem:[#allocation2 + $0xd0] sm:$0xff] %v1233_v58  ;;  %v1203_v16 = vadd.f32 %v9211_v26, %v1159_v36  ;;  %v1119_v30 = vmax.f32 %v13146_v53, %v789_v7  ;;  %v1121_v12 = vmax.f32 %v13147_v41, %v1046_v54  ;;  %6923 = vmatpush1.bf16.msra.mxu0 %v6922_v6  ;;  %v9757_v1 = vld [vmem:[%s13063_s3 + $0x678] sm:$0xff]  ;;  %1266 = vst [vmem:[#allocation2 + $0xd8] sm:$0xff] %v1234_v25  ;;  %v13148_v6 = vld [vmem:[#allocation6_spill] sm:$0xff]  ;;  %v795_v55 = vpop.f32.mrb[56].mxu0  ;;  %v1052_v62 = vpop.f32.mrb[56].mxu1 }
 0x1be   :  { %7115 = vmatpush1.bf16.msra.mxu1 %v7114_v49  ;;  %1322 = vst [vmem:[#allocation2 + $0xd0] sm:$0x80] %v9582_v61  ;;  %v1204_v31 = vadd.f32 %v9217_v23, %v1160_v48  ;;  %v1120_v49 = vmax.f32 %v13148_v6, %v791_v63  ;;  %v1122_v32 = vmax.f32 %v13149_v11, %v1048_v52  ;;  %1323 = vst [vmem:[#allocation2 + $0xd8] sm:$0x80] %v9582_v61  ;;  %v9793_v38 = vld [vmem:[%s13063_s3 + $0x650] sm:$0xff]  ;;  %v9803_v14 = vld [vmem:[%s13063_s3 + $0x688] sm:$0xff] }
 0x1bf   :  { %6925 = vmatprep.subr.bf16.mxu0 %v6924_v57  ;;  %7117 = vmatprep.subr.bf16.mxu1 %v7116_v5  ;;  %v1235_v51 = vmax.f32 %v1203_v16, 0.0  ;;  %v1161_v9 = vmax.f32 %v1119_v30, %v1121_v12  ;;  %v6930_v44 = vpack.c.bf16 %v9720_v39, %v9715_v19  ;;  %v7122_v50 = vpack.c.bf16 %v9734_v10, %v9729_v8  ;;  %v9777_v57 = vld [vmem:[%s13063_s3 + $0x640] sm:$0xff]  ;;  %v9798_v60 = vld [vmem:[%s13063_s3 + $0x670] sm:$0xff]  ;;  %v13151_v3 = vld [vmem:[#allocation9_spill] sm:$0xff]  ;;  %v797_v58 = vpop.f32.mrb[57].mxu0  ;;  %v1054_v36 = vpop.f32.mrb[57].mxu1 }
 0x1c0   :  { %2230 = vmatprep.mubr.f32.mxu0 %v9763_v4  ;;  %2713 = vmatprep.mubr.f32.mxu1 %v9763_v4  ;;  %v9782_v5 = vld [vmem:[%s13063_s3 + $0x660] sm:$0xff]  ;;  %v1236_v22 = vmax.f32 %v1204_v31, 0.0  ;;  %v1162_v42 = vmax.f32 %v1120_v49, %v1122_v32  ;;  %v6932_v46 = vpack.c.bf16 %v9747_v20, %v9739_v34  ;;  %v7124_v33 = vpack.c.bf16 %v9757_v1, %v9752_v17  ;;  %v13150_v28 = vld [vmem:[#allocation8_spill] sm:$0xff]  ;;  %v9811_v19 = vld [vmem:[%s13063_s3 + $0x6a8] sm:$0xff] }
 0x1c1   :  { %2231 = vmatmul.mubr.f32.gmra.mrb[78].mxu0 %v9768_v43  ;;  %2714 = vmatmul.mubr.f32.gmra.mrb[78].mxu1 %v9768_v43  ;;  %1267 = vst [vmem:[#allocation2 + $0xf0] sm:$0xff] %v1235_v51  ;;  %v1205_v15 = vadd.f32 %v9211_v26, %v1161_v9  ;;  %v1123_v56 = vmax.f32 %v13150_v28, %v795_v55  ;;  %v9816_v39 = vld [vmem:[%s13063_s3 + $0x698] sm:$0xff]  ;;  %v13153_v7 = vld [vmem:[#allocation11_spill] sm:$0xff]  ;;  %v1354_v10 = vld [vmem:[#allocation2 + $0xc0] sm:$0xff]  ;;  %v801_v63 = vpop.f32.mrb[58].mxu0  ;;  %v1058_v52 = vpop.f32.mrb[58].mxu1 }
 0x1c2   :  { %v1125_v2 = vmax.f32 %v13151_v3, %v1052_v62  ;;  %6927 = vmatpush1.bf16.msra.mxu0 %v6926_v0  ;;  %7119 = vmatpush1.bf16.msra.mxu1 %v7118_v18  ;;  %v9821_v25 = vld [vmem:[%s13063_s3 + $0x6b8] sm:$0xff]  ;;  %1268 = vst [vmem:[#allocation2 + $0xf8] sm:$0xff] %v1236_v22  ;;  %v1206_v0 = vadd.f32 %v9217_v23, %v1162_v42  ;;  %v13152_v18 = vld [vmem:[#allocation10_spill] sm:$0xff]  ;;  %v1355_v8 = vld [vmem:[#allocation2 + $0xc8] sm:$0xff] }
 0x1c3   :  { %v1124_v48 = vmax.f32 %v13152_v18, %v797_v58  ;;  %v1126_v54 = vmax.f32 %v13153_v7, %v1054_v36  ;;  %6929 = vmatprep.subr.bf16.mxu0 %v6928_v59  ;;  %7121 = vmatprep.subr.bf16.mxu1 %v7120_v40  ;;  %1298 = vst.msk [vmem:[#allocation2 + $0xf0] ss:$8 sm:$0x3] %vm9225_vm6, %v9582_v61  ;;  %v1237_v34 = vmax.f32 %v1205_v15, 0.0  ;;  %v9836_v59 = vld [vmem:[%s13063_s3 + $0x680] sm:$0xff]  ;;  %v9850_v1 = vld [vmem:[%s13063_s3 + $0x690] sm:$0xff] }
 0x1c4   :  { %v1163_v16 = vmax.f32 %v1123_v56, %v1125_v2  ;;  %2236 = vmatprep.mubr.f32.mxu0 %v1355_v8  ;;  %2719 = vmatprep.mubr.f32.mxu1 %v1355_v8  ;;  %v6934_v53 = vpack.c.bf16 %v9782_v5, %v9777_v57  ;;  %v7126_v30 = vpack.c.bf16 %v9798_v60, %v9793_v38  ;;  %v9841_v40 = vld [vmem:[%s13063_s3 + $0x6a0] sm:$0xff]  ;;  %v1238_v41 = vmax.f32 %v1206_v0, 0.0  ;;  %v9855_v31 = vld [vmem:[%s13063_s3 + $0x6b0] sm:$0xff]  ;;  %v9860_v6 = vld [vmem:[%s13063_s3 + $0x6c8] sm:$0xff]  ;;  %v803_v57 = vpop.f32.mrb[59].mxu0  ;;  %v1060_v5 = vpop.f32.mrb[59].mxu1 }
 0x1c5   :  { %v1164_v12 = vmax.f32 %v1124_v48, %v1126_v54  ;;  %2237 = vmatmul.mubr.f32.gmra.mrb[80].mxu0 %v1354_v10  ;;  %2720 = vmatmul.mubr.f32.gmra.mrb[80].mxu1 %v1354_v10  ;;  %v6936_v20 = vpack.c.bf16 %v9811_v19, %v9803_v14  ;;  %v7128_v17 = vpack.c.bf16 %v9821_v25, %v9816_v39  ;;  %v13154_v11 = vld [vmem:[#allocation12_spill] sm:$0xff]  ;;  %v13155_v51 = vld [vmem:[#allocation13_spill] sm:$0xff]  ;;  %v9868_v22 = vld [vmem:[%s13063_s3 + $0x6e8] sm:$0xff]  ;;  %v807_v19 = vpop.f32.mrb[60].mxu0  ;;  %v1064_v39 = vpop.f32.mrb[60].mxu1 }
 0x1c6   :  { %1269 = vst [vmem:[#allocation2 + $0x100] sm:$0xff] %v1237_v34  ;;  %v1207_v49 = vadd.f32 %v9211_v26, %v1163_v16  ;;  %v1127_v32 = vmax.f32 %v13154_v11, %v801_v63  ;;  %v1129_v9 = vmax.f32 %v13155_v51, %v1058_v52  ;;  %6931 = vmatpush1.bf16.msra.mxu0 %v6930_v44  ;;  %v9873_v42 = vld [vmem:[%s13063_s3 + $0x6d8] sm:$0xff]  ;;  %1270 = vst [vmem:[#allocation2 + $0x108] sm:$0xff] %v1238_v41  ;;  %v13157_v38 = vld [vmem:[#allocation15_spill] sm:$0xff] }
 0x1c7   :  { %7123 = vmatpush1.bf16.msra.mxu1 %v7122_v50  ;;  %v9878_v55 = vld [vmem:[%s13063_s3 + $0x6f8] sm:$0xff]  ;;  %1326 = vst [vmem:[#allocation2 + $0x100] sm:$0x80] %v9582_v61  ;;  %v1208_v44 = vadd.f32 %v9217_v23, %v1164_v12  ;;  %v13156_v50 = vld [vmem:[#allocation14_spill] sm:$0xff]  ;;  %v1130_v60 = vmax.f32 %v13157_v38, %v1060_v5  ;;  %6933 = vmatprep.subr.bf16.mxu0 %v6932_v46  ;;  %1327 = vst [vmem:[#allocation2 + $0x108] sm:$0x80] %v9582_v61 }
 0x1c8   :  { %v1128_v62 = vmax.f32 %v13156_v50, %v803_v57  ;;  %v9884_v14 = vld [vmem:[#allocation2 + $0xd8] sm:$0xff]  ;;  %7125 = vmatprep.subr.bf16.mxu1 %v7124_v33  ;;  %v1239_v15 = vmax.f32 %v1207_v49, 0.0  ;;  %v1165_v28 = vmax.f32 %v1127_v32, %v1129_v9  ;;  %v9889_v56 = vld [vmem:[#allocation2 + $0xd0] sm:$0xff]  ;;  %v6938_v3 = vpack.c.bf16 %v9841_v40, %v9836_v59  ;;  %v9898_v46 = vld [vmem:[%s13063_s3 + $0x6c0] sm:$0xff]  ;;  %v809_v59 = vpop.f32.mrb[61].mxu0  ;;  %v1066_v40 = vpop.f32.mrb[61].mxu1 }
 0x1c9   :  { %2242 = vmatprep.mubr.f32.mxu0 %v9884_v14  ;;  %2725 = vmatprep.mubr.f32.mxu1 %v9884_v14  ;;  %v7130_v2 = vpack.c.bf16 %v9855_v31, %v9850_v1  ;;  %v9903_v33 = vld [vmem:[%s13063_s3 + $0x6e0] sm:$0xff]  ;;  %v1240_v58 = vmax.f32 %v1208_v44, 0.0  ;;  %v6940_v25 = vpack.c.bf16 %v9868_v22, %v9860_v6  ;;  %v7132_v0 = vpack.c.bf16 %v9878_v55, %v9873_v42  ;;  %v9914_v18 = vld [vmem:[%s13063_s3 + $0x6d0] sm:$0xff]  ;;  %v9924_v7 = vld [vmem:[%s13063_s3 + $0x708] sm:$0xff]  ;;  %v813_v22 = vpop.f32.mrb[62].mxu0 }
 0x1ca   :  { %v1166_v36 = vmax.f32 %v1128_v62, %v1130_v60  ;;  %2243 = vmatmul.mubr.f32.gmra.mrb[82].mxu0 %v9889_v56  ;;  %2726 = vmatmul.mubr.f32.gmra.mrb[82].mxu1 %v9889_v56  ;;  %v9919_v48 = vld [vmem:[%s13063_s3 + $0x6f0] sm:$0xff]  ;;  %1271 = vst [vmem:[#allocation2 + $0x120] sm:$0xff] %v1239_v15  ;;  %v1209_v54 = vadd.f32 %v9211_v26, %v1165_v28  ;;  %v13159_v34 = vld [vmem:[#allocation17_spill] sm:$0xff]  ;;  %v9932_v41 = vld [vmem:[%s13063_s3 + $0x728] sm:$0xff]  ;;  %v815_v15 = vpop.f32.mrb[63].mxu0 }
 0x1cb   :  { %v13158_v8 = vld [vmem:[#allocation16_spill] sm:$0xff]  ;;  %v1133_v16 = vmax.f32 %v13159_v34, %v1064_v39  ;;  %6935 = vmatpush1.bf16.msra.mxu0 %v6934_v53  ;;  %7127 = vmatpush1.bf16.msra.mxu1 %v7126_v30  ;;  %v9937_v12 = vld [vmem:[%s13063_s3 + $0x718] sm:$0xff]  ;;  %1272 = vst [vmem:[#allocation2 + $0x128] sm:$0xff] %v1240_v58  ;;  %v13160_v30 = vld [vmem:[#allocation18_spill] sm:$0xff]  ;;  %v6942_v51 = vpack.c.bf16 %v9903_v33, %v9898_v46 }
 0x1cc   :  { %v1131_v10 = vmax.f32 %v13158_v8, %v807_v19  ;;  %v9942_v63 = vld [vmem:[%s13063_s3 + $0x738] sm:$0xff]  ;;  %v1210_v53 = vadd.f32 %v9217_v23, %v1166_v36  ;;  %v1132_v52 = vmax.f32 %v13160_v30, %v809_v59  ;;  %v13161_v1 = vld [vmem:[#allocation19_spill] sm:$0xff]  ;;  %6937 = vmatprep.subr.bf16.mxu0 %v6936_v20  ;;  %7129 = vmatprep.subr.bf16.mxu1 %v7128_v17  ;;  %v1358_v49 = vld [vmem:[#allocation2 + $0xf0] sm:$0xff]  ;;  %v1241_v11 = vmax.f32 %v1209_v54, 0.0  ;;  %v1070_v20 = vpop.f32.mrb[62].mxu1 }
 0x1cd   :  { %v1134_v31 = vmax.f32 %v13161_v1, %v1066_v40  ;;  %v1359_v6 = vld [vmem:[#allocation2 + $0xf8] sm:$0xff]  ;;  %1301 = vst.msk [vmem:[#allocation2 + $0x120] ss:$8 sm:$0x3] %vm9225_vm6, %v9582_v61  ;;  %v7134_v9 = vpack.c.bf16 %v9919_v48, %v9914_v18  ;;  %v6944_v17 = vpack.c.bf16 %v9932_v41, %v9924_v7  ;;  %v7136_v42 = vpack.c.bf16 %v9942_v63, %v9937_v12  ;;  %v9961_v55 = vld [vmem:[%s13063_s3 + $0x700] sm:$0xff]  ;;  %v13162_v50 = vld [vmem:[#allocation20_spill] sm:$0xff] }
 0x1ce   :  { %v1167_v32 = vmax.f32 %v1131_v10, %v1133_v16  ;;  %2248 = vmatprep.mubr.f32.mxu0 %v1359_v6  ;;  %2731 = vmatprep.mubr.f32.mxu1 %v1359_v6  ;;  %v1242_v57 = vmax.f32 %v1210_v53, 0.0  ;;  %1273 = vst [vmem:[#allocation2 + $0x130] sm:$0xff] %v1241_v11  ;;  %v1135_v62 = vmax.f32 %v13162_v50, %v813_v22  ;;  %v13163_v38 = vld [vmem:[#allocation21_spill] sm:$0xff]  ;;  %v1072_v28 = vpop.f32.mrb[63].mxu1  ;;  %v1968_v46 = vld [vmem:[%s13063_s3 + $0x720] sm:$0xff]  ;;  %v1966_v33 = vld [vmem:[%s13063_s3 + $0x710] sm:$0xff] }
 0x1cf   :  { %v1168_v5 = vmax.f32 %v1132_v52, %v1134_v31  ;;  %2249 = vmatmul.mubr.f32.gmra.mrb[84].mxu0 %v1358_v49  ;;  %2732 = vmatmul.mubr.f32.gmra.mrb[84].mxu1 %v1358_v49  ;;  %v1137_v60 = vmax.f32 %v13163_v38, %v1070_v20  ;;  %v1970_v58 = vld [vmem:[%s13063_s3 + $0x730] sm:$0xff]  ;;  %1330 = vst [vmem:[#allocation2 + $0x130] sm:$0x80] %v9582_v61  ;;  %v13165_v19 = vld [vmem:[#allocation23_spill] sm:$0xff]  ;;  %v9990_v10 = vld [vmem:[#allocation2 + $0x100] sm:$0xff] }
 0x1d0   :  { %v1211_v44 = vadd.f32 %v9211_v26, %v1167_v32  ;;  %6939 = vmatpush1.bf16.msra.mxu0 %v6938_v3  ;;  %7131 = vmatpush1.bf16.msra.mxu1 %v7130_v2  ;;  %1274 = vst [vmem:[#allocation2 + $0x138] sm:$0xff] %v1242_v57  ;;  %v13164_v2 = vld [vmem:[#allocation22_spill] sm:$0xff]  ;;  %v1138_v39 = vmax.f32 %v13165_v19, %v1072_v28  ;;  %v9979_v18 = vld [vmem:[#allocation2 + $0x108] sm:$0xff]  ;;  %v1974_v53 = vld [vmem:[%s13063_s3 + $0x750] sm:$0xff] }
 0x1d1   :  { %v1212_v3 = vadd.f32 %v9217_v23, %v1168_v5  ;;  %v1136_v36 = vmax.f32 %v13164_v2, %v815_v15  ;;  %6941 = vmatprep.subr.bf16.mxu0 %v6940_v25  ;;  %7133 = vmatprep.subr.bf16.mxu1 %v7132_v0  ;;  %v1973_v48 = vld [vmem:[%s13063_s3 + $0x748] sm:$0xff]  ;;  %1331 = vst [vmem:[#allocation2 + $0x138] sm:$0x80] %v9582_v61  ;;  %v1975_v25 = vld [vmem:[%s13063_s3 + $0x758] sm:$0xff]  ;;  %v1972_v59 = vld [vmem:[%s13063_s3 + $0x740] sm:$0xff] }
 0x1d2   :  { %v1977_v7 = vld [vmem:[%s13063_s3 + $0x768] sm:$0xff]  ;;  %v1243_v54 = vmax.f32 %v1211_v44, 0.0  ;;  %v1169_v8 = vmax.f32 %v1135_v62, %v1137_v60  ;;  %2254 = vmatprep.mubr.f32.mxu0 %v9979_v18  ;;  %2737 = vmatprep.mubr.f32.mxu1 %v9979_v18  ;;  %v1979_v0 = vld [vmem:[%s13063_s3 + $0x778] sm:$0xff]  ;;  %v6946_v41 = vpack.c.bf16 %v1968_v46, %v9961_v55  ;;  %v7138_v12 = vpack.c.bf16 %v1970_v58, %v1966_v33  ;;  %v1976_v63 = vld [vmem:[%s13063_s3 + $0x760] sm:$0xff] }
 0x1d3   :  { %v1244_v34 = vmax.f32 %v1212_v3, 0.0  ;;  %v1170_v16 = vmax.f32 %v1136_v36, %v1138_v39  ;;  %2255 = vmatmul.mubr.f32.gmra.mrb[86].mxu0 %v9990_v10  ;;  %2738 = vmatmul.mubr.f32.gmra.mrb[86].mxu1 %v9990_v10  ;;  %v1978_v30 = vld [vmem:[%s13063_s3 + $0x770] sm:$0xff]  ;;  %v6948_v31 = vpack.c.bf16 %v1977_v7, %v1973_v48  ;;  %v7140_v6 = vpack.c.bf16 %v1979_v0, %v1975_v25  ;;  %v1981_v49 = vld [vmem:[%s13063_s3 + $0x788] sm:$0xff]  ;;  %v1983_v32 = vld [vmem:[%s13063_s3 + $0x798] sm:$0xff] }
 0x1d4   :  { %1275 = vst [vmem:[#allocation2 + $0x150] sm:$0xff] %v1243_v54  ;;  %v1213_v40 = vadd.f32 %v9211_v26, %v1169_v8  ;;  %6943 = vmatpush1.bf16.msra.mxu0 %v6942_v51  ;;  %7135 = vmatpush1.bf16.msra.mxu1 %v7134_v9  ;;  %v1363_v52 = vld [vmem:[#allocation2 + $0x128] sm:$0xff]  ;;  %v1362_v1 = vld [vmem:[#allocation2 + $0x120] sm:$0xff]  ;;  %v1987_v51 = vld [vmem:[%s13063_s3 + $0x7b8] sm:$0xff]  ;;  %v6950_v57 = vpack.c.bf16 %v1976_v63, %v1972_v59  ;;  %v1487_v59 = vrot.slane %v9398_v27, 1 }
 0x1d5   :  { %1276 = vst [vmem:[#allocation2 + $0x158] sm:$0xff] %v1244_v34  ;;  %v1214_v26 = vadd.f32 %v9217_v23, %v1170_v16  ;;  %6945 = vmatprep.subr.bf16.mxu0 %v6944_v17  ;;  %7137 = vmatprep.subr.bf16.mxu1 %v7136_v42  ;;  %v1985_v23 = vld [vmem:[%s13063_s3 + $0x7a8] sm:$0xff]  ;;  %v7142_v5 = vpack.c.bf16 %v1978_v30, %v1974_v53  ;;  %v1984_v22 = vld [vmem:[%s13063_s3 + $0x7a0] sm:$0xff]  ;;  %v1982_v20 = vld [vmem:[%s13063_s3 + $0x790] sm:$0xff]  ;;  %v1484_v30 = vrot.slane %v9403_v47, 1 }
 0x1d6   :  { %1304 = vst.msk [vmem:[#allocation2 + $0x150] ss:$8 sm:$0x3] %vm9225_vm6, %v9582_v61  ;;  %v1245_v11 = vmax.f32 %v1213_v40, 0.0  ;;  %2260 = vmatprep.mubr.f32.mxu0 %v1363_v52  ;;  %2743 = vmatprep.mubr.f32.mxu1 %v1363_v52  ;;  %v1986_v17 = vld [vmem:[%s13063_s3 + $0x7b0] sm:$0xff]  ;;  %v6952_v55 = vpack.c.bf16 %v1985_v23, %v1981_v49  ;;  %v7144_v44 = vpack.c.bf16 %v1987_v51, %v1983_v32  ;;  %v1989_v50 = vld [vmem:[%s13063_s3 + $0x7c8] sm:$0xff] }
 0x1d7   :  { %v1246_v9 = vmax.f32 %v1214_v26, 0.0  ;;  %2261 = vmatmul.mubr.f32.gmra.mrb[88].mxu0 %v1362_v1  ;;  %2744 = vmatmul.mubr.f32.gmra.mrb[88].mxu1 %v1362_v1  ;;  %v1993_v62 = vld [vmem:[%s13063_s3 + $0x7e8] sm:$0xff]  ;;  %v10054_v38 = vld [vmem:[#allocation2 + $0x130] sm:$0xff]  ;;  %v1991_v60 = vld [vmem:[%s13063_s3 + $0x7d8] sm:$0xff]  ;;  %v7146_v28 = vpack.c.bf16 %v1986_v17, %v1982_v20 }
 0x1d8   :  { %1277 = vst [vmem:[#allocation2 + $0x160] sm:$0xff] %v1245_v11  ;;  %6947 = vmatpush1.bf16.msra.mxu0 %v6946_v41  ;;  %7139 = vmatpush1.bf16.msra.mxu1 %v7138_v12  ;;  %v10043_v42 = vld [vmem:[#allocation2 + $0x138] sm:$0xff]  ;;  %v1988_v46 = vld [vmem:[%s13063_s3 + $0x7c0] sm:$0xff]  ;;  %v1990_v58 = vld [vmem:[%s13063_s3 + $0x7d0] sm:$0xff]  ;;  %v6956_v36 = vpack.c.bf16 %v1993_v62, %v1989_v50 }
 0x1d9   :  { %1334 = vst [vmem:[#allocation2 + $0x160] sm:$0x80] %v9582_v61  ;;  %1278 = vst [vmem:[#allocation2 + $0x168] sm:$0xff] %v1246_v9  ;;  %6949 = vmatprep.subr.bf16.mxu0 %v6948_v31  ;;  %7141 = vmatprep.subr.bf16.mxu1 %v7140_v6  ;;  %v1995_v15 = vld [vmem:[%s13063_s3 + $0x7f8] sm:$0xff]  ;;  %v1992_v33 = vld [vmem:[%s13063_s3 + $0x7e0] sm:$0xff] }
 0x1da   :  { %1335 = vst [vmem:[#allocation2 + $0x168] sm:$0x80] %v9582_v61  ;;  %2266 = vmatprep.mubr.f32.mxu0 %v10043_v42  ;;  %2749 = vmatprep.mubr.f32.mxu1 %v10043_v42  ;;  %v6954_v61 = vpack.c.bf16 %v1984_v22, %v1980_v13  ;;  %v7148_v19 = vpack.c.bf16 %v1995_v15, %v1991_v60  ;;  %v1994_v39 = vld [vmem:[%s13063_s3 + $0x7f0] sm:$0xff]  ;;  %v1997_v48 = vld [vmem:[%s13063_s3 + $0x808] sm:$0xff]  ;;  %v1999_v25 = vld [vmem:[%s13063_s3 + $0x818] sm:$0xff] }
 0x1db   :  { %2267 = vmatmul.mubr.f32.gmra.mrb[90].mxu0 %v10054_v38  ;;  %2750 = vmatmul.mubr.f32.gmra.mrb[90].mxu1 %v10054_v38  ;;  %v2001_v7 = vld [vmem:[%s13063_s3 + $0x828] sm:$0xff]  ;;  %v2003_v0 = vld [vmem:[%s13063_s3 + $0x838] sm:$0xff]  ;;  %v6958_v34 = vpack.c.bf16 %v1992_v33, %v1988_v46  ;;  %v7150_v16 = vpack.c.bf16 %v1994_v39, %v1990_v58  ;;  %v1996_v40 = vld [vmem:[%s13063_s3 + $0x800] sm:$0xff] }
 0x1dc   :  { %6951 = vmatpush1.bf16.msra.mxu0 %v6950_v57  ;;  %7143 = vmatpush1.bf16.msra.mxu1 %v7142_v5  ;;  %v10082_v54 = vld [vmem:[#allocation2 + $0x28] sm:$0x1]  ;;  %v1371_v8 = vld [vmem:[#allocation2 + $0x8] sm:$0xfe]  ;;  %v2000_v41 = vld [vmem:[%s13063_s3 + $0x820] sm:$0xff]  ;;  %v6960_v1 = vpack.c.bf16 %v2001_v7, %v1997_v48  ;;  %v7152_v31 = vpack.c.bf16 %v2003_v0, %v1999_v25 }
 0x1dd   :  { %v1367_v3 = vld [vmem:[#allocation2 + $0x158] sm:$0xff]  ;;  %6953 = vmatprep.subr.bf16.mxu0 %v6952_v55  ;;  %7145 = vmatprep.subr.bf16.mxu1 %v7144_v44  ;;  %v1366_v2 = vld [vmem:[#allocation2 + $0x150] sm:$0xff]  ;;  %v1370_v53 = vld [vmem:[#allocation2] sm:$0xfe]  ;;  %v1486_v52 = vrot.slane %v1371_v8, 1  ;;  %v1491_v47 = vrot.slane %v10082_v54, 1  ;;  %v6962_v13 = vpack.c.bf16 %v2000_v41, %v1996_v40 }
 0x1de   :  { %2272 = vmatprep.mubr.f32.mxu0 %v1367_v3  ;;  %2755 = vmatprep.mubr.f32.mxu1 %v1367_v3  ;;  %v1998_v12 = vld [vmem:[%s13063_s3 + $0x810] sm:$0xff]  ;;  %v2005_v6 = vld [vmem:[%s13063_s3 + $0x848] sm:$0xff]  ;;  %v1372_v49 = vld [vmem:[#allocation2 + $0x20] sm:$0x1]  ;;  %v1483_v9 = vrot.slane %v1370_v53, 1 }
 0x1df   :  { %2273 = vmatmul.mubr.f32.gmra.mrb[92].mxu0 %v1366_v2  ;;  %2756 = vmatmul.mubr.f32.gmra.mrb[92].mxu1 %v1366_v2  ;;  %v2002_v27 = vld [vmem:[%s13063_s3 + $0x830] sm:$0xff]  ;;  %v2009_v11 = vld [vmem:[%s13063_s3 + $0x868] sm:$0xff]  ;;  %v2007_v23 = vld [vmem:[%s13063_s3 + $0x858] sm:$0xff]  ;;  %v1488_v51 = vsel %vm1482_vm7, %v1486_v52, %v1487_v59  ;;  %v1489_v62 = vrot.slane %v1372_v49, 1  ;;  %v1492_v33 = vsel %vm1482_vm7, %v1487_v59, %v1491_v47  ;;  %v1497_v2 = vrot.slane %v9519_v21, 1 }
 0x1e0   :  { %6955 = vmatpush1.bf16.msra.mxu0 %v6954_v61  ;;  %7147 = vmatpush1.bf16.msra.mxu1 %v7146_v28  ;;  %v10108_v26 = vld [vmem:[#allocation2 + $0x160] sm:$0xff]  ;;  %v2011_v32 = vld [vmem:[%s13063_s3 + $0x878] sm:$0xff]  ;;  %v7154_v57 = vpack.c.bf16 %v2002_v27, %v1998_v12  ;;  %v2006_v20 = vld [vmem:[%s13063_s3 + $0x850] sm:$0xff]  ;;  %v1485_v55 = vsel %vm1482_vm7, %v1483_v9, %v1484_v30  ;;  %v6964_v44 = vpack.c.bf16 %v2009_v11, %v2005_v6 }
 0x1e1   :  { %v10100_v63 = vld [vmem:[#allocation2 + $0x168] sm:$0xff]  ;;  %6957 = vmatprep.subr.bf16.mxu0 %v6956_v36  ;;  %7149 = vmatprep.subr.bf16.mxu1 %v7148_v19  ;;  %v2004_v5 = vld [vmem:[%s13063_s3 + $0x840] sm:$0xff]  ;;  %v2010_v17 = vld [vmem:[%s13063_s3 + $0x870] sm:$0xff]  ;;  %v7156_v50 = vpack.c.bf16 %v2011_v32, %v2007_v23  ;;  %v1490_v8 = vsel %vm1482_vm7, %v1484_v30, %v1489_v62 }
 0x1e2   :  { %2278 = vmatprep.mubr.f32.mxu0 %v10100_v63  ;;  %2761 = vmatprep.mubr.f32.mxu1 %v10100_v63  ;;  %v2008_v22 = vld [vmem:[%s13063_s3 + $0x860] sm:$0xff]  ;;  %v2013_v60 = vld [vmem:[%s13063_s3 + $0x888] sm:$0xff]  ;;  %v1375_v61 = vld [vmem:[#allocation2 + $0x38] sm:$0xfe]  ;;  %v7158_v3 = vpack.c.bf16 %v2010_v17, %v2006_v20 }
 0x1e3   :  { %2279 = vmatmul.mubr.f32.gmra.mrb[94].mxu0 %v10108_v26  ;;  %2762 = vmatmul.mubr.f32.gmra.mrb[94].mxu1 %v10108_v26  ;;  %v2017_v15 = vld [vmem:[%s13063_s3 + $0x8a8] sm:$0xff]  ;;  %v2015_v28 = vld [vmem:[%s13063_s3 + $0x898] sm:$0xff]  ;;  %v6966_v58 = vpack.c.bf16 %v2008_v22, %v2004_v5  ;;  %v2012_v36 = vld [vmem:[%s13063_s3 + $0x880] sm:$0xff]  ;;  %v1496_v25 = vrot.slane %v1375_v61, 1 }
 0x1e4   :  { %6959 = vmatpush1.bf16.msra.mxu0 %v6958_v34  ;;  %7151 = vmatpush1.bf16.msra.mxu1 %v7150_v16  ;;  %v2019_v46 = vld [vmem:[%s13063_s3 + $0x8b8] sm:$0xff]  ;;  %v2016_v19 = vld [vmem:[%s13063_s3 + $0x8a0] sm:$0xff]  ;;  %v6968_v48 = vpack.c.bf16 %v2017_v15, %v2013_v60  ;;  %v1374_v7 = vld [vmem:[#allocation2 + $0x30] sm:$0xfe]  ;;  %v1494_v34 = vrot.slane %v9524_v45, 1 }
 0x1e5   :  { %2349 = vmatprep.mubr.f32.mxu0 %v1488_v51  ;;  %2832 = vmatprep.mubr.f32.mxu1 %v1488_v51  ;;  %v1377_v39 = vld [vmem:[#allocation2 + $0x58] sm:$0x1]  ;;  %v2014_v54 = vld [vmem:[%s13063_s3 + $0x890] sm:$0xff]  ;;  %v7160_v0 = vpack.c.bf16 %v2019_v46, %v2015_v28  ;;  %v2021_v16 = vld [vmem:[%s13063_s3 + $0x8c8] sm:$0xff]  ;;  %v1498_v53 = vsel %vm1482_vm7, %v1496_v25, %v1497_v2  ;;  %v1493_v27 = vrot.slane %v1374_v7, 1  ;;  %v6970_v30 = vpack.c.bf16 %v2016_v19, %v2012_v36 }
 0x1e6   :  { %6961 = vmatprep.subr.bf16.mxu0 %v6960_v1  ;;  %7153 = vmatprep.subr.bf16.mxu1 %v7152_v31  ;;  %v2018_v21 = vld [vmem:[%s13063_s3 + $0x8b0] sm:$0xff]  ;;  %v1501_v40 = vrot.slane %v1377_v39, 1  ;;  %v2025_v41 = vld [vmem:[%s13063_s3 + $0x8e8] sm:$0xff]  ;;  %v2023_v12 = vld [vmem:[%s13063_s3 + $0x8d8] sm:$0xff] }
 0x1e7   :  { %2350 = vmatmul.mubr.f32.vlgmr.msra.gmra.mrb[64].mxu0 %v1485_v55  ;;  %2833 = vmatmul.mubr.f32.vlgmr.msra.gmra.mrb[64].mxu1 %v1485_v55  ;;  %v1376_v59 = vld [vmem:[#allocation2 + $0x50] sm:$0x1]  ;;  %v2027_v45 = vld [vmem:[%s13063_s3 + $0x8f8] sm:$0xff]  ;;  %v7162_v52 = vpack.c.bf16 %v2018_v21, %v2014_v54  ;;  %v2020_v1 = vld [vmem:[%s13063_s3 + $0x8c0] sm:$0xff]  ;;  %v1495_v47 = vsel %vm1482_vm7, %v1493_v27, %v1494_v34  ;;  %v6972_v11 = vpack.c.bf16 %v2025_v41, %v2021_v16  ;;  %v1507_v55 = vrot.slane %v9642_v24, 1 }
 0x1e8   :  { %6963 = vmatpush1.bf16.msra.mxu0 %v6962_v13  ;;  %7155 = vmatpush1.bf16.msra.mxu1 %v7154_v57  ;;  %v2024_v31 = vld [vmem:[%s13063_s3 + $0x8e0] sm:$0xff]  ;;  %v2022_v6 = vld [vmem:[%s13063_s3 + $0x8d0] sm:$0xff]  ;;  %v7164_v23 = vpack.c.bf16 %v2027_v45, %v2023_v12  ;;  %v1499_v32 = vrot.slane %v1376_v59, 1  ;;  %v2029_v51 = vld [vmem:[%s13063_s3 + $0x908] sm:$0xff]  ;;  %v1502_v22 = vsel %vm1482_vm7, %v1497_v2, %v1501_v40 }
 0x1e9   :  { %2355 = vmatprep.mubr.f32.mxu0 %v1492_v33  ;;  %2838 = vmatprep.mubr.f32.mxu1 %v1492_v33  ;;  %v2026_v49 = vld [vmem:[%s13063_s3 + $0x8f0] sm:$0xff]  ;;  %v2033_v9 = vld [vmem:[%s13063_s3 + $0x928] sm:$0xff]  ;;  %v2031_v57 = vld [vmem:[%s13063_s3 + $0x918] sm:$0xff]  ;;  %v6974_v20 = vpack.c.bf16 %v2024_v31, %v2020_v1 }
 0x1ea   :  { %6965 = vmatprep.subr.bf16.mxu0 %v6964_v44  ;;  %7157 = vmatprep.subr.bf16.mxu1 %v7156_v50  ;;  %v1379_v13 = vld [vmem:[#allocation2 + $0x68] sm:$0xfe]  ;;  %v2035_v5 = vld [vmem:[%s13063_s3 + $0x938] sm:$0xff]  ;;  %v7166_v17 = vpack.c.bf16 %v2026_v49, %v2022_v6  ;;  %v2028_v44 = vld [vmem:[%s13063_s3 + $0x900] sm:$0xff]  ;;  %v6976_v60 = vpack.c.bf16 %v2033_v9, %v2029_v51  ;;  %v1500_v28 = vsel %vm1482_vm7, %v1494_v34, %v1499_v32  ;;  %v1517_v6 = vrot.slane %v9763_v4, 1 }
 0x1eb   :  { %2356 = vmatmul.mubr.f32.gmra.mrb[66].mxu0 %v1490_v8  ;;  %2839 = vmatmul.mubr.f32.gmra.mrb[66].mxu1 %v1490_v8  ;;  %v2032_v50 = vld [vmem:[%s13063_s3 + $0x920] sm:$0xff]  ;;  %v1381_v62 = vld [vmem:[#allocation2 + $0x88] sm:$0x1]  ;;  %v2030_v61 = vld [vmem:[%s13063_s3 + $0x910] sm:$0xff]  ;;  %v1506_v46 = vrot.slane %v1379_v13, 1  ;;  %v7168_v33 = vpack.c.bf16 %v2035_v5, %v2031_v57  ;;  %v1514_v5 = vrot.slane %v9768_v43, 1 }
 0x1ec   :  { %6967 = vmatpush1.bf16.msra.mxu0 %v6966_v58  ;;  %7159 = vmatpush1.bf16.msra.mxu1 %v7158_v3  ;;  %v1378_v15 = vld [vmem:[#allocation2 + $0x60] sm:$0xfe]  ;;  %v2034_v24 = vld [vmem:[%s13063_s3 + $0x930] sm:$0xff]  ;;  %v1504_v58 = vrot.slane %v9647_v37, 1  ;;  %v2037_v3 = vld [vmem:[%s13063_s3 + $0x948] sm:$0xff]  ;;  %v1511_v36 = vrot.slane %v1381_v62, 1  ;;  %v6978_v54 = vpack.c.bf16 %v2032_v50, %v2028_v44 }
 0x1ed   :  { %2361 = vmatprep.mubr.f32.mxu0 %v1498_v53  ;;  %2844 = vmatprep.mubr.f32.mxu1 %v1498_v53  ;;  %v1380_v2 = vld [vmem:[#allocation2 + $0x80] sm:$0x1]  ;;  %v2041_v19 = vld [vmem:[%s13063_s3 + $0x968] sm:$0xff]  ;;  %v2039_v39 = vld [vmem:[%s13063_s3 + $0x958] sm:$0xff]  ;;  %v1503_v7 = vrot.slane %v1378_v15, 1  ;;  %v7170_v21 = vpack.c.bf16 %v2034_v24, %v2030_v61 }
 0x1ee   :  { %6969 = vmatprep.subr.bf16.mxu0 %v6968_v48  ;;  %7161 = vmatprep.subr.bf16.mxu1 %v7160_v0  ;;  %v2043_v37 = vld [vmem:[%s13063_s3 + $0x978] sm:$0xff]  ;;  %v1508_v48 = vsel %vm1482_vm7, %v1506_v46, %v1507_v55  ;;  %v2036_v8 = vld [vmem:[%s13063_s3 + $0x940] sm:$0xff]  ;;  %v2038_v0 = vld [vmem:[%s13063_s3 + $0x950] sm:$0xff]  ;;  %v6980_v59 = vpack.c.bf16 %v2041_v19, %v2037_v3  ;;  %v1509_v41 = vrot.slane %v1380_v2, 1 }
 0x1ef   :  { %2362 = vmatmul.mubr.f32.gmra.mrb[68].mxu0 %v1495_v47  ;;  %2845 = vmatmul.mubr.f32.gmra.mrb[68].mxu1 %v1495_v47  ;;  %v2040_v25 = vld [vmem:[%s13063_s3 + $0x960] sm:$0xff]  ;;  %v2042_v34 = vld [vmem:[%s13063_s3 + $0x970] sm:$0xff]  ;;  %v1505_v16 = vsel %vm1482_vm7, %v1503_v7, %v1504_v58  ;;  %v7172_v40 = vpack.c.bf16 %v2043_v37, %v2039_v39  ;;  %v2045_v12 = vld [vmem:[%s13063_s3 + $0x988] sm:$0xff] }
 0x1f0   :  { %6971 = vmatpush1.bf16.msra.mxu0 %v6970_v30  ;;  %7163 = vmatpush1.bf16.msra.mxu1 %v7162_v52  ;;  %v2049_v45 = vld [vmem:[%s13063_s3 + $0x9a8] sm:$0xff]  ;;  %v1383_v53 = vld [vmem:[#allocation2 + $0x98] sm:$0xfe]  ;;  %v1512_v52 = vsel %vm1482_vm7, %v1507_v55, %v1511_v36  ;;  %v6982_v1 = vpack.c.bf16 %v2040_v25, %v2036_v8  ;;  %v7174_v31 = vpack.c.bf16 %v2042_v34, %v2038_v0  ;;  %v2044_v49 = vld [vmem:[%s13063_s3 + $0x980] sm:$0xff]  ;;  %v1527_v8 = vrot.slane %v9884_v14, 1 }
 0x1f1   :  { %2367 = vmatprep.mubr.f32.mxu0 %v1502_v22  ;;  %2850 = vmatprep.mubr.f32.mxu1 %v1502_v22  ;;  %v2047_v27 = vld [vmem:[%s13063_s3 + $0x998] sm:$0xff]  ;;  %v2048_v47 = vld [vmem:[%s13063_s3 + $0x9a0] sm:$0xff]  ;;  %v1382_v32 = vld [vmem:[#allocation2 + $0x90] sm:$0xfe]  ;;  %v1510_v9 = vsel %vm1482_vm7, %v1504_v58, %v1509_v41  ;;  %v1516_v13 = vrot.slane %v1383_v53, 1  ;;  %v1524_v53 = vrot.slane %v9889_v56, 1 }
 0x1f2   :  { %6973 = vmatprep.subr.bf16.mxu0 %v6972_v11  ;;  %7165 = vmatprep.subr.bf16.mxu1 %v7164_v23  ;;  %v2051_v30 = vld [vmem:[%s13063_s3 + $0x9b8] sm:$0xff]  ;;  %v6984_v23 = vpack.c.bf16 %v2049_v45, %v2045_v12  ;;  %v2046_v51 = vld [vmem:[%s13063_s3 + $0x990] sm:$0xff]  ;;  %v2053_v22 = vld [vmem:[%s13063_s3 + $0x9c8] sm:$0xff]  ;;  %v1513_v62 = vrot.slane %v1382_v32, 1 }
 0x1f3   :  { %2368 = vmatmul.mubr.f32.gmra.mrb[70].mxu0 %v1500_v28  ;;  %2851 = vmatmul.mubr.f32.gmra.mrb[70].mxu1 %v1500_v28  ;;  %v1385_v11 = vld [vmem:[#allocation2 + $0xb8] sm:$0x1]  ;;  %v2050_v4 = vld [vmem:[%s13063_s3 + $0x9b0] sm:$0xff]  ;;  %v7176_v57 = vpack.c.bf16 %v2051_v30, %v2047_v27  ;;  %v2057_v55 = vld [vmem:[%s13063_s3 + $0x9e8] sm:$0xff]  ;;  %v1518_v50 = vsel %vm1482_vm7, %v1516_v13, %v1517_v6 }
 0x1f4   :  { %6975 = vmatpush1.bf16.msra.mxu0 %v6974_v20  ;;  %7167 = vmatpush1.bf16.msra.mxu1 %v7166_v17  ;;  %v1384_v20 = vld [vmem:[#allocation2 + $0xb0] sm:$0x1]  ;;  %v1521_v17 = vrot.slane %v1385_v11, 1  ;;  %v2055_v44 = vld [vmem:[%s13063_s3 + $0x9d8] sm:$0xff]  ;;  %v7178_v15 = vpack.c.bf16 %v2050_v4, %v2046_v51  ;;  %v2052_v61 = vld [vmem:[%s13063_s3 + $0x9c0] sm:$0xff]  ;;  %v6988_v58 = vpack.c.bf16 %v2057_v55, %v2053_v22 }
 0x1f5   :  { %2373 = vmatprep.mubr.f32.mxu0 %v1508_v48  ;;  %2856 = vmatprep.mubr.f32.mxu1 %v1508_v48  ;;  %v2059_v43 = vld [vmem:[%s13063_s3 + $0x9f8] sm:$0xff]  ;;  %v2056_v24 = vld [vmem:[%s13063_s3 + $0x9e0] sm:$0xff]  ;;  %v2054_v28 = vld [vmem:[%s13063_s3 + $0x9d0] sm:$0xff]  ;;  %v1519_v2 = vrot.slane %v1384_v20, 1 }
 0x1f6   :  { %6977 = vmatprep.subr.bf16.mxu0 %v6976_v60  ;;  %7169 = vmatprep.subr.bf16.mxu1 %v7168_v33  ;;  %v6986_v60 = vpack.c.bf16 %v2048_v47, %v2044_v49  ;;  %v2058_v46 = vld [vmem:[%s13063_s3 + $0x9f0] sm:$0xff]  ;;  %v1515_v33 = vsel %vm1482_vm7, %v1513_v62, %v1514_v5  ;;  %v7180_v3 = vpack.c.bf16 %v2059_v43, %v2055_v44  ;;  %v2061_v36 = vld [vmem:[%s13063_s3 + $0xa08] sm:$0xff]  ;;  %v2063_v37 = vld [vmem:[%s13063_s3 + $0xa18] sm:$0xff] }
 0x1f7   :  { %2374 = vmatmul.mubr.f32.gmra.mrb[72].mxu0 %v1505_v16  ;;  %2857 = vmatmul.mubr.f32.gmra.mrb[72].mxu1 %v1505_v16  ;;  %v2065_v19 = vld [vmem:[%s13063_s3 + $0xa28] sm:$0xff]  ;;  %v2067_v48 = vld [vmem:[%s13063_s3 + $0xa38] sm:$0xff]  ;;  %v1522_v7 = vsel %vm1482_vm7, %v1517_v6, %v1521_v17  ;;  %v2060_v25 = vld [vmem:[%s13063_s3 + $0xa00] sm:$0xff]  ;;  %v1520_v41 = vsel %vm1482_vm7, %v1514_v5, %v1519_v2 }
 0x1f8   :  { %6979 = vmatpush1.bf16.msra.mxu0 %v6978_v54  ;;  %7171 = vmatpush1.bf16.msra.mxu1 %v7170_v21  ;;  %v1387_v39 = vld [vmem:[#allocation2 + $0xc8] sm:$0xfe]  ;;  %v6990_v54 = vpack.c.bf16 %v2056_v24, %v2052_v61  ;;  %v7182_v21 = vpack.c.bf16 %v2058_v46, %v2054_v28  ;;  %v2064_v0 = vld [vmem:[%s13063_s3 + $0xa20] sm:$0xff]  ;;  %v1389_v34 = vld [vmem:[#allocation2 + $0xe8] sm:$0x1]  ;;  %v6992_v16 = vpack.c.bf16 %v2065_v19, %v2061_v36  ;;  %v1534_v36 = vrot.slane %v9990_v10, 1 }
 0x1f9   :  { %2379 = vmatprep.mubr.f32.mxu0 %v1512_v52  ;;  %2862 = vmatprep.mubr.f32.mxu1 %v1512_v52  ;;  %v2066_v14 = vld [vmem:[%s13063_s3 + $0xa30] sm:$0xff]  ;;  %v1526_v12 = vrot.slane %v1387_v39, 1  ;;  %v7184_v45 = vpack.c.bf16 %v2067_v48, %v2063_v37  ;;  %v2069_v27 = vld [vmem:[%s13063_s3 + $0xa48] sm:$0xff]  ;;  %v1388_v30 = vld [vmem:[#allocation2 + $0xe0] sm:$0x1]  ;;  %v1531_v52 = vrot.slane %v1389_v34, 1  ;;  %v6994_v47 = vpack.c.bf16 %v2064_v0, %v2060_v25 }
 0x1fa   :  { %6981 = vmatprep.subr.bf16.mxu0 %v6980_v59  ;;  %7173 = vmatprep.subr.bf16.mxu1 %v7172_v40  ;;  %v1386_v59 = vld [vmem:[#allocation2 + $0xc0] sm:$0xfe]  ;;  %v2062_v40 = vld [vmem:[%s13063_s3 + $0xa10] sm:$0xff]  ;;  %v2075_v56 = vld [vmem:[%s13063_s3 + $0xa78] sm:$0xff]  ;;  %v1529_v5 = vrot.slane %v1388_v30, 1 }
 0x1fb   :  { %2380 = vmatmul.mubr.f32.gmra.mrb[74].mxu0 %v1510_v9  ;;  %2863 = vmatmul.mubr.f32.gmra.mrb[74].mxu1 %v1510_v9  ;;  %v1528_v6 = vsel %vm1482_vm7, %v1526_v12, %v1527_v8  ;;  %v1523_v49 = vrot.slane %v1386_v59, 1  ;;  %v7186_v11 = vpack.c.bf16 %v2066_v14, %v2062_v40  ;;  %v2072_v32 = vld [vmem:[%s13063_s3 + $0xa60] sm:$0xff]  ;;  %v2070_v51 = vld [vmem:[%s13063_s3 + $0xa50] sm:$0xff]  ;;  %v2077_v22 = vld [vmem:[%s13063_s3 + $0xa88] sm:$0xff]  ;;  %v1532_v43 = vsel %vm1482_vm7, %v1527_v8, %v1531_v52 }
 0x1fc   :  { %6983 = vmatpush1.bf16.msra.mxu0 %v6982_v1  ;;  %7175 = vmatpush1.bf16.msra.mxu1 %v7174_v31  ;;  %v2073_v1 = vld [vmem:[%s13063_s3 + $0xa68] sm:$0xff]  ;;  %v2071_v31 = vld [vmem:[%s13063_s3 + $0xa58] sm:$0xff]  ;;  %v2074_v4 = vld [vmem:[%s13063_s3 + $0xa70] sm:$0xff] }
 0x1fd   :  { %2385 = vmatprep.mubr.f32.mxu0 %v1518_v50  ;;  %2868 = vmatprep.mubr.f32.mxu1 %v1518_v50  ;;  %v1525_v9 = vsel %vm1482_vm7, %v1523_v49, %v1524_v53  ;;  %v6996_v13 = vpack.c.bf16 %v2073_v1, %v2069_v27  ;;  %v2081_v20 = vld [vmem:[%s13063_s3 + $0xaa8] sm:$0xff]  ;;  %v1391_v17 = vld [vmem:[#allocation2 + $0xf8] sm:$0xfe]  ;;  %v7190_v62 = vpack.c.bf16 %v2074_v4, %v2070_v51  ;;  %v2080_v61 = vld [vmem:[%s13063_s3 + $0xaa0] sm:$0xff] }
 0x1fe   :  { %6985 = vmatprep.subr.bf16.mxu0 %v6984_v23  ;;  %7177 = vmatprep.subr.bf16.mxu1 %v7176_v57  ;;  %v2068_v23 = vld [vmem:[%s13063_s3 + $0xa40] sm:$0xff]  ;;  %v7188_v57 = vpack.c.bf16 %v2075_v56, %v2071_v31  ;;  %v2079_v55 = vld [vmem:[%s13063_s3 + $0xa98] sm:$0xff]  ;;  %v7000_v28 = vpack.c.bf16 %v2081_v20, %v2077_v22  ;;  %v1390_v46 = vld [vmem:[#allocation2 + $0xf0] sm:$0xfe] }
 0x1ff   :  { %2386 = vmatmul.mubr.f32.gmra.mrb[76].mxu0 %v1515_v33  ;;  %2869 = vmatmul.mubr.f32.gmra.mrb[76].mxu1 %v1515_v33  ;;  %v2083_v44 = vld [vmem:[%s13063_s3 + $0xab8] sm:$0xff]  ;;  %v6998_v50 = vpack.c.bf16 %v2072_v32, %v2068_v23  ;;  %v2078_v33 = vld [vmem:[%s13063_s3 + $0xa90] sm:$0xff]  ;;  %v2085_v19 = vld [vmem:[%s13063_s3 + $0xac8] sm:$0xff] }
 0x200   :  { %6987 = vmatpush1.bf16.msra.mxu0 %v6986_v60  ;;  %7179 = vmatpush1.bf16.msra.mxu1 %v7178_v15  ;;  %v1537_v60 = vrot.slane %v9979_v18, 1  ;;  %v2076_v15 = vld [vmem:[%s13063_s3 + $0xa80] sm:$0xff]  ;;  %v1393_v24 = vld [vmem:[#allocation2 + $0x118] sm:$0x1]  ;;  %v2082_v18 = vld [vmem:[%s13063_s3 + $0xab0] sm:$0xff]  ;;  %v7192_v2 = vpack.c.bf16 %v2083_v44, %v2079_v55 }
 0x201   :  { %2391 = vmatprep.mubr.f32.mxu0 %v1522_v7  ;;  %2874 = vmatprep.mubr.f32.mxu1 %v1522_v7  ;;  %v1392_v39 = vld [vmem:[#allocation2 + $0x110] sm:$0x1]  ;;  %v1541_v37 = vrot.slane %v1393_v24, 1  ;;  %v2089_v48 = vld [vmem:[%s13063_s3 + $0xae8] sm:$0xff]  ;;  %v2087_v7 = vld [vmem:[%s13063_s3 + $0xad8] sm:$0xff]  ;;  %v7002_v8 = vpack.c.bf16 %v2080_v61, %v2076_v15  ;;  %v7194_v25 = vpack.c.bf16 %v2082_v18, %v2078_v33 }
 0x202   :  { %6989 = vmatprep.subr.bf16.mxu0 %v6988_v58  ;;  %7181 = vmatprep.subr.bf16.mxu1 %v7180_v3  ;;  %v1530_v58 = vsel %vm1482_vm7, %v1524_v53, %v1529_v5  ;;  %v1536_v3 = vrot.slane %v1391_v17, 1  ;;  %v2091_v10 = vld [vmem:[%s13063_s3 + $0xaf8] sm:$0xff]  ;;  %v2084_v0 = vld [vmem:[%s13063_s3 + $0xac0] sm:$0xff]  ;;  %v2090_v59 = vld [vmem:[%s13063_s3 + $0xaf0] sm:$0xff]  ;;  %v7004_v14 = vpack.c.bf16 %v2089_v48, %v2085_v19  ;;  %v1539_v12 = vrot.slane %v1392_v39, 1 }
 0x203   :  { %2392 = vmatmul.mubr.f32.gmra.mrb[78].mxu0 %v1520_v41  ;;  %2875 = vmatmul.mubr.f32.gmra.mrb[78].mxu1 %v1520_v41  ;;  %v2088_v34 = vld [vmem:[%s13063_s3 + $0xae0] sm:$0xff]  ;;  %v7196_v41 = vpack.c.bf16 %v2091_v10, %v2087_v7  ;;  %v2097_v53 = vld [vmem:[%s13063_s3 + $0xb28] sm:$0xff]  ;;  %v2095_v30 = vld [vmem:[%s13063_s3 + $0xb18] sm:$0xff]  ;;  %v1542_v1 = vsel %vm1482_vm7, %v1537_v60, %v1541_v37  ;;  %v1557_v7 = vrot.slane %v10100_v63, 1 }
 0x204   :  { %6991 = vmatpush1.bf16.msra.mxu0 %v6990_v54  ;;  %7183 = vmatpush1.bf16.msra.mxu1 %v7182_v21  ;;  %v1538_v54 = vsel %vm1482_vm7, %v1536_v3, %v1537_v60  ;;  %v1533_v21 = vrot.slane %v1390_v46, 1  ;;  %v1395_v27 = vld [vmem:[#allocation2 + $0x128] sm:$0xfe]  ;;  %v2099_v52 = vld [vmem:[%s13063_s3 + $0xb38] sm:$0xff]  ;;  %v7006_v31 = vpack.c.bf16 %v2088_v34, %v2084_v0  ;;  %v2092_v49 = vld [vmem:[%s13063_s3 + $0xb00] sm:$0xff]  ;;  %v1540_v4 = vsel %vm1482_vm7, %v1534_v36, %v1539_v12 }
 0x205   :  { %2397 = vmatprep.mubr.f32.mxu0 %v1528_v6  ;;  %2880 = vmatprep.mubr.f32.mxu1 %v1528_v6  ;;  %v1547_v6 = vrot.slane %v10043_v42, 1  ;;  %v1394_v32 = vld [vmem:[#allocation2 + $0x120] sm:$0xfe]  ;;  %v2094_v51 = vld [vmem:[%s13063_s3 + $0xb10] sm:$0xff]  ;;  %v2101_v5 = vld [vmem:[%s13063_s3 + $0xb48] sm:$0xff] }
 0x206   :  { %6993 = vmatprep.subr.bf16.mxu0 %v6992_v16  ;;  %7185 = vmatprep.subr.bf16.mxu1 %v7184_v45  ;;  %v2086_v16 = vld [vmem:[%s13063_s3 + $0xad0] sm:$0xff]  ;;  %v1535_v40 = vsel %vm1482_vm7, %v1533_v21, %v1534_v36  ;;  %v2093_v45 = vld [vmem:[%s13063_s3 + $0xb08] sm:$0xff]  ;;  %v1396_v22 = vld [vmem:[#allocation2 + $0x140] sm:$0x1] }
 0x207   :  { %2398 = vmatmul.mubr.f32.gmra.mrb[80].mxu0 %v1525_v9  ;;  %2881 = vmatmul.mubr.f32.gmra.mrb[80].mxu1 %v1525_v9  ;;  %v7198_v56 = vpack.c.bf16 %v2090_v59, %v2086_v16  ;;  %v7008_v23 = vpack.c.bf16 %v2097_v53, %v2093_v45  ;;  %v2098_v42 = vld [vmem:[%s13063_s3 + $0xb30] sm:$0xff]  ;;  %v1546_v9 = vrot.slane %v1395_v27, 1  ;;  %v2105_v17 = vld [vmem:[%s13063_s3 + $0xb68] sm:$0xff]  ;;  %v2103_v55 = vld [vmem:[%s13063_s3 + $0xb58] sm:$0xff]  ;;  %v1549_v18 = vrot.slane %v1396_v22, 1 }
 0x208   :  { %6995 = vmatpush1.bf16.msra.mxu0 %v6994_v47  ;;  %7187 = vmatpush1.bf16.msra.mxu1 %v7186_v11  ;;  %v2096_v47 = vld [vmem:[%s13063_s3 + $0xb20] sm:$0xff]  ;;  %v1397_v11 = vld [vmem:[#allocation2 + $0x148] sm:$0x1]  ;;  %v2102_v61 = vld [vmem:[%s13063_s3 + $0xb50] sm:$0xff]  ;;  %v7012_v46 = vpack.c.bf16 %v2105_v17, %v2101_v5 }
 0x209   :  { %2403 = vmatprep.mubr.f32.mxu0 %v1532_v43  ;;  %2886 = vmatprep.mubr.f32.mxu1 %v1532_v43  ;;  %v1551_v20 = vrot.slane %v1397_v11, 1  ;;  %v1548_v44 = vsel %vm1482_vm7, %v1546_v9, %v1547_v6  ;;  %v1543_v43 = vrot.slane %v1394_v32, 1  ;;  %v2100_v60 = vld [vmem:[%s13063_s3 + $0xb40] sm:$0xff]  ;;  %v2106_v24 = vld [vmem:[%s13063_s3 + $0xb70] sm:$0xff]  ;;  %v2113_v3 = vld [vmem:[%s13063_s3 + $0xba8] sm:$0xff] }
 0x20a   :  { %6997 = vmatprep.subr.bf16.mxu0 %v6996_v13  ;;  %7189 = vmatprep.subr.bf16.mxu1 %v7188_v57  ;;  %v7200_v13 = vpack.c.bf16 %v2099_v52, %v2095_v30  ;;  %v1544_v57 = vrot.slane %v10054_v38, 1  ;;  %v2107_v38 = vld [vmem:[%s13063_s3 + $0xb78] sm:$0xff]  ;;  %v2104_v15 = vld [vmem:[%s13063_s3 + $0xb60] sm:$0xff]  ;;  %v7206_v48 = vpack.c.bf16 %v2106_v24, %v2102_v61  ;;  %v2110_v0 = vld [vmem:[%s13063_s3 + $0xb90] sm:$0xff] }
 0x20b   :  { %2404 = vmatmul.mubr.f32.gmra.mrb[82].mxu0 %v1530_v58  ;;  %2887 = vmatmul.mubr.f32.gmra.mrb[82].mxu1 %v1530_v58  ;;  %v7204_v33 = vpack.c.bf16 %v2107_v38, %v2103_v55  ;;  %v2109_v58 = vld [vmem:[%s13063_s3 + $0xb88] sm:$0xff]  ;;  %v2111_v36 = vld [vmem:[%s13063_s3 + $0xb98] sm:$0xff]  ;;  %v1552_v39 = vsel %vm1482_vm7, %v1547_v6, %v1551_v20  ;;  %v7014_v37 = vpack.c.bf16 %v2104_v15, %v2100_v60  ;;  %v2108_v10 = vld [vmem:[%s13063_s3 + $0xb80] sm:$0xff] }
 0x20c   :  { %6999 = vmatpush1.bf16.msra.mxu0 %v6998_v50  ;;  %7191 = vmatpush1.bf16.msra.mxu1 %v7190_v62  ;;  %v7010_v50 = vpack.c.bf16 %v2096_v47, %v2092_v49  ;;  %v7202_v62 = vpack.c.bf16 %v2098_v42, %v2094_v51  ;;  %v2115_v19 = vld [vmem:[%s13063_s3 + $0xbb8] sm:$0xff]  ;;  %v2114_v63 = vld [vmem:[%s13063_s3 + $0xbb0] sm:$0xff]  ;;  %v1550_v34 = vsel %vm1482_vm7, %v1544_v57, %v1549_v18  ;;  %v2121_v45 = vld [vmem:[%s13063_s3 + $0xbe8] sm:$0xff] }
 0x20d   :  { %2409 = vmatprep.mubr.f32.mxu0 %v1538_v54  ;;  %2892 = vmatprep.mubr.f32.mxu1 %v1538_v54  ;;  %v2112_v54 = vld [vmem:[%s13063_s3 + $0xba0] sm:$0xff]  ;;  %v1401_v21 = vld [vmem:[#allocation2 + $0x178] sm:$0x1]  ;;  %v7208_v59 = vpack.c.bf16 %v2115_v19, %v2111_v36  ;;  %v2118_v6 = vld [vmem:[%s13063_s3 + $0xbd0] sm:$0xff] }
 0x20e   :  { %7001 = vmatprep.subr.bf16.mxu0 %v7000_v28  ;;  %7193 = vmatprep.subr.bf16.mxu1 %v7192_v2  ;;  %v1545_v28 = vsel %vm1482_vm7, %v1543_v43, %v1544_v57  ;;  %v1399_v2 = vld [vmem:[#allocation2 + $0x158] sm:$0xfe]  ;;  %v1561_v12 = vrot.slane %v1401_v21, 1  ;;  %v7018_v52 = vpack.c.bf16 %v2112_v54, %v2108_v10  ;;  %v2122_v49 = vld [vmem:[%s13063_s3 + $0xbf0] sm:$0xff]  ;;  %v1403_v51 = vld [vmem:[#allocation2 + $0x8] sm:$0xfc] }
 0x20f   :  { %2410 = vmatmul.mubr.f32.gmra.mrb[84].mxu0 %v1535_v40  ;;  %2893 = vmatmul.mubr.f32.gmra.mrb[84].mxu1 %v1535_v40  ;;  %v1556_v16 = vrot.slane %v1399_v2, 1  ;;  %v1554_v40 = vrot.slane %v10108_v26, 1  ;;  %v2119_v53 = vld [vmem:[%s13063_s3 + $0xbd8] sm:$0xff]  ;;  %v7214_v9 = vpack.c.bf16 %v2122_v49, %v2118_v6  ;;  %v1405_v5 = vld [vmem:[#allocation2 + $0x28] sm:$0x3]  ;;  %v7866_v20 = vld [vmem:[#allocation2 + $0x10] sm:$0xff] }
 0x210   :  { %7003 = vmatpush1.bf16.msra.mxu0 %v7002_v8  ;;  %7195 = vmatpush1.bf16.msra.mxu1 %v7194_v25  ;;  %v7016_v8 = vpack.c.bf16 %v2113_v3, %v2109_v58  ;;  %v1398_v25 = vld [vmem:[#allocation2 + $0x150] sm:$0xfe]  ;;  %v2123_v26 = vld [vmem:[%s13063_s3 + $0xbf8] sm:$0xff]  ;;  %v1562_v42 = vsel %vm1482_vm7, %v1557_v7, %v1561_v12  ;;  %v1402_v22 = vld [vmem:[#allocation2] sm:$0xfc]  ;;  %v1629_v17 = vrot.slane %v7866_v20, 2 }
 0x211   :  { %2415 = vmatprep.mubr.f32.mxu0 %v1542_v1  ;;  %2898 = vmatprep.mubr.f32.mxu1 %v1542_v1  ;;  %v1558_v27 = vsel %vm1482_vm7, %v1556_v16, %v1557_v7  ;;  %v1553_v30 = vrot.slane %v1398_v25, 1  ;;  %v7210_v1 = vpack.c.bf16 %v2114_v63, %v2110_v0  ;;  %v1631_v38 = vrot.slane %v1403_v51, 2  ;;  %v1404_v43 = vld [vmem:[#allocation2 + $0x20] sm:$0x3]  ;;  %v1407_v61 = vld [vmem:[#allocation2 + $0x38] sm:$0xfc] }
 0x212   :  { %7005 = vmatprep.subr.bf16.mxu0 %v7004_v14  ;;  %7197 = vmatprep.subr.bf16.mxu1 %v7196_v41  ;;  %v2117_v14 = vld [vmem:[%s13063_s3 + $0xbc8] sm:$0xff]  ;;  %v1400_v41 = vld [vmem:[#allocation2 + $0x170] sm:$0x1]  ;;  %v1634_v15 = vrot.slane %v1404_v43, 2  ;;  %v10521_v24 = vld [vmem:[#allocation3 + $0x100] sm:$0xff]  ;;  %v1641_v58 = vrot.slane %v1407_v61, 2 }
 0x213   :  { %2416 = vmatmul.mubr.f32.gmra.mrb[86].mxu0 %v1540_v4  ;;  %2899 = vmatmul.mubr.f32.gmra.mrb[86].mxu1 %v1540_v4  ;;  %v1555_v47 = vsel %vm1482_vm7, %v1553_v30, %v1554_v40  ;;  %v7020_v11 = vpack.c.bf16 %v2121_v45, %v2117_v14  ;;  %v1559_v32 = vrot.slane %v1400_v41, 1  ;;  %v1409_v18 = vld [vmem:[#allocation2 + $0x58] sm:$0x3]  ;;  %v1406_v3 = vld [vmem:[#allocation2 + $0x30] sm:$0xfc]  ;;  %v7869_v36 = vld [vmem:[#allocation2 + $0x40] sm:$0xff] }
 0x214   :  { %7007 = vmatpush1.bf16.msra.mxu0 %v7006_v31  ;;  %7199 = vmatpush1.bf16.msra.mxu1 %v7198_v56  ;;  %v2116_v31 = vld [vmem:[%s13063_s3 + $0xbc0] sm:$0xff]  ;;  %v1635_v2 = vsel %vm1627_vm8, %v1629_v17, %v1634_v15  ;;  %v1639_v19 = vrot.slane %v7869_v36, 2  ;;  %v1638_v7 = vrot.slane %v1406_v3, 2  ;;  %v1411_v21 = vld [vmem:[#allocation2 + $0x68] sm:$0xfc]  ;;  %v7870_v25 = vld [vmem:[#allocation2 + $0x78] sm:$0xff] }
 0x215   :  { %2421 = vmatprep.mubr.f32.mxu0 %v1548_v44  ;;  %2904 = vmatprep.mubr.f32.mxu1 %v1548_v44  ;;  %v2120_v56 = vld [vmem:[%s13063_s3 + $0xbe0] sm:$0xff]  ;;  %v1560_v55 = vsel %vm1482_vm7, %v1554_v40, %v1559_v32  ;;  %v1636_v44 = vrot.slane %v1405_v5, 2  ;;  %v1652_v0 = vrot.slane %v7870_v25, 2  ;;  %v1413_v63 = vld [vmem:[#allocation2 + $0x88] sm:$0x3]  ;;  %v7871_v40 = vld [vmem:[#allocation2 + $0x70] sm:$0xff] }
 0x216   :  { %7009 = vmatprep.subr.bf16.mxu0 %v7008_v23  ;;  %7201 = vmatprep.subr.bf16.mxu1 %v7200_v13  ;;  %v7212_v23 = vpack.c.bf16 %v2123_v26, %v2119_v53  ;;  %v7022_v4 = vpack.c.bf16 %v2120_v56, %v2116_v31  ;;  %v7865_v13 = vld [vmem:[#allocation2 + $0x18] sm:$0xff]  ;;  %v1640_v10 = vsel %vm1627_vm8, %v1638_v7, %v1639_v19  ;;  %v1410_v16 = vld [vmem:[#allocation2 + $0x60] sm:$0xfc]  ;;  %v1649_v14 = vrot.slane %v7871_v40, 2  ;;  %v1412_v45 = vld [vmem:[#allocation2 + $0x80] sm:$0x3] }
 0x217   :  { %2422 = vmatmul.mubr.f32.gmra.mrb[88].mxu0 %v1545_v28  ;;  %2905 = vmatmul.mubr.f32.gmra.mrb[88].mxu1 %v1545_v28  ;;  %v1632_v57 = vrot.slane %v7865_v13, 2  ;;  %v1656_v12 = vrot.slane %v1413_v63, 2  ;;  %v1648_v53 = vrot.slane %v1410_v16, 2  ;;  %v1415_v30 = vld [vmem:[#allocation2 + $0x98] sm:$0xfc]  ;;  %v7875_v43 = vld [vmem:[#allocation2 + $0xd0] sm:$0xff] }
 0x218   :  { %7011 = vmatpush1.bf16.msra.mxu0 %v7010_v50  ;;  %7203 = vmatpush1.bf16.msra.mxu1 %v7202_v62  ;;  %v1628_v62 = vrot.slane %v1402_v22, 2  ;;  %v1417_v56 = vld [vmem:[#allocation2 + $0xb8] sm:$0x3]  ;;  %v1661_v6 = vrot.slane %v1415_v30, 2  ;;  %v1414_v49 = vld [vmem:[#allocation2 + $0x90] sm:$0xfc] }
 0x219   :  { %2427 = vmatprep.mubr.f32.mxu0 %v1552_v39  ;;  %2910 = vmatprep.mubr.f32.mxu1 %v1552_v39  ;;  %v1633_v50 = vsel %vm1627_vm8, %v1631_v38, %v1632_v57  ;;  %v1637_v28 = vsel %vm1627_vm8, %v1632_v57, %v1636_v44  ;;  %v1650_v26 = vsel %vm1627_vm8, %v1648_v53, %v1649_v14  ;;  %v1666_v51 = vrot.slane %v1417_v56, 2  ;;  %v1419_v57 = vld [vmem:[#allocation2 + $0xc8] sm:$0xfc]  ;;  %v7874_v22 = vld [vmem:[#allocation2 + $0xd8] sm:$0xff]  ;;  %v1418_v38 = vld [vmem:[#allocation2 + $0xc0] sm:$0xfc] }
 0x21a   :  { %7013 = vmatprep.subr.bf16.mxu0 %v7012_v46  ;;  %7205 = vmatprep.subr.bf16.mxu1 %v7204_v33  ;;  %v1630_v60 = vsel %vm1627_vm8, %v1628_v62, %v1629_v17  ;;  %v7868_v46 = vld [vmem:[#allocation2 + $0x48] sm:$0xff]  ;;  %v1672_v20 = vrot.slane %v7874_v22, 2  ;;  %v1420_v15 = vld [vmem:[#allocation2 + $0xe0] sm:$0x3]  ;;  %v1668_v61 = vrot.slane %v1418_v38, 2 }
 0x21b   :  { %2428 = vmatmul.mubr.f32.gmra.mrb[90].mxu0 %v1550_v34  ;;  %2911 = vmatmul.mubr.f32.gmra.mrb[90].mxu1 %v1550_v34  ;;  %v1642_v33 = vrot.slane %v7868_v46, 2  ;;  %v1651_v34 = vrot.slane %v1411_v21, 2  ;;  %v1421_v17 = vld [vmem:[#allocation2 + $0xe8] sm:$0x3]  ;;  %v1674_v46 = vrot.slane %v1420_v15, 2  ;;  %v3798_v38 = vld [vmem:[%s13066_s5 + $0x80] sm:$0xff] }
 0x21c   :  { %7015 = vmatpush1.bf16.msra.mxu0 %v7014_v37  ;;  %7207 = vmatpush1.bf16.msra.mxu1 %v7206_v48  ;;  %v1646_v37 = vrot.slane %v1409_v18, 2  ;;  %v1408_v48 = vld [vmem:[#allocation2 + $0x50] sm:$0x3] }
 0x21d   :  { %2433 = vmatprep.mubr.f32.mxu0 %v1558_v27  ;;  %2916 = vmatprep.mubr.f32.mxu1 %v1558_v27  ;;  %v1643_v39 = vsel %vm1627_vm8, %v1641_v58, %v1642_v33  ;;  %v1644_v54 = vrot.slane %v1408_v48, 2  ;;  %v1653_v41 = vsel %vm1627_vm8, %v1651_v34, %v1652_v0  ;;  %v1654_v27 = vrot.slane %v1412_v45, 2  ;;  %v7876_v58 = vld [vmem:[#allocation2 + $0x108] sm:$0xff]  ;;  %v7878_v34 = vld [vmem:[#allocation2 + $0x138] sm:$0xff]  ;;  %v3800_v15 = vld [vmem:[%s13066_s5 + $0x90] sm:$0xff] }
 0x21e   :  { %7017 = vmatprep.subr.bf16.mxu0 %v7016_v8  ;;  %7209 = vmatprep.subr.bf16.mxu1 %v7208_v59  ;;  %v1647_v8 = vsel %vm1627_vm8, %v1642_v33, %v1646_v37  ;;  %v1423_v33 = vld [vmem:[#allocation2 + $0xf8] sm:$0xfc]  ;;  %v1682_v3 = vrot.slane %v7876_v58, 2  ;;  %v7877_v37 = vld [vmem:[#allocation2 + $0x100] sm:$0xff]  ;;  %v1692_v16 = vrot.slane %v7878_v34, 2  ;;  %v3831_v34 = vld [vmem:[%s13066_s5 + $0x188] sm:$0xff] }
 0x21f   :  { %2434 = vmatmul.mubr.f32.gmra.mrb[92].mxu0 %v1555_v47  ;;  %2917 = vmatmul.mubr.f32.gmra.mrb[92].mxu1 %v1555_v47  ;;  %v1645_v59 = vsel %vm1627_vm8, %v1639_v19, %v1644_v54  ;;  %v1655_v47 = vsel %vm1627_vm8, %v1649_v14, %v1654_v27  ;;  %v1681_v36 = vrot.slane %v1423_v33, 2  ;;  %v1422_v19 = vld [vmem:[#allocation2 + $0xf0] sm:$0xfc]  ;;  %v1679_v48 = vrot.slane %v7877_v37, 2  ;;  %v1424_v54 = vld [vmem:[#allocation2 + $0x110] sm:$0x3] }
 0x220   :  { %7019 = vmatpush1.bf16.msra.mxu0 %v7018_v52  ;;  %7211 = vmatpush1.bf16.msra.mxu1 %v7210_v1  ;;  %v1657_v52 = vsel %vm1627_vm8, %v1652_v0, %v1656_v12  ;;  %v7872_v1 = vld [vmem:[#allocation2 + $0xa8] sm:$0xff]  ;;  %v1678_v21 = vrot.slane %v1422_v19, 2  ;;  %v1684_v25 = vrot.slane %v1424_v54, 2  ;;  %v1426_v14 = vld [vmem:[#allocation2 + $0x120] sm:$0xfc]  ;;  %v7879_v12 = vld [vmem:[#allocation2 + $0x130] sm:$0xff] }
 0x221   :  { %2439 = vmatprep.mubr.f32.mxu0 %v1562_v42  ;;  %2922 = vmatprep.mubr.f32.mxu1 %v1562_v42  ;;  %v1662_v31 = vrot.slane %v7872_v1, 2  ;;  %v1416_v42 = vld [vmem:[#allocation2 + $0xb0] sm:$0x3]  ;;  %v1683_v7 = vsel %vm1627_vm8, %v1681_v36, %v1682_v3  ;;  %v1427_v0 = vld [vmem:[#allocation2 + $0x128] sm:$0xfc]  ;;  %v1689_v45 = vrot.slane %v7879_v12, 2 }
 0x222   :  { %7021 = vmatprep.subr.bf16.mxu0 %v7020_v11  ;;  %7213 = vmatprep.subr.bf16.mxu1 %v7212_v23  ;;  %v7873_v11 = vld [vmem:[#allocation2 + $0xa0] sm:$0xff]  ;;  %v1664_v13 = vrot.slane %v1416_v42, 2  ;;  %v1691_v40 = vrot.slane %v1427_v0, 2  ;;  %v1688_v30 = vrot.slane %v1426_v14, 2  ;;  %v3785_v33 = vld [vmem:[%s13066_s5 + $0x18] sm:$0xff]  ;;  %v3787_v19 = vld [vmem:[%s13066_s5 + $0x28] sm:$0xff] }
 0x223   :  { %2440 = vmatmul.mubr.f32.gmra.mrb[94].mxu0 %v1560_v55  ;;  %2923 = vmatmul.mubr.f32.gmra.mrb[94].mxu1 %v1560_v55  ;;  %v1659_v23 = vrot.slane %v7873_v11, 2  ;;  %v1663_v32 = vsel %vm1627_vm8, %v1661_v6, %v1662_v31  ;;  %v1667_v5 = vsel %vm1627_vm8, %v1662_v31, %v1666_v51  ;;  %v1671_v55 = vrot.slane %v1419_v57, 2  ;;  %v1428_v27 = vld [vmem:[#allocation2 + $0x140] sm:$0x3]  ;;  %v1431_v31 = vld [vmem:[#allocation2 + $0x158] sm:$0xfc] }
 0x224   :  { %7023 = vmatpush1.bf16.msra.mxu0 %v7022_v4  ;;  %7215 = vmatpush1.bf16.msra.mxu1 %v7214_v9  ;;  %v1658_v4 = vrot.slane %v1414_v49, 2  ;;  %v1693_v53 = vsel %vm1627_vm8, %v1691_v40, %v1692_v16  ;;  %v1694_v1 = vrot.slane %v1428_v27, 2  ;;  %v7880_v6 = vld [vmem:[#allocation2 + $0x168] sm:$0xff]  ;;  %v1701_v11 = vrot.slane %v1431_v31, 2  ;;  %v7881_v51 = vld [vmem:[#allocation2 + $0x160] sm:$0xff]  ;;  %v3804_v37 = vld [vmem:[%s13066_s5 + $0xb0] sm:$0xff] }
 0x225   :  { %2510 = vmatprep.mubr.f32.mxu0 %v1633_v50  ;;  %2993 = vmatprep.mubr.f32.mxu1 %v1633_v50  ;;  %v1665_v44 = vsel %vm1627_vm8, %v1659_v23, %v1664_v13  ;;  %v1669_v50 = vrot.slane %v7875_v43, 2  ;;  %v1673_v62 = vsel %vm1627_vm8, %v1671_v55, %v1672_v20  ;;  %v1702_v49 = vrot.slane %v7880_v6, 2  ;;  %v1432_v13 = vld [vmem:[#allocation2 + $0x170] sm:$0x3]  ;;  %v4295_v55 = vld [vmem:[%s13065_s6] sm:$0xff]  ;;  %v3789_v54 = vld [vmem:[%s13066_s5 + $0x38] sm:$0xff] }
 0x226   :  { %6775 = vmatprep.subr.mxu0 %v10521_v24  ;;  %v1660_v9 = vsel %vm1627_vm8, %v1658_v4, %v1659_v23  ;;  %v1430_v23 = vld [vmem:[#allocation2 + $0x150] sm:$0xfc]  ;;  %v1699_v42 = vrot.slane %v7881_v51, 2  ;;  %v1704_v22 = vrot.slane %v1432_v13, 2  ;;  %v3802_v58 = vld [vmem:[%s13066_s5 + $0xa0] sm:$0xff]  ;;  %v3791_v14 = vld [vmem:[%s13066_s5 + $0x48] sm:$0xff] }
 0x227   :  { %2511 = vmatmul.mubr.f32.vlgmr.msra.gmra.mrb[64].mxu0 %v1630_v60  ;;  %2994 = vmatmul.mubr.f32.vlgmr.msra.gmra.mrb[64].mxu1 %v1630_v60  ;;  %v1676_v60 = vrot.slane %v1421_v17, 2  ;;  %v1703_v4 = vsel %vm1627_vm8, %v1701_v11, %v1702_v49  ;;  %v1698_v57 = vrot.slane %v1430_v23, 2  ;;  %v3786_v36 = vld [vmem:[%s13066_s5 + $0x20] sm:$0xff]  ;;  %v3816_v27 = vld [vmem:[%s13066_s5 + $0x110] sm:$0xff]  ;;  %v3809_v31 = vld [vmem:[%s13066_s5 + $0xd8] sm:$0xff] }
 0x228   :  { %2516 = vmatprep.mubr.f32.mxu0 %v1637_v28  ;;  %2999 = vmatprep.mubr.f32.mxu1 %v1637_v28  ;;  %v1670_v28 = vsel %vm1627_vm8, %v1668_v61, %v1669_v50  ;;  %v1705_v17 = vsel %vm1627_vm8, %v1699_v42, %v1704_v22  ;;  %v3801_v61 = vld [vmem:[%s13066_s5 + $0x98] sm:$0xff]  ;;  %v3830_v0 = vld [vmem:[%s13066_s5 + $0x180] sm:$0xff]  ;;  %v3792_v11 = vld [vmem:[%s13066_s5 + $0x50] sm:$0xff] }
 0x229   :  { %v1677_v18 = vsel %vm1627_vm8, %v1672_v20, %v1676_v60  ;;  %6776 = vmatpush3.msra.mxu0 %v4295_v55  ;;  %v7248_v40 = vpack.c.bf16 %v3831_v34, %v3830_v0  ;;  %v3818_v51 = vld [vmem:[%s13066_s5 + $0x120] sm:$0xff]  ;;  %v3837_v13 = vld [vmem:[%s13066_s5 + $0x1b8] sm:$0xff] }
 0x22b   :  { %2517 = vmatmul.mubr.f32.gmra.mrb[66].mxu0 %v1635_v2  ;;  %3000 = vmatmul.mubr.f32.gmra.mrb[66].mxu1 %v1635_v2  ;;  %v1425_v2 = vld [vmem:[#allocation2 + $0x118] sm:$0x3] }
 0x22c   :  { %2522 = vmatprep.mubr.f32.mxu0 %v1643_v39  ;;  %3005 = vmatprep.mubr.f32.mxu1 %v1643_v39  ;;  %v1675_v39 = vsel %vm1627_vm8, %v1669_v50, %v1674_v46  ;;  %v3782_v50 = vld [vmem:[%s13066_s5] sm:$0xff]  ;;  %v3784_v46 = vld [vmem:[%s13066_s5 + $0x10] sm:$0xff] }
 0x22d   :  { %7249 = vmatprep.subr.bf16.mxu0 %v7248_v40  ;;  %v3844_v40 = vld [vmem:[%s13066_s5 + $0x1f0] sm:$0xff] }
 0x22f   :  { %2523 = vmatmul.mubr.f32.gmra.mrb[68].mxu0 %v1640_v10  ;;  %3006 = vmatmul.mubr.f32.gmra.mrb[68].mxu1 %v1640_v10  ;;  %v1686_v10 = vrot.slane %v1425_v2, 2 }
 0x230   :  { %2528 = vmatprep.mubr.f32.mxu0 %v1647_v8  ;;  %3011 = vmatprep.mubr.f32.mxu1 %v1647_v8  ;;  %v1680_v8 = vsel %vm1627_vm8, %v1678_v21, %v1679_v48 }
 0x231   :  { %v1687_v63 = vsel %vm1627_vm8, %v1682_v3, %v1686_v10  ;;  %v3803_v3 = vld [vmem:[%s13066_s5 + $0xa8] sm:$0xff]  ;;  %v3788_v10 = vld [vmem:[%s13066_s5 + $0x30] sm:$0xff] }
 0x232   :  { %v7224_v2 = vpack.c.bf16 %v3803_v3, %v3802_v58  ;;  %v7230_v21 = vpack.c.bf16 %v3789_v54, %v3788_v10  ;;  %v3822_v58 = vld [vmem:[%s13066_s5 + $0x140] sm:$0xff]  ;;  %v3823_v3 = vld [vmem:[%s13066_s5 + $0x148] sm:$0xff]  ;;  %v3825_v10 = vld [vmem:[%s13066_s5 + $0x158] sm:$0xff] }
 0x233   :  { %2529 = vmatmul.mubr.f32.gmra.mrb[70].mxu0 %v1645_v59  ;;  %3012 = vmatmul.mubr.f32.gmra.mrb[70].mxu1 %v1645_v59  ;;  %v1429_v59 = vld [vmem:[#allocation2 + $0x148] sm:$0x3]  ;;  %v3842_v54 = vld [vmem:[%s13066_s5 + $0x1e0] sm:$0xff] }
 0x234   :  { %2534 = vmatprep.mubr.f32.mxu0 %v1653_v41  ;;  %3017 = vmatprep.mubr.f32.mxu1 %v1653_v41  ;;  %v1685_v41 = vsel %vm1627_vm8, %v1679_v48, %v1684_v25  ;;  %v3805_v48 = vld [vmem:[%s13066_s5 + $0xb8] sm:$0xff]  ;;  %v3807_v25 = vld [vmem:[%s13066_s5 + $0xc8] sm:$0xff] }
 0x237   :  { %2535 = vmatmul.mubr.f32.gmra.mrb[72].mxu0 %v1650_v26  ;;  %3018 = vmatmul.mubr.f32.gmra.mrb[72].mxu1 %v1650_v26  ;;  %v1696_v26 = vrot.slane %v1429_v59, 2  ;;  %v3790_v59 = vld [vmem:[%s13066_s5 + $0x40] sm:$0xff] }
 0x238   :  { %2540 = vmatprep.mubr.f32.mxu0 %v1657_v52  ;;  %3023 = vmatprep.mubr.f32.mxu1 %v1657_v52  ;;  %v1690_v52 = vsel %vm1627_vm8, %v1688_v30, %v1689_v45  ;;  %v7234_v12 = vpack.c.bf16 %v3791_v14, %v3790_v59  ;;  %v3827_v59 = vld [vmem:[%s13066_s5 + $0x168] sm:$0xff]  ;;  %v3845_v14 = vld [vmem:[%s13066_s5 + $0x1f8] sm:$0xff] }
 0x239   :  { %v1697_v56 = vsel %vm1627_vm8, %v1692_v16, %v1696_v26  ;;  %v4294_v16 = vld [vmem:[%s13067_s8] sm:$0xff]  ;;  %v3833_v26 = vld [vmem:[%s13066_s5 + $0x198] sm:$0xff] }
 0x23b   :  { %2541 = vmatmul.mubr.f32.gmra.mrb[74].mxu0 %v1655_v47  ;;  %3024 = vmatmul.mubr.f32.gmra.mrb[74].mxu1 %v1655_v47  ;;  %v1433_v47 = vld [vmem:[#allocation2 + $0x178] sm:$0x3] }
 0x23c   :  { %2546 = vmatprep.mubr.f32.mxu0 %v1663_v32  ;;  %3029 = vmatprep.mubr.f32.mxu1 %v1663_v32  ;;  %v1695_v32 = vsel %vm1627_vm8, %v1689_v45, %v1694_v1  ;;  %v3808_v1 = vld [vmem:[%s13066_s5 + $0xd0] sm:$0xff] }
 0x23d   :  { %v7236_v6 = vpack.c.bf16 %v3809_v31, %v3808_v1  ;;  %v13166_v1 = vsub.s32 0, %v9192_v35 }
 0x23f   :  { %2547 = vmatmul.mubr.f32.gmra.mrb[76].mxu0 %v1660_v9  ;;  %3030 = vmatmul.mubr.f32.gmra.mrb[76].mxu1 %v1660_v9  ;;  %v1706_v9 = vrot.slane %v1433_v47, 2  ;;  %v3835_v47 = vld [vmem:[%s13066_s5 + $0x1a8] sm:$0xff] }
 0x240   :  { %2552 = vmatprep.mubr.f32.mxu0 %v1667_v5  ;;  %3035 = vmatprep.mubr.f32.mxu1 %v1667_v5  ;;  %v1700_v5 = vsel %vm1627_vm8, %v1698_v57, %v1699_v42  ;;  %v3819_v42 = vld [vmem:[%s13066_s5 + $0x128] sm:$0xff]  ;;  %v3810_v57 = vld [vmem:[%s13066_s5 + $0xe0] sm:$0xff] }
 0x241   :  { %v1707_v20 = vsel %vm1627_vm8, %v1702_v49, %v1706_v9  ;;  %v3834_v49 = vld [vmem:[%s13066_s5 + $0x1a0] sm:$0xff]  ;;  %v3836_v9 = vld [vmem:[%s13066_s5 + $0x1b0] sm:$0xff]  ;;  %v7258_v22 = vpack.c.bf16 %v3819_v42, %v3818_v51 }
 0x242   :  { %v7256_v23 = vpack.c.bf16 %v3835_v47, %v3834_v49  ;;  %v7260_v55 = vpack.c.bf16 %v3837_v13, %v3836_v9 }
 0x243   :  { %2553 = vmatmul.mubr.f32.gmra.mrb[78].mxu0 %v1665_v44  ;;  %3036 = vmatmul.mubr.f32.gmra.mrb[78].mxu1 %v1665_v44  ;;  %v3799_v44 = vld [vmem:[%s13066_s5 + $0x88] sm:$0xff] }
 0x244   :  { %2558 = vmatprep.mubr.f32.mxu0 %v1673_v62  ;;  %3041 = vmatprep.mubr.f32.mxu1 %v1673_v62  ;;  %v7216_v43 = vpack.c.bf16 %v3799_v44, %v3798_v38  ;;  %v3783_v62 = vld [vmem:[%s13066_s5 + $0x8] sm:$0xff]  ;;  %v3820_v38 = vld [vmem:[%s13066_s5 + $0x130] sm:$0xff]  ;;  %v3821_v44 = vld [vmem:[%s13066_s5 + $0x138] sm:$0xff] }
 0x245   :  { %v7218_v60 = vpack.c.bf16 %v3783_v62, %v3782_v50  ;;  %v3838_v50 = vld [vmem:[%s13066_s5 + $0x1c0] sm:$0xff]  ;;  %v3839_v62 = vld [vmem:[%s13066_s5 + $0x1c8] sm:$0xff] }
 0x246   :  { %7217 = vmatprep.subr.bf16.mxu1 %v7216_v43  ;;  %v3795_v43 = vld [vmem:[%s13066_s5 + $0x68] sm:$0xff] }
 0x247   :  { %2559 = vmatmul.mubr.f32.gmra.mrb[80].mxu0 %v1670_v28  ;;  %3042 = vmatmul.mubr.f32.gmra.mrb[80].mxu1 %v1670_v28  ;;  %v7220_v28 = vpack.c.bf16 %v3801_v61, %v3800_v15  ;;  %v3812_v15 = vld [vmem:[%s13066_s5 + $0xf0] sm:$0xff]  ;;  %v3813_v61 = vld [vmem:[%s13066_s5 + $0xf8] sm:$0xff] }
 0x248   :  { %2564 = vmatprep.mubr.f32.mxu0 %v1677_v18  ;;  %3047 = vmatprep.mubr.f32.mxu1 %v1677_v18  ;;  %v7222_v18 = vpack.c.bf16 %v3785_v33, %v3784_v46  ;;  %v7244_v46 = vpack.c.bf16 %v3813_v61, %v3812_v15  ;;  %v3796_v33 = vld [vmem:[%s13066_s5 + $0x70] sm:$0xff] }
 0x249   :  { %7219 = vmatpush3.bf16.msra.mxu1 %v7218_v60 }
 0x24a   :  { %7221 = vmatprep.subr.bf16.mxu1 %v7220_v28  ;;  %v7262_v28 = vpack.c.bf16 %v3821_v44, %v3820_v38 }
 0x24b   :  { %2565 = vmatmul.mubr.f32.gmra.mrb[82].mxu0 %v1675_v39  ;;  %3048 = vmatmul.mubr.f32.gmra.mrb[82].mxu1 %v1675_v39  ;;  %v7226_v39 = vpack.c.bf16 %v3787_v19, %v3786_v36  ;;  %v3840_v36 = vld [vmem:[%s13066_s5 + $0x1d0] sm:$0xff]  ;;  %v3841_v19 = vld [vmem:[%s13066_s5 + $0x1d8] sm:$0xff] }
 0x24c   :  { %2570 = vmatprep.mubr.f32.mxu0 %v1683_v7  ;;  %3053 = vmatprep.mubr.f32.mxu1 %v1683_v7  ;;  %v7228_v7 = vpack.c.bf16 %v3805_v48, %v3804_v37  ;;  %v7266_v37 = vpack.c.bf16 %v3823_v3, %v3822_v58  ;;  %v7268_v48 = vpack.c.bf16 %v3841_v19, %v3840_v36 }
 0x24d   :  { %7223 = vmatpush3.bf16.msra.mxu1 %v7222_v18  ;;  %v7264_v18 = vpack.c.bf16 %v3839_v62, %v3838_v50 }
 0x24e   :  { %7225 = vmatprep.subr.bf16.mxu1 %v7224_v2  ;;  %v3797_v2 = vld [vmem:[%s13066_s5 + $0x78] sm:$0xff] }
 0x24f   :  { %2571 = vmatmul.mubr.f32.gmra.mrb[84].mxu0 %v1680_v8  ;;  %3054 = vmatmul.mubr.f32.gmra.mrb[84].mxu1 %v1680_v8  ;;  %v3806_v8 = vld [vmem:[%s13066_s5 + $0xc0] sm:$0xff] }
 0x250   :  { %2576 = vmatprep.mubr.f32.mxu0 %v1687_v63  ;;  %3059 = vmatprep.mubr.f32.mxu1 %v1687_v63  ;;  %v7232_v63 = vpack.c.bf16 %v3807_v25, %v3806_v8  ;;  %v3862_v8 = vld [vmem:[%s13066_s5 + $0x280] sm:$0xff]  ;;  %v3863_v25 = vld [vmem:[%s13066_s5 + $0x288] sm:$0xff] }
 0x251   :  { %7227 = vmatpush3.bf16.msra.mxu1 %v7226_v39  ;;  %v7246_v39 = vpack.c.bf16 %v3797_v2, %v3796_v33  ;;  %v7280_v0 = vpack.c.bf16 %v3863_v25, %v3862_v8 }
 0x252   :  { %7229 = vmatprep.subr.bf16.mxu1 %v7228_v7  ;;  %v3824_v7 = vld [vmem:[%s13066_s5 + $0x150] sm:$0xff] }
 0x253   :  { %2577 = vmatmul.mubr.f32.gmra.mrb[86].mxu0 %v1685_v41  ;;  %3060 = vmatmul.mubr.f32.gmra.mrb[86].mxu1 %v1685_v41  ;;  %v3815_v41 = vld [vmem:[%s13066_s5 + $0x108] sm:$0xff] }
 0x254   :  { %2582 = vmatprep.mubr.f32.mxu0 %v1693_v53  ;;  %3065 = vmatprep.mubr.f32.mxu1 %v1693_v53  ;;  %v3832_v53 = vld [vmem:[%s13066_s5 + $0x190] sm:$0xff] }
 0x255   :  { %7231 = vmatpush3.bf16.msra.mxu1 %v7230_v21  ;;  %v7252_v30 = vpack.c.bf16 %v3833_v26, %v3832_v53  ;;  %v3843_v21 = vld [vmem:[%s13066_s5 + $0x1e8] sm:$0xff]  ;;  %v3894_v53 = vld [vmem:[%s13066_s5 + $0x380] sm:$0xff] }
 0x256   :  { %7233 = vmatprep.subr.bf16.mxu1 %v7232_v63  ;;  %v7270_v63 = vpack.c.bf16 %v3825_v10, %v3824_v7  ;;  %v7272_v34 = vpack.c.bf16 %v3843_v21, %v3842_v54  ;;  %v3895_v26 = vld [vmem:[%s13066_s5 + $0x388] sm:$0xff] }
 0x257   :  { %2583 = vmatmul.mubr.f32.gmra.mrb[88].mxu0 %v1690_v52  ;;  %3066 = vmatmul.mubr.f32.gmra.mrb[88].mxu1 %v1690_v52  ;;  %v3817_v52 = vld [vmem:[%s13066_s5 + $0x118] sm:$0xff] }
 0x258   :  { %2588 = vmatprep.mubr.f32.mxu0 %v1697_v56  ;;  %3071 = vmatprep.mubr.f32.mxu1 %v1697_v56  ;;  %v7254_v56 = vpack.c.bf16 %v3817_v52, %v3816_v27  ;;  %v3122_v52 = vld [vmem:[%s13068_s4] sm:$0x3] }
 0x259   :  { %7235 = vmatpush3.bf16.msra.mxu1 %v7234_v12  ;;  %v3828_v12 = vld [vmem:[%s13066_s5 + $0x170] sm:$0xff]  ;;  %v10770_v31 = vrot.slane %v3122_v52, %v13166_v1  ;;  %v10774_v49 = vrot.slane %v3122_v52, %v1179_v29 }
 0x25a   :  { %7237 = vmatprep.subr.bf16.mxu1 %v7236_v6 }
 0x25b   :  { %2589 = vmatmul.mubr.f32.gmra.mrb[90].mxu0 %v1695_v32  ;;  %3072 = vmatmul.mubr.f32.gmra.mrb[90].mxu1 %v1695_v32  ;;  %v3793_v32 = vld [vmem:[%s13066_s5 + $0x58] sm:$0xff] }
 0x25c   :  { %2594 = vmatprep.mubr.f32.mxu0 %v1703_v4  ;;  %3077 = vmatprep.mubr.f32.mxu1 %v1703_v4  ;;  %v7238_v4 = vpack.c.bf16 %v3793_v32, %v3792_v11 }
 0x25e   :  { %7239 = vmatpush3.bf16.msra.mxu1 %v7238_v4 }
 0x25f   :  { %2595 = vmatmul.mubr.f32.gmra.mrb[92].mxu0 %v1700_v5  ;;  %3078 = vmatmul.mubr.f32.gmra.mrb[92].mxu1 %v1700_v5  ;;  %v3811_v5 = vld [vmem:[%s13066_s5 + $0xe8] sm:$0xff] }
 0x260   :  { %2600 = vmatprep.mubr.f32.mxu0 %v1707_v20  ;;  %3083 = vmatprep.mubr.f32.mxu1 %v1707_v20  ;;  %v7240_v20 = vpack.c.bf16 %v3811_v5, %v3810_v57 }
 0x262   :  { %7241 = vmatprep.subr.bf16.mxu1 %v7240_v20 }
 0x263   :  { %2601 = vmatmul.mubr.f32.gmra.mrb[94].mxu0 %v1705_v17  ;;  %3084 = vmatmul.mubr.f32.gmra.mrb[94].mxu1 %v1705_v17  ;;  %v3794_v17 = vld [vmem:[%s13066_s5 + $0x60] sm:$0xff] }
 0x264   :  { %6777 = vmatprep.mubr.msk.f32.mxu0 %vm7886_vm10, %v10521_v24  ;;  %v3814_v24 = vld [vmem:[%s13066_s5 + $0x100] sm:$0xff]  ;;  %v7242_v60 = vpack.c.bf16 %v3795_v43, %v3794_v17 }
 0x265   :  { %v7250_v45 = vpack.c.bf16 %v3815_v41, %v3814_v24  ;;  %v7276_v41 = vpack.c.bf16 %v3845_v14, %v3844_v40 }
 0x266   :  { %7243 = vmatpush3.bf16.msra.mxu1 %v7242_v60 }
 0x267   :  { %6778 = vmatmul.mubr.msk.f32.vlgmr.msra.gmra.mrb[96].mxu0 %vm4296_vm9, %v4294_v16  ;;  %7245 = vmatprep.subr.bf16.mxu1 %v7244_v46  ;;  %v3826_v16 = vld [vmem:[%s13066_s5 + $0x160] sm:$0xff]  ;;  %v7887_v46 = vmov 1935823168  }
 0x268   :  { %7251 = vmatpush3.bf16.msra.mxu0 %v7250_v45  ;;  %v7274_v24 = vpack.c.bf16 %v3827_v59, %v3826_v16  ;;  %v3829_v45 = vld [vmem:[%s13066_s5 + $0x178] sm:$0xff]  ;;  %v3559_v33 = vunpack.c.l.s4 %v7887_v46 }
 0x269   :  { %7253 = vmatprep.subr.bf16.mxu0 %v7252_v30  ;;  %v7278_v27 = vpack.c.bf16 %v3829_v45, %v3828_v12  ;;  %v7312_v30 = vpack.c.bf16 %v3895_v26, %v3894_v53 }
 0x26a   :  { %7247 = vmatpush3.bf16.msra.mxu1 %v7246_v39  ;;  %v3560_v25 = vunpack.c.0.s8 %v3559_v33 }
 0x26b   :  { %7281 = vmatprep.subr.bf16.mxu1 %v7280_v0 }
 0x26c   :  { %7255 = vmatpush3.bf16.msra.mxu0 %v7254_v56 }
 0x26d   :  { %7257 = vmatprep.subr.bf16.mxu0 %v7256_v23 }
 0x270   :  { %7259 = vmatpush3.bf16.msra.mxu0 %v7258_v22 }
 0x271   :  { %7261 = vmatprep.subr.bf16.mxu0 %v7260_v55 }
 0x274   :  { %7263 = vmatpush3.bf16.msra.mxu0 %v7262_v28 }
 0x275   :  { %7265 = vmatprep.subr.bf16.mxu0 %v7264_v18 }
 0x278   :  { %7267 = vmatpush3.bf16.msra.mxu0 %v7266_v37 }
 0x279   :  { %7269 = vmatprep.subr.bf16.mxu0 %v7268_v48 }
 0x27c   :  { %7271 = vmatpush3.bf16.msra.mxu0 %v7270_v63 }
 0x27d   :  { %7273 = vmatprep.subr.bf16.mxu0 %v7272_v34 }
 0x280   :  { %7275 = vmatpush3.bf16.msra.mxu0 %v7274_v24 }
 0x281   :  { %7277 = vmatprep.subr.bf16.mxu0 %v7276_v41 }
 0x284   :  { %7279 = vmatpush3.bf16.msra.mxu0 %v7278_v27 }
 0x285   :  { %7313 = vmatprep.subr.bf16.mxu0 %v7312_v30 }
 0x2fa   :  { %v2512_v56 = vpop.f32.mrb[64].mxu0  ;;  %v2995_v6 = vpop.f32.mrb[64].mxu1 }
 0x2fb   :  { %v3090_v47 = vmax.f32 %v2512_v56, %v2995_v6  ;;  %v2514_v11 = vpop.f32.mrb[65].mxu0  ;;  %v2997_v23 = vpop.f32.mrb[65].mxu1  ;;  %v10798_v6 = vsub.s32 %v3560_v25, %v9192_v35 }
 0x2fc   :  { %v3091_v32 = vmax.f32 %v2514_v11, %v2997_v23 }
 0x2fd   :  { %v3134_v51 = vadd.f32 %v10770_v31, %v3090_v47 }
 0x2fe   :  { %v3135_v42 = vadd.f32 %v10774_v49, %v3091_v32  ;;  %v2518_v4 = vpop.f32.mrb[66].mxu0  ;;  %v3001_v9 = vpop.f32.mrb[66].mxu1 }
 0x2ff   :  { %v3166_v13 = vmax.f32 %v3134_v51, 0.0  ;;  %v3092_v57 = vmax.f32 %v2518_v4, %v3001_v9  ;;  %v2520_v5 = vpop.f32.mrb[67].mxu0  ;;  %v3003_v22 = vpop.f32.mrb[67].mxu1 }
 0x300   :  { %v3167_v20 = vmax.f32 %v3135_v42, 0.0  ;;  %v3093_v17 = vmax.f32 %v2520_v5, %v3003_v22 }
 0x301   :  { %3198 = vst [vmem:[#allocation3] sm:$0xff] %v3166_v13  ;;  %v3136_v29 = vadd.f32 %v10770_v31, %v3092_v57 }
 0x302   :  { %3199 = vst [vmem:[#allocation3 + $0x8] sm:$0xff] %v3167_v20  ;;  %v3137_v55 = vadd.f32 %v10774_v49, %v3093_v17  ;;  %v2524_v38 = vpop.f32.mrb[68].mxu0  ;;  %v3007_v44 = vpop.f32.mrb[68].mxu1 }
 0x303   :  { %v3168_v43 = vmax.f32 %v3136_v29, 0.0  ;;  %v3094_v50 = vmax.f32 %v2524_v38, %v3007_v44  ;;  %v2526_v62 = vpop.f32.mrb[69].mxu0  ;;  %v3009_v60 = vpop.f32.mrb[69].mxu1 }
 0x304   :  { %v3169_v15 = vmax.f32 %v3137_v55, 0.0  ;;  %v3095_v61 = vmax.f32 %v2526_v62, %v3009_v60 }
 0x305   :  { %3200 = vst [vmem:[#allocation3 + $0x10] sm:$0xff] %v3168_v43  ;;  %v3138_v28 = vadd.f32 %v10770_v31, %v3094_v50  ;;  %v10783_v8 = vrot.slane %v3168_v43, 1 }
 0x306   :  { %3201 = vst [vmem:[#allocation3 + $0x18] sm:$0xff] %v3169_v15  ;;  %v3139_v18 = vadd.f32 %v10774_v49, %v3095_v61  ;;  %v2530_v58 = vpop.f32.mrb[70].mxu0  ;;  %v3013_v3 = vpop.f32.mrb[70].mxu1  ;;  %v10786_v59 = vrot.slane %v3169_v15, 1 }
 0x307   :  { %v3170_v2 = vmax.f32 %v3138_v28, 0.0  ;;  %v3096_v36 = vmax.f32 %v2530_v58, %v3013_v3  ;;  %v2532_v19 = vpop.f32.mrb[71].mxu0  ;;  %v3015_v39 = vpop.f32.mrb[71].mxu1 }
 0x308   :  { %v3171_v37 = vmax.f32 %v3139_v18, 0.0  ;;  %v3097_v48 = vmax.f32 %v2532_v19, %v3015_v39  ;;  %v3264_v7 = vld [vmem:[#allocation3] sm:$0xfe] }
 0x309   :  { %v3140_v10 = vadd.f32 %v10770_v31, %v3096_v36  ;;  %v3265_v54 = vld [vmem:[#allocation3 + $0x8] sm:$0xfe]  ;;  %v3332_v21 = vrot.slane %v3264_v7, 1  ;;  %v10793_v52 = vrot.slane %v3170_v2, 1 }
 0x30a   :  { %v3141_v0 = vadd.f32 %v10774_v49, %v3097_v48  ;;  %v2536_v63 = vpop.f32.mrb[72].mxu0  ;;  %v3019_v34 = vpop.f32.mrb[72].mxu1  ;;  %v3335_v16 = vrot.slane %v3265_v54, 1  ;;  %v10801_v32 = vrot.slane %v3171_v37, 1 }
 0x30b   :  { %v3172_v40 = vmax.f32 %v3140_v10, 0.0  ;;  %v3098_v14 = vmax.f32 %v2536_v63, %v3019_v34  ;;  %v2538_v24 = vpop.f32.mrb[73].mxu0  ;;  %v3021_v41 = vpop.f32.mrb[73].mxu1  ;;  %v3334_v12 = vsel %vm1482_vm7, %v3332_v21, %v10783_v8 }
 0x30c   :  { %v3173_v45 = vmax.f32 %v3141_v0, 0.0  ;;  %v3099_v53 = vmax.f32 %v2538_v24, %v3021_v41  ;;  %v3337_v26 = vsel %vm1482_vm7, %v3335_v16, %v10786_v59  ;;  %v3430_v27 = vmax.f32 %v3166_v13, %v3334_v12 }
 0x30d   :  { %3204 = vst [vmem:[#allocation3 + $0x30] sm:$0xff] %v3172_v40  ;;  %v3142_v30 = vadd.f32 %v10770_v31, %v3098_v14  ;;  %v10795_v1 = vrot.slane %v3172_v40, 1  ;;  %v3431_v56 = vmax.f32 %v3167_v20, %v3337_v26 }
 0x30e   :  { %3205 = vst [vmem:[#allocation3 + $0x38] sm:$0xff] %v3173_v45  ;;  %v3143_v47 = vadd.f32 %v10774_v49, %v3099_v53  ;;  %v2542_v11 = vpop.f32.mrb[74].mxu0  ;;  %v3025_v23 = vpop.f32.mrb[74].mxu1  ;;  %v10803_v51 = vrot.slane %v3173_v45, 1  ;;  %v7888_v53 = vmov 1966171168  }
 0x30f   :  { %v3174_v42 = vmax.f32 %v3142_v30, 0.0  ;;  %v3100_v4 = vmax.f32 %v2542_v11, %v3025_v23  ;;  %v2544_v9 = vpop.f32.mrb[75].mxu0  ;;  %v3027_v13 = vpop.f32.mrb[75].mxu1  ;;  %v3343_v57 = vsel %vm1482_vm7, %v10793_v52, %v10795_v1  ;;  %v3494_v5 = vcombine.low %v3430_v27, %v3431_v56 }
 0x310   :  { %v3175_v22 = vmax.f32 %v3143_v47, 0.0  ;;  %v3101_v20 = vmax.f32 %v2544_v9, %v3027_v13  ;;  %v3345_v17 = vsel %vm1482_vm7, %v10801_v32, %v10803_v51  ;;  %v3434_v29 = vmax.f32 %v3170_v2, %v3343_v57 }
 0x311   :  { %v3144_v55 = vadd.f32 %v10770_v31, %v3100_v4  ;;  %v3435_v38 = vmax.f32 %v3171_v37, %v3345_v17  ;;  %v3495_v62 = vcombine.high %v3430_v27, %v3431_v56  ;;  %v10813_v3 = vrot.slane %v3174_v42, 1 }
 0x312   :  { %v3145_v44 = vadd.f32 %v10774_v49, %v3101_v20  ;;  %v2548_v43 = vpop.f32.mrb[76].mxu0  ;;  %v3031_v50 = vpop.f32.mrb[76].mxu1  ;;  %v10816_v2 = vrot.slane %v3494_v5, %v10798_v6  ;;  %v10819_v19 = vrot.slane %v3175_v22, 1  ;;  %v4411_v26 = vunpack.c.l.s4 %v7888_v53 }
 0x313   :  { %v3176_v60 = vmax.f32 %v3144_v55, 0.0  ;;  %v3102_v15 = vmax.f32 %v2548_v43, %v3031_v50  ;;  %v2550_v61 = vpop.f32.mrb[77].mxu0  ;;  %v3033_v28 = vpop.f32.mrb[77].mxu1  ;;  %v3498_v46 = vcombine.low %v3434_v29, %v3435_v38  ;;  %v3499_v33 = vcombine.high %v3434_v29, %v3435_v38 }
 0x314   :  { %v3177_v18 = vmax.f32 %v3145_v44, 0.0  ;;  %v3103_v58 = vmax.f32 %v2550_v61, %v3033_v28  ;;  %v10830_v21 = vrot.slane %v3495_v62, %v10798_v6  ;;  %v4412_v55 = vunpack.c.0.s8 %v4411_v26 }
 0x315   :  { %3208 = vst [vmem:[#allocation3 + $0x50] sm:$0xff] %v3176_v60  ;;  %v3146_v36 = vadd.f32 %v10770_v31, %v3102_v15  ;;  %v10821_v39 = vrot.slane %v3176_v60, 1  ;;  %v10824_v37 = vrot.slane %v3498_v46, %v10798_v6  ;;  %v10833_v25 = vrot.slane %v3499_v33, %v10798_v6 }
 0x316   :  { %3209 = vst [vmem:[#allocation3 + $0x58] sm:$0xff] %v3177_v18  ;;  %v3147_v48 = vadd.f32 %v10774_v49, %v3103_v58  ;;  %v2554_v7 = vpop.f32.mrb[78].mxu0  ;;  %v3037_v10 = vpop.f32.mrb[78].mxu1  ;;  %v10827_v54 = vrot.slane %v3177_v18, 1 }
 0x317   :  { %v3178_v0 = vmax.f32 %v3146_v36, 0.0  ;;  %v3104_v63 = vmax.f32 %v2554_v7, %v3037_v10  ;;  %v2556_v34 = vpop.f32.mrb[79].mxu0  ;;  %v3039_v16 = vpop.f32.mrb[79].mxu1  ;;  %v3351_v40 = vsel %vm1482_vm7, %v10813_v3, %v10821_v39  ;;  %v4402_v14 = vcombine.low %v10816_v2, %v10824_v37 }
 0x318   :  { %v3179_v24 = vmax.f32 %v3147_v48, 0.0  ;;  %v3105_v41 = vmax.f32 %v2556_v34, %v3039_v16  ;;  %v3353_v12 = vsel %vm1482_vm7, %v10819_v19, %v10827_v54  ;;  %v3438_v45 = vmax.f32 %v3174_v42, %v3351_v40 }
 0x319   :  { %v3148_v27 = vadd.f32 %v10770_v31, %v3104_v63  ;;  %v3439_v30 = vmax.f32 %v3175_v22, %v3353_v12  ;;  %v4403_v23 = vcombine.high %v10816_v2, %v10824_v37  ;;  %v4538_v4 = vcombine.low %v10830_v21, %v10833_v25 }
 0x31a   :  { %v3149_v56 = vadd.f32 %v10774_v49, %v3105_v41  ;;  %v2560_v47 = vpop.f32.mrb[80].mxu0  ;;  %v3043_v11 = vpop.f32.mrb[80].mxu1  ;;  %v10850_v38 = vrot.slane %v3178_v0, 1  ;;  %v10855_v60 = vrot.slane %v3179_v24, 1  ;;  %v10869_v16 = vsub.s32 %v4412_v55, %v9192_v35 }
 0x31b   :  { %v3180_v9 = vmax.f32 %v3148_v27, 0.0  ;;  %v3106_v13 = vmax.f32 %v2560_v47, %v3043_v11  ;;  %v2562_v57 = vpop.f32.mrb[81].mxu0  ;;  %v3045_v5 = vpop.f32.mrb[81].mxu1  ;;  %v3502_v42 = vcombine.low %v3438_v45, %v3439_v30  ;;  %v3503_v20 = vcombine.high %v3438_v45, %v3439_v30 }
 0x31c   :  { %v3181_v17 = vmax.f32 %v3149_v56, 0.0  ;;  %v3107_v29 = vmax.f32 %v2562_v57, %v3045_v5 }
 0x31d   :  { %3212 = vst [vmem:[#allocation3 + $0x70] sm:$0xff] %v3180_v9  ;;  %v3150_v22 = vadd.f32 %v10770_v31, %v3106_v13  ;;  %v10852_v44 = vrot.slane %v3180_v9, 1  ;;  %v10874_v9 = vrot.slane %v3503_v20, %v10798_v6 }
 0x31e   :  { %3213 = vst [vmem:[#allocation3 + $0x78] sm:$0xff] %v3181_v17  ;;  %v3151_v43 = vadd.f32 %v10774_v49, %v3107_v29  ;;  %v2566_v50 = vpop.f32.mrb[82].mxu0  ;;  %v3049_v62 = vpop.f32.mrb[82].mxu1  ;;  %v10857_v15 = vrot.slane %v3181_v17, 1 }
 0x31f   :  { %13167 = vst [vmem:[#allocation4_spill] sm:$0xff] %v10852_v44  ;;  %v3182_v28 = vmax.f32 %v3150_v22, 0.0  ;;  %v3108_v46 = vmax.f32 %v2566_v50, %v3049_v62  ;;  %v2568_v33 = vpop.f32.mrb[83].mxu0  ;;  %v3051_v18 = vpop.f32.mrb[83].mxu1  ;;  %v3359_v58 = vsel %vm1482_vm7, %v10850_v38, %v10852_v44 }
 0x320   :  { %13168 = vst [vmem:[#allocation5_spill] sm:$0xff] %v10857_v15  ;;  %v3183_v36 = vmax.f32 %v3151_v43, 0.0  ;;  %v3109_v48 = vmax.f32 %v2568_v33, %v3051_v18  ;;  %v3361_v7 = vsel %vm1482_vm7, %v10855_v60, %v10857_v15  ;;  %v3442_v10 = vmax.f32 %v3178_v0, %v3359_v58 }
 0x321   :  { %v3152_v63 = vadd.f32 %v10770_v31, %v3108_v46  ;;  %v3443_v34 = vmax.f32 %v3179_v24, %v3361_v7  ;;  %v3620_v0 = vrot.slane %v3502_v42, %v10798_v6  ;;  %v10877_v24 = vrot.slane %v3182_v28, 1 }
 0x322   :  { %v3153_v40 = vadd.f32 %v10774_v49, %v3109_v48  ;;  %v2572_v41 = vpop.f32.mrb[84].mxu0  ;;  %v3055_v12 = vpop.f32.mrb[84].mxu1  ;;  %v10883_v55 = vrot.slane %v3183_v36, 1 }
 0x323   :  { %v3184_v45 = vmax.f32 %v3152_v63, 0.0  ;;  %v3110_v53 = vmax.f32 %v2572_v41, %v3055_v12  ;;  %v2574_v26 = vpop.f32.mrb[85].mxu0  ;;  %v3057_v27 = vpop.f32.mrb[85].mxu1  ;;  %v3506_v30 = vcombine.low %v3442_v10, %v3443_v34  ;;  %v3507_v56 = vcombine.high %v3442_v10, %v3443_v34  ;;  %13169 = vst [vmem:[#allocation6_spill] sm:$0xff] %v10877_v24 }
 0x324   :  { %v3185_v47 = vmax.f32 %v3153_v40, 0.0  ;;  %v3111_v11 = vmax.f32 %v2574_v26, %v3057_v27  ;;  %13171 = vst [vmem:[#allocation8_spill] sm:$0xff] %v10883_v55  ;;  %v10903_v34 = vrot.slane %v4402_v14, %v10869_v16 }
 0x325   :  { %3216 = vst [vmem:[#allocation3 + $0x90] sm:$0xff] %v3184_v45  ;;  %v3154_v35 = vadd.f32 %v10770_v31, %v3110_v53  ;;  %v10879_v13 = vrot.slane %v3184_v45, 1  ;;  %v3648_v57 = vrot.slane %v3506_v30, %v10798_v6  ;;  %v10888_v20 = vrot.slane %v3507_v56, %v10798_v6 }
 0x326   :  { %3217 = vst [vmem:[#allocation3 + $0x98] sm:$0xff] %v3185_v47  ;;  %v3155_v5 = vadd.f32 %v10774_v49, %v3111_v11  ;;  %v2578_v17 = vpop.f32.mrb[86].mxu0  ;;  %v3061_v29 = vpop.f32.mrb[86].mxu1  ;;  %v10885_v42 = vrot.slane %v3185_v47, 1 }
 0x327   :  { %13170 = vst [vmem:[#allocation7_spill] sm:$0xff] %v10879_v13  ;;  %v3186_v22 = vmax.f32 %v3154_v35, 0.0  ;;  %v3112_v43 = vmax.f32 %v2578_v17, %v3061_v29  ;;  %v2580_v50 = vpop.f32.mrb[87].mxu0  ;;  %v3063_v62 = vpop.f32.mrb[87].mxu1  ;;  %v3367_v46 = vsel %vm1482_vm7, %v10877_v24, %v10879_v13  ;;  %v4404_v33 = vcombine.low %v3620_v0, %v3648_v57  ;;  %v11130_v13 = vld [vmem:[%s13066_s5 + $0x2b0] sm:$0xff] }
 0x328   :  { %13172 = vst [vmem:[#allocation9_spill] sm:$0xff] %v10885_v42  ;;  %v3187_v18 = vmax.f32 %v3155_v5, 0.0  ;;  %v3113_v58 = vmax.f32 %v2580_v50, %v3063_v62  ;;  %v3369_v48 = vsel %vm1482_vm7, %v10883_v55, %v10885_v42  ;;  %v10896_v7 = vmax.f32 %v3182_v28, %v3367_v46  ;;  %v10977_v62 = vld [vmem:[%s13066_s5 + $0x208] sm:$0xff]  ;;  %v11044_v42 = vld [vmem:[%s13066_s5 + $0x210] sm:$0xff] }
 0x329   :  { %v3156_v10 = vadd.f32 %v10770_v31, %v3112_v43  ;;  %v3447_v63 = vmax.f32 %v3183_v36, %v3369_v48  ;;  %v10906_v40 = vrot.slane %v4404_v33, %v10869_v16  ;;  %v4405_v53 = vcombine.high %v3620_v0, %v3648_v57  ;;  %13185 = vst [vmem:[#allocation22_spill] sm:$0xff] %v11044_v42  ;;  %v11216_v42 = vld [vmem:[%s13066_s5 + $0x240] sm:$0xff] }
 0x32a   :  { %v3157_v41 = vadd.f32 %v10774_v49, %v3113_v58  ;;  %v2584_v12 = vpop.f32.mrb[88].mxu0  ;;  %v3067_v45 = vpop.f32.mrb[88].mxu1  ;;  %v10913_v28 = vrot.slane %v4403_v23, %v10869_v16  ;;  %v4540_v36 = vcombine.low %v10874_v9, %v10888_v20  ;;  %v10928_v23 = vrot.slane %v3186_v22, 1 }
 0x32b   :  { %v3188_v26 = vmax.f32 %v3156_v10, 0.0  ;;  %v3114_v14 = vmax.f32 %v2584_v12, %v3067_v45  ;;  %v2586_v27 = vpop.f32.mrb[89].mxu0  ;;  %v3069_v30 = vpop.f32.mrb[89].mxu1  ;;  %v3510_v56 = vcombine.low %v10896_v7, %v3447_v63  ;;  %v10923_v2 = vrot.slane %v4405_v53, %v10869_v16 }
 0x32c   :  { %v3189_v11 = vmax.f32 %v3157_v41, 0.0  ;;  %v3115_v0 = vmax.f32 %v2586_v27, %v3069_v30  ;;  %13173 = vst [vmem:[#allocation10_spill] sm:$0xff] %v10928_v23  ;;  %v10935_v43 = vrot.slane %v3187_v18, 1  ;;  %v13210_v44 = vcombine.high %v10903_v34, %v10906_v40 }
 0x32d   :  { %3220 = vst [vmem:[#allocation3 + $0xb0] sm:$0xff] %v3188_v26  ;;  %v10926_v37 = vadd.f32 %v10770_v31, %v3114_v14  ;;  %v10930_v57 = vrot.slane %v3188_v26, 1  ;;  %v10953_v30 = vrot.slane %v3510_v56, %v10798_v6 }
 0x32e   :  { %3221 = vst [vmem:[#allocation3 + $0xb8] sm:$0xff] %v3189_v11  ;;  %v10933_v5 = vadd.f32 %v10774_v49, %v3115_v0  ;;  %v2590_v17 = vpop.f32.mrb[90].mxu0  ;;  %v3073_v29 = vpop.f32.mrb[90].mxu1  ;;  %13175 = vst [vmem:[#allocation12_spill] sm:$0xff] %v10935_v43  ;;  %v10937_v50 = vrot.slane %v3189_v11, 1  ;;  %v10959_v11 = vrot.slane %v4538_v4, %v10869_v16 }
 0x32f   :  { %13174 = vst [vmem:[#allocation11_spill] sm:$0xff] %v10930_v57  ;;  %v13072_v46 = vmax.f32 %v10926_v37, 0.0  ;;  %v3116_v33 = vmax.f32 %v2590_v17, %v3073_v29  ;;  %v2592_v58 = vpop.f32.mrb[91].mxu0  ;;  %v3075_v48 = vpop.f32.mrb[91].mxu1  ;;  %v3375_v10 = vsel %vm1482_vm7, %v10928_v23, %v10930_v57  ;;  %v13188_v47 = vmax.f32 %v10926_v37, 0.0  ;;  %v11135_v23 = vld [vmem:[%s13066_s5 + $0x2b8] sm:$0xff] }
 0x330   :  { %13176 = vst [vmem:[#allocation13_spill] sm:$0xff] %v10937_v50  ;;  %v3191_v12 = vmax.f32 %v10933_v5, 0.0  ;;  %v3117_v45 = vmax.f32 %v2592_v58, %v3075_v48  ;;  %v3377_v53 = vsel %vm1482_vm7, %v10935_v43, %v10937_v50  ;;  %v3450_v26 = vmax.f32 %v3186_v22, %v3375_v10  ;;  %v11072_v43 = vld [vmem:[%s13066_s5 + $0x2a0] sm:$0xff] }
 0x331   :  { %v3160_v14 = vadd.f32 %v10770_v31, %v3116_v33  ;;  %v3451_v27 = vmax.f32 %v3187_v18, %v3377_v53  ;;  %v10964_v29 = vrot.slane %v13072_v46, 1  ;;  %v3511_v18 = vcombine.high %v10896_v7, %v3447_v63  ;;  %13190 = vst [vmem:[#allocation26_spill] sm:$0xff] %v11072_v43  ;;  %v11186_v43 = vld [vmem:[%s13066_s5 + $0x2c0] sm:$0xff] }
 0x332   :  { %v3161_v0 = vadd.f32 %v10774_v49, %v3117_v45  ;;  %v2596_v5 = vpop.f32.mrb[92].mxu0  ;;  %v3079_v17 = vpop.f32.mrb[92].mxu1  ;;  %v10966_v22 = vrot.slane %v3191_v12, 1  ;;  %v10972_v45 = vld [vmem:[%s13066_s5 + $0x200] sm:$0xff]  ;;  %v10983_v63 = vrot.slane %v4540_v36, %v10869_v16  ;;  %v11006_v36 = vld [vmem:[%s13066_s5 + $0x290] sm:$0xff]  ;;  %13203 = vst [vmem:[#allocation38_spill] sm:$0xff] %v11186_v43  ;;  %v4494_v43 = vrot.slane %v13210_v44, %v10869_v16 }
 0x333   :  { %13177 = vst [vmem:[#allocation14_spill] sm:$0xff] %v10964_v29  ;;  %v3192_v56 = vmax.f32 %v3160_v14, 0.0  ;;  %v3118_v33 = vmax.f32 %v2596_v5, %v3079_v17  ;;  %v2598_v58 = vpop.f32.mrb[93].mxu0  ;;  %v3081_v48 = vpop.f32.mrb[93].mxu1  ;;  %v3514_v10 = vcombine.low %v3450_v26, %v3451_v27  ;;  %v3515_v53 = vcombine.high %v3450_v26, %v3451_v27  ;;  %v11001_v5 = vld [vmem:[%s13066_s5 + $0x308] sm:$0xff]  ;;  %13180 = vst [vmem:[#allocation17_spill] sm:$0xff] %v11006_v36 }
 0x334   :  { %13178 = vst [vmem:[#allocation15_spill] sm:$0xff] %v10966_v22  ;;  %v3193_v4 = vmax.f32 %v3161_v0, 0.0  ;;  %v3119_v41 = vmax.f32 %v2598_v58, %v3081_v48  ;;  %v10980_v7 = vrot.slane %v3511_v18, %v10798_v6  ;;  %v10996_v0 = vld [vmem:[%s13066_s5 + $0x300] sm:$0xff]  ;;  %v11019_v48 = vld [vmem:[%s13066_s5 + $0x298] sm:$0xff]  ;;  %v11158_v36 = vld [vmem:[%s13066_s5 + $0x230] sm:$0xff] }
 0x335   :  { %3224 = vst [vmem:[#allocation3 + $0xd0] sm:$0xff] %v3192_v56  ;;  %v10986_v26 = vadd.f32 %v10770_v31, %v3118_v33  ;;  %v10988_v14 = vrot.slane %v3192_v56, 1  ;;  %v10991_v27 = vrot.slane %v3514_v10, %v10798_v6  ;;  %v11009_v17 = vrot.slane %v3515_v53, %v10798_v6  ;;  %13182 = vst [vmem:[#allocation19_spill] sm:$0xff] %v11019_v48  ;;  %v11024_v10 = vld [vmem:[%s13066_s5 + $0x390] sm:$0xff]  ;;  %v11029_v53 = vld [vmem:[%s13066_s5 + $0x398] sm:$0xff] }
 0x336   :  { %3225 = vst [vmem:[#allocation3 + $0xd8] sm:$0xff] %v3193_v4  ;;  %v11012_v18 = vadd.f32 %v10774_v49, %v3119_v41  ;;  %v2602_v56 = vpop.f32.mrb[94].mxu0  ;;  %v3085_v33 = vpop.f32.mrb[94].mxu1  ;;  %v11014_v58 = vrot.slane %v3193_v4, 1  ;;  %13183 = vst [vmem:[#allocation20_spill] sm:$0xff] %v11024_v10  ;;  %v11049_v4 = vld [vmem:[%s13066_s5 + $0x218] sm:$0xff] }
 0x337   :  { %13179 = vst [vmem:[#allocation16_spill] sm:$0xff] %v10988_v14  ;;  %13184 = vst [vmem:[#allocation21_spill] sm:$0xff] %v11029_v53  ;;  %v3120_v35 = vmax.f32 %v2602_v56, %v3085_v33  ;;  %v2604_v61 = vpop.f32.mrb[95].mxu0  ;;  %v3087_v46 = vpop.f32.mrb[95].mxu1  ;;  %v3383_v50 = vsel %vm1482_vm7, %v10964_v29, %v10988_v14  ;;  %v11054_v56 = vld [vmem:[%s13066_s5 + $0x310] sm:$0xff]  ;;  %v11067_v29 = vld [vmem:[%s13066_s5 + $0x318] sm:$0xff] }
 0x338   :  { %13181 = vst [vmem:[#allocation18_spill] sm:$0xff] %v11014_v58  ;;  %13186 = vst [vmem:[#allocation23_spill] sm:$0xff] %v11049_v4  ;;  %v3121_v41 = vmax.f32 %v2604_v61, %v3087_v46  ;;  %v3385_v57 = vsel %vm1482_vm7, %v10966_v22, %v11014_v58  ;;  %v11062_v14 = vmax.f32 %v13188_v47, %v3383_v50  ;;  %v11077_v61 = vld [vmem:[%s13066_s5 + $0x2a8] sm:$0xff]  ;;  %v11089_v33 = vld [vmem:[%s13066_s5 + $0x3a0] sm:$0xff]  ;;  %v13204_v55 = vmax.f32 %v11012_v18, 0.0 }
 0x339   :  { %13187 = vst [vmem:[#allocation24_spill] sm:$0xff] %v11054_v56  ;;  %13189 = vst [vmem:[#allocation25_spill] sm:$0xff] %v11067_v29  ;;  %v3164_v46 = vadd.f32 %v10770_v31, %v3120_v35  ;;  %v11080_v37 = vmax.f32 %v3191_v12, %v3385_v57  ;;  %v11094_v58 = vld [vmem:[%s13066_s5 + $0x3a8] sm:$0xff]  ;;  %v11099_v31 = vld [vmem:[%s13066_s5 + $0x220] sm:$0xff]  ;;  %v13207_v4 = vmax.f32 %v10986_v26, 0.0 }
 0x33a   :  { %13191 = vst [vmem:[#allocation27_spill] sm:$0xff] %v11077_v61  ;;  %13192 = vst [vmem:[#allocation28_spill] sm:$0xff] %v11089_v33  ;;  %v3165_v35 = vadd.f32 %v10774_v49, %v3121_v41  ;;  %v11109_v50 = vld [vmem:[%s13066_s5 + $0x228] sm:$0xff]  ;;  %v11114_v47 = vld [vmem:[%s13066_s5 + $0x320] sm:$0xff]  ;;  %v11202_v33 = vrot.slane %v13204_v55, 1 }
 0x33b   :  { %13193 = vst [vmem:[#allocation29_spill] sm:$0xff] %v11094_v58  ;;  %13194 = vst [vmem:[#allocation30_spill] sm:$0xff] %v11099_v31  ;;  %v11119_v49 = vld [vmem:[%s13066_s5 + $0x328] sm:$0xff]  ;;  %v3196_v57 = vmax.f32 %v3164_v46, 0.0  ;;  %v3518_v12 = vcombine.low %v11062_v14, %v11080_v37  ;;  %v11140_v46 = vld [vmem:[%s13066_s5 + $0x3b0] sm:$0xff]  ;;  %v3519_v22 = vcombine.high %v11062_v14, %v11080_v37 }
 0x33c   :  { %13195 = vst [vmem:[#allocation31_spill] sm:$0xff] %v11109_v50  ;;  %13196 = vst [vmem:[#allocation32_spill] sm:$0xff] %v11114_v47  ;;  %v11145_v41 = vld [vmem:[%s13066_s5 + $0x3b8] sm:$0xff]  ;;  %v3197_v15 = vmax.f32 %v3165_v35, 0.0  ;;  %v11168_v14 = vld [vmem:[%s13066_s5 + $0x330] sm:$0xff]  ;;  %v13200_v35 = vmax.f32 %v10986_v26, 0.0 }
 0x33d   :  { %13197 = vst [vmem:[#allocation33_spill] sm:$0xff] %v11119_v49  ;;  %13198 = vst [vmem:[#allocation34_spill] sm:$0xff] %v11140_v46  ;;  %v11163_v48 = vld [vmem:[%s13066_s5 + $0x238] sm:$0xff]  ;;  %v11179_v10 = vrot.slane %v3196_v57, 1  ;;  %v11191_v61 = vld [vmem:[%s13066_s5 + $0x2c8] sm:$0xff] }
 0x33e   :  { %13199 = vst [vmem:[#allocation35_spill] sm:$0xff] %v11145_v41  ;;  %v11173_v37 = vld [vmem:[%s13066_s5 + $0x338] sm:$0xff]  ;;  %3228 = vst [vmem:[#allocation3 + $0xf0] sm:$0xff] %v3196_v57  ;;  %v11177_v53 = vrot.slane %v13200_v35, 1  ;;  %v11196_v35 = vld [vmem:[%s13066_s5 + $0x3c0] sm:$0xff]  ;;  %v4541_v57 = vcombine.high %v10874_v9, %v10888_v20  ;;  %v11204_v58 = vrot.slane %v3197_v15, 1  ;;  %v13211_v41 = vcombine.low %v10903_v34, %v10906_v40 }
 0x33f   :  { %13202 = vst [vmem:[#allocation37_spill] sm:$0xff] %v11179_v10  ;;  %3229 = vst [vmem:[#allocation3 + $0xf8] sm:$0xff] %v3197_v15  ;;  %v11211_v29 = vld [vmem:[%s13066_s5 + $0x3c8] sm:$0xff]  ;;  %v4543_v15 = vcombine.high %v10980_v7, %v11009_v17  ;;  %v11233_v56 = vld [vmem:[%s13066_s5 + $0x340] sm:$0xff]  ;;  %v13214_v40 = vcombine.low %v10953_v30, %v10991_v27 }
 0x340   :  { %13201 = vst [vmem:[#allocation36_spill] sm:$0xff] %v11177_v53  ;;  %v11221_v9 = vld [vmem:[%s13066_s5 + $0x248] sm:$0xff]  ;;  %v3391_v55 = vsel %vm1482_vm7, %v11177_v53, %v11179_v10  ;;  %13205 = vst [vmem:[#allocation39_spill] sm:$0xff] %v11233_v56  ;;  %v11243_v50 = vld [vmem:[%s13066_s5 + $0x2d0] sm:$0xff]  ;;  %v13206_v10 = vcombine.high %v10830_v21, %v10833_v25  ;;  %v4573_v47 = vrot.slane %v4541_v57, %v10869_v16 }
 0x341   :  { %v11238_v31 = vld [vmem:[%s13066_s5 + $0x348] sm:$0xff]  ;;  %v3393_v49 = vsel %vm1482_vm7, %v11202_v33, %v11204_v58  ;;  %v3458_v53 = vmax.f32 %v13207_v4, %v3391_v55  ;;  %v11262_v21 = vld [vmem:[%s13066_s5 + $0x2d8] sm:$0xff]  ;;  %v11267_v25 = vld [vmem:[%s13066_s5 + $0x3d0] sm:$0xff]  ;;  %v4480_v46 = vrot.slane %v13211_v41, %v10869_v16  ;;  %v3732_v55 = vrot.slane %v3518_v12, %v10798_v6 }
 0x342   :  { %v4559_v20 = vrot.slane %v13206_v10, %v10869_v16  ;;  %13208 = vst [vmem:[#allocation40_spill] sm:$0xff] %v11267_v25  ;;  %v11272_v26 = vld [vmem:[%s13066_s5 + $0x3d8] sm:$0xff]  ;;  %v13209_v10 = vmax.f32 %v11012_v18, 0.0  ;;  %v13212_v18 = vcombine.high %v10913_v28, %v10923_v2  ;;  %v4444_v41 = vrot.slane %v13214_v40, %v10869_v16 }
 0x344   :  { %v3459_v4 = vmax.f32 %v13209_v10, %v3393_v49  ;;  %v4605_v24 = vcombine.high %v4559_v20, %v4573_v47  ;;  %v11304_v56 = vrot.slane %v13212_v18, %v10869_v16  ;;  %v3739_v10 = vrot.slane %v3519_v22, %v10798_v6 }
 0x345   :  { %v13215_v18 = vcombine.high %v10953_v30, %v10991_v27  ;;  %v13217_v22 = vcombine.high %v10959_v11, %v10983_v63  ;;  %v13218_v30 = vcombine.low %v10959_v11, %v10983_v63  ;;  %v11354_v11 = vsel %vm1482_vm7, %v10783_v8, %v10793_v52 }
 0x346   :  { %v3522_v49 = vcombine.low %v3458_v53, %v3459_v4  ;;  %v3523_v57 = vcombine.high %v3458_v53, %v3459_v4  ;;  %v13213_v53 = vcombine.low %v10913_v28, %v10923_v2  ;;  %v13216_v2 = vcombine.low %v10980_v7, %v11009_v17 }
 0x347   :  { %v4451_v28 = vrot.slane %v13215_v18, %v10869_v16  ;;  %v11338_v27 = vrot.slane %v13218_v30, %v10869_v16  ;;  %v4587_v18 = vrot.slane %v4543_v15, %v10869_v16  ;;  %v11342_v7 = vrot.slane %v4605_v24, %v10869_v16 }
 0x348   :  { %v11310_v4 = vrot.slane %v13213_v53, %v10869_v16  ;;  %v3760_v44 = vrot.slane %v3522_v49, %v10798_v6  ;;  %v3767_v34 = vrot.slane %v3523_v57, %v10798_v6  ;;  %v4580_v12 = vrot.slane %v13216_v2, %v10869_v16 }
 0x349   :  { %v11332_v57 = vrot.slane %v13217_v22, %v10869_v16  ;;  %13219 = vst [vmem:[#allocation41_spill] sm:$0xff] %v11338_v27  ;;  %13220 = vst [vmem:[#allocation42_spill] sm:$0xff] %v11342_v7  ;;  %v4604_v17 = vcombine.low %v4559_v20, %v4573_v47  ;;  %v11359_v24 = vsel %vm1482_vm7, %v10786_v59, %v10801_v32  ;;  %v3255_v7 = vld [vmem:[#allocation3 + $0xb8] sm:$0xff] }
 0x34a   :  { %v4408_v49 = vcombine.low %v3732_v55, %v3760_v44  ;;  %v4409_v53 = vcombine.high %v3732_v55, %v3760_v44  ;;  %v4544_v25 = vcombine.low %v3739_v10, %v3767_v34  ;;  %v4545_v40 = vcombine.high %v3739_v10, %v3767_v34 }
 0x34b   :  { %v11349_v44 = vrot.slane %v4604_v17, %v10869_v16  ;;  %v11364_v63 = vsel %vm1482_vm7, %v10795_v1, %v10813_v3 }
 0x34c   :  { %v4458_v2 = vrot.slane %v4408_v49, %v10869_v16  ;;  %v4465_v22 = vrot.slane %v4409_v53, %v10869_v16  ;;  %v4594_v55 = vrot.slane %v4544_v25, %v10869_v16  ;;  %v4601_v10 = vrot.slane %v4545_v40, %v10869_v16 }
 0x34d   :  { %13221 = vst [vmem:[#allocation43_spill] sm:$0xff] %v11349_v44  ;;  %v13252_v44 = vld [vmem:[#allocation24_spill] sm:$0xff] }
 0x34e   :  { %v4470_v47 = vcombine.low %v4444_v41, %v4458_v2  ;;  %v4471_v15 = vcombine.high %v4444_v41, %v4458_v2  ;;  %v4473_v20 = vcombine.high %v4451_v28, %v4465_v22  ;;  %v4472_v25 = vcombine.low %v4451_v28, %v4465_v22  ;;  %v3296_v2 = vld [vmem:[#allocation3 + $0x100] sm:$0x1] }
 0x34f   :  { %v4607_v34 = vcombine.high %v4580_v12, %v4594_v55  ;;  %v4606_v49 = vcombine.low %v4580_v12, %v4594_v55  ;;  %v4609_v53 = vcombine.high %v4587_v18, %v4601_v10  ;;  %v4608_v40 = vcombine.low %v4587_v18, %v4601_v10 }
 0x350   :  { %v4522_v8 = vrot.slane %v4471_v15, %v10869_v16  ;;  %v4508_v52 = vrot.slane %v4470_v47, %v10869_v16  ;;  %v4529_v59 = vrot.slane %v4473_v20, %v10869_v16  ;;  %v11370_v32 = vrot.slane %v4472_v25, %v10869_v16  ;;  %v3297_v15 = vld [vmem:[#allocation3 + $0x108] sm:$0x1] }
 0x351   :  { %v11373_v1 = vrot.slane %v4607_v34, %v10869_v16  ;;  %v11376_v3 = vrot.slane %v4606_v49, %v10869_v16  ;;  %v11379_v41 = vrot.slane %v4609_v53, %v10869_v16  ;;  %v11382_v28 = vrot.slane %v4608_v40, %v10869_v16 }
 0x352   :  { %v4534_v12 = vcombine.low %v4494_v43, %v4522_v8  ;;  %v4535_v30 = vcombine.high %v4494_v43, %v4522_v8  ;;  %v4530_v18 = vcombine.low %v4480_v46, %v4508_v52  ;;  %v4531_v17 = vcombine.high %v4480_v46, %v4508_v52  ;;  %v3242_v52 = vld [vmem:[#allocation3 + $0x50] sm:$0xff]  ;;  %v3243_v8 = vld [vmem:[#allocation3 + $0x58] sm:$0xff]  ;;  %v13243_v46 = vld [vmem:[#allocation15_spill] sm:$0xff] }
 0x353   :  { %13222 = vst [vmem:[#allocation44_spill] sm:$0xff] %v11376_v3  ;;  %13223 = vst [vmem:[#allocation45_spill] sm:$0xff] %v11379_v41  ;;  %v4536_v22 = vcombine.low %v11304_v56, %v4529_v59  ;;  %v4537_v55 = vcombine.high %v11304_v56, %v4529_v59  ;;  %v3394_v49 = vrot.slane %v3296_v2, 1  ;;  %v13225_v53 = vpack.c.bf16 %v10977_v62, %v10972_v45  ;;  %v3235_v62 = vld [vmem:[#allocation3 + $0x18] sm:$0xff]  ;;  %v3238_v45 = vld [vmem:[#allocation3 + $0x30] sm:$0xff] }
 0x354   :  { %13224 = vst [vmem:[#allocation46_spill] sm:$0xff] %v11382_v28  ;;  %5042 = vmatprep.mubr.f32.mxu1 %v4534_v12  ;;  %5112 = vmatprep.mubr.f32.mxu0 %v4535_v30  ;;  %v13226_v40 = vpack.c.bf16 %v11001_v5, %v10996_v0  ;;  %v3349_v59 = vsel %vm1482_vm7, %v10803_v51, %v10819_v19  ;;  %v3396_v12 = vrot.slane %v3297_v15, 1  ;;  %v3234_v30 = vld [vmem:[#allocation3 + $0x10] sm:$0xff]  ;;  %v13230_v51 = vld [vmem:[#allocation17_spill] sm:$0xff] }
 0x355   :  { %5043 = vmatmul.mubr.f32.vlgmr.msra.gmra.mrb[96].mxu1 %v4530_v18  ;;  %5113 = vmatmul.mubr.f32.vlgmr.msra.gmra.mrb[98].mxu0 %v4531_v17  ;;  %v3355_v0 = vsel %vm1482_vm7, %v10821_v39, %v10850_v38  ;;  %v3357_v5 = vsel %vm1482_vm7, %v10827_v54, %v10855_v60  ;;  %v13227_v18 = vld [vmem:[#allocation6_spill] sm:$0xff]  ;;  %v13228_v17 = vld [vmem:[#allocation4_spill] sm:$0xff]  ;;  %v13236_v38 = vld [vmem:[#allocation5_spill] sm:$0xff]  ;;  %v11471_v27 = vmax.f32 %v3235_v62, %v11359_v24 }
 0x356   :  { %7283 = vmatpush3.bf16.msra.mxu1 %v13225_v53  ;;  %7315 = vmatpush3.bf16.msra.mxu0 %v13226_v40  ;;  %v3363_v2 = vsel %vm1482_vm7, %v13228_v17, %v13227_v18  ;;  %v13229_v53 = vld [vmem:[#allocation19_spill] sm:$0xff]  ;;  %v3239_v40 = vld [vmem:[#allocation3 + $0x38] sm:$0xff]  ;;  %v13235_v39 = vld [vmem:[#allocation8_spill] sm:$0xff] }
 0x357   :  { %5182 = vmatprep.mubr.f32.mxu1 %v4536_v22  ;;  %5252 = vmatprep.mubr.f32.mxu0 %v4537_v55  ;;  %v13231_v19 = vpack.c.bf16 %v13229_v53, %v13230_v51  ;;  %v13232_v22 = vld [vmem:[#allocation21_spill] sm:$0xff]  ;;  %v13233_v55 = vld [vmem:[#allocation20_spill] sm:$0xff]  ;;  %v3365_v34 = vsel %vm1482_vm7, %v13236_v38, %v13235_v39  ;;  %v13237_v54 = vld [vmem:[#allocation10_spill] sm:$0xff] }
 0x358   :  { %v13234_v15 = vpack.c.bf16 %v13232_v22, %v13233_v55  ;;  %v13238_v60 = vld [vmem:[#allocation7_spill] sm:$0xff]  ;;  %v13239_v18 = vld [vmem:[#allocation12_spill] sm:$0xff]  ;;  %v13240_v17 = vld [vmem:[#allocation9_spill] sm:$0xff] }
 0x359   :  { %7285 = vmatprep.subr.bf16.mxu1 %v13231_v19  ;;  %v3371_v25 = vsel %vm1482_vm7, %v13238_v60, %v13237_v54  ;;  %v3373_v53 = vsel %vm1482_vm7, %v13240_v17, %v13239_v18  ;;  %v3246_v51 = vld [vmem:[#allocation3 + $0x70] sm:$0xff]  ;;  %v3247_v19 = vld [vmem:[#allocation3 + $0x78] sm:$0xff]  ;;  %v13241_v22 = vld [vmem:[#allocation14_spill] sm:$0xff] }
 0x35a   :  { %7317 = vmatprep.subr.bf16.mxu0 %v13234_v15  ;;  %v3250_v56 = vld [vmem:[#allocation3 + $0x90] sm:$0xff]  ;;  %v13242_v55 = vld [vmem:[#allocation11_spill] sm:$0xff]  ;;  %v13244_v43 = vld [vmem:[#allocation13_spill] sm:$0xff] }
 0x35b   :  { %v3379_v15 = vsel %vm1482_vm7, %v13242_v55, %v13241_v22  ;;  %v3381_v20 = vsel %vm1482_vm7, %v13244_v43, %v13243_v46  ;;  %v13245_v39 = vld [vmem:[#allocation36_spill] sm:$0xff]  ;;  %v13247_v54 = vld [vmem:[#allocation18_spill] sm:$0xff]  ;;  %v13248_v18 = vld [vmem:[#allocation23_spill] sm:$0xff] }
 0x35c   :  { %v13246_v38 = vld [vmem:[#allocation16_spill] sm:$0xff]  ;;  %v3389_v60 = vsel %vm1482_vm7, %v13247_v54, %v11202_v33  ;;  %v13249_v17 = vld [vmem:[#allocation22_spill] sm:$0xff]  ;;  %v13251_v28 = vld [vmem:[#allocation25_spill] sm:$0xff]  ;;  %v11492_v62 = vmax.f32 %v3255_v7, %v3381_v20 }
 0x35d   :  { %v3387_v47 = vsel %vm1482_vm7, %v13246_v38, %v13245_v39  ;;  %v13250_v10 = vpack.c.bf16 %v13248_v18, %v13249_v17  ;;  %v13253_v41 = vpack.c.bf16 %v13251_v28, %v13252_v44  ;;  %v3251_v22 = vld [vmem:[#allocation3 + $0x98] sm:$0xff]  ;;  %v3254_v55 = vld [vmem:[#allocation3 + $0xb0] sm:$0xff]  ;;  %v3397_v39 = vsel %vm1482_vm7, %v11204_v58, %v3396_v12  ;;  %v13255_v33 = vld [vmem:[#allocation27_spill] sm:$0xff] }
 0x35e   :  { %v13254_v43 = vld [vmem:[#allocation37_spill] sm:$0xff]  ;;  %v11462_v38 = vmax.f32 %v3234_v30, %v11354_v11  ;;  %v13256_v54 = vld [vmem:[#allocation26_spill] sm:$0xff]  ;;  %v13259_v17 = vld [vmem:[#allocation28_spill] sm:$0xff]  ;;  %v11476_v58 = vmax.f32 %v3239_v40, %v3349_v59  ;;  %v11478_v12 = vmax.f32 %v3242_v52, %v3355_v0  ;;  %v11480_v30 = vmax.f32 %v3243_v8, %v3357_v5 }
 0x35f   :  { %7287 = vmatpush3.bf16.msra.mxu1 %v13250_v10  ;;  %7319 = vmatpush3.bf16.msra.mxu0 %v13253_v41  ;;  %v3395_v46 = vsel %vm1482_vm7, %v13254_v43, %v3394_v49  ;;  %v13257_v18 = vpack.c.bf16 %v13255_v33, %v13256_v54  ;;  %v13258_v10 = vld [vmem:[#allocation29_spill] sm:$0xff]  ;;  %v3258_v41 = vld [vmem:[#allocation3 + $0xd0] sm:$0xff]  ;;  %v11474_v49 = vmax.f32 %v3238_v45, %v11364_v63  ;;  %v13261_v63 = vld [vmem:[#allocation31_spill] sm:$0xff] }
 0x360   :  { %v13260_v44 = vpack.c.bf16 %v13258_v10, %v13259_v17  ;;  %v3259_v28 = vld [vmem:[#allocation3 + $0xd8] sm:$0xff]  ;;  %v3262_v3 = vld [vmem:[#allocation3 + $0xf0] sm:$0xff]  ;;  %v11482_v43 = vmax.f32 %v3246_v51, %v3363_v2  ;;  %v11484_v33 = vmax.f32 %v3247_v19, %v3365_v34  ;;  %v11486_v54 = vmax.f32 %v3250_v56, %v3371_v25  ;;  %v13262_v59 = vld [vmem:[#allocation30_spill] sm:$0xff] }
 0x361   :  { %7289 = vmatprep.subr.bf16.mxu1 %v13257_v18  ;;  %v3263_v11 = vld [vmem:[#allocation3 + $0xf8] sm:$0xff]  ;;  %v11488_v18 = vmax.f32 %v3251_v22, %v3373_v53  ;;  %v11490_v24 = vmax.f32 %v3254_v55, %v3379_v15  ;;  %v13263_v45 = vpack.c.bf16 %v13261_v63, %v13262_v59  ;;  %v13265_v0 = vld [vmem:[#allocation32_spill] sm:$0xff]  ;;  %v11500_v5 = vmax.f32 %v3258_v41, %v3387_v47  ;;  %v13268_v7 = vld [vmem:[#allocation35_spill] sm:$0xff] }
 0x362   :  { %7321 = vmatprep.subr.bf16.mxu0 %v13260_v44  ;;  %v13264_v52 = vld [vmem:[#allocation33_spill] sm:$0xff]  ;;  %v11502_v34 = vmax.f32 %v3259_v28, %v3389_v60  ;;  %v11504_v56 = vmax.f32 %v3262_v3, %v3395_v46  ;;  %v13267_v25 = vpack.c.bf16 %v11135_v23, %v11130_v13  ;;  %v13269_v20 = vld [vmem:[#allocation34_spill] sm:$0xff]  ;;  %v11512_v40 = vmax.f32 %v3263_v11, %v3397_v39  ;;  %v3856_v19 = vld [vmem:[%s13066_s5 + $0x250] sm:$0xff] }
 0x363   :  { %7291 = vmatpush3.bf16.msra.mxu1 %v13263_v45  ;;  %v13266_v8 = vpack.c.bf16 %v13264_v52, %v13265_v0  ;;  %v13270_v2 = vpack.c.bf16 %v13268_v7, %v13269_v20  ;;  %v3496_v53 = vcombine.low %v11462_v38, %v11471_v27  ;;  %v3500_v47 = vcombine.low %v11474_v49, %v11476_v58  ;;  %v3857_v10 = vld [vmem:[%s13066_s5 + $0x258] sm:$0xff]  ;;  %v3888_v17 = vld [vmem:[%s13066_s5 + $0x350] sm:$0xff]  ;;  %v3874_v11 = vld [vmem:[%s13066_s5 + $0x2e0] sm:$0xff] }
 0x364   :  { %7293 = vmatprep.subr.bf16.mxu1 %v13267_v25  ;;  %v3504_v3 = vcombine.low %v11478_v12, %v11480_v30  ;;  %v3508_v51 = vcombine.low %v11482_v43, %v11484_v33  ;;  %v3512_v13 = vcombine.low %v11486_v54, %v11488_v18  ;;  %v3516_v23 = vcombine.low %v11490_v24, %v11492_v62  ;;  %v3889_v44 = vld [vmem:[%s13066_s5 + $0x358] sm:$0xff]  ;;  %v3875_v63 = vld [vmem:[%s13066_s5 + $0x2e8] sm:$0xff] }
 0x365   :  { %7323 = vmatpush3.bf16.msra.mxu0 %v13266_v8  ;;  %v3520_v15 = vcombine.low %v11500_v5, %v11502_v34  ;;  %v3524_v60 = vcombine.low %v11504_v56, %v11512_v40  ;;  %v11534_v22 = vrot.slane %v3496_v53, %v10798_v6  ;;  %v11537_v55 = vrot.slane %v3500_v47, %v10798_v6  ;;  %v13277_v53 = vld [vmem:[#allocation39_spill] sm:$0xff] }
 0x366   :  { %7325 = vmatprep.subr.bf16.mxu0 %v13270_v2  ;;  %v13271_v46 = vpack.c.bf16 %v11163_v48, %v11158_v36  ;;  %v13272_v39 = vpack.c.bf16 %v11173_v37, %v11168_v14  ;;  %v11555_v41 = vrot.slane %v3504_v3, %v10798_v6  ;;  %v11558_v36 = vrot.slane %v3508_v51, %v10798_v6  ;;  %v13273_v14 = vld [vmem:[#allocation38_spill] sm:$0xff] }
 0x367   :  { %v11561_v48 = vrot.slane %v3512_v13, %v10798_v6  ;;  %v13274_v37 = vpack.c.bf16 %v11191_v61, %v13273_v14  ;;  %v13275_v28 = vpack.c.bf16 %v11211_v29, %v11196_v35  ;;  %v11576_v59 = vrot.slane %v3516_v23, %v10798_v6  ;;  %v3906_v29 = vld [vmem:[%s13066_s5 + $0x3e0] sm:$0xff]  ;;  %v3907_v35 = vld [vmem:[%s13066_s5 + $0x3e8] sm:$0xff] }
 0x368   :  { %7295 = vmatpush3.bf16.msra.mxu1 %v13271_v46  ;;  %v11579_v45 = vrot.slane %v3520_v15, %v10798_v6  ;;  %v11582_v61 = vrot.slane %v3524_v60, %v10798_v6  ;;  %v4674_v52 = vcombine.low %v11534_v22, %v11537_v55  ;;  %v4676_v0 = vcombine.low %v11555_v41, %v11558_v36  ;;  %v3858_v51 = vld [vmem:[%s13066_s5 + $0x260] sm:$0xff]  ;;  %v3859_v13 = vld [vmem:[%s13066_s5 + $0x268] sm:$0xff] }
 0x369   :  { %7327 = vmatpush3.bf16.msra.mxu0 %v13272_v39  ;;  %7297 = vmatprep.subr.bf16.mxu1 %v13274_v37  ;;  %v7302_v8 = vpack.c.bf16 %v3857_v10, %v3856_v19  ;;  %v7334_v25 = vpack.c.bf16 %v3889_v44, %v3888_v17  ;;  %v4678_v7 = vcombine.low %v11561_v48, %v11576_v59  ;;  %v3890_v23 = vld [vmem:[%s13066_s5 + $0x360] sm:$0xff]  ;;  %v13280_v19 = vld [vmem:[#allocation40_spill] sm:$0xff]  ;;  %v3891_v46 = vld [vmem:[%s13066_s5 + $0x368] sm:$0xff] }
 0x36a   :  { %7329 = vmatprep.subr.bf16.mxu0 %v13275_v28  ;;  %v4680_v20 = vcombine.low %v11579_v45, %v11582_v61  ;;  %v13276_v2 = vpack.c.bf16 %v11221_v9, %v11216_v42  ;;  %v13278_v47 = vpack.c.bf16 %v11238_v31, %v13277_v53  ;;  %v7304_v3 = vpack.c.bf16 %v3875_v63, %v3874_v11  ;;  %v3876_v39 = vld [vmem:[%s13066_s5 + $0x2f0] sm:$0xff]  ;;  %v3877_v10 = vld [vmem:[%s13066_s5 + $0x2f8] sm:$0xff]  ;;  %v3959_v53 = vld [vmem:[%s13066_s5 + $0x588] sm:$0xff] }
 0x36b   :  { %v4688_v42 = vrot.slane %v4674_v52, %v10869_v16  ;;  %v4702_v9 = vrot.slane %v4676_v0, %v10869_v16  ;;  %v13279_v31 = vpack.c.bf16 %v11262_v21, %v11243_v50  ;;  %v13281_v15 = vpack.c.bf16 %v11272_v26, %v13280_v19  ;;  %v3908_v26 = vld [vmem:[%s13066_s5 + $0x3f0] sm:$0xff]  ;;  %v3909_v17 = vld [vmem:[%s13066_s5 + $0x3f8] sm:$0xff]  ;;  %v3942_v19 = vld [vmem:[%s13066_s5 + $0x500] sm:$0xff] }
 0x36c   :  { %7299 = vmatpush3.bf16.msra.mxu1 %v13276_v2  ;;  %v7336_v60 = vpack.c.bf16 %v3907_v35, %v3906_v29  ;;  %v4716_v50 = vrot.slane %v4678_v7, %v10869_v16  ;;  %v4730_v21 = vrot.slane %v4680_v20, %v10869_v16  ;;  %v7306_v37 = vpack.c.bf16 %v3859_v13, %v3858_v51  ;;  %v3860_v63 = vld [vmem:[%s13066_s5 + $0x270] sm:$0xff]  ;;  %v3861_v29 = vld [vmem:[%s13066_s5 + $0x278] sm:$0xff]  ;;  %v3927_v20 = vld [vmem:[%s13066_s5 + $0x488] sm:$0xff] }
 0x36d   :  { %7331 = vmatpush3.bf16.msra.mxu0 %v13278_v47  ;;  %7301 = vmatprep.subr.bf16.mxu1 %v13279_v31  ;;  %v4739_v44 = vcombine.high %v4688_v42, %v4702_v9  ;;  %v7338_v28 = vpack.c.bf16 %v3891_v46, %v3890_v23  ;;  %v7308_v11 = vpack.c.bf16 %v3877_v10, %v3876_v39  ;;  %v3892_v52 = vld [vmem:[%s13066_s5 + $0x370] sm:$0xff]  ;;  %v3893_v0 = vld [vmem:[%s13066_s5 + $0x378] sm:$0xff]  ;;  %v3958_v2 = vld [vmem:[%s13066_s5 + $0x580] sm:$0xff] }
 0x36e   :  { %7333 = vmatprep.subr.bf16.mxu0 %v13281_v15  ;;  %v4743_v14 = vcombine.high %v4716_v50, %v4730_v21  ;;  %v7340_v35 = vpack.c.bf16 %v3909_v17, %v3908_v26  ;;  %v3910_v47 = vld [vmem:[%s13066_s5 + $0x400] sm:$0xff]  ;;  %v7310_v13 = vpack.c.bf16 %v3861_v29, %v3860_v63  ;;  %v7342_v23 = vpack.c.bf16 %v3893_v0, %v3892_v52  ;;  %v3911_v31 = vld [vmem:[%s13066_s5 + $0x408] sm:$0xff]  ;;  %v3928_v39 = vld [vmem:[%s13066_s5 + $0x490] sm:$0xff] }
 0x36f   :  { %v3943_v15 = vld [vmem:[%s13066_s5 + $0x508] sm:$0xff]  ;;  %v7376_v46 = vpack.c.bf16 %v3959_v53, %v3958_v2  ;;  %v4738_v10 = vcombine.low %v4688_v42, %v4702_v9  ;;  %v4742_v26 = vcombine.low %v4716_v50, %v4730_v21  ;;  %v7346_v17 = vpack.c.bf16 %v3911_v31, %v3910_v47  ;;  %v3930_v52 = vld [vmem:[%s13066_s5 + $0x4a0] sm:$0xff] }
 0x370   :  { %7303 = vmatpush3.bf16.msra.mxu1 %v7302_v8  ;;  %v3926_v8 = vld [vmem:[%s13066_s5 + $0x480] sm:$0xff]  ;;  %v11657_v7 = vrot.slane %v4743_v14, %v10869_v16  ;;  %v3929_v14 = vld [vmem:[%s13066_s5 + $0x498] sm:$0xff]  ;;  %v4677_v42 = vcombine.high %v11555_v41, %v11558_v36  ;;  %v4679_v21 = vcombine.high %v11561_v48, %v11576_v59  ;;  %v3944_v41 = vld [vmem:[%s13066_s5 + $0x510] sm:$0xff]  ;;  %v4681_v36 = vcombine.high %v11579_v45, %v11582_v61 }
 0x371   :  { %7335 = vmatpush3.bf16.msra.mxu0 %v7334_v25  ;;  %7305 = vmatprep.subr.bf16.mxu1 %v7304_v3  ;;  %v11654_v25 = vrot.slane %v4739_v44, %v10869_v16  ;;  %v7378_v44 = vpack.c.bf16 %v3943_v15, %v3942_v19  ;;  %v11701_v9 = vrot.slane %v4738_v10, %v10869_v16  ;;  %v3931_v45 = vld [vmem:[%s13066_s5 + $0x4a8] sm:$0xff]  ;;  %v3962_v2 = vld [vmem:[%s13066_s5 + $0x5a0] sm:$0xff] }
 0x372   :  { %7337 = vmatprep.subr.bf16.mxu0 %v7336_v60  ;;  %v7344_v60 = vpack.c.bf16 %v3927_v20, %v3926_v8  ;;  %v11704_v50 = vrot.slane %v4742_v26, %v10869_v16  ;;  %v11723_v48 = vrot.slane %v4677_v42, %v10869_v16  ;;  %v7348_v59 = vpack.c.bf16 %v3929_v14, %v3928_v39  ;;  %v3963_v53 = vld [vmem:[%s13066_s5 + $0x5a8] sm:$0xff]  ;;  %v3914_v31 = vld [vmem:[%s13066_s5 + $0x420] sm:$0xff]  ;;  %v3965_v14 = vld [vmem:[%s13066_s5 + $0x5b8] sm:$0xff] }
 0x373   :  { %v4806_v3 = vcombine.low %v11654_v25, %v11657_v7  ;;  %v4807_v51 = vcombine.high %v11654_v25, %v11657_v7  ;;  %v13282_v8 = vcombine.low %v11310_v4, %v11370_v32  ;;  %v13283_v20 = vcombine.high %v11310_v4, %v11370_v32  ;;  %v3946_v39 = vld [vmem:[%s13066_s5 + $0x520] sm:$0xff]  ;;  %v3947_v10 = vld [vmem:[%s13066_s5 + $0x528] sm:$0xff]  ;;  %v4092_v25 = vld [vmem:[%s13066_s5 + $0x9b0] sm:$0xff] }
 0x374   :  { %7307 = vmatpush3.bf16.msra.mxu1 %v7306_v37  ;;  %v3960_v37 = vld [vmem:[%s13066_s5 + $0x590] sm:$0xff]  ;;  %v4802_v61 = vcombine.low %v11701_v9, %v11704_v50  ;;  %v4803_v0 = vcombine.high %v11701_v9, %v11704_v50  ;;  %v11751_v47 = vrot.slane %v4679_v21, %v10869_v16  ;;  %v13284_v4 = vcombine.low %v11332_v57, %v11373_v1  ;;  %v4093_v7 = vld [vmem:[%s13066_s5 + $0x9b8] sm:$0xff]  ;;  %v4138_v9 = vld [vmem:[%s13066_s5 + $0xb20] sm:$0xff] }
 0x375   :  { %7339 = vmatpush3.bf16.msra.mxu0 %v7338_v28  ;;  %7309 = vmatprep.subr.bf16.mxu1 %v7308_v11  ;;  %v3961_v28 = vld [vmem:[%s13066_s5 + $0x598] sm:$0xff]  ;;  %v4675_v11 = vcombine.high %v11534_v22, %v11537_v55  ;;  %v3912_v22 = vld [vmem:[%s13066_s5 + $0x410] sm:$0xff]  ;;  %v13285_v19 = vcombine.high %v11332_v57, %v11373_v1  ;;  %v7384_v57 = vpack.c.bf16 %v3963_v53, %v3962_v2  ;;  %v3918_v2 = vld [vmem:[%s13066_s5 + $0x440] sm:$0xff] }
 0x376   :  { %7341 = vmatprep.subr.bf16.mxu0 %v7340_v35  ;;  %v3913_v55 = vld [vmem:[%s13066_s5 + $0x418] sm:$0xff]  ;;  %v7380_v29 = vpack.c.bf16 %v3961_v28, %v3960_v37  ;;  %v3932_v1 = vld [vmem:[%s13066_s5 + $0x4b0] sm:$0xff]  ;;  %v3919_v53 = vld [vmem:[%s13066_s5 + $0x448] sm:$0xff] }
 0x377   :  { %v11720_v63 = vrot.slane %v4675_v11, %v10869_v16  ;;  %v3945_v35 = vld [vmem:[%s13066_s5 + $0x518] sm:$0xff]  ;;  %v7350_v32 = vpack.c.bf16 %v3913_v55, %v3912_v22  ;;  %v3916_v37 = vld [vmem:[%s13066_s5 + $0x430] sm:$0xff]  ;;  %v7386_v22 = vpack.c.bf16 %v3947_v10, %v3946_v39  ;;  %v7362_v39 = vpack.c.bf16 %v3919_v53, %v3918_v2  ;;  %v3922_v53 = vld [vmem:[%s13066_s5 + $0x460] sm:$0xff] }
 0x378   :  { %7311 = vmatpush3.bf16.msra.mxu1 %v7310_v13  ;;  %v11754_v13 = vrot.slane %v4681_v36, %v10869_v16  ;;  %v7382_v15 = vpack.c.bf16 %v3945_v35, %v3944_v41  ;;  %v3917_v28 = vld [vmem:[%s13066_s5 + $0x438] sm:$0xff]  ;;  %v3948_v55 = vld [vmem:[%s13066_s5 + $0x530] sm:$0xff]  ;;  %v3934_v36 = vld [vmem:[%s13066_s5 + $0x4c0] sm:$0xff] }
 0x379   :  { %7343 = vmatpush3.bf16.msra.mxu0 %v7342_v23  ;;  %7345 = vmatprep.subr.bf16.mxu1 %v7344_v60  ;;  %v4741_v23 = vcombine.high %v11720_v63, %v11723_v48  ;;  %v7352_v60 = vpack.c.bf16 %v3931_v45, %v3930_v52  ;;  %v3949_v41 = vld [vmem:[%s13066_s5 + $0x538] sm:$0xff]  ;;  %v3966_v35 = vld [vmem:[%s13066_s5 + $0x5c0] sm:$0xff]  ;;  %v3967_v52 = vld [vmem:[%s13066_s5 + $0x5c8] sm:$0xff]  ;;  %v4740_v10 = vcombine.low %v11720_v63, %v11723_v48 }
 0x37a   :  { %7377 = vmatprep.subr.bf16.mxu0 %v7376_v46  ;;  %v3915_v46 = vld [vmem:[%s13066_s5 + $0x428] sm:$0xff]  ;;  %v4745_v26 = vcombine.high %v11751_v47, %v11754_v13  ;;  %v3501_v63 = vcombine.high %v11474_v49, %v11476_v58  ;;  %v3517_v49 = vcombine.high %v11490_v24, %v11492_v62  ;;  %v3521_v58 = vcombine.high %v11500_v5, %v11502_v34  ;;  %v3938_v62 = vld [vmem:[%s13066_s5 + $0x4e0] sm:$0xff] }
 0x37b   :  { %5183 = vmatmul.mubr.f32.vlgmr.msra.gmra.mrb[98].mxu1 %v13282_v8  ;;  %v11797_v11 = vrot.slane %v4741_v23, %v10869_v16  ;;  %v7354_v21 = vpack.c.bf16 %v3915_v46, %v3914_v31  ;;  %v3950_v23 = vld [vmem:[%s13066_s5 + $0x540] sm:$0xff]  ;;  %v3937_v31 = vld [vmem:[%s13066_s5 + $0x4d8] sm:$0xff]  ;;  %v7392_v46 = vpack.c.bf16 %v3967_v52, %v3966_v35  ;;  %v11857_v48 = vrot.slane %v4740_v10, %v10869_v16  ;;  %v3939_v5 = vld [vmem:[%s13066_s5 + $0x4e8] sm:$0xff] }
 0x37c   :  { %5253 = vmatmul.mubr.f32.vlgmr.msra.gmra.mrb[100].mxu0 %v13283_v20  ;;  %7347 = vmatpush3.bf16.msra.mxu1 %v7346_v17  ;;  %v3933_v17 = vld [vmem:[%s13066_s5 + $0x4b8] sm:$0xff]  ;;  %v11800_v42 = vrot.slane %v4745_v26, %v10869_v16  ;;  %v4744_v26 = vcombine.low %v11751_v47, %v11754_v13  ;;  %v3505_v13 = vcombine.high %v11478_v12, %v11480_v30  ;;  %v3972_v10 = vld [vmem:[%s13066_s5 + $0x5f0] sm:$0xff] }
 0x37d   :  { %5322 = vmatprep.mubr.f32.mxu1 %v13284_v4  ;;  %7379 = vmatpush3.bf16.msra.mxu0 %v7378_v44  ;;  %v3964_v44 = vld [vmem:[%s13066_s5 + $0x5b0] sm:$0xff]  ;;  %v3951_v4 = vld [vmem:[%s13066_s5 + $0x548] sm:$0xff]  ;;  %v3525_v12 = vcombine.high %v11504_v56, %v11512_v40  ;;  %v11900_v56 = vrot.slane %v3501_v63, %v10798_v6  ;;  %v7368_v2 = vpack.c.bf16 %v3939_v5, %v3938_v62 }
 0x37e   :  { %5392 = vmatprep.mubr.f32.mxu0 %v13285_v19  ;;  %7349 = vmatprep.subr.bf16.mxu1 %v7348_v59  ;;  %v7356_v59 = vpack.c.bf16 %v3933_v17, %v3932_v1  ;;  %v4808_v45 = vcombine.low %v11797_v11, %v11800_v42  ;;  %v4809_v8 = vcombine.high %v11797_v11, %v11800_v42  ;;  %v3968_v17 = vld [vmem:[%s13066_s5 + $0x5d0] sm:$0xff]  ;;  %v4157_v42 = vld [vmem:[%s13066_s5 + $0xbb8] sm:$0xff] }
 0x37f   :  { %7381 = vmatprep.subr.bf16.mxu0 %v7380_v29  ;;  %v3935_v29 = vld [vmem:[%s13066_s5 + $0x4c8] sm:$0xff]  ;;  %v7388_v20 = vpack.c.bf16 %v3965_v14, %v3964_v44  ;;  %v7358_v19 = vpack.c.bf16 %v3917_v28, %v3916_v37  ;;  %v3969_v44 = vld [vmem:[%s13066_s5 + $0x5d8] sm:$0xff]  ;;  %v3497_v14 = vcombine.high %v11462_v38, %v11471_v27  ;;  %v11860_v47 = vrot.slane %v4744_v26, %v10869_v16  ;;  %v3920_v27 = vld [vmem:[%s13066_s5 + $0x450] sm:$0xff] }
 0x380   :  { %7351 = vmatpush3.bf16.msra.mxu1 %v7350_v32  ;;  %v3936_v32 = vld [vmem:[%s13066_s5 + $0x4d0] sm:$0xff]  ;;  %v3509_v37 = vcombine.high %v11482_v43, %v11484_v33  ;;  %v3513_v38 = vcombine.high %v11486_v54, %v11488_v18  ;;  %v7396_v30 = vpack.c.bf16 %v3969_v44, %v3968_v17  ;;  %v3921_v43 = vld [vmem:[%s13066_s5 + $0x458] sm:$0xff]  ;;  %v11903_v40 = vrot.slane %v3505_v13, %v10798_v6 }
 0x381   :  { %7383 = vmatpush3.bf16.msra.mxu0 %v7382_v15  ;;  %7353 = vmatprep.subr.bf16.mxu1 %v7352_v60  ;;  %v7390_v15 = vpack.c.bf16 %v3949_v41, %v3948_v55  ;;  %v7360_v60 = vpack.c.bf16 %v3935_v29, %v3934_v36  ;;  %v7364_v1 = vpack.c.bf16 %v3937_v31, %v3936_v32  ;;  %v3952_v33 = vld [vmem:[%s13066_s5 + $0x550] sm:$0xff]  ;;  %v3953_v54 = vld [vmem:[%s13066_s5 + $0x558] sm:$0xff] }
 0x382   :  { %7385 = vmatprep.subr.bf16.mxu0 %v7384_v57  ;;  %v7394_v57 = vpack.c.bf16 %v3951_v4, %v3950_v23  ;;  %v4804_v18 = vcombine.low %v11857_v48, %v11860_v47  ;;  %v4805_v24 = vcombine.high %v11857_v48, %v11860_v47  ;;  %v11897_v34 = vrot.slane %v3497_v14, %v10798_v6  ;;  %v3954_v23 = vld [vmem:[%s13066_s5 + $0x560] sm:$0xff]  ;;  %v3973_v26 = vld [vmem:[%s13066_s5 + $0x5f8] sm:$0xff]  ;;  %v3924_v44 = vld [vmem:[%s13066_s5 + $0x470] sm:$0xff] }
 0x383   :  { %v11906_v28 = vrot.slane %v3509_v37, %v10798_v6  ;;  %v11915_v55 = vrot.slane %v3513_v38, %v10798_v6  ;;  %v11918_v41 = vrot.slane %v3517_v49, %v10798_v6  ;;  %v11921_v36 = vrot.slane %v3521_v58, %v10798_v6  ;;  %v3925_v37 = vld [vmem:[%s13066_s5 + $0x478] sm:$0xff]  ;;  %v4156_v11 = vld [vmem:[%s13066_s5 + $0xbb0] sm:$0xff]  ;;  %v4202_v48 = vld [vmem:[%s13066_s5 + $0xd20] sm:$0xff] }
 0x384   :  { %7355 = vmatpush3.bf16.msra.mxu1 %v7354_v21  ;;  %v3970_v21 = vld [vmem:[%s13066_s5 + $0x5e0] sm:$0xff]  ;;  %v7366_v29 = vpack.c.bf16 %v3921_v43, %v3920_v27  ;;  %v7398_v35 = vpack.c.bf16 %v3953_v54, %v3952_v33  ;;  %v4810_v52 = vcombine.low %v11897_v34, %v11900_v56  ;;  %v3956_v27 = vld [vmem:[%s13066_s5 + $0x570] sm:$0xff]  ;;  %v3957_v38 = vld [vmem:[%s13066_s5 + $0x578] sm:$0xff]  ;;  %v7404_v58 = vpack.c.bf16 %v3973_v26, %v3972_v10 }
 0x385   :  { %7387 = vmatpush3.bf16.msra.mxu0 %v7386_v22  ;;  %7357 = vmatprep.subr.bf16.mxu1 %v7356_v59  ;;  %v3971_v22 = vld [vmem:[%s13066_s5 + $0x5e8] sm:$0xff]  ;;  %v11924_v59 = vrot.slane %v3525_v12, %v10798_v6  ;;  %v4814_v4 = vcombine.low %v11915_v55, %v11918_v41  ;;  %v3990_v12 = vld [vmem:[%s13066_s5 + $0x680] sm:$0xff]  ;;  %v4813_v10 = vcombine.high %v11903_v40, %v11906_v28  ;;  %v4024_v26 = vld [vmem:[%s13066_s5 + $0x790] sm:$0xff] }
 0x386   :  { %7389 = vmatprep.subr.bf16.mxu0 %v7388_v20  ;;  %v4812_v20 = vcombine.low %v11903_v40, %v11906_v28  ;;  %v3923_v6 = vld [vmem:[%s13066_s5 + $0x468] sm:$0xff]  ;;  %v7400_v31 = vpack.c.bf16 %v3971_v22, %v3970_v21  ;;  %v4022_v43 = vld [vmem:[%s13066_s5 + $0x780] sm:$0xff]  ;;  %v7374_v21 = vpack.c.bf16 %v3925_v37, %v3924_v44  ;;  %v7406_v22 = vpack.c.bf16 %v3957_v38, %v3956_v27  ;;  %v3976_v28 = vld [vmem:[%s13066_s5 + $0x610] sm:$0xff] }
 0x387   :  { %v4816_v32 = vcombine.low %v11921_v36, %v11924_v59  ;;  %v7370_v17 = vpack.c.bf16 %v3923_v6, %v3922_v53  ;;  %v4023_v33 = vld [vmem:[%s13066_s5 + $0x788] sm:$0xff]  ;;  %v3974_v54 = vld [vmem:[%s13066_s5 + $0x600] sm:$0xff]  ;;  %v13286_v27 = vld [vmem:[#allocation41_spill] sm:$0xff] }
 0x388   :  { %7359 = vmatpush3.bf16.msra.mxu1 %v7358_v19  ;;  %v3955_v19 = vld [vmem:[%s13066_s5 + $0x568] sm:$0xff]  ;;  %v7440_v6 = vpack.c.bf16 %v4023_v33, %v4022_v43  ;;  %v13287_v38 = vld [vmem:[#allocation44_spill] sm:$0xff] }
 0x389   :  { %7391 = vmatpush3.bf16.msra.mxu0 %v7390_v15  ;;  %7361 = vmatprep.subr.bf16.mxu1 %v7360_v60  ;;  %v3940_v15 = vld [vmem:[%s13066_s5 + $0x4f0] sm:$0xff]  ;;  %v3941_v60 = vld [vmem:[%s13066_s5 + $0x4f8] sm:$0xff]  ;;  %v7402_v63 = vpack.c.bf16 %v3955_v19, %v3954_v23  ;;  %v3995_v44 = vld [vmem:[%s13066_s5 + $0x6a8] sm:$0xff] }
 0x38a   :  { %7393 = vmatprep.subr.bf16.mxu0 %v7392_v46  ;;  %v4824_v46 = vrot.slane %v4810_v52, %v10869_v16  ;;  %v7372_v13 = vpack.c.bf16 %v3941_v60, %v3940_v15  ;;  %v4007_v52 = vld [vmem:[%s13066_s5 + $0x708] sm:$0xff]  ;;  %v3992_v23 = vld [vmem:[%s13066_s5 + $0x690] sm:$0xff]  ;;  %v4811_v60 = vcombine.high %v11897_v34, %v11900_v56  ;;  %v4815_v34 = vcombine.high %v11915_v55, %v11918_v41 }
 0x38b   :  { %v4817_v56 = vcombine.high %v11921_v36, %v11924_v59  ;;  %v4845_v41 = vrot.slane %v4813_v10, %v10869_v16  ;;  %v4009_v36 = vld [vmem:[%s13066_s5 + $0x718] sm:$0xff]  ;;  %v3994_v59 = vld [vmem:[%s13066_s5 + $0x6a0] sm:$0xff] }
 0x38c   :  { %7363 = vmatpush3.bf16.msra.mxu1 %v7362_v39  ;;  %v4838_v39 = vrot.slane %v4812_v20, %v10869_v16  ;;  %v4831_v55 = vrot.slane %v4811_v60, %v10869_v16  ;;  %v4011_v60 = vld [vmem:[%s13066_s5 + $0x728] sm:$0xff] }
 0x38d   :  { %7395 = vmatpush3.bf16.msra.mxu0 %v7394_v57  ;;  %7365 = vmatprep.subr.bf16.mxu1 %v7364_v1  ;;  %v4852_v57 = vrot.slane %v4814_v4, %v10869_v16  ;;  %v4866_v1 = vrot.slane %v4816_v32, %v10869_v16  ;;  %v3993_v4 = vld [vmem:[%s13066_s5 + $0x698] sm:$0xff]  ;;  %v4873_v37 = vrot.slane %v4817_v56, %v10869_v16 }
 0x38e   :  { %7397 = vmatprep.subr.bf16.mxu0 %v7396_v30  ;;  %v4875_v14 = vcombine.high %v4824_v46, %v4838_v39  ;;  %v3991_v30 = vld [vmem:[%s13066_s5 + $0x688] sm:$0xff]  ;;  %v4874_v32 = vcombine.low %v4824_v46, %v4838_v39  ;;  %v7412_v40 = vpack.c.bf16 %v3993_v4, %v3992_v23  ;;  %v4877_v43 = vcombine.high %v4831_v55, %v4845_v41 }
 0x38f   :  { %v4879_v49 = vcombine.high %v4852_v57, %v4866_v1  ;;  %v7408_v20 = vpack.c.bf16 %v3991_v30, %v3990_v12  ;;  %v4026_v12 = vld [vmem:[%s13066_s5 + $0x7a0] sm:$0xff]  ;;  %v4027_v30 = vld [vmem:[%s13066_s5 + $0x7a8] sm:$0xff]  ;;  %v4876_v33 = vcombine.low %v4831_v55, %v4845_v41 }
 0x390   :  { %7367 = vmatpush3.bf16.msra.mxu1 %v7366_v29  ;;  %v11990_v62 = vrot.slane %v4875_v14, %v10869_v16  ;;  %v3975_v29 = vld [vmem:[%s13066_s5 + $0x608] sm:$0xff]  ;;  %v12025_v46 = vrot.slane %v4874_v32, %v10869_v16  ;;  %v7416_v32 = vpack.c.bf16 %v3995_v44, %v3994_v59  ;;  %v12099_v56 = vrot.slane %v4877_v43, %v10869_v16 }
 0x391   :  { %7399 = vmatpush3.bf16.msra.mxu0 %v7398_v35  ;;  %7369 = vmatprep.subr.bf16.mxu1 %v7368_v2  ;;  %v11993_v5 = vrot.slane %v4879_v49, %v10869_v16  ;;  %v4006_v35 = vld [vmem:[%s13066_s5 + $0x700] sm:$0xff]  ;;  %v7410_v19 = vpack.c.bf16 %v3975_v29, %v3974_v54  ;;  %v13288_v49 = vcombine.low %v13286_v27, %v13287_v38  ;;  %v12075_v29 = vpop.f32.mrb[96].mxu0  ;;  %v3999_v43 = vld [vmem:[%s13066_s5 + $0x6c8] sm:$0xff] }
 0x392   :  { %7401 = vmatprep.subr.bf16.mxu0 %v7400_v31  ;;  %v4878_v31 = vcombine.low %v4852_v57, %v4866_v1  ;;  %v7442_v15 = vpack.c.bf16 %v4007_v52, %v4006_v35  ;;  %v3977_v57 = vld [vmem:[%s13066_s5 + $0x618] sm:$0xff]  ;;  %v4008_v1 = vld [vmem:[%s13066_s5 + $0x710] sm:$0xff]  ;;  %v13289_v54 = vcombine.high %v13286_v27, %v13287_v38  ;;  %v6779_v10 = vpop.f32.mrb[97].mxu0 }
 0x393   :  { %v4942_v2 = vcombine.low %v11990_v62, %v11993_v5  ;;  %v4943_v53 = vcombine.high %v11990_v62, %v11993_v5  ;;  %v7446_v4 = vpack.c.bf16 %v4009_v36, %v4008_v1  ;;  %v12111_v1 = vrot.slane %v4876_v33, %v10869_v16  ;;  %v4012_v27 = vld [vmem:[%s13066_s5 + $0x730] sm:$0xff]  ;;  %v4030_v33 = vld [vmem:[%s13066_s5 + $0x7c0] sm:$0xff]  ;;  %v4221_v5 = vld [vmem:[%s13066_s5 + $0xdb8] sm:$0xff] }
 0x394   :  { %7371 = vmatpush3.bf16.msra.mxu1 %v7370_v17  ;;  %v4025_v17 = vld [vmem:[%s13066_s5 + $0x798] sm:$0xff]  ;;  %v12028_v39 = vrot.slane %v4878_v31, %v10869_v16  ;;  %v3979_v31 = vld [vmem:[%s13066_s5 + $0x628] sm:$0xff]  ;;  %v4220_v62 = vld [vmem:[%s13066_s5 + $0xdb0] sm:$0xff] }
 0x395   :  { %7403 = vmatpush3.bf16.msra.mxu0 %v7402_v63  ;;  %7373 = vmatprep.subr.bf16.mxu1 %v7372_v13  ;;  %v4859_v13 = vrot.slane %v4815_v34, %v10869_v16  ;;  %v3997_v34 = vld [vmem:[%s13066_s5 + $0x6b8] sm:$0xff] }
 0x396   :  { %7405 = vmatprep.subr.bf16.mxu0 %v7404_v58  ;;  %v4938_v14 = vcombine.low %v12025_v46, %v12028_v39  ;;  %v4939_v63 = vcombine.high %v12025_v46, %v12028_v39  ;;  %v7444_v58 = vpack.c.bf16 %v4025_v17, %v4024_v26  ;;  %v3996_v17 = vld [vmem:[%s13066_s5 + $0x6b0] sm:$0xff]  ;;  %v4266_v46 = vld [vmem:[%s13066_s5 + $0xf20] sm:$0xff] }
 0x397   :  { %v4881_v35 = vcombine.high %v4859_v13, %v4873_v37  ;;  %v4880_v52 = vcombine.low %v4859_v13, %v4873_v37  ;;  %v7420_v13 = vpack.c.bf16 %v3997_v34, %v3996_v17  ;;  %v3980_v37 = vld [vmem:[%s13066_s5 + $0x630] sm:$0xff]  ;;  %v3985_v34 = vld [vmem:[%s13066_s5 + $0x658] sm:$0xff] }
 0x398   :  { %7375 = vmatpush3.bf16.msra.mxu1 %v7374_v21  ;;  %v7414_v21 = vpack.c.bf16 %v3977_v57, %v3976_v28  ;;  %v4029_v57 = vld [vmem:[%s13066_s5 + $0x7b8] sm:$0xff]  ;;  %v3984_v17 = vld [vmem:[%s13066_s5 + $0x650] sm:$0xff] }
 0x399   :  { %7407 = vmatpush3.bf16.msra.mxu0 %v7406_v22  ;;  %7409 = vmatprep.subr.bf16.mxu1 %v7408_v20  ;;  %v3978_v22 = vld [vmem:[%s13066_s5 + $0x620] sm:$0xff]  ;;  %v12102_v28 = vrot.slane %v4881_v35, %v10869_v16  ;;  %v12114_v55 = vrot.slane %v4880_v52, %v10869_v16  ;;  %v3981_v16 = vld [vmem:[%s13066_s5 + $0x638] sm:$0xff] }
 0x39a   :  { %7441 = vmatprep.subr.bf16.mxu0 %v7440_v6  ;;  %v13290_v20 = vld [vmem:[#allocation42_spill] sm:$0xff]  ;;  %v13291_v6 = vld [vmem:[#allocation45_spill] sm:$0xff]  ;;  %v7418_v41 = vpack.c.bf16 %v3979_v31, %v3978_v22 }
 0x39b   :  { %5323 = vmatmul.mubr.f32.vlgmr.msra.gmra.mrb[100].mxu1 %v13288_v49  ;;  %v13292_v23 = vcombine.low %v13290_v20, %v13291_v6  ;;  %v13293_v26 = vcombine.high %v13290_v20, %v13291_v6  ;;  %v4944_v59 = vcombine.low %v12099_v56, %v12102_v28  ;;  %v4945_v44 = vcombine.high %v12099_v56, %v12102_v28  ;;  %v3982_v52 = vld [vmem:[%s13066_s5 + $0x640] sm:$0xff]  ;;  %v3983_v20 = vld [vmem:[%s13066_s5 + $0x648] sm:$0xff]  ;;  %v4001_v31 = vld [vmem:[%s13066_s5 + $0x6d8] sm:$0xff] }
 0x39c   :  { %5393 = vmatmul.mubr.f32.vlgmr.msra.gmra.mrb[102].mxu0 %v13289_v54  ;;  %7411 = vmatpush3.bf16.msra.mxu1 %v7410_v19  ;;  %v4010_v19 = vld [vmem:[%s13066_s5 + $0x720] sm:$0xff]  ;;  %v4940_v38 = vcombine.low %v12111_v1, %v12114_v55  ;;  %v4941_v49 = vcombine.high %v12111_v1, %v12114_v55  ;;  %v4031_v54 = vld [vmem:[%s13066_s5 + $0x7c8] sm:$0xff]  ;;  %v7426_v10 = vpack.c.bf16 %v3983_v20, %v3982_v52  ;;  %v4036_v52 = vld [vmem:[%s13066_s5 + $0x7f0] sm:$0xff] }
 0x39d   :  { %5462 = vmatprep.mubr.f32.mxu1 %v13292_v23  ;;  %7443 = vmatpush3.bf16.msra.mxu0 %v7442_v15  ;;  %v7448_v15 = vpack.c.bf16 %v4027_v30, %v4026_v12  ;;  %v7450_v36 = vpack.c.bf16 %v4011_v60, %v4010_v19  ;;  %v4013_v12 = vld [vmem:[%s13066_s5 + $0x738] sm:$0xff]  ;;  %v3998_v30 = vld [vmem:[%s13066_s5 + $0x6c0] sm:$0xff]  ;;  %v7456_v23 = vpack.c.bf16 %v4031_v54, %v4030_v33  ;;  %v4032_v19 = vld [vmem:[%s13066_s5 + $0x7d0] sm:$0xff] }
 0x39e   :  { %5532 = vmatprep.mubr.f32.mxu0 %v13293_v26  ;;  %7413 = vmatprep.subr.bf16.mxu1 %v7412_v40  ;;  %v4028_v40 = vld [vmem:[%s13066_s5 + $0x7b0] sm:$0xff]  ;;  %v7454_v22 = vpack.c.bf16 %v4013_v12, %v4012_v27  ;;  %v7424_v35 = vpack.c.bf16 %v3999_v43, %v3998_v30  ;;  %v4014_v6 = vld [vmem:[%s13066_s5 + $0x740] sm:$0xff]  ;;  %v4033_v60 = vld [vmem:[%s13066_s5 + $0x7d8] sm:$0xff]  ;;  %v7430_v27 = vpack.c.bf16 %v3985_v34, %v3984_v17 }
 0x39f   :  { %7445 = vmatprep.subr.bf16.mxu0 %v7444_v58  ;;  %v7452_v58 = vpack.c.bf16 %v4029_v57, %v4028_v40  ;;  %v4016_v40 = vld [vmem:[%s13066_s5 + $0x750] sm:$0xff]  ;;  %v7460_v57 = vpack.c.bf16 %v4033_v60, %v4032_v19  ;;  %v3986_v30 = vld [vmem:[%s13066_s5 + $0x660] sm:$0xff]  ;;  %v3987_v43 = vld [vmem:[%s13066_s5 + $0x668] sm:$0xff] }
 0x3a0   :  { %7415 = vmatpush3.bf16.msra.mxu1 %v7414_v21  ;;  %v7422_v21 = vpack.c.bf16 %v3981_v16, %v3980_v37  ;;  %v4034_v37 = vld [vmem:[%s13066_s5 + $0x7e0] sm:$0xff]  ;;  %v4035_v16 = vld [vmem:[%s13066_s5 + $0x7e8] sm:$0xff]  ;;  %v4037_v20 = vld [vmem:[%s13066_s5 + $0x7f8] sm:$0xff] }
 0x3a1   :  { %7447 = vmatpush3.bf16.msra.mxu0 %v7446_v4  ;;  %7417 = vmatprep.subr.bf16.mxu1 %v7416_v32  ;;  %v4015_v4 = vld [vmem:[%s13066_s5 + $0x748] sm:$0xff]  ;;  %v4000_v32 = vld [vmem:[%s13066_s5 + $0x6d0] sm:$0xff]  ;;  %v4018_v33 = vld [vmem:[%s13066_s5 + $0x760] sm:$0xff]  ;;  %v7464_v54 = vpack.c.bf16 %v4035_v16, %v4034_v37  ;;  %v7468_v60 = vpack.c.bf16 %v4037_v20, %v4036_v52 }
 0x3a2   :  { %7449 = vmatprep.subr.bf16.mxu0 %v7448_v15  ;;  %v7458_v26 = vpack.c.bf16 %v4015_v4, %v4014_v6  ;;  %v7428_v15 = vpack.c.bf16 %v4001_v31, %v4000_v32  ;;  %v7434_v6 = vpack.c.bf16 %v3987_v43, %v3986_v30  ;;  %v3988_v32 = vld [vmem:[%s13066_s5 + $0x670] sm:$0xff]  ;;  %v3989_v31 = vld [vmem:[%s13066_s5 + $0x678] sm:$0xff]  ;;  %v4086_v17 = vld [vmem:[%s13066_s5 + $0x980] sm:$0xff] }
 0x3a3   :  { %v4020_v19 = vld [vmem:[%s13066_s5 + $0x770] sm:$0xff]  ;;  %v4087_v34 = vld [vmem:[%s13066_s5 + $0x988] sm:$0xff]  ;;  %v4070_v16 = vld [vmem:[%s13066_s5 + $0x900] sm:$0xff] }
 0x3a4   :  { %7419 = vmatpush3.bf16.msra.mxu1 %v7418_v41  ;;  %v4017_v41 = vld [vmem:[%s13066_s5 + $0x758] sm:$0xff]  ;;  %v7504_v37 = vpack.c.bf16 %v4087_v34, %v4086_v17  ;;  %v4088_v43 = vld [vmem:[%s13066_s5 + $0x990] sm:$0xff] }
 0x3a5   :  { %7451 = vmatpush3.bf16.msra.mxu0 %v7450_v36  ;;  %7421 = vmatprep.subr.bf16.mxu1 %v7420_v13  ;;  %v4002_v36 = vld [vmem:[%s13066_s5 + $0x6e0] sm:$0xff]  ;;  %v4003_v13 = vld [vmem:[%s13066_s5 + $0x6e8] sm:$0xff]  ;;  %v4073_v20 = vld [vmem:[%s13066_s5 + $0x918] sm:$0xff] }
 0x3a6   :  { %7453 = vmatprep.subr.bf16.mxu0 %v7452_v58  ;;  %v7462_v58 = vpack.c.bf16 %v4017_v41, %v4016_v40  ;;  %v7432_v12 = vpack.c.bf16 %v4003_v13, %v4002_v36  ;;  %v7438_v40 = vpack.c.bf16 %v3989_v31, %v3988_v32  ;;  %v4038_v36 = vld [vmem:[%s13066_s5 + $0x800] sm:$0xff]  ;;  %v4039_v13 = vld [vmem:[%s13066_s5 + $0x808] sm:$0xff]  ;;  %v4284_v56 = vld [vmem:[%s13066_s5 + $0xfb0] sm:$0xff] }
 0x3a7   :  { %v7474_v30 = vpack.c.bf16 %v4039_v13, %v4038_v36  ;;  %v13295_v32 = vld [vmem:[#allocation46_spill] sm:$0xff]  ;;  %v4075_v36 = vld [vmem:[%s13066_s5 + $0x928] sm:$0xff]  ;;  %v4060_v13 = vld [vmem:[%s13066_s5 + $0x8b0] sm:$0xff] }
 0x3a8   :  { %7423 = vmatpush3.bf16.msra.mxu1 %v7422_v21  ;;  %v4019_v21 = vld [vmem:[%s13066_s5 + $0x768] sm:$0xff]  ;;  %v4285_v28 = vld [vmem:[%s13066_s5 + $0xfb8] sm:$0xff] }
 0x3a9   :  { %7455 = vmatpush3.bf16.msra.mxu0 %v7454_v22  ;;  %7425 = vmatprep.subr.bf16.mxu1 %v7424_v35  ;;  %v4004_v22 = vld [vmem:[%s13066_s5 + $0x6f0] sm:$0xff]  ;;  %v4005_v35 = vld [vmem:[%s13066_s5 + $0x6f8] sm:$0xff] }
 0x3aa   :  { %7457 = vmatprep.subr.bf16.mxu0 %v7456_v23  ;;  %v7466_v23 = vpack.c.bf16 %v4019_v21, %v4018_v33  ;;  %v7436_v4 = vpack.c.bf16 %v4005_v35, %v4004_v22  ;;  %v4089_v33 = vld [vmem:[%s13066_s5 + $0x998] sm:$0xff]  ;;  %v4040_v21 = vld [vmem:[%s13066_s5 + $0x810] sm:$0xff] }
 0x3ab   :  { %v4041_v22 = vld [vmem:[%s13066_s5 + $0x818] sm:$0xff]  ;;  %v4072_v35 = vld [vmem:[%s13066_s5 + $0x910] sm:$0xff] }
 0x3ac   :  { %7427 = vmatpush3.bf16.msra.mxu1 %v7426_v10  ;;  %v4021_v10 = vld [vmem:[%s13066_s5 + $0x778] sm:$0xff]  ;;  %v7510_v17 = vpack.c.bf16 %v4073_v20, %v4072_v35  ;;  %v4095_v35 = vld [vmem:[%s13066_s5 + $0x9c8] sm:$0xff] }
 0x3ad   :  { %7459 = vmatpush3.bf16.msra.mxu0 %v7458_v26  ;;  %7429 = vmatprep.subr.bf16.mxu1 %v7428_v15  ;;  %v4054_v26 = vld [vmem:[%s13066_s5 + $0x880] sm:$0xff]  ;;  %v4055_v15 = vld [vmem:[%s13066_s5 + $0x888] sm:$0xff] }
 0x3ae   :  { %7461 = vmatprep.subr.bf16.mxu0 %v7460_v57  ;;  %v7470_v57 = vpack.c.bf16 %v4021_v10, %v4020_v19  ;;  %v7472_v41 = vpack.c.bf16 %v4055_v15, %v4054_v26  ;;  %v7508_v19 = vpack.c.bf16 %v4089_v33, %v4088_v43  ;;  %v4091_v10 = vld [vmem:[%s13066_s5 + $0x9a8] sm:$0xff]  ;;  %v7478_v15 = vpack.c.bf16 %v4041_v22, %v4040_v21  ;;  %v4077_v33 = vld [vmem:[%s13066_s5 + $0x938] sm:$0xff]  ;;  %v4094_v22 = vld [vmem:[%s13066_s5 + $0x9c0] sm:$0xff] }
 0x3af   :  { %v7516_v43 = vpack.c.bf16 %v4093_v7, %v4092_v25  ;;  %v4063_v21 = vld [vmem:[%s13066_s5 + $0x8c8] sm:$0xff]  ;;  %v4098_v7 = vld [vmem:[%s13066_s5 + $0x9e0] sm:$0xff] }
 0x3b0   :  { %7431 = vmatpush3.bf16.msra.mxu1 %v7430_v27  ;;  %v4071_v27 = vld [vmem:[%s13066_s5 + $0x908] sm:$0xff] }
 0x3b1   :  { %7463 = vmatpush3.bf16.msra.mxu0 %v7462_v58  ;;  %7433 = vmatprep.subr.bf16.mxu1 %v7432_v12  ;;  %v4056_v58 = vld [vmem:[%s13066_s5 + $0x890] sm:$0xff]  ;;  %v4057_v12 = vld [vmem:[%s13066_s5 + $0x898] sm:$0xff]  ;;  %v4067_v25 = vld [vmem:[%s13066_s5 + $0x8e8] sm:$0xff] }
 0x3b2   :  { %7465 = vmatprep.subr.bf16.mxu0 %v7464_v54  ;;  %v7506_v54 = vpack.c.bf16 %v4071_v27, %v4070_v16  ;;  %v7476_v52 = vpack.c.bf16 %v4057_v12, %v4056_v58  ;;  %v4044_v58 = vld [vmem:[%s13066_s5 + $0x830] sm:$0xff]  ;;  %v4045_v12 = vld [vmem:[%s13066_s5 + $0x838] sm:$0xff] }
 0x3b4   :  { %7435 = vmatpush3.bf16.msra.mxu1 %v7434_v6  ;;  %v4058_v6 = vld [vmem:[%s13066_s5 + $0x8a0] sm:$0xff] }
 0x3b5   :  { %7467 = vmatpush3.bf16.msra.mxu0 %v7466_v23  ;;  %7437 = vmatprep.subr.bf16.mxu1 %v7436_v4  ;;  %v4059_v23 = vld [vmem:[%s13066_s5 + $0x8a8] sm:$0xff] }
 0x3b6   :  { %7469 = vmatprep.subr.bf16.mxu0 %v7468_v60  ;;  %v13294_v4 = vld [vmem:[#allocation43_spill] sm:$0xff]  ;;  %v4090_v60 = vld [vmem:[%s13066_s5 + $0x9a0] sm:$0xff]  ;;  %v7480_v34 = vpack.c.bf16 %v4059_v23, %v4058_v6 }
 0x3b7   :  { %v13296_v31 = vcombine.low %v13294_v4, %v13295_v32  ;;  %v13297_v26 = vcombine.high %v13294_v4, %v13295_v32  ;;  %v4046_v23 = vld [vmem:[%s13066_s5 + $0x840] sm:$0xff]  ;;  %v4047_v4 = vld [vmem:[%s13066_s5 + $0x848] sm:$0xff] }
 0x3b8   :  { %7439 = vmatpush3.bf16.msra.mxu1 %v7438_v40  ;;  %v4042_v40 = vld [vmem:[%s13066_s5 + $0x820] sm:$0xff] }
 0x3b9   :  { %7471 = vmatpush3.bf16.msra.mxu0 %v7470_v57  ;;  %7473 = vmatprep.subr.bf16.mxu1 %v7472_v41  ;;  %v4043_v57 = vld [vmem:[%s13066_s5 + $0x828] sm:$0xff]  ;;  %v4074_v41 = vld [vmem:[%s13066_s5 + $0x920] sm:$0xff] }
 0x3ba   :  { %7505 = vmatprep.subr.bf16.mxu0 %v7504_v37  ;;  %v4061_v37 = vld [vmem:[%s13066_s5 + $0x8b8] sm:$0xff]  ;;  %v7514_v16 = vpack.c.bf16 %v4075_v36, %v4074_v41  ;;  %v4078_v32 = vld [vmem:[%s13066_s5 + $0x940] sm:$0xff] }
 0x3bb   :  { %5463 = vmatmul.mubr.f32.vlgmr.msra.gmra.mrb[102].mxu1 %v13296_v31  ;;  %v7484_v27 = vpack.c.bf16 %v4061_v37, %v4060_v13  ;;  %v7520_v31 = vpack.c.bf16 %v4095_v35, %v4094_v22  ;;  %v4049_v41 = vld [vmem:[%s13066_s5 + $0x858] sm:$0xff]  ;;  %v4066_v37 = vld [vmem:[%s13066_s5 + $0x8e0] sm:$0xff]  ;;  %v4100_v35 = vld [vmem:[%s13066_s5 + $0x9f0] sm:$0xff] }
 0x3bc   :  { %5533 = vmatmul.mubr.f32.vlgmr.msra.gmra.mrb[104].mxu0 %v13297_v26  ;;  %7475 = vmatpush3.bf16.msra.mxu1 %v7474_v30  ;;  %v4076_v30 = vld [vmem:[%s13066_s5 + $0x930] sm:$0xff]  ;;  %v4081_v13 = vld [vmem:[%s13066_s5 + $0x958] sm:$0xff] }
 0x3bd   :  { %5602 = vmatprep.mubr.f32.mxu1 %v4806_v3  ;;  %7507 = vmatpush3.bf16.msra.mxu0 %v7506_v54  ;;  %v7512_v3 = vpack.c.bf16 %v4091_v10, %v4090_v60  ;;  %v4062_v54 = vld [vmem:[%s13066_s5 + $0x8c0] sm:$0xff]  ;;  %v7518_v20 = vpack.c.bf16 %v4077_v33, %v4076_v30  ;;  %v4064_v60 = vld [vmem:[%s13066_s5 + $0x8d0] sm:$0xff]  ;;  %v4065_v10 = vld [vmem:[%s13066_s5 + $0x8d8] sm:$0xff] }
 0x3be   :  { %5672 = vmatprep.mubr.f32.mxu0 %v4807_v51  ;;  %7477 = vmatprep.subr.bf16.mxu1 %v7476_v52  ;;  %v7482_v51 = vpack.c.bf16 %v4043_v57, %v4042_v40  ;;  %v7486_v52 = vpack.c.bf16 %v4045_v12, %v4044_v58  ;;  %v7488_v6 = vpack.c.bf16 %v4063_v21, %v4062_v54  ;;  %v4096_v26 = vld [vmem:[%s13066_s5 + $0x9d0] sm:$0xff]  ;;  %v4050_v12 = vld [vmem:[%s13066_s5 + $0x860] sm:$0xff]  ;;  %v4051_v30 = vld [vmem:[%s13066_s5 + $0x868] sm:$0xff] }
 0x3bf   :  { %7509 = vmatprep.subr.bf16.mxu0 %v7508_v19  ;;  %v4079_v19 = vld [vmem:[%s13066_s5 + $0x948] sm:$0xff]  ;;  %v7492_v40 = vpack.c.bf16 %v4065_v10, %v4064_v60  ;;  %v4048_v57 = vld [vmem:[%s13066_s5 + $0x850] sm:$0xff]  ;;  %v7496_v58 = vpack.c.bf16 %v4067_v25, %v4066_v37  ;;  %v4069_v22 = vld [vmem:[%s13066_s5 + $0x8f8] sm:$0xff] }
 0x3c0   :  { %7479 = vmatpush3.bf16.msra.mxu1 %v7478_v15  ;;  %v4097_v15 = vld [vmem:[%s13066_s5 + $0x9d8] sm:$0xff]  ;;  %v4083_v54 = vld [vmem:[%s13066_s5 + $0x968] sm:$0xff]  ;;  %v4068_v21 = vld [vmem:[%s13066_s5 + $0x8f0] sm:$0xff] }
 0x3c1   :  { %7511 = vmatpush3.bf16.msra.mxu0 %v7510_v17  ;;  %7481 = vmatprep.subr.bf16.mxu1 %v7480_v34  ;;  %v7490_v17 = vpack.c.bf16 %v4047_v4, %v4046_v23  ;;  %v7522_v34 = vpack.c.bf16 %v4079_v19, %v4078_v32  ;;  %v7524_v36 = vpack.c.bf16 %v4097_v15, %v4096_v26  ;;  %v4052_v4 = vld [vmem:[%s13066_s5 + $0x870] sm:$0xff]  ;;  %v4053_v32 = vld [vmem:[%s13066_s5 + $0x878] sm:$0xff]  ;;  %v4118_v10 = vld [vmem:[%s13066_s5 + $0xa80] sm:$0xff] }
 0x3c2   :  { %7513 = vmatprep.subr.bf16.mxu0 %v7512_v3  ;;  %v4080_v3 = vld [vmem:[%s13066_s5 + $0x950] sm:$0xff]  ;;  %v7500_v23 = vpack.c.bf16 %v4069_v22, %v4068_v21  ;;  %v4085_v60 = vld [vmem:[%s13066_s5 + $0x978] sm:$0xff]  ;;  %v4119_v26 = vld [vmem:[%s13066_s5 + $0xa88] sm:$0xff] }
 0x3c3   :  { %v4150_v15 = vld [vmem:[%s13066_s5 + $0xb80] sm:$0xff]  ;;  %v4135_v37 = vld [vmem:[%s13066_s5 + $0xb08] sm:$0xff]  ;;  %v4120_v25 = vld [vmem:[%s13066_s5 + $0xa90] sm:$0xff] }
 0x3c4   :  { %7483 = vmatpush3.bf16.msra.mxu1 %v7482_v51  ;;  %v4099_v51 = vld [vmem:[%s13066_s5 + $0x9e8] sm:$0xff]  ;;  %v4122_v21 = vld [vmem:[%s13066_s5 + $0xaa0] sm:$0xff] }
 0x3c5   :  { %7515 = vmatpush3.bf16.msra.mxu0 %v7514_v16  ;;  %7485 = vmatprep.subr.bf16.mxu1 %v7484_v27  ;;  %v7494_v16 = vpack.c.bf16 %v4049_v41, %v4048_v57  ;;  %v7526_v27 = vpack.c.bf16 %v4081_v13, %v4080_v3  ;;  %v7528_v33 = vpack.c.bf16 %v4099_v51, %v4098_v7  ;;  %v4102_v41 = vld [vmem:[%s13066_s5 + $0xa00] sm:$0xff]  ;;  %v4103_v3 = vld [vmem:[%s13066_s5 + $0xa08] sm:$0xff]  ;;  %v4121_v7 = vld [vmem:[%s13066_s5 + $0xa98] sm:$0xff] }
 0x3c6   :  { %7517 = vmatprep.subr.bf16.mxu0 %v7516_v43  ;;  %v4082_v43 = vld [vmem:[%s13066_s5 + $0x960] sm:$0xff]  ;;  %v7536_v57 = vpack.c.bf16 %v4119_v26, %v4118_v10  ;;  %v7538_v51 = vpack.c.bf16 %v4103_v3, %v4102_v41  ;;  %v4123_v22 = vld [vmem:[%s13066_s5 + $0xaa8] sm:$0xff]  ;;  %v4108_v10 = vld [vmem:[%s13066_s5 + $0xa30] sm:$0xff] }
 0x3c7   :  { %v4134_v13 = vld [vmem:[%s13066_s5 + $0xb00] sm:$0xff]  ;;  %v4109_v26 = vld [vmem:[%s13066_s5 + $0xa38] sm:$0xff]  ;;  %v4159_v3 = vld [vmem:[%s13066_s5 + $0xbc8] sm:$0xff] }
 0x3c8   :  { %7487 = vmatpush3.bf16.msra.mxu1 %v7486_v52  ;;  %v4101_v52 = vld [vmem:[%s13066_s5 + $0x9f8] sm:$0xff]  ;;  %v4158_v41 = vld [vmem:[%s13066_s5 + $0xbc0] sm:$0xff] }
 0x3c9   :  { %7519 = vmatpush3.bf16.msra.mxu0 %v7518_v20  ;;  %7489 = vmatprep.subr.bf16.mxu1 %v7488_v6  ;;  %v7498_v20 = vpack.c.bf16 %v4051_v30, %v4050_v12  ;;  %v7530_v6 = vpack.c.bf16 %v4083_v54, %v4082_v43  ;;  %v7532_v19 = vpack.c.bf16 %v4101_v52, %v4100_v35  ;;  %v4104_v12 = vld [vmem:[%s13066_s5 + $0xa10] sm:$0xff]  ;;  %v4105_v30 = vld [vmem:[%s13066_s5 + $0xa18] sm:$0xff]  ;;  %v4154_v52 = vld [vmem:[%s13066_s5 + $0xba0] sm:$0xff] }
 0x3ca   :  { %7521 = vmatprep.subr.bf16.mxu0 %v7520_v31  ;;  %v4084_v31 = vld [vmem:[%s13066_s5 + $0x970] sm:$0xff]  ;;  %v4137_v54 = vld [vmem:[%s13066_s5 + $0xb18] sm:$0xff] }
 0x3cb   :  { %v4136_v43 = vld [vmem:[%s13066_s5 + $0xb10] sm:$0xff] }
 0x3cc   :  { %7491 = vmatpush3.bf16.msra.mxu1 %v7490_v17  ;;  %v4151_v17 = vld [vmem:[%s13066_s5 + $0xb88] sm:$0xff] }
 0x3cd   :  { %7523 = vmatpush3.bf16.msra.mxu0 %v7522_v34  ;;  %7493 = vmatprep.subr.bf16.mxu1 %v7492_v40  ;;  %v7502_v34 = vpack.c.bf16 %v4053_v32, %v4052_v4  ;;  %v7534_v40 = vpack.c.bf16 %v4085_v60, %v4084_v31  ;;  %v4106_v4 = vld [vmem:[%s13066_s5 + $0xa20] sm:$0xff]  ;;  %v4107_v32 = vld [vmem:[%s13066_s5 + $0xa28] sm:$0xff]  ;;  %v4125_v31 = vld [vmem:[%s13066_s5 + $0xab8] sm:$0xff] }
 0x3ce   :  { %7525 = vmatprep.subr.bf16.mxu0 %v7524_v36  ;;  %v7568_v36 = vpack.c.bf16 %v4151_v17, %v4150_v15  ;;  %v4140_v15 = vld [vmem:[%s13066_s5 + $0xb30] sm:$0xff]  ;;  %v7580_v17 = vpack.c.bf16 %v4157_v42, %v4156_v11  ;;  %v4146_v11 = vld [vmem:[%s13066_s5 + $0xb60] sm:$0xff] }
 0x3d0   :  { %7495 = vmatpush3.bf16.msra.mxu1 %v7494_v16  ;;  %v4152_v16 = vld [vmem:[%s13066_s5 + $0xb90] sm:$0xff] }
 0x3d1   :  { %7527 = vmatpush3.bf16.msra.mxu0 %v7526_v27  ;;  %7497 = vmatprep.subr.bf16.mxu1 %v7496_v58  ;;  %v4153_v27 = vld [vmem:[%s13066_s5 + $0xb98] sm:$0xff]  ;;  %v7570_v58 = vpack.c.bf16 %v4135_v37, %v4134_v13 }
 0x3d2   :  { %7529 = vmatprep.subr.bf16.mxu0 %v7528_v33  ;;  %v7540_v33 = vpack.c.bf16 %v4121_v7, %v4120_v25  ;;  %v7572_v35 = vpack.c.bf16 %v4153_v27, %v4152_v16  ;;  %v4110_v25 = vld [vmem:[%s13066_s5 + $0xa40] sm:$0xff]  ;;  %v4111_v7 = vld [vmem:[%s13066_s5 + $0xa48] sm:$0xff]  ;;  %v7584_v16 = vpack.c.bf16 %v4159_v3, %v4158_v41  ;;  %v4148_v41 = vld [vmem:[%s13066_s5 + $0xb70] sm:$0xff] }
 0x3d3   :  { %v4143_v27 = vld [vmem:[%s13066_s5 + $0xb48] sm:$0xff] }
 0x3d4   :  { %7499 = vmatpush3.bf16.msra.mxu1 %v7498_v20  ;;  %v4155_v20 = vld [vmem:[%s13066_s5 + $0xba8] sm:$0xff] }
 0x3d5   :  { %7531 = vmatpush3.bf16.msra.mxu0 %v7530_v6  ;;  %7501 = vmatprep.subr.bf16.mxu1 %v7500_v23  ;;  %v7542_v6 = vpack.c.bf16 %v4105_v30, %v4104_v12  ;;  %v7544_v23 = vpack.c.bf16 %v4123_v22, %v4122_v21  ;;  %v7576_v50 = vpack.c.bf16 %v4155_v20, %v4154_v52  ;;  %v4129_v12 = vld [vmem:[%s13066_s5 + $0xad8] sm:$0xff]  ;;  %v4160_v30 = vld [vmem:[%s13066_s5 + $0xbd0] sm:$0xff] }
 0x3d6   :  { %7533 = vmatprep.subr.bf16.mxu0 %v7532_v19  ;;  %v4112_v22 = vld [vmem:[%s13066_s5 + $0xa50] sm:$0xff] }
 0x3d7   :  { %v4144_v52 = vld [vmem:[%s13066_s5 + $0xb50] sm:$0xff] }
 0x3d8   :  { %7503 = vmatpush3.bf16.msra.mxu1 %v7502_v34  ;;  %v4141_v34 = vld [vmem:[%s13066_s5 + $0xb38] sm:$0xff] }
 0x3d9   :  { %7535 = vmatpush3.bf16.msra.mxu0 %v7534_v40  ;;  %7537 = vmatprep.subr.bf16.mxu1 %v7536_v57  ;;  %v4126_v40 = vld [vmem:[%s13066_s5 + $0xac0] sm:$0xff]  ;;  %v4127_v57 = vld [vmem:[%s13066_s5 + $0xac8] sm:$0xff]  ;;  %v7582_v13 = vpack.c.bf16 %v4141_v34, %v4140_v15 }
 0x3da   :  { %7569 = vmatprep.subr.bf16.mxu0 %v7568_v36  ;;  %v7550_v36 = vpack.c.bf16 %v4109_v26, %v4108_v10  ;;  %v7552_v37 = vpack.c.bf16 %v4127_v57, %v4126_v40  ;;  %v4164_v10 = vld [vmem:[%s13066_s5 + $0xbf0] sm:$0xff]  ;;  %v4165_v26 = vld [vmem:[%s13066_s5 + $0xbf8] sm:$0xff] }
 0x3db   :  { %5603 = vmatmul.mubr.f32.vlgmr.msra.gmra.mrb[104].mxu1 %v4802_v61  ;;  %v7574_v61 = vpack.c.bf16 %v4137_v54, %v4136_v43  ;;  %v4161_v43 = vld [vmem:[%s13066_s5 + $0xbd8] sm:$0xff]  ;;  %v4116_v40 = vld [vmem:[%s13066_s5 + $0xa70] sm:$0xff]  ;;  %v7596_v3 = vpack.c.bf16 %v4165_v26, %v4164_v10 }
 0x3dc   :  { %5673 = vmatmul.mubr.f32.vlgmr.msra.gmra.mrb[106].mxu0 %v4803_v0  ;;  %7539 = vmatpush3.bf16.msra.mxu1 %v7538_v51  ;;  %v4139_v0 = vld [vmem:[%s13066_s5 + $0xb28] sm:$0xff]  ;;  %v4142_v51 = vld [vmem:[%s13066_s5 + $0xb40] sm:$0xff]  ;;  %v7588_v20 = vpack.c.bf16 %v4161_v43, %v4160_v30  ;;  %v4117_v57 = vld [vmem:[%s13066_s5 + $0xa78] sm:$0xff] }
 0x3dd   :  { %5742 = vmatprep.mubr.f32.mxu1 %v4808_v45  ;;  %7571 = vmatpush3.bf16.msra.mxu0 %v7570_v58  ;;  %v4124_v45 = vld [vmem:[%s13066_s5 + $0xab0] sm:$0xff]  ;;  %v7578_v19 = vpack.c.bf16 %v4139_v0, %v4138_v9  ;;  %v7586_v54 = vpack.c.bf16 %v4143_v27, %v4142_v51  ;;  %v7566_v51 = vpack.c.bf16 %v4117_v57, %v4116_v40  ;;  %v4198_v43 = vld [vmem:[%s13066_s5 + $0xd00] sm:$0xff]  ;;  %v4205_v57 = vld [vmem:[%s13066_s5 + $0xd38] sm:$0xff] }
 0x3de   :  { %5812 = vmatprep.mubr.f32.mxu0 %v4809_v8  ;;  %7541 = vmatprep.subr.bf16.mxu1 %v7540_v33  ;;  %v7546_v8 = vpack.c.bf16 %v4107_v32, %v4106_v4  ;;  %v7548_v60 = vpack.c.bf16 %v4125_v31, %v4124_v45  ;;  %v4128_v58 = vld [vmem:[%s13066_s5 + $0xad0] sm:$0xff]  ;;  %v7554_v33 = vpack.c.bf16 %v4111_v7, %v4110_v25  ;;  %v4162_v4 = vld [vmem:[%s13066_s5 + $0xbe0] sm:$0xff]  ;;  %v4163_v32 = vld [vmem:[%s13066_s5 + $0xbe8] sm:$0xff] }
 0x3df   :  { %7573 = vmatprep.subr.bf16.mxu0 %v7572_v35  ;;  %v7556_v21 = vpack.c.bf16 %v4129_v12, %v4128_v58  ;;  %v4113_v35 = vld [vmem:[%s13066_s5 + $0xa58] sm:$0xff]  ;;  %v4114_v45 = vld [vmem:[%s13066_s5 + $0xa60] sm:$0xff]  ;;  %v4115_v31 = vld [vmem:[%s13066_s5 + $0xa68] sm:$0xff]  ;;  %v7592_v42 = vpack.c.bf16 %v4163_v32, %v4162_v4  ;;  %v7644_v40 = vpack.c.bf16 %v4221_v5, %v4220_v62 }
 0x3e0   :  { %7543 = vmatpush3.bf16.msra.mxu1 %v7542_v6  ;;  %v4145_v6 = vld [vmem:[%s13066_s5 + $0xb58] sm:$0xff]  ;;  %v7558_v9 = vpack.c.bf16 %v4113_v35, %v4112_v22  ;;  %v7562_v15 = vpack.c.bf16 %v4115_v31, %v4114_v45  ;;  %v4214_v25 = vld [vmem:[%s13066_s5 + $0xd80] sm:$0xff]  ;;  %v4215_v7 = vld [vmem:[%s13066_s5 + $0xd88] sm:$0xff] }
 0x3e1   :  { %7575 = vmatpush3.bf16.msra.mxu0 %v7574_v61  ;;  %7545 = vmatprep.subr.bf16.mxu1 %v7544_v23  ;;  %v4130_v61 = vld [vmem:[%s13066_s5 + $0xae0] sm:$0xff]  ;;  %v4131_v23 = vld [vmem:[%s13066_s5 + $0xae8] sm:$0xff]  ;;  %v7632_v30 = vpack.c.bf16 %v4215_v7, %v4214_v25  ;;  %v4216_v35 = vld [vmem:[%s13066_s5 + $0xd90] sm:$0xff] }
 0x3e2   :  { %7577 = vmatprep.subr.bf16.mxu0 %v7576_v50  ;;  %v7590_v50 = vpack.c.bf16 %v4145_v6, %v4144_v52  ;;  %v7560_v0 = vpack.c.bf16 %v4131_v23, %v4130_v61  ;;  %v4166_v58 = vld [vmem:[%s13066_s5 + $0xc00] sm:$0xff]  ;;  %v4167_v12 = vld [vmem:[%s13066_s5 + $0xc08] sm:$0xff]  ;;  %v4217_v52 = vld [vmem:[%s13066_s5 + $0xd98] sm:$0xff] }
 0x3e3   :  { %v7602_v22 = vpack.c.bf16 %v4167_v12, %v4166_v58  ;;  %v4168_v6 = vld [vmem:[%s13066_s5 + $0xc10] sm:$0xff]  ;;  %v4169_v61 = vld [vmem:[%s13066_s5 + $0xc18] sm:$0xff]  ;;  %v4218_v45 = vld [vmem:[%s13066_s5 + $0xda0] sm:$0xff] }
 0x3e4   :  { %7547 = vmatpush3.bf16.msra.mxu1 %v7546_v8  ;;  %v4147_v8 = vld [vmem:[%s13066_s5 + $0xb68] sm:$0xff]  ;;  %v4200_v23 = vld [vmem:[%s13066_s5 + $0xd10] sm:$0xff]  ;;  %v4201_v32 = vld [vmem:[%s13066_s5 + $0xd18] sm:$0xff] }
 0x3e5   :  { %7579 = vmatpush3.bf16.msra.mxu0 %v7578_v19  ;;  %7549 = vmatprep.subr.bf16.mxu1 %v7548_v60  ;;  %v4132_v19 = vld [vmem:[%s13066_s5 + $0xaf0] sm:$0xff]  ;;  %v4133_v60 = vld [vmem:[%s13066_s5 + $0xaf8] sm:$0xff]  ;;  %v4219_v31 = vld [vmem:[%s13066_s5 + $0xda8] sm:$0xff] }
 0x3e6   :  { %7581 = vmatprep.subr.bf16.mxu0 %v7580_v17  ;;  %v7594_v17 = vpack.c.bf16 %v4147_v8, %v4146_v11  ;;  %v7564_v34 = vpack.c.bf16 %v4133_v60, %v4132_v19  ;;  %v7606_v11 = vpack.c.bf16 %v4169_v61, %v4168_v6  ;;  %v4170_v8 = vld [vmem:[%s13066_s5 + $0xc20] sm:$0xff]  ;;  %v4171_v19 = vld [vmem:[%s13066_s5 + $0xc28] sm:$0xff]  ;;  %v7640_v47 = vpack.c.bf16 %v4219_v31, %v4218_v45  ;;  %v4189_v60 = vld [vmem:[%s13066_s5 + $0xcb8] sm:$0xff] }
 0x3e7   :  { %v4207_v12 = vld [vmem:[%s13066_s5 + $0xd48] sm:$0xff]  ;;  %v4208_v6 = vld [vmem:[%s13066_s5 + $0xd50] sm:$0xff] }
 0x3e8   :  { %7551 = vmatpush3.bf16.msra.mxu1 %v7550_v36  ;;  %v4149_v36 = vld [vmem:[%s13066_s5 + $0xb78] sm:$0xff] }
 0x3e9   :  { %7583 = vmatpush3.bf16.msra.mxu0 %v7582_v13  ;;  %7553 = vmatprep.subr.bf16.mxu1 %v7552_v37  ;;  %v4182_v13 = vld [vmem:[%s13066_s5 + $0xc80] sm:$0xff]  ;;  %v4183_v37 = vld [vmem:[%s13066_s5 + $0xc88] sm:$0xff] }
 0x3ea   :  { %7585 = vmatprep.subr.bf16.mxu0 %v7584_v16  ;;  %v7598_v16 = vpack.c.bf16 %v4149_v36, %v4148_v41  ;;  %v7600_v27 = vpack.c.bf16 %v4183_v37, %v4182_v13  ;;  %v4190_v41 = vld [vmem:[%s13066_s5 + $0xcc0] sm:$0xff]  ;;  %v4223_v13 = vld [vmem:[%s13066_s5 + $0xdc8] sm:$0xff] }
 0x3eb   :  { %v4222_v36 = vld [vmem:[%s13066_s5 + $0xdc0] sm:$0xff] }
 0x3ec   :  { %7555 = vmatpush3.bf16.msra.mxu1 %v7554_v33  ;;  %v4199_v33 = vld [vmem:[%s13066_s5 + $0xd08] sm:$0xff]  ;;  %v7648_v58 = vpack.c.bf16 %v4223_v13, %v4222_v36 }
 0x3ed   :  { %7587 = vmatpush3.bf16.msra.mxu0 %v7586_v54  ;;  %7557 = vmatprep.subr.bf16.mxu1 %v7556_v21  ;;  %v4184_v54 = vld [vmem:[%s13066_s5 + $0xc90] sm:$0xff]  ;;  %v4185_v21 = vld [vmem:[%s13066_s5 + $0xc98] sm:$0xff] }
 0x3ee   :  { %7589 = vmatprep.subr.bf16.mxu0 %v7588_v20  ;;  %v7634_v20 = vpack.c.bf16 %v4199_v33, %v4198_v43  ;;  %v7604_v4 = vpack.c.bf16 %v4185_v21, %v4184_v54  ;;  %v4193_v43 = vld [vmem:[%s13066_s5 + $0xcd8] sm:$0xff]  ;;  %v4224_v33 = vld [vmem:[%s13066_s5 + $0xdd0] sm:$0xff] }
 0x3ef   :  { %v4225_v54 = vld [vmem:[%s13066_s5 + $0xdd8] sm:$0xff] }
 0x3f0   :  { %7559 = vmatpush3.bf16.msra.mxu1 %v7558_v9  ;;  %v4186_v9 = vld [vmem:[%s13066_s5 + $0xca0] sm:$0xff]  ;;  %v7652_v61 = vpack.c.bf16 %v4225_v54, %v4224_v33  ;;  %v4232_v54 = vld [vmem:[%s13066_s5 + $0xe10] sm:$0xff] }
 0x3f1   :  { %7591 = vmatpush3.bf16.msra.mxu0 %v7590_v50  ;;  %7561 = vmatprep.subr.bf16.mxu1 %v7560_v0  ;;  %v4187_v50 = vld [vmem:[%s13066_s5 + $0xca8] sm:$0xff]  ;;  %v7636_v0 = vpack.c.bf16 %v4217_v52, %v4216_v35  ;;  %v4176_v52 = vld [vmem:[%s13066_s5 + $0xc50] sm:$0xff] }
 0x3f2   :  { %7593 = vmatprep.subr.bf16.mxu0 %v7592_v42  ;;  %v7608_v42 = vpack.c.bf16 %v4187_v50, %v4186_v9  ;;  %v4226_v9 = vld [vmem:[%s13066_s5 + $0xde0] sm:$0xff]  ;;  %v4227_v50 = vld [vmem:[%s13066_s5 + $0xde8] sm:$0xff] }
 0x3f4   :  { %7563 = vmatpush3.bf16.msra.mxu1 %v7562_v15  ;;  %v4172_v15 = vld [vmem:[%s13066_s5 + $0xc30] sm:$0xff] }
 0x3f5   :  { %7595 = vmatpush3.bf16.msra.mxu0 %v7594_v17  ;;  %7565 = vmatprep.subr.bf16.mxu1 %v7564_v34  ;;  %v4173_v17 = vld [vmem:[%s13066_s5 + $0xc38] sm:$0xff]  ;;  %v4204_v34 = vld [vmem:[%s13066_s5 + $0xd30] sm:$0xff] }
 0x3f6   :  { %7597 = vmatprep.subr.bf16.mxu0 %v7596_v3  ;;  %v4191_v3 = vld [vmem:[%s13066_s5 + $0xcc8] sm:$0xff]  ;;  %v7614_v37 = vpack.c.bf16 %v4173_v17, %v4172_v15  ;;  %v7646_v25 = vpack.c.bf16 %v4205_v57, %v4204_v34  ;;  %v4213_v17 = vld [vmem:[%s13066_s5 + $0xd78] sm:$0xff]  ;;  %v4246_v34 = vld [vmem:[%s13066_s5 + $0xe80] sm:$0xff] }
 0x3f7   :  { %v7616_v7 = vpack.c.bf16 %v4191_v3, %v4190_v41  ;;  %v4278_v57 = vld [vmem:[%s13066_s5 + $0xf80] sm:$0xff]  ;;  %v4279_v41 = vld [vmem:[%s13066_s5 + $0xf88] sm:$0xff] }
 0x3f8   :  { %7567 = vmatpush3.bf16.msra.mxu1 %v7566_v51  ;;  %v4174_v51 = vld [vmem:[%s13066_s5 + $0xc40] sm:$0xff] }
 0x3f9   :  { %7599 = vmatpush3.bf16.msra.mxu0 %v7598_v16  ;;  %7601 = vmatprep.subr.bf16.mxu1 %v7600_v27  ;;  %v4175_v16 = vld [vmem:[%s13066_s5 + $0xc48] sm:$0xff]  ;;  %v4206_v27 = vld [vmem:[%s13066_s5 + $0xd40] sm:$0xff] }
 0x3fa   :  { %7633 = vmatprep.subr.bf16.mxu0 %v7632_v30  ;;  %v4192_v30 = vld [vmem:[%s13066_s5 + $0xcd0] sm:$0xff]  ;;  %v7618_v21 = vpack.c.bf16 %v4175_v16, %v4174_v51  ;;  %v4262_v51 = vld [vmem:[%s13066_s5 + $0xf00] sm:$0xff]  ;;  %v4263_v16 = vld [vmem:[%s13066_s5 + $0xf08] sm:$0xff] }
 0x3fb   :  { %5743 = vmatmul.mubr.f32.vlgmr.msra.gmra.mrb[106].mxu1 %v4804_v18  ;;  %v7638_v18 = vpack.c.bf16 %v4201_v32, %v4200_v23  ;;  %v7620_v35 = vpack.c.bf16 %v4193_v43, %v4192_v30  ;;  %v4209_v23 = vld [vmem:[%s13066_s5 + $0xd58] sm:$0xff]  ;;  %v4195_v32 = vld [vmem:[%s13066_s5 + $0xce8] sm:$0xff]  ;;  %v4280_v30 = vld [vmem:[%s13066_s5 + $0xf90] sm:$0xff]  ;;  %v7698_v33 = vpack.c.bf16 %v4263_v16, %v4262_v51 }
 0x3fc   :  { %5813 = vmatmul.mubr.f32.vlgmr.msra.gmra.mrb[108].mxu0 %v4805_v24  ;;  %7603 = vmatpush3.bf16.msra.mxu1 %v7602_v22  ;;  %v4203_v24 = vld [vmem:[%s13066_s5 + $0xd28] sm:$0xff]  ;;  %v7650_v22 = vpack.c.bf16 %v4207_v12, %v4206_v27  ;;  %v7654_v45 = vpack.c.bf16 %v4209_v23, %v4208_v6  ;;  %v4248_v27 = vld [vmem:[%s13066_s5 + $0xe90] sm:$0xff]  ;;  %v4281_v43 = vld [vmem:[%s13066_s5 + $0xf98] sm:$0xff] }
 0x3fd   :  { %5882 = vmatprep.mubr.f32.mxu1 %v4942_v2  ;;  %7635 = vmatpush3.bf16.msra.mxu0 %v7634_v20  ;;  %v4188_v2 = vld [vmem:[%s13066_s5 + $0xcb0] sm:$0xff]  ;;  %v7642_v10 = vpack.c.bf16 %v4203_v24, %v4202_v48  ;;  %v4177_v20 = vld [vmem:[%s13066_s5 + $0xc58] sm:$0xff]  ;;  %v4251_v6 = vld [vmem:[%s13066_s5 + $0xea8] sm:$0xff] }
 0x3fe   :  { %5952 = vmatprep.mubr.f32.mxu0 %v4943_v53  ;;  %7605 = vmatprep.subr.bf16.mxu1 %v7604_v4  ;;  %v7610_v53 = vpack.c.bf16 %v4171_v19, %v4170_v8  ;;  %v7612_v26 = vpack.c.bf16 %v4189_v60, %v4188_v2  ;;  %v4194_v4 = vld [vmem:[%s13066_s5 + $0xce0] sm:$0xff]  ;;  %v7656_v8 = vpack.c.bf16 %v4227_v50, %v4226_v9  ;;  %v4211_v19 = vld [vmem:[%s13066_s5 + $0xd68] sm:$0xff]  ;;  %v4196_v48 = vld [vmem:[%s13066_s5 + $0xcf0] sm:$0xff] }
 0x3ff   :  { %7637 = vmatprep.subr.bf16.mxu0 %v7636_v0  ;;  %v7622_v0 = vpack.c.bf16 %v4177_v20, %v4176_v52  ;;  %v7624_v31 = vpack.c.bf16 %v4195_v32, %v4194_v4  ;;  %v4228_v24 = vld [vmem:[%s13066_s5 + $0xdf0] sm:$0xff]  ;;  %v4229_v2 = vld [vmem:[%s13066_s5 + $0xdf8] sm:$0xff]  ;;  %v4250_v20 = vld [vmem:[%s13066_s5 + $0xea0] sm:$0xff] }
 0x400   :  { %7607 = vmatpush3.bf16.msra.mxu1 %v7606_v11  ;;  %v4178_v11 = vld [vmem:[%s13066_s5 + $0xc60] sm:$0xff]  ;;  %v7660_v15 = vpack.c.bf16 %v4229_v2, %v4228_v24  ;;  %v4265_v52 = vld [vmem:[%s13066_s5 + $0xf18] sm:$0xff]  ;;  %v4283_v4 = vld [vmem:[%s13066_s5 + $0xfa8] sm:$0xff]  ;;  %v7672_v9 = vpack.c.bf16 %v4251_v6, %v4250_v20 }
 0x401   :  { %7639 = vmatpush3.bf16.msra.mxu0 %v7638_v18  ;;  %7609 = vmatprep.subr.bf16.mxu1 %v7608_v42  ;;  %v4179_v18 = vld [vmem:[%s13066_s5 + $0xc68] sm:$0xff]  ;;  %v4210_v42 = vld [vmem:[%s13066_s5 + $0xd60] sm:$0xff]  ;;  %v4272_v51 = vld [vmem:[%s13066_s5 + $0xf50] sm:$0xff] }
 0x402   :  { %7641 = vmatprep.subr.bf16.mxu0 %v7640_v47  ;;  %v4197_v47 = vld [vmem:[%s13066_s5 + $0xcf8] sm:$0xff]  ;;  %v7626_v60 = vpack.c.bf16 %v4179_v18, %v4178_v11  ;;  %v7658_v62 = vpack.c.bf16 %v4211_v19, %v4210_v42  ;;  %v4282_v23 = vld [vmem:[%s13066_s5 + $0xfa0] sm:$0xff]  ;;  %v4236_v18 = vld [vmem:[%s13066_s5 + $0xe30] sm:$0xff]  ;;  %v7708_v19 = vpack.c.bf16 %v4285_v28, %v4284_v56 }
 0x403   :  { %v7628_v5 = vpack.c.bf16 %v4197_v47, %v4196_v48  ;;  %v4234_v50 = vld [vmem:[%s13066_s5 + $0xe20] sm:$0xff]  ;;  %v7704_v39 = vpack.c.bf16 %v4283_v4, %v4282_v23  ;;  %v4237_v42 = vld [vmem:[%s13066_s5 + $0xe38] sm:$0xff]  ;;  %v4255_v24 = vld [vmem:[%s13066_s5 + $0xec8] sm:$0xff] }
 0x404   :  { %7611 = vmatpush3.bf16.msra.mxu1 %v7610_v53  ;;  %v4180_v53 = vld [vmem:[%s13066_s5 + $0xc70] sm:$0xff]  ;;  %v4269_v48 = vld [vmem:[%s13066_s5 + $0xf38] sm:$0xff]  ;;  %v4254_v47 = vld [vmem:[%s13066_s5 + $0xec0] sm:$0xff] }
 0x405   :  { %7643 = vmatpush3.bf16.msra.mxu0 %v7642_v10  ;;  %7613 = vmatprep.subr.bf16.mxu1 %v7612_v26  ;;  %v4181_v10 = vld [vmem:[%s13066_s5 + $0xc78] sm:$0xff]  ;;  %v4212_v26 = vld [vmem:[%s13066_s5 + $0xd70] sm:$0xff]  ;;  %v4286_v2 = vld [vmem:[%s13066_s5 + $0xfc0] sm:$0xff] }
 0x406   :  { %7645 = vmatprep.subr.bf16.mxu0 %v7644_v40  ;;  %v4247_v40 = vld [vmem:[%s13066_s5 + $0xe88] sm:$0xff]  ;;  %v7630_v3 = vpack.c.bf16 %v4181_v10, %v4180_v53  ;;  %v7662_v36 = vpack.c.bf16 %v4213_v17, %v4212_v26  ;;  %v7680_v53 = vpack.c.bf16 %v4255_v24, %v4254_v47  ;;  %v4238_v10 = vld [vmem:[%s13066_s5 + $0xe40] sm:$0xff]  ;;  %v4260_v4 = vld [vmem:[%s13066_s5 + $0xef0] sm:$0xff] }
 0x407   :  { %v7664_v13 = vpack.c.bf16 %v4247_v40, %v4246_v34  ;;  %v4239_v26 = vld [vmem:[%s13066_s5 + $0xe48] sm:$0xff]  ;;  %v4256_v40 = vld [vmem:[%s13066_s5 + $0xed0] sm:$0xff]  ;;  %v4245_v28 = vld [vmem:[%s13066_s5 + $0xe78] sm:$0xff] }
 0x408   :  { %7615 = vmatpush3.bf16.msra.mxu1 %v7614_v37  ;;  %v4230_v37 = vld [vmem:[%s13066_s5 + $0xe00] sm:$0xff]  ;;  %v4271_v34 = vld [vmem:[%s13066_s5 + $0xf48] sm:$0xff]  ;;  %v4244_v56 = vld [vmem:[%s13066_s5 + $0xe70] sm:$0xff] }
 0x409   :  { %7647 = vmatpush3.bf16.msra.mxu0 %v7646_v25  ;;  %7617 = vmatprep.subr.bf16.mxu1 %v7616_v7  ;;  %v4231_v25 = vld [vmem:[%s13066_s5 + $0xe08] sm:$0xff]  ;;  %v7696_v7 = vpack.c.bf16 %v4279_v41, %v4278_v57  ;;  %v4257_v57 = vld [vmem:[%s13066_s5 + $0xed8] sm:$0xff]  ;;  %v4288_v41 = vld [vmem:[%s13066_s5 + $0xfd0] sm:$0xff] }
 0x40a   :  { %7649 = vmatprep.subr.bf16.mxu0 %v7648_v58  ;;  %v4249_v58 = vld [vmem:[%s13066_s5 + $0xe98] sm:$0xff]  ;;  %v7666_v12 = vpack.c.bf16 %v4231_v25, %v4230_v37  ;;  %v7684_v37 = vpack.c.bf16 %v4257_v57, %v4256_v40  ;;  %v4240_v25 = vld [vmem:[%s13066_s5 + $0xe50] sm:$0xff]  ;;  %v4275_v23 = vld [vmem:[%s13066_s5 + $0xf68] sm:$0xff] }
 0x40c   :  { %7619 = vmatpush3.bf16.msra.mxu1 %v7618_v21  ;;  %v4233_v21 = vld [vmem:[%s13066_s5 + $0xe18] sm:$0xff] }
 0x40d   :  { %7651 = vmatpush3.bf16.msra.mxu0 %v7650_v22  ;;  %7621 = vmatprep.subr.bf16.mxu1 %v7620_v35  ;;  %v4264_v22 = vld [vmem:[%s13066_s5 + $0xf10] sm:$0xff]  ;;  %v7668_v35 = vpack.c.bf16 %v4249_v58, %v4248_v27  ;;  %v7670_v32 = vpack.c.bf16 %v4233_v21, %v4232_v54  ;;  %v4273_v27 = vld [vmem:[%s13066_s5 + $0xf58] sm:$0xff]  ;;  %v4258_v58 = vld [vmem:[%s13066_s5 + $0xee0] sm:$0xff] }
 0x40e   :  { %7653 = vmatprep.subr.bf16.mxu0 %v7652_v61  ;;  %v7700_v61 = vpack.c.bf16 %v4281_v43, %v4280_v30  ;;  %v4290_v30 = vld [vmem:[%s13066_s5 + $0xfe0] sm:$0xff]  ;;  %v4291_v43 = vld [vmem:[%s13066_s5 + $0xfe8] sm:$0xff]  ;;  %v7718_v54 = vpack.c.bf16 %v4273_v27, %v4272_v51 }
 0x410   :  { %7623 = vmatpush3.bf16.msra.mxu1 %v7622_v0  ;;  %v4235_v0 = vld [vmem:[%s13066_s5 + $0xe28] sm:$0xff] }
 0x411   :  { %7655 = vmatpush3.bf16.msra.mxu0 %v7654_v45  ;;  %7625 = vmatprep.subr.bf16.mxu1 %v7624_v31  ;;  %v4253_v45 = vld [vmem:[%s13066_s5 + $0xeb8] sm:$0xff] }
 0x412   :  { %7657 = vmatprep.subr.bf16.mxu0 %v7656_v8  ;;  %v4268_v8 = vld [vmem:[%s13066_s5 + $0xf30] sm:$0xff] }
 0x414   :  { %7627 = vmatpush3.bf16.msra.mxu1 %v7626_v60  ;;  %v4287_v60 = vld [vmem:[%s13066_s5 + $0xfc8] sm:$0xff] }
 0x415   :  { %7659 = vmatpush3.bf16.msra.mxu0 %v7658_v62  ;;  %7629 = vmatprep.subr.bf16.mxu1 %v7628_v5  ;;  %v7678_v62 = vpack.c.bf16 %v4237_v42, %v4236_v18  ;;  %v7710_v5 = vpack.c.bf16 %v4269_v48, %v4268_v8  ;;  %v7712_v17 = vpack.c.bf16 %v4287_v60, %v4286_v2  ;;  %v4277_v18 = vld [vmem:[%s13066_s5 + $0xf78] sm:$0xff] }
 0x416   :  { %7661 = vmatprep.subr.bf16.mxu0 %v7660_v15  ;;  %v4270_v15 = vld [vmem:[%s13066_s5 + $0xf40] sm:$0xff]  ;;  %v7694_v8 = vpack.c.bf16 %v4245_v28, %v4244_v56 }
 0x417   :  { %v6212_v56 = vld [vmem:[%s13069_s7] ss:$0 sm:$0xff] }
 0x418   :  { %7631 = vmatpush3.bf16.msra.mxu1 %v7630_v3  ;;  %v4289_v3 = vld [vmem:[%s13066_s5 + $0xfd8] sm:$0xff] }
 0x419   :  { %7663 = vmatpush3.bf16.msra.mxu0 %v7662_v36  ;;  %7665 = vmatprep.subr.bf16.mxu1 %v7664_v13  ;;  %v7682_v36 = vpack.c.bf16 %v4239_v26, %v4238_v10  ;;  %v7714_v13 = vpack.c.bf16 %v4271_v34, %v4270_v15  ;;  %v7716_v16 = vpack.c.bf16 %v4289_v3, %v4288_v41 }
 0x41a   :  { %7697 = vmatprep.subr.bf16.mxu0 %v7696_v7  ;;  %v4241_v7 = vld [vmem:[%s13066_s5 + $0xe58] sm:$0xff] }
 0x41b   :  { %5883 = vmatmul.mubr.f32.vlgmr.msra.gmra.mrb[108].mxu1 %v4938_v14  ;;  %v7702_v14 = vpack.c.bf16 %v4265_v52, %v4264_v22  ;;  %v4242_v22 = vld [vmem:[%s13066_s5 + $0xe60] sm:$0xff] }
 0x41c   :  { %5953 = vmatmul.mubr.f32.vlgmr.msra.gmra.mrb[110].mxu0 %v4939_v63  ;;  %7667 = vmatpush3.bf16.msra.mxu1 %v7666_v12  ;;  %v4267_v63 = vld [vmem:[%s13066_s5 + $0xf28] sm:$0xff]  ;;  %v4274_v52 = vld [vmem:[%s13066_s5 + $0xf60] sm:$0xff] }
 0x41d   :  { %6022 = vmatprep.mubr.f32.mxu1 %v4944_v59  ;;  %7699 = vmatpush3.bf16.msra.mxu0 %v7698_v33  ;;  %v4252_v59 = vld [vmem:[%s13066_s5 + $0xeb0] sm:$0xff]  ;;  %v7706_v31 = vpack.c.bf16 %v4267_v63, %v4266_v46  ;;  %v4259_v12 = vld [vmem:[%s13066_s5 + $0xee8] sm:$0xff]  ;;  %v7686_v33 = vpack.c.bf16 %v4241_v7, %v4240_v25 }
 0x41e   :  { %6092 = vmatprep.mubr.f32.mxu0 %v4945_v44  ;;  %7669 = vmatprep.subr.bf16.mxu1 %v7668_v35  ;;  %v7674_v44 = vpack.c.bf16 %v4235_v0, %v4234_v50  ;;  %v7676_v11 = vpack.c.bf16 %v4253_v45, %v4252_v59  ;;  %v7688_v21 = vpack.c.bf16 %v4259_v12, %v4258_v58  ;;  %v4243_v35 = vld [vmem:[%s13066_s5 + $0xe68] sm:$0xff]  ;;  %v4292_v50 = vld [vmem:[%s13066_s5 + $0xff0] sm:$0xff]  ;;  %v4293_v0 = vld [vmem:[%s13066_s5 + $0xff8] sm:$0xff] }
 0x41f   :  { %7701 = vmatprep.subr.bf16.mxu0 %v7700_v61  ;;  %v7720_v61 = vpack.c.bf16 %v4291_v43, %v4290_v30  ;;  %v7690_v63 = vpack.c.bf16 %v4243_v35, %v4242_v22  ;;  %v7722_v59 = vpack.c.bf16 %v4275_v23, %v4274_v52 }
 0x420   :  { %7671 = vmatpush3.bf16.msra.mxu1 %v7670_v32  ;;  %v4261_v32 = vld [vmem:[%s13066_s5 + $0xef8] sm:$0xff] }
 0x421   :  { %7703 = vmatpush3.bf16.msra.mxu0 %v7702_v14  ;;  %7673 = vmatprep.subr.bf16.mxu1 %v7672_v9  ;;  %v7692_v45 = vpack.c.bf16 %v4261_v32, %v4260_v4 }
 0x422   :  { %7705 = vmatprep.subr.bf16.mxu0 %v7704_v39 }
 0x424   :  { %7675 = vmatpush3.bf16.msra.mxu1 %v7674_v44 }
 0x425   :  { %7707 = vmatpush3.bf16.msra.mxu0 %v7706_v31  ;;  %7677 = vmatprep.subr.bf16.mxu1 %v7676_v11  ;;  %v7724_v31 = vpack.c.bf16 %v4293_v0, %v4292_v50  ;;  %v4276_v11 = vld [vmem:[%s13066_s5 + $0xf70] sm:$0xff] }
 0x426   :  { %7709 = vmatprep.subr.bf16.mxu0 %v7708_v19  ;;  %v7726_v19 = vpack.c.bf16 %v4277_v18, %v4276_v11 }
 0x428   :  { %7679 = vmatpush3.bf16.msra.mxu1 %v7678_v62  ;;  %v6247_v20 = vpop.f32.mrb[96].mxu1  ;;  %v6282_v6 = vpop.f32.mrb[98].mxu0 }
 0x429   :  { %7711 = vmatpush3.bf16.msra.mxu0 %v7710_v5  ;;  %7681 = vmatprep.subr.bf16.mxu1 %v7680_v53  ;;  %v6248_v14 = vpop.f32.mrb[97].mxu1  ;;  %v6283_v9 = vpop.f32.mrb[99].mxu0 }
 0x42a   :  { %7713 = vmatprep.subr.bf16.mxu0 %v7712_v17  ;;  %v6249_v46 = vadd.f32 %v6248_v14, %v6247_v20  ;;  %v6284_v39 = vadd.f32 %v6283_v9, %v6282_v6 }
 0x42c   :  { %7683 = vmatpush3.bf16.msra.mxu1 %v7682_v36  ;;  %v5045_v44 = vadd.f32 %v6249_v46, %v12075_v29 }
 0x42d   :  { %7715 = vmatpush3.bf16.msra.mxu0 %v7714_v13  ;;  %7685 = vmatprep.subr.bf16.mxu1 %v7684_v37 }
 0x42e   :  { %7717 = vmatprep.subr.bf16.mxu0 %v7716_v16  ;;  %v5115_v42 = vadd.f32 %v6284_v39, %v5045_v44 }
 0x430   :  { %7687 = vmatpush3.bf16.msra.mxu1 %v7686_v33 }
 0x431   :  { %7719 = vmatpush3.bf16.msra.mxu0 %v7718_v54  ;;  %7689 = vmatprep.subr.bf16.mxu1 %v7688_v21 }
 0x432   :  { %7721 = vmatprep.subr.bf16.mxu0 %v7720_v61 }
 0x434   :  { %7691 = vmatpush3.bf16.msra.mxu1 %v7690_v63 }
 0x435   :  { %7723 = vmatpush3.bf16.msra.mxu0 %v7722_v59  ;;  %7693 = vmatprep.subr.bf16.mxu1 %v7692_v45 }
 0x436   :  { %7725 = vmatprep.subr.bf16.mxu0 %v7724_v31 }
 0x438   :  { %7695 = vmatpush3.bf16.msra.mxu1 %v7694_v8 }
 0x439   :  { %7727 = vmatpush3.bf16.msra.mxu0 %v7726_v19 }
 0x43b   :  { %6023 = vmatmul.mubr.f32.vlgmr.msra.gmra.mrb[110].mxu1 %v4940_v38 }
 0x43c   :  { %6093 = vmatmul.mubr.f32.vlgmr.msra.gmra.mrb[112].mxu0 %v4941_v49 }
 0x44e   :  { %v6317_v29 = vpop.f32.mrb[98].mxu1 }
 0x44f   :  { %v6352_v48 = vpop.f32.mrb[100].mxu0  ;;  %v6318_v47 = vpop.f32.mrb[99].mxu1 }
 0x450   :  { %v6353_v24 = vpop.f32.mrb[101].mxu0  ;;  %v6319_v2 = vadd.f32 %v6318_v47, %v6317_v29 }
 0x451   :  { %v6354_v60 = vadd.f32 %v6353_v24, %v6352_v48 }
 0x452   :  { %v5185_v62 = vadd.f32 %v6319_v2, %v5115_v42 }
 0x454   :  { %v5255_v5 = vadd.f32 %v6354_v60, %v5185_v62 }
 0x46e   :  { %v6387_v53 = vpop.f32.mrb[100].mxu1 }
 0x46f   :  { %v6422_v10 = vpop.f32.mrb[102].mxu0  ;;  %v6388_v26 = vpop.f32.mrb[101].mxu1 }
 0x470   :  { %v6389_v15 = vadd.f32 %v6388_v26, %v6387_v53  ;;  %v6423_v17 = vpop.f32.mrb[103].mxu0 }
 0x471   :  { %v6424_v34 = vadd.f32 %v6423_v17, %v6422_v10 }
 0x472   :  { %v5325_v40 = vadd.f32 %v6389_v15, %v5255_v5 }
 0x474   :  { %v5395_v38 = vadd.f32 %v6424_v34, %v5325_v40 }
 0x48e   :  { %v6457_v57 = vpop.f32.mrb[102].mxu1 }
 0x48f   :  { %v6492_v41 = vpop.f32.mrb[104].mxu0  ;;  %v6458_v1 = vpop.f32.mrb[103].mxu1 }
 0x490   :  { %v6459_v55 = vadd.f32 %v6458_v1, %v6457_v57  ;;  %v6493_v49 = vpop.f32.mrb[105].mxu0 }
 0x491   :  { %v6494_v3 = vadd.f32 %v6493_v49, %v6492_v41 }
 0x492   :  { %v5465_v36 = vadd.f32 %v6459_v55, %v5395_v38 }
 0x494   :  { %v5535_v13 = vadd.f32 %v6494_v3, %v5465_v36 }
 0x4ae   :  { %v6527_v37 = vpop.f32.mrb[104].mxu1 }
 0x4af   :  { %v6562_v25 = vpop.f32.mrb[106].mxu0  ;;  %v6528_v7 = vpop.f32.mrb[105].mxu1 }
 0x4b0   :  { %v6529_v51 = vadd.f32 %v6528_v7, %v6527_v37  ;;  %v6563_v16 = vpop.f32.mrb[107].mxu0 }
 0x4b1   :  { %v6564_v27 = vadd.f32 %v6563_v16, %v6562_v25 }
 0x4b2   :  { %v5605_v58 = vadd.f32 %v6529_v51, %v5535_v13 }
 0x4b4   :  { %v5675_v12 = vadd.f32 %v6564_v27, %v5605_v58 }
 0x4ce   :  { %v6597_v30 = vpop.f32.mrb[106].mxu1 }
 0x4cf   :  { %v6632_v43 = vpop.f32.mrb[108].mxu0  ;;  %v6598_v33 = vpop.f32.mrb[107].mxu1 }
 0x4d0   :  { %v6599_v54 = vadd.f32 %v6598_v33, %v6597_v30  ;;  %v6633_v21 = vpop.f32.mrb[109].mxu0 }
 0x4d1   :  { %v6634_v22 = vadd.f32 %v6633_v21, %v6632_v43 }
 0x4d2   :  { %v5745_v35 = vadd.f32 %v6599_v54, %v5675_v12 }
 0x4d4   :  { %v5815_v52 = vadd.f32 %v6634_v22, %v5745_v35 }
 0x4ee   :  { %v6667_v20 = vpop.f32.mrb[108].mxu1 }
 0x4ef   :  { %v6702_v6 = vpop.f32.mrb[110].mxu0  ;;  %v6668_v61 = vpop.f32.mrb[109].mxu1 }
 0x4f0   :  { %v6669_v23 = vadd.f32 %v6668_v61, %v6667_v20  ;;  %v6703_v4 = vpop.f32.mrb[111].mxu0 }
 0x4f1   :  { %v6704_v32 = vadd.f32 %v6703_v4, %v6702_v6 }
 0x4f2   :  { %v5885_v14 = vadd.f32 %v6669_v23, %v5815_v52 }
 0x4f4   :  { %v5955_v9 = vadd.f32 %v6704_v32, %v5885_v14 }
 0x50e   :  { %v6737_v50 = vpop.f32.mrb[110].mxu1 }
 0x50f   :  { %v6772_v0 = vpop.f32.mrb[112].mxu0  ;;  %v6738_v46 = vpop.f32.mrb[111].mxu1 }
 0x510   :  { %v6739_v39 = vadd.f32 %v6738_v46, %v6737_v50  ;;  %v6773_v63 = vpop.f32.mrb[113].mxu0 }
 0x511   :  { %v6774_v59 = vadd.f32 %v6773_v63, %v6772_v0 }
 0x512   :  { %v6025_v45 = vadd.f32 %v6739_v39, %v5955_v9 }
 0x514   :  { %v6095_v28 = vadd.f32 %v6774_v59, %v6025_v45 }
 0x516   :  { %v6105_v44 = vadd.f32 %v6212_v56, %v6095_v28 }
 0x518   :  { %6106 = vst [vmem:[%s13070_s9] sm:$0xff] %v6105_v44 }

</bundles_post_ra>
